<compile_context>
chip_gen: v7x
topology: tpu7x:2x2x1
jax: 0.10.0
libtpu: 0.0.40
codegen_flags: <defaults>
</compile_context>

<pallas_src>
import functools

import jax
import jax.numpy as jnp
from jax.experimental import pallas as pl
from jax.experimental.pallas import tpu as pltpu

LANE = 128
# Tile for the im2col-matmul M axis: multiple of 256 (v6e MXU) and 128 (v5e),
# small enough that double-buffered bf16 tiles fit the 32 MiB scoped VMEM
# default on every generation (incl. v7x's 64 MiB physical VMEM).
_TILE_M = 512


def _round_up(x, m):
    return (x + m - 1) // m * m


# -----------------------------------------------------------------------------
# Pallas kernels
# -----------------------------------------------------------------------------
def _conv_mm_kernel(x_ref, w_ref, b_ref, o_ref):
    """Fused im2col-matmul + bias + LeakyReLU(0.2).

    x_ref: (tile_m, K) bf16 im2col patches
    w_ref: (K, Coutp)  bf16
    b_ref: (1, Coutp)  f32
    o_ref: (tile_m, Coutp) bf16
    """
    acc = jnp.dot(x_ref[...], w_ref[...], preferred_element_type=jnp.float32)
    acc = acc + b_ref[...]
    o_ref[...] = jnp.maximum(acc, 0.2 * acc).astype(o_ref.dtype)


def _head_kernel(x_ref, w1_ref, b1_ref, w2_ref, b2_ref, vec_ref, sig_ref):
    """Fused head: linear -> (dropout eval = identity) -> linear -> sigmoid.

    x_ref:  (N, F)  bf16 flattened conv features (F = 4*4*Cp4)
    w1_ref: (F, Dp) bf16, b1_ref: (1, Dp) f32
    w2_ref: (1, Dp) f32,  b2_ref: (1, 1) f32
    vec_ref: (N, Dp) f32   -> padded output_vec
    sig_ref: (N, 1)  f32   -> sigmoid(logit)
    """
    vec = jnp.dot(x_ref[...], w1_ref[...], preferred_element_type=jnp.float32)
    vec = vec + b1_ref[...]
    vec_ref[...] = vec
    # TODO(synk): nn.Dropout(0.4) is applied in eval mode (identity); training-mode
    # stochastic masking (pltpu.prng_*) is not reproduced here.
    # Tail (D -> 1) as a lane reduction instead of a 1-column MXU matmul.
    logit = jnp.sum(vec * w2_ref[...], axis=-1, keepdims=True) + b2_ref[...]
    sig_ref[...] = pl.reciprocal(1.0 + jnp.exp(-logit), approx=True)


# -----------------------------------------------------------------------------
# Pallas wrappers
# -----------------------------------------------------------------------------
def conv_lrelu_pallas(cols, w_mat, b_row):
    """cols: (M, K) bf16, w_mat: (K, Coutp) bf16, b_row: (1, Coutp) f32
    -> (M, Coutp) bf16, tiled over M with double-buffered BlockSpecs."""
    m, k = cols.shape
    coutp = w_mat.shape[1]
    tile_m = m if m <= _TILE_M else _TILE_M
    grid = (pl.cdiv(m, tile_m),)

    cost = pl.CostEstimate(
        flops=2 * m * k * coutp,
        transcendentals=0,
        bytes_accessed=m * k * 2 + k * coutp * 2 + coutp * 4 + m * coutp * 2,
    )

    return pl.pallas_call(
        _conv_mm_kernel,
        out_shape=jax.ShapeDtypeStruct((m, coutp), jnp.bfloat16),
        grid=grid,
        in_specs=[
            pl.BlockSpec((tile_m, k), lambda i: (i, 0)),
            pl.BlockSpec((k, coutp), lambda i: (0, 0)),
            pl.BlockSpec((1, coutp), lambda i: (0, 0)),
        ],
        out_specs=pl.BlockSpec((tile_m, coutp), lambda i: (i, 0)),
        compiler_params=pltpu.CompilerParams(dimension_semantics=("parallel",)),
        cost_estimate=cost,
    )(cols, w_mat, b_row)


def head_pallas(feat, w1, b1, w2_row, b2):
    n = feat.shape[0]
    dp = w1.shape[1]
    vmem = pl.BlockSpec(memory_space=pltpu.MemorySpace.VMEM)
    vec_p, sig = pl.pallas_call(
        _head_kernel,
        out_shape=(
            jax.ShapeDtypeStruct((n, dp), jnp.float32),
            jax.ShapeDtypeStruct((n, 1), jnp.float32),
        ),
        in_specs=[vmem, vmem, vmem, vmem, vmem],
        out_specs=(vmem, vmem),
    )(feat, w1, b1, w2_row, b2)
    return vec_p, sig


# -----------------------------------------------------------------------------
# Glue: im2col patch extraction (index shuffling only; compute stays in Pallas)
# TODO(synk): im2col is still materialized in HBM (in bf16); a fully fused
# per-tap accumulation kernel would cut activation traffic further.
# -----------------------------------------------------------------------------
def im2col(x_nhwc, kh, kw, stride, pad):
    n, h, w, c = x_nhwc.shape
    xp = jnp.pad(x_nhwc, ((0, 0), (pad, pad), (pad, pad), (0, 0)))
    ho = (h + 2 * pad - kh) // stride + 1
    wo = (w + 2 * pad - kw) // stride + 1
    taps = []
    for i in range(kh):
        for j in range(kw):
            taps.append(xp[:, i:i + stride * ho:stride, j:j + stride * wo:stride, :])
    cols = jnp.concatenate(taps, axis=-1)             # (N, Ho, Wo, KH*KW*C)
    return cols.reshape(n * ho * wo, kh * kw * c), (n, ho, wo)


def conv_block(x_nhwc, w_mat, b_row, kh, kw, stride, pad):
    cols, (n, ho, wo) = im2col(x_nhwc, kh, kw, stride, pad)
    out = conv_lrelu_pallas(cols, w_mat, b_row)
    return out.reshape(n, ho, wo, w_mat.shape[1])


# -----------------------------------------------------------------------------
# Parameter init (PyTorch-equivalent layout, deterministic synthetic values)
# -----------------------------------------------------------------------------
def init_params(key, model_dim, output_dim, channels):
    ks = jax.random.split(key, 12)
    md = model_dim

    def conv_w(k, kh, kw, cin, cout):
        fan_in = kh * kw * cin
        return jax.random.normal(k, (kh, kw, cin, cout), jnp.float32) / jnp.sqrt(fan_in)

    def lin_w(k, fin, fout):
        return jax.random.normal(k, (fin, fout), jnp.float32) / jnp.sqrt(fin)

    return {
        # conv weights stored as (KH, KW, Cin, Cout)
        "c1_w": conv_w(ks[0], 3, 3, channels, md),
        "c1_b": 0.01 * jax.random.normal(ks[1], (md,), jnp.float32),
        "c2_w": conv_w(ks[2], 4, 4, md, 2 * md),
        "c2_b": 0.01 * jax.random.normal(ks[3], (2 * md,), jnp.float32),
        "c3_w": conv_w(ks[4], 4, 4, 2 * md, 2 * md),
        "c3_b": 0.01 * jax.random.normal(ks[5], (2 * md,), jnp.float32),
        "c4_w": conv_w(ks[6], 4, 4, 2 * md, 4 * md),
        "c4_b": 0.01 * jax.random.normal(ks[7], (4 * md,), jnp.float32),
        # lin_w rows ordered like PyTorch's NCHW flatten: (c, h, w)
        "lin_w": lin_w(ks[8], 4 * 4 * 4 * md, output_dim),
        "lin_b": 0.01 * jax.random.normal(ks[9], (output_dim,), jnp.float32),
        "tail_w": lin_w(ks[10], output_dim, 1),
        "tail_b": 0.01 * jax.random.normal(ks[11], (1,), jnp.float32),
    }


def prepare_params(params, model_dim, output_dim, channels):
    """One-time conversion to the kernel layout: bf16 weights, lane-padded
    output channels, im2col-matmul weight layout, transpose folded into lin_w."""
    md = model_dim
    cp = [
        _round_up(md, LANE),
        _round_up(2 * md, LANE),
        _round_up(2 * md, LANE),
        _round_up(4 * md, LANE),
    ]
    cins = [channels, cp[0], cp[1], cp[2]]

    prepared = {}
    for idx, name in enumerate(["c1", "c2", "c3", "c4"]):
        w = params[name + "_w"]                       # (kh, kw, cin, cout)
        b = params[name + "_b"]
        kh, kw, cin, cout = w.shape
        cin_p, cout_p = cins[idx], cp[idx]
        w = jnp.pad(w, ((0, 0), (0, 0), (0, cin_p - cin), (0, cout_p - cout)))
        prepared[name + "_w"] = w.reshape(kh * kw * cin_p, cout_p).astype(jnp.bfloat16)
        prepared[name + "_b"] = (
            jnp.pad(b, (0, cout_p - cout)).reshape(1, cout_p).astype(jnp.float32)
        )

    # Head: fold NCHW-flatten -> NHWC(padded-channel)-flatten into lin_w rows,
    # pad the output dim to 128 lanes (zero columns).
    c4, cp4 = 4 * md, cp[3]
    dp = _round_up(output_dim, LANE)
    lw = params["lin_w"].reshape(c4, 4, 4, output_dim)     # rows were (c, h, w)
    lw = jnp.transpose(lw, (1, 2, 0, 3))                   # (h, w, c, D)
    lw = jnp.pad(lw, ((0, 0), (0, 0), (0, cp4 - c4), (0, dp - output_dim)))
    prepared["lin_w"] = lw.reshape(4 * 4 * cp4, dp).astype(jnp.bfloat16)
    prepared["lin_b"] = (
        jnp.pad(params["lin_b"], (0, dp - output_dim)).reshape(1, dp).astype(jnp.float32)
    )
    prepared["tail_w"] = (
        jnp.pad(params["tail_w"].T, ((0, 0), (0, dp - output_dim))).astype(jnp.float32)
    )
    prepared["tail_b"] = params["tail_b"].reshape(1, 1).astype(jnp.float32)
    return prepared


# -----------------------------------------------------------------------------
# Forward pass (mirrors Critic.forward)
# -----------------------------------------------------------------------------
@functools.partial(jax.jit, static_argnames=("output_dim",))
def critic_forward(prepared, img_nchw, output_dim):
    # img_nchw: (N, C, H, W) like PyTorch; convert to NHWC bf16 for the conv path.
    x = jnp.transpose(img_nchw, (0, 2, 3, 1)).astype(jnp.bfloat16)

    # model_body (channels carried lane-padded; padded channels stay 0)
    x = conv_block(x, prepared["c1_w"], prepared["c1_b"], 3, 3, 1, 1)   # (N,32,32,Cp1)
    x = conv_block(x, prepared["c2_w"], prepared["c2_b"], 4, 4, 2, 1)   # (N,16,16,Cp2)
    x = conv_block(x, prepared["c3_w"], prepared["c3_b"], 4, 4, 2, 1)   # (N, 8, 8,Cp3)
    x = conv_block(x, prepared["c4_w"], prepared["c4_b"], 4, 4, 2, 1)   # (N, 4, 4,Cp4)

    # PyTorch's NCHW flatten is folded into lin_w's row permutation, so a plain
    # NHWC reshape suffices here (no transpose of the feature tensor).
    n = x.shape[0]
    feat = x.reshape(n, -1)

    vec_p, sig = head_pallas(
        feat, prepared["lin_w"], prepared["lin_b"],
        prepared["tail_w"], prepared["tail_b"],
    )
    return sig.reshape(-1), vec_p[:, :output_dim]


# -----------------------------------------------------------------------------
if __name__ == "__main__":
    # Final spatial must be 4x4, so the forward implies 32x32 input
    # (32 -> 32 -> 16 -> 8 -> 4).
    batch, channels, spatial = 2, 4, 32
    model_dim, output_dim = 8, 16

    key = jax.random.PRNGKey(0)
    k_params, k_img = jax.random.split(key)
    params = init_params(k_params, model_dim, output_dim, channels)
    prepared = prepare_params(params, model_dim, output_dim, channels)
    img = jax.random.normal(k_img, (batch, channels, spatial, spatial), jnp.float32)

    probs, output_vec = critic_forward(prepared, img, output_dim=output_dim)
    jax.block_until_ready((probs, output_vec))

    assert probs.shape == (batch,)
    assert output_vec.shape == (batch, output_dim)
    assert bool(jnp.all(jnp.isfinite(probs))) and bool(jnp.all(jnp.isfinite(output_vec)))
    assert bool(jnp.all(probs >= 0.0)) and bool(jnp.all(probs <= 1.0))
    print("KERNEL_OK")
</pallas_src>

<mosaic_0001>
module attributes {stable_mosaic.version = 11 : i64} {
  func.func @_conv_mm_kernel(%arg0: i32, %arg1: memref<512x36xbf16, #tpu.memory_space<vmem>>, %arg2: memref<36x128xbf16, #tpu.memory_space<vmem>>, %arg3: memref<1x128xf32, #tpu.memory_space<vmem>>, %arg4: memref<512x128xbf16, #tpu.memory_space<vmem>>) attributes {dimension_semantics = [#tpu.dimension_semantics<parallel>], iteration_bounds = array<i64: 4>, scalar_prefetch = 0 : i64, scratch_operands = 0 : i64, tpu.core_type = #tpu.core_type<tc>, window_params = [{transform_indices = @transform_0, window_bounds = array<i64: 512, 36>}, {pipeline_mode = #tpu.pipeline_mode<synchronous>, transform_indices = @transform_1, window_bounds = array<i64: 36, 128>}, {pipeline_mode = #tpu.pipeline_mode<synchronous>, transform_indices = @transform_2, window_bounds = array<i64: 1, 128>}, {transform_indices = @transform_3, window_bounds = array<i64: 512, 128>}]} {
    %c0 = arith.constant 0 : index
    %c0_0 = arith.constant 0 : index
    %0 = vector.load %arg1[%c0, %c0_0] : memref<512x36xbf16, #tpu.memory_space<vmem>>, vector<512x36xbf16>
    %c0_1 = arith.constant 0 : index
    %c0_2 = arith.constant 0 : index
    %1 = vector.load %arg2[%c0_1, %c0_2] : memref<36x128xbf16, #tpu.memory_space<vmem>>, vector<36x128xbf16>
    %cst = arith.constant dense<0.000000e+00> : vector<512x128xf32>
    %2 = tpu.matmul %0, %1, %cst {dimension_numbers = #tpu.dot_dimension_numbers<[1], [0], [0], [1], [0, 0, 1, 1], [], []>} : vector<512x36xbf16>, vector<36x128xbf16>, vector<512x128xf32> -> vector<512x128xf32>
    %c0_3 = arith.constant 0 : index
    %c0_4 = arith.constant 0 : index
    %3 = vector.load %arg3[%c0_3, %c0_4] : memref<1x128xf32, #tpu.memory_space<vmem>>, vector<1x128xf32>
    %4 = vector.broadcast %3 : vector<1x128xf32> to vector<512x128xf32>
    %5 = arith.addf %2, %4 : vector<512x128xf32>
    %cst_5 = arith.constant 2.000000e-01 : f32
    %6 = vector.broadcast %cst_5 : f32 to vector<512x128xf32>
    %7 = arith.mulf %6, %5 : vector<512x128xf32>
    %8 = arith.maximumf %5, %7 : vector<512x128xf32>
    %9 = arith.truncf %8 : vector<512x128xf32> to vector<512x128xbf16>
    %c0_6 = arith.constant 0 : index
    %c0_7 = arith.constant 0 : index
    %10 = vector.load %arg4[%c0_6, %c0_7] : memref<512x128xbf16, #tpu.memory_space<vmem>>, vector<512x128xbf16>
    tpu.vector_store %arg4[%c0_6, %c0_7], %9 {strides = array<i32>} : memref<512x128xbf16, #tpu.memory_space<vmem>>, vector<512x128xbf16>,
    return
  }
  func.func @transform_0(%arg0: i32) -> (i32, i32) {
    %c0_i32 = arith.constant 0 : i32
    %c0_i32_0 = arith.constant 0 : i32
    return %arg0, %c0_i32 : i32, i32
  }
  func.func @transform_1(%arg0: i32) -> (i32, i32) {
    %c0_i32 = arith.constant 0 : i32
    %c0_i32_0 = arith.constant 0 : i32
    %c0_i32_1 = arith.constant 0 : i32
    return %c0_i32, %c0_i32_0 : i32, i32
  }
  func.func @transform_2(%arg0: i32) -> (i32, i32) {
    %c0_i32 = arith.constant 0 : i32
    %c0_i32_0 = arith.constant 0 : i32
    %c0_i32_1 = arith.constant 0 : i32
    return %c0_i32, %c0_i32_0 : i32, i32
  }
  func.func @transform_3(%arg0: i32) -> (i32, i32) {
    %c0_i32 = arith.constant 0 : i32
    %c0_i32_0 = arith.constant 0 : i32
    return %arg0, %c0_i32 : i32, i32
  }
}

module attributes {stable_mosaic.version = 11 : i64} {
  func.func @_conv_mm_kernel(%arg0: i32, %arg1: memref<512x2048xbf16, #tpu.memory_space<vmem>>, %arg2: memref<2048x128xbf16, #tpu.memory_space<vmem>>, %arg3: memref<1x128xf32, #tpu.memory_space<vmem>>, %arg4: memref<512x128xbf16, #tpu.memory_space<vmem>>) attributes {dimension_semantics = [#tpu.dimension_semantics<parallel>], iteration_bounds = array<i64: 1>, scalar_prefetch = 0 : i64, scratch_operands = 0 : i64, tpu.core_type = #tpu.core_type<tc>, window_params = [{transform_indices = @transform_0, window_bounds = array<i64: 512, 2048>}, {pipeline_mode = #tpu.pipeline_mode<synchronous>, transform_indices = @transform_1, window_bounds = array<i64: 2048, 128>}, {pipeline_mode = #tpu.pipeline_mode<synchronous>, transform_indices = @transform_2, window_bounds = array<i64: 1, 128>}, {transform_indices = @transform_3, window_bounds = array<i64: 512, 128>}]} {
    %c0 = arith.constant 0 : index
    %c0_0 = arith.constant 0 : index
    %0 = vector.load %arg1[%c0, %c0_0] : memref<512x2048xbf16, #tpu.memory_space<vmem>>, vector<512x2048xbf16>
    %c0_1 = arith.constant 0 : index
    %c0_2 = arith.constant 0 : index
    %1 = vector.load %arg2[%c0_1, %c0_2] : memref<2048x128xbf16, #tpu.memory_space<vmem>>, vector<2048x128xbf16>
    %cst = arith.constant dense<0.000000e+00> : vector<512x128xf32>
    %2 = tpu.matmul %0, %1, %cst {dimension_numbers = #tpu.dot_dimension_numbers<[1], [0], [0], [1], [0, 0, 1, 1], [], []>} : vector<512x2048xbf16>, vector<2048x128xbf16>, vector<512x128xf32> -> vector<512x128xf32>
    %c0_3 = arith.constant 0 : index
    %c0_4 = arith.constant 0 : index
    %3 = vector.load %arg3[%c0_3, %c0_4] : memref<1x128xf32, #tpu.memory_space<vmem>>, vector<1x128xf32>
    %4 = vector.broadcast %3 : vector<1x128xf32> to vector<512x128xf32>
    %5 = arith.addf %2, %4 : vector<512x128xf32>
    %cst_5 = arith.constant 2.000000e-01 : f32
    %6 = vector.broadcast %cst_5 : f32 to vector<512x128xf32>
    %7 = arith.mulf %6, %5 : vector<512x128xf32>
    %8 = arith.maximumf %5, %7 : vector<512x128xf32>
    %9 = arith.truncf %8 : vector<512x128xf32> to vector<512x128xbf16>
    %c0_6 = arith.constant 0 : index
    %c0_7 = arith.constant 0 : index
    %10 = vector.load %arg4[%c0_6, %c0_7] : memref<512x128xbf16, #tpu.memory_space<vmem>>, vector<512x128xbf16>
    tpu.vector_store %arg4[%c0_6, %c0_7], %9 {strides = array<i32>} : memref<512x128xbf16, #tpu.memory_space<vmem>>, vector<512x128xbf16>,
    return
  }
  func.func @transform_0(%arg0: i32) -> (i32, i32) {
    %c0_i32 = arith.constant 0 : i32
    %c0_i32_0 = arith.constant 0 : i32
    return %arg0, %c0_i32 : i32, i32
  }
  func.func @transform_1(%arg0: i32) -> (i32, i32) {
    %c0_i32 = arith.constant 0 : i32
    %c0_i32_0 = arith.constant 0 : i32
    %c0_i32_1 = arith.constant 0 : i32
    return %c0_i32, %c0_i32_0 : i32, i32
  }
  func.func @transform_2(%arg0: i32) -> (i32, i32) {
    %c0_i32 = arith.constant 0 : i32
    %c0_i32_0 = arith.constant 0 : i32
    %c0_i32_1 = arith.constant 0 : i32
    return %c0_i32, %c0_i32_0 : i32, i32
  }
  func.func @transform_3(%arg0: i32) -> (i32, i32) {
    %c0_i32 = arith.constant 0 : i32
    %c0_i32_0 = arith.constant 0 : i32
    return %arg0, %c0_i32 : i32, i32
  }
}

module attributes {stable_mosaic.version = 11 : i64} {
  func.func @_conv_mm_kernel(%arg0: i32, %arg1: memref<128x2048xbf16, #tpu.memory_space<vmem>>, %arg2: memref<2048x128xbf16, #tpu.memory_space<vmem>>, %arg3: memref<1x128xf32, #tpu.memory_space<vmem>>, %arg4: memref<128x128xbf16, #tpu.memory_space<vmem>>) attributes {dimension_semantics = [#tpu.dimension_semantics<parallel>], iteration_bounds = array<i64: 1>, scalar_prefetch = 0 : i64, scratch_operands = 0 : i64, tpu.core_type = #tpu.core_type<tc>, window_params = [{transform_indices = @transform_0, window_bounds = array<i64: 128, 2048>}, {pipeline_mode = #tpu.pipeline_mode<synchronous>, transform_indices = @transform_1, window_bounds = array<i64: 2048, 128>}, {pipeline_mode = #tpu.pipeline_mode<synchronous>, transform_indices = @transform_2, window_bounds = array<i64: 1, 128>}, {transform_indices = @transform_3, window_bounds = array<i64: 128, 128>}]} {
    %c0 = arith.constant 0 : index
    %c0_0 = arith.constant 0 : index
    %0 = vector.load %arg1[%c0, %c0_0] : memref<128x2048xbf16, #tpu.memory_space<vmem>>, vector<128x2048xbf16>
    %c0_1 = arith.constant 0 : index
    %c0_2 = arith.constant 0 : index
    %1 = vector.load %arg2[%c0_1, %c0_2] : memref<2048x128xbf16, #tpu.memory_space<vmem>>, vector<2048x128xbf16>
    %cst = arith.constant dense<0.000000e+00> : vector<128x128xf32>
    %2 = tpu.matmul %0, %1, %cst {dimension_numbers = #tpu.dot_dimension_numbers<[1], [0], [0], [1], [0, 0, 1, 1], [], []>} : vector<128x2048xbf16>, vector<2048x128xbf16>, vector<128x128xf32> -> vector<128x128xf32>
    %c0_3 = arith.constant 0 : index
    %c0_4 = arith.constant 0 : index
    %3 = vector.load %arg3[%c0_3, %c0_4] : memref<1x128xf32, #tpu.memory_space<vmem>>, vector<1x128xf32>
    %4 = vector.broadcast %3 : vector<1x128xf32> to vector<128x128xf32>
    %5 = arith.addf %2, %4 : vector<128x128xf32>
    %cst_5 = arith.constant 2.000000e-01 : f32
    %6 = vector.broadcast %cst_5 : f32 to vector<128x128xf32>
    %7 = arith.mulf %6, %5 : vector<128x128xf32>
    %8 = arith.maximumf %5, %7 : vector<128x128xf32>
    %9 = arith.truncf %8 : vector<128x128xf32> to vector<128x128xbf16>
    %c0_6 = arith.constant 0 : index
    %c0_7 = arith.constant 0 : index
    %10 = vector.load %arg4[%c0_6, %c0_7] : memref<128x128xbf16, #tpu.memory_space<vmem>>, vector<128x128xbf16>
    tpu.vector_store %arg4[%c0_6, %c0_7], %9 {strides = array<i32>} : memref<128x128xbf16, #tpu.memory_space<vmem>>, vector<128x128xbf16>,
    return
  }
  func.func @transform_0(%arg0: i32) -> (i32, i32) {
    %c0_i32 = arith.constant 0 : i32
    %c0_i32_0 = arith.constant 0 : i32
    return %arg0, %c0_i32 : i32, i32
  }
  func.func @transform_1(%arg0: i32) -> (i32, i32) {
    %c0_i32 = arith.constant 0 : i32
    %c0_i32_0 = arith.constant 0 : i32
    %c0_i32_1 = arith.constant 0 : i32
    return %c0_i32, %c0_i32_0 : i32, i32
  }
  func.func @transform_2(%arg0: i32) -> (i32, i32) {
    %c0_i32 = arith.constant 0 : i32
    %c0_i32_0 = arith.constant 0 : i32
    %c0_i32_1 = arith.constant 0 : i32
    return %c0_i32, %c0_i32_0 : i32, i32
  }
  func.func @transform_3(%arg0: i32) -> (i32, i32) {
    %c0_i32 = arith.constant 0 : i32
    %c0_i32_0 = arith.constant 0 : i32
    return %arg0, %c0_i32 : i32, i32
  }
}

module attributes {stable_mosaic.version = 11 : i64} {
  func.func @_conv_mm_kernel(%arg0: i32, %arg1: memref<32x2048xbf16, #tpu.memory_space<vmem>>, %arg2: memref<2048x128xbf16, #tpu.memory_space<vmem>>, %arg3: memref<1x128xf32, #tpu.memory_space<vmem>>, %arg4: memref<32x128xbf16, #tpu.memory_space<vmem>>) attributes {dimension_semantics = [#tpu.dimension_semantics<parallel>], iteration_bounds = array<i64: 1>, scalar_prefetch = 0 : i64, scratch_operands = 0 : i64, tpu.core_type = #tpu.core_type<tc>, window_params = [{transform_indices = @transform_0, window_bounds = array<i64: 32, 2048>}, {pipeline_mode = #tpu.pipeline_mode<synchronous>, transform_indices = @transform_1, window_bounds = array<i64: 2048, 128>}, {pipeline_mode = #tpu.pipeline_mode<synchronous>, transform_indices = @transform_2, window_bounds = array<i64: 1, 128>}, {transform_indices = @transform_3, window_bounds = array<i64: 32, 128>}]} {
    %c0 = arith.constant 0 : index
    %c0_0 = arith.constant 0 : index
    %0 = vector.load %arg1[%c0, %c0_0] : memref<32x2048xbf16, #tpu.memory_space<vmem>>, vector<32x2048xbf16>
    %c0_1 = arith.constant 0 : index
    %c0_2 = arith.constant 0 : index
    %1 = vector.load %arg2[%c0_1, %c0_2] : memref<2048x128xbf16, #tpu.memory_space<vmem>>, vector<2048x128xbf16>
    %cst = arith.constant dense<0.000000e+00> : vector<32x128xf32>
    %2 = tpu.matmul %0, %1, %cst {dimension_numbers = #tpu.dot_dimension_numbers<[1], [0], [0], [1], [0, 0, 1, 1], [], []>} : vector<32x2048xbf16>, vector<2048x128xbf16>, vector<32x128xf32> -> vector<32x128xf32>
    %c0_3 = arith.constant 0 : index
    %c0_4 = arith.constant 0 : index
    %3 = vector.load %arg3[%c0_3, %c0_4] : memref<1x128xf32, #tpu.memory_space<vmem>>, vector<1x128xf32>
    %4 = vector.broadcast %3 : vector<1x128xf32> to vector<32x128xf32>
    %5 = arith.addf %2, %4 : vector<32x128xf32>
    %cst_5 = arith.constant 2.000000e-01 : f32
    %6 = vector.broadcast %cst_5 : f32 to vector<32x128xf32>
    %7 = arith.mulf %6, %5 : vector<32x128xf32>
    %8 = arith.maximumf %5, %7 : vector<32x128xf32>
    %9 = arith.truncf %8 : vector<32x128xf32> to vector<32x128xbf16>
    %c0_6 = arith.constant 0 : index
    %c0_7 = arith.constant 0 : index
    %10 = vector.load %arg4[%c0_6, %c0_7] : memref<32x128xbf16, #tpu.memory_space<vmem>>, vector<32x128xbf16>
    tpu.vector_store %arg4[%c0_6, %c0_7], %9 {strides = array<i32>} : memref<32x128xbf16, #tpu.memory_space<vmem>>, vector<32x128xbf16>,
    return
  }
  func.func @transform_0(%arg0: i32) -> (i32, i32) {
    %c0_i32 = arith.constant 0 : i32
    %c0_i32_0 = arith.constant 0 : i32
    return %arg0, %c0_i32 : i32, i32
  }
  func.func @transform_1(%arg0: i32) -> (i32, i32) {
    %c0_i32 = arith.constant 0 : i32
    %c0_i32_0 = arith.constant 0 : i32
    %c0_i32_1 = arith.constant 0 : i32
    return %c0_i32, %c0_i32_0 : i32, i32
  }
  func.func @transform_2(%arg0: i32) -> (i32, i32) {
    %c0_i32 = arith.constant 0 : i32
    %c0_i32_0 = arith.constant 0 : i32
    %c0_i32_1 = arith.constant 0 : i32
    return %c0_i32, %c0_i32_0 : i32, i32
  }
  func.func @transform_3(%arg0: i32) -> (i32, i32) {
    %c0_i32 = arith.constant 0 : i32
    %c0_i32_0 = arith.constant 0 : i32
    return %arg0, %c0_i32 : i32, i32
  }
}

module attributes {stable_mosaic.version = 11 : i64} {
  func.func @_head_kernel(%arg0: memref<2x2048xbf16, #tpu.memory_space<vmem>>, %arg1: memref<2048x128xbf16, #tpu.memory_space<vmem>>, %arg2: memref<1x128xf32, #tpu.memory_space<vmem>>, %arg3: memref<1x128xf32, #tpu.memory_space<vmem>>, %arg4: memref<1x1xf32, #tpu.memory_space<vmem>>, %arg5: memref<2x128xf32, #tpu.memory_space<vmem>>, %arg6: memref<2x1xf32, #tpu.memory_space<vmem>>) attributes {dimension_semantics = [], scalar_prefetch = 0 : i64, scratch_operands = 0 : i64, tpu.core_type = #tpu.core_type<tc>} {
    %c0 = arith.constant 0 : index
    %c0_0 = arith.constant 0 : index
    %0 = vector.load %arg0[%c0, %c0_0] : memref<2x2048xbf16, #tpu.memory_space<vmem>>, vector<2x2048xbf16>
    %c0_1 = arith.constant 0 : index
    %c0_2 = arith.constant 0 : index
    %1 = vector.load %arg1[%c0_1, %c0_2] : memref<2048x128xbf16, #tpu.memory_space<vmem>>, vector<2048x128xbf16>
    %cst = arith.constant dense<0.000000e+00> : vector<2x128xf32>
    %2 = tpu.matmul %0, %1, %cst {dimension_numbers = #tpu.dot_dimension_numbers<[1], [0], [0], [1], [0, 0, 1, 1], [], []>} : vector<2x2048xbf16>, vector<2048x128xbf16>, vector<2x128xf32> -> vector<2x128xf32>
    %c0_3 = arith.constant 0 : index
    %c0_4 = arith.constant 0 : index
    %3 = vector.load %arg2[%c0_3, %c0_4] : memref<1x128xf32, #tpu.memory_space<vmem>>, vector<1x128xf32>
    %4 = vector.broadcast %3 : vector<1x128xf32> to vector<2x128xf32>
    %5 = arith.addf %2, %4 : vector<2x128xf32>
    %c0_5 = arith.constant 0 : index
    %c0_6 = arith.constant 0 : index
    %6 = vector.load %arg5[%c0_5, %c0_6] : memref<2x128xf32, #tpu.memory_space<vmem>>, vector<2x128xf32>
    tpu.vector_store %arg5[%c0_5, %c0_6], %5 {strides = array<i32>} : memref<2x128xf32, #tpu.memory_space<vmem>>, vector<2x128xf32>,
    %c0_7 = arith.constant 0 : index
    %c0_8 = arith.constant 0 : index
    %7 = vector.load %arg3[%c0_7, %c0_8] : memref<1x128xf32, #tpu.memory_space<vmem>>, vector<1x128xf32>
    %8 = vector.broadcast %7 : vector<1x128xf32> to vector<2x128xf32>
    %9 = arith.mulf %5, %8 : vector<2x128xf32>
    %cst_9 = arith.constant dense<0.000000e+00> : vector<2xf32>
    %10 = vector.multi_reduction <add>, %9, %cst_9 [1] : vector<2x128xf32> to vector<2xf32>
    %11 = vector.shape_cast %10 : vector<2xf32> to vector<2x1xf32>
    %c0_10 = arith.constant 0 : index
    %c0_11 = arith.constant 0 : index
    %12 = vector.load %arg4[%c0_10, %c0_11] : memref<1x1xf32, #tpu.memory_space<vmem>>, vector<1x1xf32>
    %13 = vector.broadcast %12 : vector<1x1xf32> to vector<2x1xf32>
    %14 = arith.addf %11, %13 : vector<2x1xf32>
    %cst_12 = arith.constant 0.000000e+00 : f32
    %15 = vector.broadcast %cst_12 : f32 to vector<2x1xf32>
    %16 = arith.subf %15, %14 : vector<2x1xf32>
    %17 = math.exp %16 : vector<2x1xf32>
    %cst_13 = arith.constant 1.000000e+00 : f32
    %18 = vector.broadcast %cst_13 : f32 to vector<2x1xf32>
    %19 = arith.addf %18, %17 : vector<2x1xf32>
    %20 = tpu.reciprocal %19 {approx = true} : vector<2x1xf32> -> vector<2x1xf32>
    %c0_14 = arith.constant 0 : index
    %c0_15 = arith.constant 0 : index
    %21 = vector.load %arg6[%c0_14, %c0_15] : memref<2x1xf32, #tpu.memory_space<vmem>>, vector<2x1xf32>
    tpu.vector_store %arg6[%c0_14, %c0_15], %20 {strides = array<i32>} : memref<2x1xf32, #tpu.memory_space<vmem>>, vector<2x1xf32>,
    return
  }
}

</mosaic_0001>

<bundles_post_ra>
// kernel: critic_forward.5
= control target key start
LH: loop header
LB: loop body
LE: loop exit
PB: predicated region body
PF: predicated region fallthrough
CT: control target
= control target key end

     0   :  { %s1902_s12 = smov 0   ;;  %s2104_s0 = inlined_call_operand.vmem [shape: bf16[2048,36], index: 0, kind: input, shape index: {}]   ;;  %s2105_s1 = inlined_call_operand.vmem [shape: bf16[36,128], index: 1, kind: input, shape index: {}]   ;;  %s2106_s2 = inlined_call_operand.vmem [shape: f32[1,128], index: 2, kind: input, shape index: {}]   ;;  %s2107_s3 = inlined_call_operand.vmem [shape: bf16[2048,128], index: 3, kind: output, shape index: {}]  }
   0x1 LB: > { %s1320_s13 = sadd.s32 4294967295, %s1880_s12   ;;  %p1324_p0 = scmp.ge.s32.totalorder %s1880_s12, 1  ;;  %s1880_s12 = sphi %s1902_s12, %s13_s12  }
   0x2   : > { %p138_p1 = scmp.lt.s32.totalorder %s1880_s12, 5 }
   0x4   : > { %p139_p2 = pnand %p1324_p0, %p138_p1 }
   0x5   : > { %v1839_v0 = vld [vmem:[%s2105_s1] sm:$0xff] (!%p139_p2)   ;;  %v1840_v1 = vld [vmem:[%s2105_s1 + $0x8] sm:$0xff] (!%p139_p2)   ;;  %s1325_s18 = sshll.u32 (!%p139_p2), %s1320_s13, 6  ;;  %v1841_v2 = vld [vmem:[%s2105_s1 + $0x10] ss:$0 sps:$4 sm:$0x33] (!%p139_p2)  }
   0x6   : > { %142 = sbr.rel (%p139_p2) target bundleno = 299 (0x12b), region = 32  ;;  %1753 = vmatprep.subr.bf16.mxu0 (!%p139_p2), %v1839_v0  ;;  %1823 = vmatprep.subr.bf16.mxu1 (!%p139_p2), %v1839_v0  ;;  %p163_p3 = scmp.lt.s32.totalorder (!%p139_p2), %s1325_s18, 255  ;;  %vm523_vm0 = vcmask (!%p139_p2), 1041408   ;;  %vm426_vm1 = vcmask (!%p139_p2), 293888   ;;  %v1996_v36 = vld [vmem:[%s2106_s2] ss:$0 sm:$0xff] (!%p139_p2) }
   0x7   : > { %1754 = vmatpush3.bf16.msra.mxu0 (!%p139_p2), %v1839_v0  ;;  %1826 = vmatpush3.bf16.msra.mxu1 (!%p139_p2), %v1839_v0  ;;  %v525_v3 = vsel (!%p139_p2), %vm523_vm0, %v1841_v2, 0 }
   0x8   : > { %1755 = vmatprep.subr.bf16.mxu0 (!%p139_p2), %v1840_v1  ;;  %1824 = vmatprep.subr.bf16.mxu1 (!%p139_p2), %v1840_v1 }
   0xb   : > { %1756 = vmatpush3.bf16.msra.mxu0 (!%p139_p2), %v1840_v1  ;;  %1827 = vmatpush3.bf16.msra.mxu1 (!%p139_p2), %v1840_v1 }
   0xc   : > { %1829 = vmatprep.subr.msk.bf16.mxu0 (!%p139_p2), %vm523_vm0, %v1841_v2  ;;  %1830 = vmatprep.subr.msk.bf16.mxu1 (!%p139_p2), %vm523_vm0, %v1841_v2 }
   0xd   : > { %s2109_s18 = smov (!%p163_p3, %s1325_s18), 255 }
   0xe   : > { %s1326_s21 = sshll.u32 %s2109_s18, 2 }
   0xf   : > { %s1927_s24 = scalar_lea.vmem %s2104_s0, %s1326_s21  ;;  %1758 = vmatpush3.bf16.msra.mxu0 %v525_v3  ;;  %1828 = vmatpush3.bf16.msra.mxu1 %v525_v3  ;;  %s2011_s29 = scalar_lea.vmem %s2107_s3, %s1326_s21 }
  0x10   : > { %v1842_v4 = vld [vmem:[%s1927_s24] sm:$0xff]   ;;  %v1844_v6 = vld [vmem:[%s1927_s24 + $0x8] sm:$0xff]   ;;  %v1846_v8 = vld [vmem:[%s1927_s24 + $0x10] sm:$0xff]  }
  0x11   : > { %v1843_v5 = vld [vmem:[%s1927_s24 + $0x80] sm:$0xff]   ;;  %1759 = vmatprep.mubr.msk.bf16.mxu0 %vm426_vm1, %v1842_v4  ;;  %v1845_v7 = vld [vmem:[%s1927_s24 + $0x88] sm:$0xff]   ;;  %v1847_v9 = vld [vmem:[%s1927_s24 + $0x90] sm:$0xff]  }
  0x12   : > { %1791 = vmatprep.mubr.msk.bf16.mxu1 %vm426_vm1, %v1843_v5  ;;  %1760 = vmatmul.mubr.msk.bf16.vlgmr.msra.gmra.mrb[0].mxu0 %vm426_vm1, %v1844_v6  ;;  %v1848_v10 = vld [vmem:[%s1927_s24 + $0x18] sm:$0xff]   ;;  %v1850_v12 = vld [vmem:[%s1927_s24 + $0x20] sm:$0xff]   ;;  %v1852_v14 = vld [vmem:[%s1927_s24 + $0x28] sm:$0xff]  }
  0x13   : > { %1792 = vmatmul.mubr.msk.bf16.vlgmr.msra.gmra.mrb[0].mxu1 %vm426_vm1, %v1845_v7  ;;  %1763 = vmatprep.mubr.msk.bf16.mxu0 %vm426_vm1, %v1846_v8  ;;  %v1849_v11 = vld [vmem:[%s1927_s24 + $0x98] sm:$0xff]   ;;  %v1851_v13 = vld [vmem:[%s1927_s24 + $0xa0] sm:$0xff]   ;;  %v1853_v15 = vld [vmem:[%s1927_s24 + $0xa8] sm:$0xff]  }
  0x14   : > { %1795 = vmatprep.mubr.msk.bf16.mxu1 %vm426_vm1, %v1847_v9  ;;  %v1854_v16 = vld [vmem:[%s1927_s24 + $0x30] sm:$0xff]   ;;  %v1856_v18 = vld [vmem:[%s1927_s24 + $0x38] sm:$0xff]   ;;  %v1858_v20 = vld [vmem:[%s1927_s24 + $0x40] sm:$0xff]  }
  0x15   : > { %v1855_v17 = vld [vmem:[%s1927_s24 + $0xb0] sm:$0xff]   ;;  %v1857_v19 = vld [vmem:[%s1927_s24 + $0xb8] sm:$0xff]   ;;  %v1859_v21 = vld [vmem:[%s1927_s24 + $0xc0] sm:$0xff]  }
  0x16   : > { %v1860_v22 = vld [vmem:[%s1927_s24 + $0x48] sm:$0xff]   ;;  %v1862_v24 = vld [vmem:[%s1927_s24 + $0x50] sm:$0xff]   ;;  %v1864_v26 = vld [vmem:[%s1927_s24 + $0x58] sm:$0xff]  }
  0x17   : > { %v1861_v23 = vld [vmem:[%s1927_s24 + $0xc8] sm:$0xff]   ;;  %v1863_v25 = vld [vmem:[%s1927_s24 + $0xd0] sm:$0xff]   ;;  %v1865_v27 = vld [vmem:[%s1927_s24 + $0xd8] sm:$0xff]  }
  0x18   : > { %v1866_v28 = vld [vmem:[%s1927_s24 + $0x60] sm:$0xff]   ;;  %v1868_v30 = vld [vmem:[%s1927_s24 + $0x68] sm:$0xff]   ;;  %v1870_v32 = vld [vmem:[%s1927_s24 + $0x70] sm:$0xff]  }
  0x19   : > { %v1867_v29 = vld [vmem:[%s1927_s24 + $0xe0] sm:$0xff]   ;;  %v1869_v31 = vld [vmem:[%s1927_s24 + $0xe8] sm:$0xff]   ;;  %v1871_v33 = vld [vmem:[%s1927_s24 + $0xf0] sm:$0xff]  }
  0x1a   : > { %1764 = vmatmul.mubr.msk.bf16.gmra.mrb[4].mxu0 %vm426_vm1, %v1848_v10  ;;  %v1872_v34 = vld [vmem:[%s1927_s24 + $0x78] sm:$0xff]  }
  0x1b   : > { %1796 = vmatmul.mubr.msk.bf16.gmra.mrb[4].mxu1 %vm426_vm1, %v1849_v11  ;;  %1767 = vmatprep.mubr.msk.bf16.mxu0 %vm426_vm1, %v1850_v12  ;;  %v1873_v35 = vld [vmem:[%s1927_s24 + $0xf8] sm:$0xff]  }
  0x1c   : > { %1799 = vmatprep.mubr.msk.bf16.mxu1 %vm426_vm1, %v1851_v13 }
  0x22   : > { %1768 = vmatmul.mubr.msk.bf16.gmra.mrb[8].mxu0 %vm426_vm1, %v1852_v14 }
  0x23   : > { %1800 = vmatmul.mubr.msk.bf16.gmra.mrb[8].mxu1 %vm426_vm1, %v1853_v15  ;;  %1771 = vmatprep.mubr.msk.bf16.mxu0 %vm426_vm1, %v1854_v16 }
  0x24   : > { %1803 = vmatprep.mubr.msk.bf16.mxu1 %vm426_vm1, %v1855_v17 }
  0x2a   : > { %1772 = vmatmul.mubr.msk.bf16.gmra.mrb[12].mxu0 %vm426_vm1, %v1856_v18 }
  0x2b   : > { %1804 = vmatmul.mubr.msk.bf16.gmra.mrb[12].mxu1 %vm426_vm1, %v1857_v19  ;;  %1775 = vmatprep.mubr.msk.bf16.mxu0 %vm426_vm1, %v1858_v20 }
  0x2c   : > { %1807 = vmatprep.mubr.msk.bf16.mxu1 %vm426_vm1, %v1859_v21 }
  0x32   : > { %1776 = vmatmul.mubr.msk.bf16.gmra.mrb[16].mxu0 %vm426_vm1, %v1860_v22 }
  0x33   : > { %1808 = vmatmul.mubr.msk.bf16.gmra.mrb[16].mxu1 %vm426_vm1, %v1861_v23  ;;  %1779 = vmatprep.mubr.msk.bf16.mxu0 %vm426_vm1, %v1862_v24 }
  0x34   : > { %1811 = vmatprep.mubr.msk.bf16.mxu1 %vm426_vm1, %v1863_v25 }
  0x3a   : > { %1780 = vmatmul.mubr.msk.bf16.gmra.mrb[20].mxu0 %vm426_vm1, %v1864_v26 }
  0x3b   : > { %1812 = vmatmul.mubr.msk.bf16.gmra.mrb[20].mxu1 %vm426_vm1, %v1865_v27  ;;  %1783 = vmatprep.mubr.msk.bf16.mxu0 %vm426_vm1, %v1866_v28 }
  0x3c   : > { %1815 = vmatprep.mubr.msk.bf16.mxu1 %vm426_vm1, %v1867_v29 }
  0x42   : > { %1784 = vmatmul.mubr.msk.bf16.gmra.mrb[24].mxu0 %vm426_vm1, %v1868_v30 }
  0x43   : > { %1816 = vmatmul.mubr.msk.bf16.gmra.mrb[24].mxu1 %vm426_vm1, %v1869_v31  ;;  %1787 = vmatprep.mubr.msk.bf16.mxu0 %vm426_vm1, %v1870_v32 }
  0x44   : > { %1819 = vmatprep.mubr.msk.bf16.mxu1 %vm426_vm1, %v1871_v33 }
  0x4a   : > { %1788 = vmatmul.mubr.msk.bf16.gmra.mrb[28].mxu0 %vm426_vm1, %v1872_v34 }
  0x4b   : > { %1820 = vmatmul.mubr.msk.bf16.gmra.mrb[28].mxu1 %vm426_vm1, %v1873_v35 }
  0xe5   : > { %v1761_v37 = vpop.f32.mrb[0].mxu0 }
  0xe6   : > { %v1793_v38 = vpop.f32.mrb[0].mxu1  ;;  %v570_v39 = vadd.f32 %v1761_v37, %v1996_v36  ;;  %v561_v41 = vpop.f32.mrb[1].mxu0 }
  0xe7   : > { %v698_v40 = vadd.f32 %v1793_v38, %v1996_v36  ;;  %v689_v42 = vpop.f32.mrb[1].mxu1  ;;  %v562_v43 = vadd.f32 %v1996_v36, %v561_v41  ;;  %v1762_v45 = vpop.f32.mrb[2].mxu0 }
  0xe8   : > { %v690_v44 = vadd.f32 %v1996_v36, %v689_v42  ;;  %v1794_v46 = vpop.f32.mrb[2].mxu1  ;;  %v818_v47 = vmul.f32 0.2, %v570_v39  ;;  %v573_v49 = vadd.f32 %v1762_v45, %v1996_v36  ;;  %v564_v51 = vpop.f32.mrb[3].mxu0 }
  0xe9   : > { %v850_v48 = vmul.f32 0.2, %v698_v40  ;;  %v701_v50 = vadd.f32 %v1794_v46, %v1996_v36  ;;  %v692_v52 = vpop.f32.mrb[3].mxu1  ;;  %v816_v53 = vmul.f32 0.2, %v562_v43  ;;  %v565_v55 = vadd.f32 %v1996_v36, %v564_v51 }
  0xea   : > { %v848_v54 = vmul.f32 0.2, %v690_v44  ;;  %v693_v56 = vadd.f32 %v1996_v36, %v692_v52  ;;  %v819_v57 = vmul.f32 0.2, %v573_v49  ;;  %v882_v61 = vmax.f32 %v570_v39, %v818_v47 }
  0xeb   : > { %v851_v58 = vmul.f32 0.2, %v701_v50  ;;  %v817_v59 = vmul.f32 0.2, %v565_v55  ;;  %v914_v62 = vmax.f32 %v698_v40, %v850_v48  ;;  %v880_v1 = vmax.f32 %v562_v43, %v816_v53 }
  0xec   : > { %v849_v60 = vmul.f32 0.2, %v693_v56  ;;  %v883_v63 = vmax.f32 %v573_v49, %v819_v57  ;;  %v912_v2 = vmax.f32 %v690_v44, %v848_v54 }
  0xed   : > { %v915_v0 = vmax.f32 %v701_v50, %v851_v58  ;;  %v881_v3 = vmax.f32 %v565_v55, %v817_v59  ;;  %v1765_v5 = vpop.f32.mrb[4].mxu0 }
  0xee   : > { %v913_v4 = vmax.f32 %v693_v56, %v849_v60  ;;  %v1797_v6 = vpop.f32.mrb[4].mxu1  ;;  %v1535_v7 = vpack.c.bf16 %v883_v63, %v882_v61  ;;  %v586_v9 = vadd.f32 %v1765_v5, %v1996_v36  ;;  %v577_v11 = vpop.f32.mrb[5].mxu0 }
  0xef   : > { %v1615_v8 = vpack.c.bf16 %v915_v0, %v914_v62  ;;  %v714_v10 = vadd.f32 %v1797_v6, %v1996_v36  ;;  %v705_v12 = vpop.f32.mrb[5].mxu1  ;;  %v1530_v13 = vpack.c.bf16 %v881_v3, %v880_v1  ;;  %v578_v15 = vadd.f32 %v1996_v36, %v577_v11  ;;  %v1766_v17 = vpop.f32.mrb[6].mxu0 }
  0xf0   : > { %v1610_v14 = vpack.c.bf16 %v913_v4, %v912_v2  ;;  %v706_v16 = vadd.f32 %v1996_v36, %v705_v12  ;;  %v1798_v18 = vpop.f32.mrb[6].mxu1  ;;  %1687 = vst [vmem:[%s2011_s29 + $0x8] sm:$0xff] %v1535_v7   ;;  %v822_v19 = vmul.f32 0.2, %v586_v9  ;;  %v589_v21 = vadd.f32 %v1766_v17, %v1996_v36  ;;  %v580_v23 = vpop.f32.mrb[7].mxu0 }
  0xf1   : > { %1703 = vst [vmem:[%s2011_s29 + $0x88] sm:$0xff] %v1615_v8   ;;  %v854_v20 = vmul.f32 0.2, %v714_v10  ;;  %v717_v22 = vadd.f32 %v1798_v18, %v1996_v36  ;;  %v708_v24 = vpop.f32.mrb[7].mxu1  ;;  %1531 = vst [vmem:[%s2011_s29] sm:$0xff] %v1530_v13   ;;  %v820_v25 = vmul.f32 0.2, %v578_v15  ;;  %v581_v27 = vadd.f32 %v1996_v36, %v580_v23 }
  0xf2   : > { %1702 = vst [vmem:[%s2011_s29 + $0x80] sm:$0xff] %v1610_v14   ;;  %v852_v26 = vmul.f32 0.2, %v706_v16  ;;  %v709_v28 = vadd.f32 %v1996_v36, %v708_v24  ;;  %v823_v29 = vmul.f32 0.2, %v589_v21  ;;  %v886_v33 = vmax.f32 %v586_v9, %v822_v19 }
  0xf3   : > { %v855_v30 = vmul.f32 0.2, %v717_v22  ;;  %v821_v31 = vmul.f32 0.2, %v581_v27  ;;  %v918_v34 = vmax.f32 %v714_v10, %v854_v20  ;;  %v884_v38 = vmax.f32 %v578_v15, %v820_v25 }
  0xf4   : > { %v853_v32 = vmul.f32 0.2, %v709_v28  ;;  %v887_v35 = vmax.f32 %v589_v21, %v823_v29  ;;  %v916_v39 = vmax.f32 %v706_v16, %v852_v26 }
  0xf5   : > { %v919_v37 = vmax.f32 %v717_v22, %v855_v30  ;;  %v885_v40 = vmax.f32 %v581_v27, %v821_v31  ;;  %v1769_v42 = vpop.f32.mrb[8].mxu0 }
  0xf6   : > { %v917_v41 = vmax.f32 %v709_v28, %v853_v32  ;;  %v1801_v43 = vpop.f32.mrb[8].mxu1  ;;  %v1545_v44 = vpack.c.bf16 %v887_v35, %v886_v33  ;;  %v602_v46 = vadd.f32 %v1769_v42, %v1996_v36  ;;  %v593_v48 = vpop.f32.mrb[9].mxu0 }
  0xf7   : > { %v1625_v45 = vpack.c.bf16 %v919_v37, %v918_v34  ;;  %v730_v47 = vadd.f32 %v1801_v43, %v1996_v36  ;;  %v721_v49 = vpop.f32.mrb[9].mxu1  ;;  %v1540_v50 = vpack.c.bf16 %v885_v40, %v884_v38  ;;  %v594_v52 = vadd.f32 %v1996_v36, %v593_v48  ;;  %v1770_v54 = vpop.f32.mrb[10].mxu0 }
  0xf8   : > { %v1620_v51 = vpack.c.bf16 %v917_v41, %v916_v39  ;;  %v722_v53 = vadd.f32 %v1996_v36, %v721_v49  ;;  %v1802_v55 = vpop.f32.mrb[10].mxu1  ;;  %1689 = vst [vmem:[%s2011_s29 + $0x18] sm:$0xff] %v1545_v44   ;;  %v826_v56 = vmul.f32 0.2, %v602_v46  ;;  %v605_v58 = vadd.f32 %v1770_v54, %v1996_v36  ;;  %v596_v60 = vpop.f32.mrb[11].mxu0 }
  0xf9   : > { %1705 = vst [vmem:[%s2011_s29 + $0x98] sm:$0xff] %v1625_v45   ;;  %v858_v57 = vmul.f32 0.2, %v730_v47  ;;  %v733_v59 = vadd.f32 %v1802_v55, %v1996_v36  ;;  %v724_v61 = vpop.f32.mrb[11].mxu1  ;;  %1688 = vst [vmem:[%s2011_s29 + $0x10] sm:$0xff] %v1540_v50   ;;  %v597_v0 = vadd.f32 %v1996_v36, %v596_v60 }
  0xfa   : > { %1704 = vst [vmem:[%s2011_s29 + $0x90] sm:$0xff] %v1620_v51   ;;  %v824_v62 = vmul.f32 0.2, %v594_v52  ;;  %v856_v63 = vmul.f32 0.2, %v722_v53  ;;  %v725_v1 = vadd.f32 %v1996_v36, %v724_v61  ;;  %v890_v6 = vmax.f32 %v602_v46, %v826_v56 }
  0xfb   : > { %v827_v2 = vmul.f32 0.2, %v605_v58  ;;  %v859_v3 = vmul.f32 0.2, %v733_v59  ;;  %v825_v4 = vmul.f32 0.2, %v597_v0  ;;  %v922_v7 = vmax.f32 %v730_v47, %v858_v57 }
  0xfc   : > { %v857_v5 = vmul.f32 0.2, %v725_v1  ;;  %v888_v10 = vmax.f32 %v594_v52, %v824_v62  ;;  %v920_v11 = vmax.f32 %v722_v53, %v856_v63 }
  0xfd   : > { %v891_v8 = vmax.f32 %v605_v58, %v827_v2  ;;  %v923_v9 = vmax.f32 %v733_v59, %v859_v3  ;;  %v889_v12 = vmax.f32 %v597_v0, %v825_v4  ;;  %v1773_v14 = vpop.f32.mrb[12].mxu0 }
  0xfe   : > { %v921_v13 = vmax.f32 %v725_v1, %v857_v5  ;;  %v1805_v15 = vpop.f32.mrb[12].mxu1  ;;  %v618_v18 = vadd.f32 %v1773_v14, %v1996_v36  ;;  %v609_v20 = vpop.f32.mrb[13].mxu0 }
  0xff   : > { %v1555_v16 = vpack.c.bf16 %v891_v8, %v890_v6  ;;  %v1635_v17 = vpack.c.bf16 %v923_v9, %v922_v7  ;;  %v746_v19 = vadd.f32 %v1805_v15, %v1996_v36  ;;  %v737_v21 = vpop.f32.mrb[13].mxu1  ;;  %v1550_v22 = vpack.c.bf16 %v889_v12, %v888_v10  ;;  %v1774_v26 = vpop.f32.mrb[14].mxu0 }
 0x100   : > { %v1630_v23 = vpack.c.bf16 %v921_v13, %v920_v11  ;;  %v610_v24 = vadd.f32 %v1996_v36, %v609_v20  ;;  %v738_v25 = vadd.f32 %v1996_v36, %v737_v21  ;;  %v1806_v27 = vpop.f32.mrb[14].mxu1  ;;  %v830_v28 = vmul.f32 0.2, %v618_v18  ;;  %v612_v32 = vpop.f32.mrb[15].mxu0 }
 0x101   : > { %1691 = vst [vmem:[%s2011_s29 + $0x28] sm:$0xff] %v1555_v16   ;;  %1707 = vst [vmem:[%s2011_s29 + $0xa8] sm:$0xff] %v1635_v17   ;;  %v862_v29 = vmul.f32 0.2, %v746_v19  ;;  %v621_v30 = vadd.f32 %v1774_v26, %v1996_v36  ;;  %v749_v31 = vadd.f32 %v1806_v27, %v1996_v36  ;;  %v740_v33 = vpop.f32.mrb[15].mxu1  ;;  %v613_v37 = vadd.f32 %v1996_v36, %v612_v32 }
 0x102   : > { %1690 = vst [vmem:[%s2011_s29 + $0x20] sm:$0xff] %v1550_v22   ;;  %1706 = vst [vmem:[%s2011_s29 + $0xa0] sm:$0xff] %v1630_v23   ;;  %v828_v34 = vmul.f32 0.2, %v610_v24  ;;  %v860_v35 = vmul.f32 0.2, %v738_v25  ;;  %v741_v38 = vadd.f32 %v1996_v36, %v740_v33  ;;  %v894_v43 = vmax.f32 %v618_v18, %v830_v28 }
 0x103   : > { %v831_v39 = vmul.f32 0.2, %v621_v30  ;;  %v863_v40 = vmul.f32 0.2, %v749_v31  ;;  %v829_v41 = vmul.f32 0.2, %v613_v37  ;;  %v926_v44 = vmax.f32 %v746_v19, %v862_v29 }
 0x104   : > { %v861_v42 = vmul.f32 0.2, %v741_v38  ;;  %v892_v47 = vmax.f32 %v610_v24, %v828_v34  ;;  %v924_v48 = vmax.f32 %v738_v25, %v860_v35 }
 0x105   : > { %v895_v45 = vmax.f32 %v621_v30, %v831_v39  ;;  %v927_v46 = vmax.f32 %v749_v31, %v863_v40  ;;  %v893_v49 = vmax.f32 %v613_v37, %v829_v41  ;;  %v1777_v51 = vpop.f32.mrb[16].mxu0 }
 0x106   : > { %v925_v50 = vmax.f32 %v741_v38, %v861_v42  ;;  %v1809_v52 = vpop.f32.mrb[16].mxu1  ;;  %v634_v55 = vadd.f32 %v1777_v51, %v1996_v36  ;;  %v625_v57 = vpop.f32.mrb[17].mxu0 }
 0x107   : > { %v1565_v53 = vpack.c.bf16 %v895_v45, %v894_v43  ;;  %v1645_v54 = vpack.c.bf16 %v927_v46, %v926_v44  ;;  %v762_v56 = vadd.f32 %v1809_v52, %v1996_v36  ;;  %v753_v58 = vpop.f32.mrb[17].mxu1  ;;  %v1560_v59 = vpack.c.bf16 %v893_v49, %v892_v47  ;;  %v1778_v63 = vpop.f32.mrb[18].mxu0 }
 0x108   : > { %v1640_v60 = vpack.c.bf16 %v925_v50, %v924_v48  ;;  %v626_v61 = vadd.f32 %v1996_v36, %v625_v57  ;;  %v754_v62 = vadd.f32 %v1996_v36, %v753_v58  ;;  %v1810_v0 = vpop.f32.mrb[18].mxu1  ;;  %v834_v1 = vmul.f32 0.2, %v634_v55  ;;  %v628_v5 = vpop.f32.mrb[19].mxu0 }
 0x109   : > { %1693 = vst [vmem:[%s2011_s29 + $0x38] sm:$0xff] %v1565_v53   ;;  %1709 = vst [vmem:[%s2011_s29 + $0xb8] sm:$0xff] %v1645_v54   ;;  %v866_v2 = vmul.f32 0.2, %v762_v56  ;;  %v637_v3 = vadd.f32 %v1778_v63, %v1996_v36  ;;  %v765_v4 = vadd.f32 %v1810_v0, %v1996_v36  ;;  %v756_v6 = vpop.f32.mrb[19].mxu1  ;;  %v629_v9 = vadd.f32 %v1996_v36, %v628_v5 }
 0x10a   : > { %1692 = vst [vmem:[%s2011_s29 + $0x30] sm:$0xff] %v1560_v59   ;;  %1708 = vst [vmem:[%s2011_s29 + $0xb0] sm:$0xff] %v1640_v60   ;;  %v832_v7 = vmul.f32 0.2, %v626_v61  ;;  %v864_v8 = vmul.f32 0.2, %v754_v62  ;;  %v757_v10 = vadd.f32 %v1996_v36, %v756_v6  ;;  %v898_v15 = vmax.f32 %v634_v55, %v834_v1 }
 0x10b   : > { %v835_v11 = vmul.f32 0.2, %v637_v3  ;;  %v867_v12 = vmul.f32 0.2, %v765_v4  ;;  %v833_v13 = vmul.f32 0.2, %v629_v9  ;;  %v930_v16 = vmax.f32 %v762_v56, %v866_v2 }
 0x10c   : > { %v865_v14 = vmul.f32 0.2, %v757_v10  ;;  %v896_v19 = vmax.f32 %v626_v61, %v832_v7  ;;  %v928_v20 = vmax.f32 %v754_v62, %v864_v8 }
 0x10d   : > { %v899_v17 = vmax.f32 %v637_v3, %v835_v11  ;;  %v931_v18 = vmax.f32 %v765_v4, %v867_v12  ;;  %v897_v21 = vmax.f32 %v629_v9, %v833_v13  ;;  %v1781_v23 = vpop.f32.mrb[20].mxu0 }
 0x10e   : > { %v929_v22 = vmax.f32 %v757_v10, %v865_v14  ;;  %v1813_v24 = vpop.f32.mrb[20].mxu1  ;;  %v650_v27 = vadd.f32 %v1781_v23, %v1996_v36  ;;  %v641_v29 = vpop.f32.mrb[21].mxu0 }
 0x10f   : > { %v1575_v25 = vpack.c.bf16 %v899_v17, %v898_v15  ;;  %v1655_v26 = vpack.c.bf16 %v931_v18, %v930_v16  ;;  %v778_v28 = vadd.f32 %v1813_v24, %v1996_v36  ;;  %v769_v30 = vpop.f32.mrb[21].mxu1  ;;  %v1570_v31 = vpack.c.bf16 %v897_v21, %v896_v19  ;;  %v1782_v35 = vpop.f32.mrb[22].mxu0 }
 0x110   : > { %v1650_v32 = vpack.c.bf16 %v929_v22, %v928_v20  ;;  %v642_v33 = vadd.f32 %v1996_v36, %v641_v29  ;;  %v770_v34 = vadd.f32 %v1996_v36, %v769_v30  ;;  %v1814_v37 = vpop.f32.mrb[22].mxu1  ;;  %v838_v38 = vmul.f32 0.2, %v650_v27  ;;  %v644_v42 = vpop.f32.mrb[23].mxu0 }
 0x111   : > { %1695 = vst [vmem:[%s2011_s29 + $0x48] sm:$0xff] %v1575_v25   ;;  %1711 = vst [vmem:[%s2011_s29 + $0xc8] sm:$0xff] %v1655_v26   ;;  %v870_v39 = vmul.f32 0.2, %v778_v28  ;;  %v653_v40 = vadd.f32 %v1782_v35, %v1996_v36  ;;  %v781_v41 = vadd.f32 %v1814_v37, %v1996_v36  ;;  %v772_v43 = vpop.f32.mrb[23].mxu1  ;;  %v645_v46 = vadd.f32 %v1996_v36, %v644_v42 }
 0x112   : > { %1694 = vst [vmem:[%s2011_s29 + $0x40] sm:$0xff] %v1570_v31   ;;  %1710 = vst [vmem:[%s2011_s29 + $0xc0] sm:$0xff] %v1650_v32   ;;  %v836_v44 = vmul.f32 0.2, %v642_v33  ;;  %v868_v45 = vmul.f32 0.2, %v770_v34  ;;  %v773_v47 = vadd.f32 %v1996_v36, %v772_v43  ;;  %v902_v52 = vmax.f32 %v650_v27, %v838_v38 }
 0x113   : > { %v839_v48 = vmul.f32 0.2, %v653_v40  ;;  %v871_v49 = vmul.f32 0.2, %v781_v41  ;;  %v837_v50 = vmul.f32 0.2, %v645_v46  ;;  %v934_v53 = vmax.f32 %v778_v28, %v870_v39 }
 0x114   : > { %v869_v51 = vmul.f32 0.2, %v773_v47  ;;  %v900_v56 = vmax.f32 %v642_v33, %v836_v44  ;;  %v932_v57 = vmax.f32 %v770_v34, %v868_v45 }
 0x115   : > { %v903_v54 = vmax.f32 %v653_v40, %v839_v48  ;;  %v935_v55 = vmax.f32 %v781_v41, %v871_v49  ;;  %v901_v58 = vmax.f32 %v645_v46, %v837_v50  ;;  %v1785_v60 = vpop.f32.mrb[24].mxu0 }
 0x116   : > { %v933_v59 = vmax.f32 %v773_v47, %v869_v51  ;;  %v1817_v61 = vpop.f32.mrb[24].mxu1  ;;  %v666_v0 = vadd.f32 %v1785_v60, %v1996_v36  ;;  %v657_v2 = vpop.f32.mrb[25].mxu0 }
 0x117   : > { %v1585_v62 = vpack.c.bf16 %v903_v54, %v902_v52  ;;  %v1665_v63 = vpack.c.bf16 %v935_v55, %v934_v53  ;;  %v794_v1 = vadd.f32 %v1817_v61, %v1996_v36  ;;  %v785_v3 = vpop.f32.mrb[25].mxu1  ;;  %v1580_v4 = vpack.c.bf16 %v901_v58, %v900_v56  ;;  %v1786_v8 = vpop.f32.mrb[26].mxu0 }
 0x118   : > { %v1660_v5 = vpack.c.bf16 %v933_v59, %v932_v57  ;;  %v658_v6 = vadd.f32 %v1996_v36, %v657_v2  ;;  %v786_v7 = vadd.f32 %v1996_v36, %v785_v3  ;;  %v1818_v9 = vpop.f32.mrb[26].mxu1  ;;  %v842_v10 = vmul.f32 0.2, %v666_v0  ;;  %v660_v14 = vpop.f32.mrb[27].mxu0 }
 0x119   : > { %1697 = vst [vmem:[%s2011_s29 + $0x58] sm:$0xff] %v1585_v62   ;;  %1713 = vst [vmem:[%s2011_s29 + $0xd8] sm:$0xff] %v1665_v63   ;;  %v874_v11 = vmul.f32 0.2, %v794_v1  ;;  %v669_v12 = vadd.f32 %v1786_v8, %v1996_v36  ;;  %v797_v13 = vadd.f32 %v1818_v9, %v1996_v36  ;;  %v788_v15 = vpop.f32.mrb[27].mxu1  ;;  %v661_v18 = vadd.f32 %v1996_v36, %v660_v14 }
 0x11a   : > { %1696 = vst [vmem:[%s2011_s29 + $0x50] sm:$0xff] %v1580_v4   ;;  %1712 = vst [vmem:[%s2011_s29 + $0xd0] sm:$0xff] %v1660_v5   ;;  %v840_v16 = vmul.f32 0.2, %v658_v6  ;;  %v872_v17 = vmul.f32 0.2, %v786_v7  ;;  %v789_v19 = vadd.f32 %v1996_v36, %v788_v15  ;;  %v906_v24 = vmax.f32 %v666_v0, %v842_v10 }
 0x11b   : > { %v843_v20 = vmul.f32 0.2, %v669_v12  ;;  %v875_v21 = vmul.f32 0.2, %v797_v13  ;;  %v841_v22 = vmul.f32 0.2, %v661_v18  ;;  %v938_v25 = vmax.f32 %v794_v1, %v874_v11 }
 0x11c   : > { %v873_v23 = vmul.f32 0.2, %v789_v19  ;;  %v904_v28 = vmax.f32 %v658_v6, %v840_v16  ;;  %v936_v29 = vmax.f32 %v786_v7, %v872_v17 }
 0x11d   : > { %v907_v26 = vmax.f32 %v669_v12, %v843_v20  ;;  %v939_v27 = vmax.f32 %v797_v13, %v875_v21  ;;  %v905_v30 = vmax.f32 %v661_v18, %v841_v22  ;;  %v1789_v32 = vpop.f32.mrb[28].mxu0 }
 0x11e   : > { %v937_v31 = vmax.f32 %v789_v19, %v873_v23  ;;  %v1821_v33 = vpop.f32.mrb[28].mxu1  ;;  %v682_v37 = vadd.f32 %v1789_v32, %v1996_v36  ;;  %v673_v39 = vpop.f32.mrb[29].mxu0 }
 0x11f   : > { %v1595_v34 = vpack.c.bf16 %v907_v26, %v906_v24  ;;  %v1675_v35 = vpack.c.bf16 %v939_v27, %v938_v25  ;;  %v810_v38 = vadd.f32 %v1821_v33, %v1996_v36  ;;  %v801_v40 = vpop.f32.mrb[29].mxu1  ;;  %v1590_v41 = vpack.c.bf16 %v905_v30, %v904_v28  ;;  %v1790_v45 = vpop.f32.mrb[30].mxu0 }
 0x120   : > { %v1670_v42 = vpack.c.bf16 %v937_v31, %v936_v29  ;;  %v674_v43 = vadd.f32 %v1996_v36, %v673_v39  ;;  %v802_v44 = vadd.f32 %v1996_v36, %v801_v40  ;;  %v1822_v46 = vpop.f32.mrb[30].mxu1  ;;  %v846_v47 = vmul.f32 0.2, %v682_v37  ;;  %v676_v51 = vpop.f32.mrb[31].mxu0 }
 0x121   : > { %1699 = vst [vmem:[%s2011_s29 + $0x68] sm:$0xff] %v1595_v34   ;;  %1715 = vst [vmem:[%s2011_s29 + $0xe8] sm:$0xff] %v1675_v35   ;;  %v878_v48 = vmul.f32 0.2, %v810_v38  ;;  %v685_v49 = vadd.f32 %v1790_v45, %v1996_v36  ;;  %v813_v50 = vadd.f32 %v1822_v46, %v1996_v36  ;;  %v804_v52 = vpop.f32.mrb[31].mxu1  ;;  %v677_v55 = vadd.f32 %v1996_v36, %v676_v51 }
 0x122   : > { %1698 = vst [vmem:[%s2011_s29 + $0x60] sm:$0xff] %v1590_v41   ;;  %1714 = vst [vmem:[%s2011_s29 + $0xe0] sm:$0xff] %v1670_v42   ;;  %v844_v53 = vmul.f32 0.2, %v674_v43  ;;  %v876_v54 = vmul.f32 0.2, %v802_v44  ;;  %v805_v56 = vadd.f32 %v1996_v36, %v804_v52  ;;  %v910_v61 = vmax.f32 %v682_v37, %v846_v47 }
 0x123   : > { %v847_v57 = vmul.f32 0.2, %v685_v49  ;;  %v879_v58 = vmul.f32 0.2, %v813_v50  ;;  %v845_v59 = vmul.f32 0.2, %v677_v55  ;;  %v942_v62 = vmax.f32 %v810_v38, %v878_v48 }
 0x124   : > { %v877_v60 = vmul.f32 0.2, %v805_v56  ;;  %v908_v1 = vmax.f32 %v674_v43, %v844_v53  ;;  %v940_v2 = vmax.f32 %v802_v44, %v876_v54 }
 0x125   : > { %v911_v63 = vmax.f32 %v685_v49, %v847_v57  ;;  %v943_v0 = vmax.f32 %v813_v50, %v879_v58  ;;  %v909_v3 = vmax.f32 %v677_v55, %v845_v59 }
 0x126   : > { %v941_v4 = vmax.f32 %v805_v56, %v877_v60 }
 0x127   : > { %v1605_v5 = vpack.c.bf16 %v911_v63, %v910_v61  ;;  %v1685_v6 = vpack.c.bf16 %v943_v0, %v942_v62  ;;  %v1600_v7 = vpack.c.bf16 %v909_v3, %v908_v1 }
 0x128   : > { %v1680_v36 = vpack.c.bf16 %v941_v4, %v940_v2 }
 0x129   : > { %1701 = vst [vmem:[%s2011_s29 + $0x78] sm:$0xff] %v1605_v5   ;;  %1717 = vst [vmem:[%s2011_s29 + $0xf8] sm:$0xff] %v1685_v6  }
 0x12a   : > { %1700 = vst [vmem:[%s2011_s29 + $0x70] sm:$0xff] %v1600_v7   ;;  %1716 = vst [vmem:[%s2011_s29 + $0xf0] sm:$0xff] %v1680_v36  }
 0x12b PF: > { %s13_s12 = sadd.s32 1, %s1880_s12  }
 0x12c   : > { %p10_p4 = scmp.ge.s32.totalorder %s13_s12, 6  }
 0x12e   :  { %12 = sbr.rel (!%p10_p4) target bundleno = 1 (0x1), region = 62 }

// kernel: critic_forward.6
= control target key start
LH: loop header
LB: loop body
LE: loop exit
PB: predicated region body
PF: predicated region fallthrough
CT: control target
= control target key end

     0   :  { %v8868_v0 = vmov 0   ;;  %s11123_s1 = inlined_call_operand.vmem [shape: bf16[2048,128], index: 1, kind: input, shape index: {}]   ;;  %s11124_s0 = inlined_call_operand.vmem [shape: bf16[512,2048], index: 0, kind: input, shape index: {}]   ;;  %s11125_s2 = inlined_call_operand.vmem [shape: f32[1,128], index: 2, kind: input, shape index: {}]   ;;  %s11126_s3 = inlined_call_operand.vmem [shape: bf16[512,128], index: 3, kind: output, shape index: {}]  }
   0x1   :  { %4118 = vmatprep.subr.bf16.mxu1 %v8868_v0  ;;  %5274 = vmatprep.subr.bf16.mxu0 %v8868_v0  ;;  %v8739_v1 = vld [vmem:[%s11123_s1] sm:$0xff]   ;;  %v8741_v3 = vld [vmem:[%s11123_s1 + $0x8] sm:$0xff]   ;;  %v8743_v5 = vld [vmem:[%s11123_s1 + $0x10] sm:$0xff]  }
   0x2   :  { %v8740_v2 = vld [vmem:[%s11123_s1 + $0x200] sm:$0xff]   ;;  %4119 = vmatpush1.bf16.msra.mxu1 %v8739_v1  ;;  %v8742_v4 = vld [vmem:[%s11123_s1 + $0x208] sm:$0xff]   ;;  %v8744_v6 = vld [vmem:[%s11123_s1 + $0x210] sm:$0xff]  }
   0x3   :  { %5275 = vmatpush1.bf16.msra.mxu0 %v8740_v2  ;;  %4120 = vmatprep.subr.bf16.mxu1 %v8868_v0  ;;  %v8745_v7 = vld [vmem:[%s11123_s1 + $0x18] sm:$0xff]   ;;  %v8747_v9 = vld [vmem:[%s11123_s1 + $0x20] sm:$0xff]   ;;  %v8749_v11 = vld [vmem:[%s11123_s1 + $0x28] sm:$0xff]  }
   0x4   :  { %5276 = vmatprep.subr.bf16.mxu0 %v8868_v0  ;;  %v8746_v8 = vld [vmem:[%s11123_s1 + $0x218] sm:$0xff]   ;;  %v8748_v10 = vld [vmem:[%s11123_s1 + $0x220] sm:$0xff]   ;;  %v8750_v12 = vld [vmem:[%s11123_s1 + $0x228] sm:$0xff]  }
   0x5   :  { %v8751_v13 = vld [vmem:[%s11123_s1 + $0x30] sm:$0xff]   ;;  %v8753_v15 = vld [vmem:[%s11123_s1 + $0x38] sm:$0xff]   ;;  %v8755_v17 = vld [vmem:[%s11123_s1 + $0x40] sm:$0xff]  }
   0x6   :  { %4121 = vmatpush1.bf16.msra.mxu1 %v8741_v3  ;;  %v8752_v14 = vld [vmem:[%s11123_s1 + $0x230] sm:$0xff]   ;;  %v8754_v16 = vld [vmem:[%s11123_s1 + $0x238] sm:$0xff]   ;;  %v8756_v18 = vld [vmem:[%s11123_s1 + $0x240] sm:$0xff]  }
   0x7   :  { %5277 = vmatpush1.bf16.msra.mxu0 %v8742_v4  ;;  %4122 = vmatprep.subr.bf16.mxu1 %v8868_v0  ;;  %v8964_v19 = vld [vmem:[%s11124_s0] sm:$0xff]  ;;  %v8757_v24 = vld [vmem:[%s11123_s1 + $0x48] sm:$0xff]   ;;  %v8759_v27 = vld [vmem:[%s11123_s1 + $0x50] sm:$0xff]  }
   0x8   :  { %5278 = vmatprep.subr.bf16.mxu0 %v8868_v0  ;;  %v8969_v20 = vld [vmem:[%s11124_s0 + $0x40] sm:$0xff]  ;;  %v8758_v26 = vld [vmem:[%s11123_s1 + $0x248] sm:$0xff]   ;;  %v8760_v28 = vld [vmem:[%s11123_s1 + $0x250] sm:$0xff]  }
   0x9   :  { %v8974_v21 = vld [vmem:[%s11124_s0 + $0x20] sm:$0xff]  ;;  %v6884_v22 = vcombine.high %v8964_v19, %v8969_v20  ;;  %v8761_v29 = vld [vmem:[%s11123_s1 + $0x58] sm:$0xff]   ;;  %v8765_v33 = vld [vmem:[%s11123_s1 + $0x68] sm:$0xff]   ;;  %v6883_v42 = vcombine.low %v8964_v19, %v8969_v20 }
   0xa   :  { %4123 = vmatpush1.bf16.msra.mxu1 %v8743_v5  ;;  %v8981_v23 = vld [vmem:[%s11124_s0 + $0x60] sm:$0xff]  ;;  %v8762_v30 = vld [vmem:[%s11123_s1 + $0x258] sm:$0xff]   ;;  %v8766_v34 = vld [vmem:[%s11123_s1 + $0x268] sm:$0xff]  }
   0xb   :  { %5279 = vmatpush1.bf16.msra.mxu0 %v8744_v6  ;;  %4124 = vmatprep.subr.bf16.mxu1 %v8868_v0  ;;  %v6892_v25 = vcombine.high %v8974_v21, %v8981_v23  ;;  %v8763_v31 = vld [vmem:[%s11123_s1 + $0x60] sm:$0xff]   ;;  %v8767_v35 = vld [vmem:[%s11123_s1 + $0x70] sm:$0xff]   ;;  %v8769_v37 = vld [vmem:[%s11123_s1 + $0x78] sm:$0xff]   ;;  %v6891_v44 = vcombine.low %v8974_v21, %v8981_v23 }
   0xc   :  { %5280 = vmatprep.subr.bf16.mxu0 %v8868_v0  ;;  %4150 = vmatprep.mubr.bf16.mxu1 %v6884_v22  ;;  %v8764_v32 = vld [vmem:[%s11123_s1 + $0x260] sm:$0xff]   ;;  %v8768_v36 = vld [vmem:[%s11123_s1 + $0x270] sm:$0xff]   ;;  %v8770_v38 = vld [vmem:[%s11123_s1 + $0x278] sm:$0xff]  }
   0xd   :  { %5306 = vmatprep.mubr.bf16.mxu0 %v6892_v25  ;;  %v31_v39 = vld [vmem:[%s11124_s0 + $0x80] sm:$0xff]  ;;  %v8773_v51 = vld [vmem:[%s11123_s1 + $0x88] sm:$0xff]   ;;  %v8775_v59 = vld [vmem:[%s11123_s1 + $0x90] sm:$0xff]  }
   0xe   :  { %4125 = vmatpush1.bf16.msra.mxu1 %v8745_v7  ;;  %v39_v40 = vld [vmem:[%s11124_s0 + $0xc0] sm:$0xff]  ;;  %v8774_v52 = vld [vmem:[%s11123_s1 + $0x288] sm:$0xff]   ;;  %v8776_v60 = vld [vmem:[%s11123_s1 + $0x290] sm:$0xff]  }
   0xf   :  { %5281 = vmatpush1.bf16.msra.mxu0 %v8746_v8  ;;  %4126 = vmatprep.subr.bf16.mxu1 %v8868_v0  ;;  %v35_v41 = vld [vmem:[%s11124_s0 + $0xa0] sm:$0xff]  ;;  %v6900_v47 = vcombine.high %v31_v39, %v39_v40  ;;  %v6899_v55 = vcombine.low %v31_v39, %v39_v40  ;;  %v8777_v2 = vld [vmem:[%s11123_s1 + $0x98] sm:$0xff]   ;;  %v8784_v20 = vld [vmem:[%s11123_s1 + $0x2b0] sm:$0xff]  }
  0x10   :  { %5282 = vmatprep.subr.bf16.mxu0 %v8868_v0  ;;  %v43_v43 = vld [vmem:[%s11124_s0 + $0xe0] sm:$0xff]  ;;  %v8778_v3 = vld [vmem:[%s11123_s1 + $0x298] sm:$0xff]   ;;  %v8790_v39 = vld [vmem:[%s11123_s1 + $0x2c8] sm:$0xff]  }
  0x11   :  { %v8771_v45 = vld [vmem:[%s11123_s1 + $0x80] sm:$0xff]   ;;  %v6908_v48 = vcombine.high %v35_v41, %v43_v43  ;;  %v6907_v56 = vcombine.low %v35_v41, %v43_v43  ;;  %v8791_v41 = vld [vmem:[%s11123_s1 + $0xd0] sm:$0xff]  }
  0x12   :  { %4127 = vmatpush1.bf16.msra.mxu1 %v8747_v9  ;;  %v8772_v46 = vld [vmem:[%s11123_s1 + $0x280] sm:$0xff]  }
  0x13   :  { %5283 = vmatpush1.bf16.msra.mxu0 %v8748_v10  ;;  %4128 = vmatprep.subr.bf16.mxu1 %v8868_v0  ;;  %v47_v49 = vld [vmem:[%s11124_s0 + $0x100] sm:$0xff] }
  0x14   :  { %5284 = vmatprep.subr.bf16.mxu0 %v8868_v0  ;;  %v55_v50 = vld [vmem:[%s11124_s0 + $0x140] sm:$0xff] }
  0x15   :  { %v51_v53 = vld [vmem:[%s11124_s0 + $0x120] sm:$0xff]  ;;  %v6916_v57 = vcombine.high %v47_v49, %v55_v50  ;;  %v6915_v4 = vcombine.low %v47_v49, %v55_v50 }
  0x16   :  { %4129 = vmatpush1.bf16.msra.mxu1 %v8749_v11  ;;  %v59_v54 = vld [vmem:[%s11124_s0 + $0x160] sm:$0xff] }
  0x17   :  { %5285 = vmatpush1.bf16.msra.mxu0 %v8750_v12  ;;  %4130 = vmatprep.subr.bf16.mxu1 %v8868_v0  ;;  %v6924_v58 = vcombine.high %v51_v53, %v59_v54  ;;  %v63_v61 = vld [vmem:[%s11124_s0 + $0x180] sm:$0xff]  ;;  %v6923_v6 = vcombine.low %v51_v53, %v59_v54 }
  0x18   :  { %5286 = vmatprep.subr.bf16.mxu0 %v8868_v0  ;;  %v71_v62 = vld [vmem:[%s11124_s0 + $0x1c0] sm:$0xff] }
  0x19   :  { %v67_v63 = vld [vmem:[%s11124_s0 + $0x1a0] sm:$0xff]  ;;  %v6932_v7 = vcombine.high %v63_v61, %v71_v62 }
  0x1a   :  { %4131 = vmatpush1.bf16.msra.mxu1 %v8751_v13  ;;  %v75_v1 = vld [vmem:[%s11124_s0 + $0x1e0] sm:$0xff] }
  0x1b   :  { %5287 = vmatpush1.bf16.msra.mxu0 %v8752_v14  ;;  %4132 = vmatprep.subr.bf16.mxu1 %v8868_v0  ;;  %v8779_v5 = vld [vmem:[%s11123_s1 + $0xa0] sm:$0xff]   ;;  %v6940_v9 = vcombine.high %v67_v63, %v75_v1  ;;  %v8781_v14 = vld [vmem:[%s11123_s1 + $0xa8] sm:$0xff]  }
  0x1c   :  { %5288 = vmatprep.subr.bf16.mxu0 %v8868_v0  ;;  %v8780_v8 = vld [vmem:[%s11123_s1 + $0x2a0] sm:$0xff]  }
  0x1d   :  { %v79_v10 = vld [vmem:[%s11124_s0 + $0x200] sm:$0xff] }
  0x1e   :  { %4133 = vmatpush1.bf16.msra.mxu1 %v8753_v15  ;;  %v87_v11 = vld [vmem:[%s11124_s0 + $0x240] sm:$0xff]  ;;  %v8782_v15 = vld [vmem:[%s11123_s1 + $0x2a8] sm:$0xff]  }
  0x1f   :  { %5289 = vmatpush1.bf16.msra.mxu0 %v8754_v16  ;;  %4134 = vmatprep.subr.bf16.mxu1 %v8868_v0  ;;  %v83_v12 = vld [vmem:[%s11124_s0 + $0x220] sm:$0xff]  ;;  %v6931_v16 = vcombine.low %v63_v61, %v71_v62  ;;  %v6948_v19 = vcombine.high %v79_v10, %v87_v11 }
  0x20   :  { %5290 = vmatprep.subr.bf16.mxu0 %v8868_v0  ;;  %v91_v13 = vld [vmem:[%s11124_s0 + $0x260] sm:$0xff] }
  0x21   :  { %v6956_v21 = vcombine.high %v83_v12, %v91_v13  ;;  %v95_v22 = vld [vmem:[%s11124_s0 + $0x280] sm:$0xff] }
  0x22   :  { %4135 = vmatpush1.bf16.msra.mxu1 %v8755_v17  ;;  %v8783_v17 = vld [vmem:[%s11123_s1 + $0xb0] sm:$0xff]   ;;  %v103_v23 = vld [vmem:[%s11124_s0 + $0x2c0] sm:$0xff] }
  0x23   :  { %5291 = vmatpush1.bf16.msra.mxu0 %v8756_v18  ;;  %4136 = vmatprep.subr.bf16.mxu1 %v8868_v0  ;;  %v6939_v18 = vcombine.low %v67_v63, %v75_v1  ;;  %v107_v25 = vld [vmem:[%s11124_s0 + $0x2e0] sm:$0xff]  ;;  %v6963_v40 = vcombine.low %v95_v22, %v103_v23 }
  0x24   :  { %5292 = vmatprep.subr.bf16.mxu0 %v8868_v0  ;;  %v139_v49 = vld [vmem:[%s11124_s0 + $0x3e0] sm:$0xff] }
  0x25   :  { %v143_v54 = vld [vmem:[%s11124_s0 + $0x400] sm:$0xff] }
  0x26   :  { %4137 = vmatpush1.bf16.msra.mxu1 %v8757_v24  ;;  %v99_v24 = vld [vmem:[%s11124_s0 + $0x2a0] sm:$0xff] }
  0x27   :  { %5293 = vmatpush1.bf16.msra.mxu0 %v8758_v26  ;;  %4138 = vmatprep.subr.bf16.mxu1 %v8868_v0  ;;  %v8785_v26 = vld [vmem:[%s11123_s1 + $0xb8] sm:$0xff]   ;;  %v159_v1 = vld [vmem:[%s11124_s0 + $0x480] sm:$0xff] }
  0x28   :  { %5294 = vmatprep.subr.bf16.mxu0 %v8868_v0 }
  0x2a   :  { %4139 = vmatpush1.bf16.msra.mxu1 %v8759_v27  ;;  %v8786_v27 = vld [vmem:[%s11123_s1 + $0x2b8] sm:$0xff]  }
  0x2b   :  { %5295 = vmatpush1.bf16.msra.mxu0 %v8760_v28  ;;  %4140 = vmatprep.subr.bf16.mxu1 %v8868_v0  ;;  %v6947_v28 = vcombine.low %v79_v10, %v87_v11  ;;  %v8795_v10 = vld [vmem:[%s11123_s1 + $0xe0] sm:$0xff]  }
  0x2c   :  { %5296 = vmatprep.subr.bf16.mxu0 %v8868_v0  ;;  %v8796_v11 = vld [vmem:[%s11123_s1 + $0x2e0] sm:$0xff]  }
  0x2e   :  { %4141 = vmatpush1.bf16.msra.mxu1 %v8761_v29  ;;  %v8787_v29 = vld [vmem:[%s11123_s1 + $0xc0] sm:$0xff]  }
  0x2f   :  { %5297 = vmatpush1.bf16.msra.mxu0 %v8762_v30  ;;  %4142 = vmatprep.subr.bf16.mxu1 %v8868_v0  ;;  %v6955_v30 = vcombine.low %v83_v12, %v91_v13  ;;  %v183_v12 = vld [vmem:[%s11124_s0 + $0x540] sm:$0xff] }
  0x30   :  { %5298 = vmatprep.subr.bf16.mxu0 %v8868_v0  ;;  %v179_v13 = vld [vmem:[%s11124_s0 + $0x520] sm:$0xff] }
  0x32   :  { %4143 = vmatpush1.bf16.msra.mxu1 %v8763_v31  ;;  %v6964_v31 = vcombine.high %v95_v22, %v103_v23  ;;  %v203_v22 = vld [vmem:[%s11124_s0 + $0x5e0] sm:$0xff] }
  0x33   :  { %5299 = vmatpush1.bf16.msra.mxu0 %v8764_v32  ;;  %4144 = vmatprep.subr.bf16.mxu1 %v8868_v0  ;;  %v8788_v32 = vld [vmem:[%s11123_s1 + $0x2c0] sm:$0xff]  }
  0x34   :  { %5300 = vmatprep.subr.bf16.mxu0 %v8868_v0 }
  0x36   :  { %4145 = vmatpush1.bf16.msra.mxu1 %v8765_v33  ;;  %v6972_v33 = vcombine.high %v99_v24, %v107_v25 }
  0x37   :  { %5301 = vmatpush1.bf16.msra.mxu0 %v8766_v34  ;;  %4146 = vmatprep.subr.bf16.mxu1 %v8868_v0  ;;  %v111_v34 = vld [vmem:[%s11124_s0 + $0x300] sm:$0xff] }
  0x38   :  { %5302 = vmatprep.subr.bf16.mxu0 %v8868_v0 }
  0x3a   :  { %4147 = vmatpush1.bf16.msra.mxu1 %v8767_v35  ;;  %v119_v35 = vld [vmem:[%s11124_s0 + $0x340] sm:$0xff] }
  0x3b   :  { %5303 = vmatpush1.bf16.msra.mxu0 %v8768_v36  ;;  %4148 = vmatprep.subr.bf16.mxu1 %v8868_v0  ;;  %v115_v36 = vld [vmem:[%s11124_s0 + $0x320] sm:$0xff]  ;;  %v6980_v43 = vcombine.high %v111_v34, %v119_v35  ;;  %v6979_v50 = vcombine.low %v111_v34, %v119_v35 }
  0x3c   :  { %5304 = vmatprep.subr.bf16.mxu0 %v8868_v0 }
  0x3e   :  { %4149 = vmatpush1.bf16.msra.mxu1 %v8769_v37  ;;  %v123_v37 = vld [vmem:[%s11124_s0 + $0x360] sm:$0xff] }
  0x3f   :  { %5305 = vmatpush1.bf16.msra.mxu0 %v8770_v38  ;;  %4407 = vmatprep.subr.bf16.mxu1 %v8868_v0  ;;  %v8789_v38 = vld [vmem:[%s11123_s1 + $0xc8] sm:$0xff]  }
  0x40   :  { %5563 = vmatprep.subr.bf16.mxu0 %v8868_v0 }
  0x41   :  { %4151 = vmatmul.mubr.bf16.vlgmr.msra.gmra.mrb[0].mxu1 %v6883_v42  ;;  %v6971_v42 = vcombine.low %v99_v24, %v107_v25 }
  0x42   :  { %5307 = vmatmul.mubr.bf16.vlgmr.msra.gmra.mrb[0].mxu0 %v6891_v44  ;;  %4408 = vmatpush1.bf16.msra.mxu1 %v8771_v45  ;;  %v8792_v44 = vld [vmem:[%s11123_s1 + $0x2d0] sm:$0xff]   ;;  %v6988_v45 = vcombine.high %v115_v36, %v123_v37 }
  0x43   :  { %5564 = vmatpush1.bf16.msra.mxu0 %v8772_v46  ;;  %4158 = vmatprep.mubr.bf16.mxu1 %v6900_v47  ;;  %v127_v46 = vld [vmem:[%s11124_s0 + $0x380] sm:$0xff] }
  0x44   :  { %5314 = vmatprep.mubr.bf16.mxu0 %v6908_v48  ;;  %4409 = vmatprep.subr.bf16.mxu1 %v8868_v0  ;;  %v135_v47 = vld [vmem:[%s11124_s0 + $0x3c0] sm:$0xff] }
  0x45   :  { %5565 = vmatprep.subr.bf16.mxu0 %v8868_v0  ;;  %v131_v48 = vld [vmem:[%s11124_s0 + $0x3a0] sm:$0xff] }
  0x46   :  { %4410 = vmatpush1.bf16.msra.mxu1 %v8773_v51  ;;  %v6987_v51 = vcombine.low %v115_v36, %v123_v37  ;;  %v7004_v53 = vcombine.high %v131_v48, %v139_v49  ;;  %v7003_v61 = vcombine.low %v131_v48, %v139_v49  ;;  %v223_v37 = vld [vmem:[%s11124_s0 + $0x680] sm:$0xff] }
  0x47   :  { %5566 = vmatpush1.bf16.msra.mxu0 %v8774_v52  ;;  %4411 = vmatprep.subr.bf16.mxu1 %v8868_v0  ;;  %v6996_v52 = vcombine.high %v127_v46, %v135_v47  ;;  %v247_v48 = vld [vmem:[%s11124_s0 + $0x740] sm:$0xff] }
  0x48   :  { %5567 = vmatprep.subr.bf16.mxu0 %v8868_v0  ;;  %v243_v49 = vld [vmem:[%s11124_s0 + $0x720] sm:$0xff] }
  0x49   :  { %4159 = vmatmul.mubr.bf16.gmra.mrb[4].mxu1 %v6899_v55  ;;  %v8793_v55 = vld [vmem:[%s11123_s1 + $0xd8] sm:$0xff]  }
  0x4a   :  { %5315 = vmatmul.mubr.bf16.gmra.mrb[4].mxu0 %v6907_v56  ;;  %4166 = vmatprep.mubr.bf16.mxu1 %v6916_v57  ;;  %v8794_v56 = vld [vmem:[%s11123_s1 + $0x2d8] sm:$0xff]   ;;  %v151_v57 = vld [vmem:[%s11124_s0 + $0x440] sm:$0xff] }
  0x4b   :  { %5322 = vmatprep.mubr.bf16.mxu0 %v6924_v58  ;;  %4412 = vmatpush1.bf16.msra.mxu1 %v8775_v59  ;;  %v147_v58 = vld [vmem:[%s11124_s0 + $0x420] sm:$0xff]  ;;  %v7012_v62 = vcombine.high %v143_v54, %v151_v57 }
  0x4c   :  { %5568 = vmatpush1.bf16.msra.mxu0 %v8776_v60  ;;  %4413 = vmatprep.subr.bf16.mxu1 %v8868_v0  ;;  %v155_v59 = vld [vmem:[%s11124_s0 + $0x460] sm:$0xff]  ;;  %v6995_v60 = vcombine.low %v127_v46, %v135_v47  ;;  %v8800_v46 = vld [vmem:[%s11123_s1 + $0x2f0] sm:$0xff]  }
  0x4d   :  { %5569 = vmatprep.subr.bf16.mxu0 %v8868_v0  ;;  %v7020_v63 = vcombine.high %v147_v58, %v155_v59  ;;  %v239_v47 = vld [vmem:[%s11124_s0 + $0x700] sm:$0xff] }
  0x4f   :  { %4414 = vmatpush1.bf16.msra.mxu1 %v8777_v2  ;;  %v167_v2 = vld [vmem:[%s11124_s0 + $0x4c0] sm:$0xff] }
  0x50   :  { %5570 = vmatpush1.bf16.msra.mxu0 %v8778_v3  ;;  %4415 = vmatprep.subr.bf16.mxu1 %v8868_v0  ;;  %v163_v3 = vld [vmem:[%s11124_s0 + $0x4a0] sm:$0xff] }
  0x51   :  { %4167 = vmatmul.mubr.bf16.gmra.mrb[8].mxu1 %v6915_v4  ;;  %5571 = vmatprep.subr.bf16.mxu0 %v8868_v0  ;;  %v171_v4 = vld [vmem:[%s11124_s0 + $0x4e0] sm:$0xff] }
  0x52   :  { %5323 = vmatmul.mubr.bf16.gmra.mrb[8].mxu0 %v6923_v6  ;;  %4174 = vmatprep.mubr.bf16.mxu1 %v6932_v7  ;;  %v7019_v6 = vcombine.low %v147_v58, %v155_v59  ;;  %v7028_v7 = vcombine.high %v159_v1, %v167_v2  ;;  %v267_v58 = vld [vmem:[%s11124_s0 + $0x7e0] sm:$0xff]  ;;  %v7107_v59 = vcombine.low %v239_v47, %v247_v48 }
  0x53   :  { %5330 = vmatprep.mubr.bf16.mxu0 %v6940_v9  ;;  %4416 = vmatpush1.bf16.msra.mxu1 %v8779_v5  ;;  %v7011_v5 = vcombine.low %v143_v54, %v151_v57  ;;  %v175_v9 = vld [vmem:[%s11124_s0 + $0x500] sm:$0xff] }
  0x54   :  { %5572 = vmatpush1.bf16.msra.mxu0 %v8780_v8  ;;  %4417 = vmatprep.subr.bf16.mxu1 %v8868_v0  ;;  %v7036_v8 = vcombine.high %v163_v3, %v171_v4  ;;  %v7043_v23 = vcombine.low %v175_v9, %v183_v12  ;;  %v259_v57 = vld [vmem:[%s11124_s0 + $0x7a0] sm:$0xff] }
  0x55   :  { %5573 = vmatprep.subr.bf16.mxu0 %v8868_v0 }
  0x57   :  { %4418 = vmatpush1.bf16.msra.mxu1 %v8781_v14  ;;  %v187_v14 = vld [vmem:[%s11124_s0 + $0x560] sm:$0xff] }
  0x58   :  { %5574 = vmatpush1.bf16.msra.mxu0 %v8782_v15  ;;  %4419 = vmatprep.subr.bf16.mxu1 %v8868_v0  ;;  %v7027_v15 = vcombine.low %v159_v1, %v167_v2  ;;  %v7051_v24 = vcombine.low %v179_v13, %v187_v14  ;;  %v8802_v1 = vld [vmem:[%s11123_s1 + $0x2f8] sm:$0xff]   ;;  %v271_v2 = vld [vmem:[%s11124_s0 + $0x800] sm:$0xff] }
  0x59   :  { %4175 = vmatmul.mubr.bf16.gmra.mrb[12].mxu1 %v6931_v16  ;;  %5575 = vmatprep.subr.bf16.mxu0 %v8868_v0  ;;  %v7035_v16 = vcombine.low %v163_v3, %v171_v4  ;;  %v279_v3 = vld [vmem:[%s11124_s0 + $0x840] sm:$0xff] }
  0x5a   :  { %5331 = vmatmul.mubr.bf16.gmra.mrb[12].mxu0 %v6939_v18  ;;  %4182 = vmatprep.mubr.bf16.mxu1 %v6948_v19  ;;  %v7052_v18 = vcombine.high %v179_v13, %v187_v14  ;;  %v191_v19 = vld [vmem:[%s11124_s0 + $0x580] sm:$0xff]  ;;  %v7139_v14 = vcombine.low %v271_v2, %v279_v3 }
  0x5b   :  { %5338 = vmatprep.mubr.bf16.mxu0 %v6956_v21  ;;  %4420 = vmatpush1.bf16.msra.mxu1 %v8783_v17  ;;  %v7044_v17 = vcombine.high %v175_v9, %v183_v12  ;;  %v195_v21 = vld [vmem:[%s11124_s0 + $0x5a0] sm:$0xff] }
  0x5c   :  { %5576 = vmatpush1.bf16.msra.mxu0 %v8784_v20  ;;  %4421 = vmatprep.subr.bf16.mxu1 %v8868_v0  ;;  %v199_v20 = vld [vmem:[%s11124_s0 + $0x5c0] sm:$0xff]  ;;  %v7067_v34 = vcombine.low %v195_v21, %v203_v22 }
  0x5d   :  { %5577 = vmatprep.subr.bf16.mxu0 %v8868_v0  ;;  %v7060_v25 = vcombine.high %v191_v19, %v199_v20  ;;  %v275_v4 = vld [vmem:[%s11124_s0 + $0x820] sm:$0xff] }
  0x5e   :  { %v291_v12 = vld [vmem:[%s11124_s0 + $0x8a0] sm:$0xff] }
  0x5f   :  { %4422 = vmatpush1.bf16.msra.mxu1 %v8785_v26  ;;  %v7068_v26 = vcombine.high %v195_v21, %v203_v22  ;;  %v299_v13 = vld [vmem:[%s11124_s0 + $0x8e0] sm:$0xff] }
  0x60   :  { %5578 = vmatpush1.bf16.msra.mxu0 %v8786_v27  ;;  %4423 = vmatprep.subr.bf16.mxu1 %v8868_v0  ;;  %v8797_v27 = vld [vmem:[%s11123_s1 + $0xe8] sm:$0xff]   ;;  %v315_v21 = vld [vmem:[%s11124_s0 + $0x960] sm:$0xff] }
  0x61   :  { %4183 = vmatmul.mubr.bf16.gmra.mrb[16].mxu1 %v6947_v28  ;;  %5579 = vmatprep.subr.bf16.mxu0 %v8868_v0  ;;  %v8798_v28 = vld [vmem:[%s11123_s1 + $0x2e8] sm:$0xff]  }
  0x62   :  { %5339 = vmatmul.mubr.bf16.gmra.mrb[16].mxu0 %v6955_v30  ;;  %4190 = vmatprep.mubr.bf16.mxu1 %v6964_v31  ;;  %v215_v30 = vld [vmem:[%s11124_s0 + $0x640] sm:$0xff] }
  0x63   :  { %5346 = vmatprep.mubr.bf16.mxu0 %v6972_v33  ;;  %4424 = vmatpush1.bf16.msra.mxu1 %v8787_v29  ;;  %v207_v29 = vld [vmem:[%s11124_s0 + $0x600] sm:$0xff]  ;;  %v7059_v33 = vcombine.low %v191_v19, %v199_v20 }
  0x64   :  { %5580 = vmatpush1.bf16.msra.mxu0 %v8788_v32  ;;  %4425 = vmatprep.subr.bf16.mxu1 %v8868_v0  ;;  %v211_v31 = vld [vmem:[%s11124_s0 + $0x620] sm:$0xff]  ;;  %v7076_v35 = vcombine.high %v207_v29, %v215_v30 }
  0x65   :  { %5581 = vmatprep.subr.bf16.mxu0 %v8868_v0  ;;  %v219_v32 = vld [vmem:[%s11124_s0 + $0x660] sm:$0xff] }
  0x66   :  { %v7084_v36 = vcombine.high %v211_v31, %v219_v32  ;;  %v311_v19 = vld [vmem:[%s11124_s0 + $0x940] sm:$0xff] }
  0x67   :  { %4426 = vmatpush1.bf16.msra.mxu1 %v8789_v38  ;;  %v231_v38 = vld [vmem:[%s11124_s0 + $0x6c0] sm:$0xff] }
  0x68   :  { %5582 = vmatpush1.bf16.msra.mxu0 %v8790_v39  ;;  %4427 = vmatprep.subr.bf16.mxu1 %v8868_v0  ;;  %v227_v39 = vld [vmem:[%s11124_s0 + $0x6a0] sm:$0xff] }
  0x69   :  { %4191 = vmatmul.mubr.bf16.gmra.mrb[20].mxu1 %v6963_v40  ;;  %5583 = vmatprep.subr.bf16.mxu0 %v8868_v0  ;;  %v235_v40 = vld [vmem:[%s11124_s0 + $0x6e0] sm:$0xff] }
  0x6a   :  { %5347 = vmatmul.mubr.bf16.gmra.mrb[20].mxu0 %v6971_v42  ;;  %4198 = vmatprep.mubr.bf16.mxu1 %v6980_v43  ;;  %v7083_v42 = vcombine.low %v211_v31, %v219_v32  ;;  %v7092_v43 = vcombine.high %v223_v37, %v231_v38  ;;  %v307_v20 = vld [vmem:[%s11124_s0 + $0x920] sm:$0xff] }
  0x6b   :  { %5354 = vmatprep.mubr.bf16.mxu0 %v6988_v45  ;;  %4428 = vmatpush1.bf16.msra.mxu1 %v8791_v41  ;;  %v7075_v41 = vcombine.low %v207_v29, %v215_v30  ;;  %v8799_v45 = vld [vmem:[%s11123_s1 + $0xf0] sm:$0xff]   ;;  %v331_v29 = vld [vmem:[%s11124_s0 + $0x9e0] sm:$0xff]  ;;  %v7179_v31 = vcombine.low %v307_v20, %v315_v21 }
  0x6c   :  { %5584 = vmatpush1.bf16.msra.mxu0 %v8792_v44  ;;  %4429 = vmatprep.subr.bf16.mxu1 %v8868_v0  ;;  %v7100_v44 = vcombine.high %v227_v39, %v235_v40 }
  0x6d   :  { %5585 = vmatprep.subr.bf16.mxu0 %v8868_v0 }
  0x6f   :  { %4430 = vmatpush1.bf16.msra.mxu1 %v8793_v55  ;;  %v255_v55 = vld [vmem:[%s11124_s0 + $0x780] sm:$0xff] }
  0x70   :  { %5586 = vmatpush1.bf16.msra.mxu0 %v8794_v56  ;;  %4431 = vmatprep.subr.bf16.mxu1 %v8868_v0  ;;  %v263_v56 = vld [vmem:[%s11124_s0 + $0x7c0] sm:$0xff] }
  0x71   :  { %4199 = vmatmul.mubr.bf16.gmra.mrb[24].mxu1 %v6979_v50  ;;  %5587 = vmatprep.subr.bf16.mxu0 %v8868_v0  ;;  %v251_v50 = vld [vmem:[%s11124_s0 + $0x760] sm:$0xff] }
  0x72   :  { %5355 = vmatmul.mubr.bf16.gmra.mrb[24].mxu0 %v6987_v51  ;;  %4206 = vmatprep.mubr.bf16.mxu1 %v6996_v52  ;;  %v7091_v51 = vcombine.low %v223_v37, %v231_v38  ;;  %v7099_v52 = vcombine.low %v227_v39, %v235_v40  ;;  %v7116_v54 = vcombine.high %v243_v49, %v251_v50  ;;  %v347_v37 = vld [vmem:[%s11124_s0 + $0xa60] sm:$0xff] }
  0x73   :  { %5362 = vmatprep.mubr.bf16.mxu0 %v7004_v53  ;;  %4432 = vmatpush1.bf16.msra.mxu1 %v8795_v10  ;;  %v7108_v53 = vcombine.high %v239_v47, %v247_v48  ;;  %v287_v10 = vld [vmem:[%s11124_s0 + $0x880] sm:$0xff] }
  0x74   :  { %5588 = vmatpush1.bf16.msra.mxu0 %v8796_v11  ;;  %4433 = vmatprep.subr.bf16.mxu1 %v8868_v0  ;;  %v295_v11 = vld [vmem:[%s11124_s0 + $0x8c0] sm:$0xff] }
  0x75   :  { %5589 = vmatprep.subr.bf16.mxu0 %v8868_v0  ;;  %v7155_v22 = vcombine.low %v287_v10, %v295_v11 }
  0x77   :  { %4434 = vmatpush1.bf16.msra.mxu1 %v8797_v27  ;;  %v327_v27 = vld [vmem:[%s11124_s0 + $0x9c0] sm:$0xff] }
  0x78   :  { %5590 = vmatpush1.bf16.msra.mxu0 %v8798_v28  ;;  %4435 = vmatprep.subr.bf16.mxu1 %v8868_v0  ;;  %v323_v28 = vld [vmem:[%s11124_s0 + $0x9a0] sm:$0xff] }
  0x79   :  { %4207 = vmatmul.mubr.bf16.gmra.mrb[28].mxu1 %v6995_v60  ;;  %5591 = vmatprep.subr.bf16.mxu0 %v8868_v0  ;;  %v7115_v60 = vcombine.low %v243_v49, %v251_v50  ;;  %v7195_v39 = vcombine.low %v323_v28, %v331_v29  ;;  %v367_v50 = vld [vmem:[%s11124_s0 + $0xb00] sm:$0xff] }
  0x7a   :  { %5363 = vmatmul.mubr.bf16.gmra.mrb[28].mxu0 %v7003_v61  ;;  %4214 = vmatprep.mubr.bf16.mxu1 %v7012_v62  ;;  %v7124_v61 = vcombine.high %v255_v55, %v263_v56  ;;  %v7132_v62 = vcombine.high %v259_v57, %v267_v58 }
  0x7b   :  { %5370 = vmatprep.mubr.bf16.mxu0 %v7020_v63  ;;  %4436 = vmatpush1.bf16.msra.mxu1 %v8799_v45  ;;  %v8801_v63 = vld [vmem:[%s11123_s1 + $0xf8] sm:$0xff]   ;;  %v363_v45 = vld [vmem:[%s11124_s0 + $0xae0] sm:$0xff] }
  0x7c   :  { %5592 = vmatpush1.bf16.msra.mxu0 %v8800_v46  ;;  %4437 = vmatprep.subr.bf16.mxu1 %v8868_v0 }
  0x7d   :  { %5593 = vmatprep.subr.bf16.mxu0 %v8868_v0 }
  0x7f   :  { %4438 = vmatpush1.bf16.msra.mxu1 %v8801_v63 }
  0x80   :  { %5594 = vmatpush1.bf16.msra.mxu0 %v8802_v1  ;;  %4696 = vmatprep.subr.bf16.mxu1 %v8868_v0 }
  0x81   :  { %4215 = vmatmul.mubr.bf16.gmra.mrb[32].mxu1 %v7011_v5  ;;  %v283_v5 = vld [vmem:[%s11124_s0 + $0x860] sm:$0xff]  ;;  %5852 = vmatprep.subr.bf16.mxu0 %v8868_v0 }
  0x82   :  { %5371 = vmatmul.mubr.bf16.gmra.mrb[32].mxu0 %v7019_v6  ;;  %4222 = vmatprep.mubr.bf16.mxu1 %v7028_v7  ;;  %v7123_v6 = vcombine.low %v255_v55, %v263_v56  ;;  %v7131_v7 = vcombine.low %v259_v57, %v267_v58  ;;  %v7148_v9 = vcombine.high %v275_v4, %v283_v5  ;;  %v383_v58 = vld [vmem:[%s11124_s0 + $0xb80] sm:$0xff] }
  0x83   :  { %5378 = vmatprep.mubr.bf16.mxu0 %v7036_v8  ;;  %v7140_v8 = vcombine.high %v271_v2, %v279_v3  ;;  %v399_v3 = vld [vmem:[%s11124_s0 + $0xc00] sm:$0xff] }
  0x89   :  { %4223 = vmatmul.mubr.bf16.gmra.mrb[36].mxu1 %v7027_v15  ;;  %v7147_v15 = vcombine.low %v275_v4, %v283_v5  ;;  %v407_v4 = vld [vmem:[%s11124_s0 + $0xc40] sm:$0xff] }
  0x8a   :  { %5379 = vmatmul.mubr.bf16.gmra.mrb[36].mxu0 %v7035_v16  ;;  %4230 = vmatprep.mubr.bf16.mxu1 %v7044_v17  ;;  %v7156_v16 = vcombine.high %v287_v10, %v295_v11  ;;  %v7164_v17 = vcombine.high %v291_v12, %v299_v13  ;;  %v403_v5 = vld [vmem:[%s11124_s0 + $0xc20] sm:$0xff] }
  0x8b   :  { %5386 = vmatprep.mubr.bf16.mxu0 %v7052_v18  ;;  %v303_v18 = vld [vmem:[%s11124_s0 + $0x900] sm:$0xff] }
  0x8c   :  { %v7171_v30 = vcombine.low %v303_v18, %v311_v19  ;;  %v415_v11 = vld [vmem:[%s11124_s0 + $0xc80] sm:$0xff] }
  0x91   :  { %4231 = vmatmul.mubr.bf16.gmra.mrb[40].mxu1 %v7043_v23  ;;  %v7163_v23 = vcombine.low %v291_v12, %v299_v13  ;;  %v423_v12 = vld [vmem:[%s11124_s0 + $0xcc0] sm:$0xff] }
  0x92   :  { %5387 = vmatmul.mubr.bf16.gmra.mrb[40].mxu0 %v7051_v24  ;;  %4238 = vmatprep.mubr.bf16.mxu1 %v7060_v25  ;;  %v7172_v24 = vcombine.high %v303_v18, %v311_v19  ;;  %v7180_v25 = vcombine.high %v307_v20, %v315_v21  ;;  %v419_v13 = vld [vmem:[%s11124_s0 + $0xca0] sm:$0xff] }
  0x93   :  { %5394 = vmatprep.mubr.bf16.mxu0 %v7068_v26  ;;  %v319_v26 = vld [vmem:[%s11124_s0 + $0x980] sm:$0xff] }
  0x94   :  { %v7188_v32 = vcombine.high %v319_v26, %v327_v27  ;;  %v7187_v38 = vcombine.low %v319_v26, %v327_v27  ;;  %v431_v19 = vld [vmem:[%s11124_s0 + $0xd00] sm:$0xff] }
  0x95   :  { %v439_v20 = vld [vmem:[%s11124_s0 + $0xd40] sm:$0xff] }
  0x96   :  { %v435_v21 = vld [vmem:[%s11124_s0 + $0xd20] sm:$0xff] }
  0x97   :  { %v447_v27 = vld [vmem:[%s11124_s0 + $0xd80] sm:$0xff] }
  0x99   :  { %4239 = vmatmul.mubr.bf16.gmra.mrb[44].mxu1 %v7059_v33  ;;  %v7196_v33 = vcombine.high %v323_v28, %v331_v29  ;;  %v455_v28 = vld [vmem:[%s11124_s0 + $0xdc0] sm:$0xff] }
  0x9a   :  { %5395 = vmatmul.mubr.bf16.gmra.mrb[44].mxu0 %v7067_v34  ;;  %4246 = vmatprep.mubr.bf16.mxu1 %v7076_v35  ;;  %v335_v34 = vld [vmem:[%s11124_s0 + $0xa00] sm:$0xff] }
  0x9b   :  { %5402 = vmatprep.mubr.bf16.mxu0 %v7084_v36  ;;  %v343_v35 = vld [vmem:[%s11124_s0 + $0xa40] sm:$0xff] }
  0x9c   :  { %v339_v36 = vld [vmem:[%s11124_s0 + $0xa20] sm:$0xff]  ;;  %v7204_v40 = vcombine.high %v335_v34, %v343_v35  ;;  %v7203_v46 = vcombine.low %v335_v34, %v343_v35 }
  0x9d   :  { %v7211_v47 = vcombine.low %v339_v36, %v347_v37  ;;  %v451_v29 = vld [vmem:[%s11124_s0 + $0xda0] sm:$0xff] }
  0x9e   :  { %v463_v35 = vld [vmem:[%s11124_s0 + $0xe00] sm:$0xff] }
  0xa1   :  { %4247 = vmatmul.mubr.bf16.gmra.mrb[48].mxu1 %v7075_v41  ;;  %v7212_v41 = vcombine.high %v339_v36, %v347_v37  ;;  %v471_v36 = vld [vmem:[%s11124_s0 + $0xe40] sm:$0xff] }
  0xa2   :  { %5403 = vmatmul.mubr.bf16.gmra.mrb[48].mxu0 %v7083_v42  ;;  %4254 = vmatprep.mubr.bf16.mxu1 %v7092_v43  ;;  %v351_v42 = vld [vmem:[%s11124_s0 + $0xa80] sm:$0xff] }
  0xa3   :  { %5410 = vmatprep.mubr.bf16.mxu0 %v7100_v44  ;;  %v359_v43 = vld [vmem:[%s11124_s0 + $0xac0] sm:$0xff] }
  0xa4   :  { %v355_v44 = vld [vmem:[%s11124_s0 + $0xaa0] sm:$0xff]  ;;  %v7220_v48 = vcombine.high %v351_v42, %v359_v43 }
  0xa5   :  { %v7228_v49 = vcombine.high %v355_v44, %v363_v45  ;;  %v7227_v55 = vcombine.low %v355_v44, %v363_v45  ;;  %v467_v37 = vld [vmem:[%s11124_s0 + $0xe20] sm:$0xff] }
  0xa6   :  { %v487_v44 = vld [vmem:[%s11124_s0 + $0xec0] sm:$0xff] }
  0xa7   :  { %v483_v45 = vld [vmem:[%s11124_s0 + $0xea0] sm:$0xff] }
  0xa9   :  { %4255 = vmatmul.mubr.bf16.gmra.mrb[52].mxu1 %v7091_v51  ;;  %v375_v51 = vld [vmem:[%s11124_s0 + $0xb40] sm:$0xff] }
  0xaa   :  { %5411 = vmatmul.mubr.bf16.gmra.mrb[52].mxu0 %v7099_v52  ;;  %4262 = vmatprep.mubr.bf16.mxu1 %v7108_v53  ;;  %v371_v52 = vld [vmem:[%s11124_s0 + $0xb20] sm:$0xff]  ;;  %v7236_v56 = vcombine.high %v367_v50, %v375_v51 }
  0xab   :  { %5418 = vmatprep.mubr.bf16.mxu0 %v7116_v54  ;;  %v379_v53 = vld [vmem:[%s11124_s0 + $0xb60] sm:$0xff]  ;;  %v7219_v54 = vcombine.low %v351_v42, %v359_v43 }
  0xac   :  { %v7244_v57 = vcombine.high %v371_v52, %v379_v53  ;;  %v7243_v63 = vcombine.low %v371_v52, %v379_v53  ;;  %v479_v43 = vld [vmem:[%s11124_s0 + $0xe80] sm:$0xff] }
  0xad   :  { %v503_v52 = vld [vmem:[%s11124_s0 + $0xf40] sm:$0xff] }
  0xae   :  { %v499_v53 = vld [vmem:[%s11124_s0 + $0xf20] sm:$0xff] }
  0xb1   :  { %4263 = vmatmul.mubr.bf16.gmra.mrb[56].mxu1 %v7107_v59  ;;  %v391_v59 = vld [vmem:[%s11124_s0 + $0xbc0] sm:$0xff] }
  0xb2   :  { %5419 = vmatmul.mubr.bf16.gmra.mrb[56].mxu0 %v7115_v60  ;;  %4270 = vmatprep.mubr.bf16.mxu1 %v7124_v61  ;;  %v387_v60 = vld [vmem:[%s11124_s0 + $0xba0] sm:$0xff]  ;;  %v7252_v1 = vcombine.high %v383_v58, %v391_v59 }
  0xb3   :  { %5426 = vmatprep.mubr.bf16.mxu0 %v7132_v62  ;;  %v395_v61 = vld [vmem:[%s11124_s0 + $0xbe0] sm:$0xff]  ;;  %v7235_v62 = vcombine.low %v367_v50, %v375_v51 }
  0xb4   :  { %v7260_v2 = vcombine.high %v387_v60, %v395_v61  ;;  %v495_v51 = vld [vmem:[%s11124_s0 + $0xf00] sm:$0xff] }
  0xb9   :  { %4271 = vmatmul.mubr.bf16.gmra.mrb[60].mxu1 %v7123_v6  ;;  %v411_v6 = vld [vmem:[%s11124_s0 + $0xc60] sm:$0xff] }
  0xba   :  { %5427 = vmatmul.mubr.bf16.gmra.mrb[60].mxu0 %v7131_v7  ;;  %4278 = vmatprep.mubr.bf16.mxu1 %v7140_v8  ;;  %v7251_v7 = vcombine.low %v383_v58, %v391_v59  ;;  %v7259_v8 = vcombine.low %v387_v60, %v395_v61  ;;  %v7276_v10 = vcombine.high %v403_v5, %v411_v6  ;;  %v511_v59 = vld [vmem:[%s11124_s0 + $0xf80] sm:$0xff] }
  0xbb   :  { %5434 = vmatprep.mubr.bf16.mxu0 %v7148_v9  ;;  %v7268_v9 = vcombine.high %v399_v3, %v407_v4  ;;  %v519_v60 = vld [vmem:[%s11124_s0 + $0xfc0] sm:$0xff] }
  0xbc   :  { %v515_v61 = vld [vmem:[%s11124_s0 + $0xfa0] sm:$0xff] }
  0xc1   :  { %4279 = vmatmul.mubr.bf16.gmra.mrb[64].mxu1 %v7139_v14  ;;  %v427_v14 = vld [vmem:[%s11124_s0 + $0xce0] sm:$0xff] }
  0xc2   :  { %5435 = vmatmul.mubr.bf16.gmra.mrb[64].mxu0 %v7147_v15  ;;  %4286 = vmatprep.mubr.bf16.mxu1 %v7156_v16  ;;  %v7267_v15 = vcombine.low %v399_v3, %v407_v4  ;;  %v7275_v16 = vcombine.low %v403_v5, %v411_v6  ;;  %v7292_v18 = vcombine.high %v419_v13, %v427_v14  ;;  %v16_v4 = vld [vmem:[%s11124_s0 + $0x8] sm:$0xff] }
  0xc3   :  { %5442 = vmatprep.mubr.bf16.mxu0 %v7164_v17  ;;  %v7284_v17 = vcombine.high %v415_v11, %v423_v12  ;;  %v24_v5 = vld [vmem:[%s11124_s0 + $0x48] sm:$0xff] }
  0xc4   :  { %v20_v6 = vld [vmem:[%s11124_s0 + $0x28] sm:$0xff] }
  0xc9   :  { %4287 = vmatmul.mubr.bf16.gmra.mrb[68].mxu1 %v7155_v22  ;;  %v443_v22 = vld [vmem:[%s11124_s0 + $0xd60] sm:$0xff] }
  0xca   :  { %5443 = vmatmul.mubr.bf16.gmra.mrb[68].mxu0 %v7163_v23  ;;  %4294 = vmatprep.mubr.bf16.mxu1 %v7172_v24  ;;  %v7283_v23 = vcombine.low %v415_v11, %v423_v12  ;;  %v7291_v24 = vcombine.low %v419_v13, %v427_v14  ;;  %v7308_v26 = vcombine.high %v435_v21, %v443_v22  ;;  %v32_v12 = vld [vmem:[%s11124_s0 + $0x88] sm:$0xff] }
  0xcb   :  { %5450 = vmatprep.mubr.bf16.mxu0 %v7180_v25  ;;  %v7300_v25 = vcombine.high %v431_v19, %v439_v20  ;;  %v40_v13 = vld [vmem:[%s11124_s0 + $0xc8] sm:$0xff]  ;;  %v6885_v14 = vcombine.low %v16_v4, %v24_v5 }
  0xd1   :  { %4295 = vmatmul.mubr.bf16.gmra.mrb[72].mxu1 %v7171_v30  ;;  %v459_v30 = vld [vmem:[%s11124_s0 + $0xde0] sm:$0xff] }
  0xd2   :  { %5451 = vmatmul.mubr.bf16.gmra.mrb[72].mxu0 %v7179_v31  ;;  %4302 = vmatprep.mubr.bf16.mxu1 %v7188_v32  ;;  %v7299_v31 = vcombine.low %v431_v19, %v439_v20  ;;  %v7307_v32 = vcombine.low %v435_v21, %v443_v22  ;;  %v7324_v34 = vcombine.high %v451_v29, %v459_v30  ;;  %v8804_v19 = vld [vmem:[%s11123_s1 + $0x300] sm:$0xff]   ;;  %v8805_v22 = vld [vmem:[%s11123_s1 + $0x108] sm:$0xff]  }
  0xd3   :  { %5458 = vmatprep.mubr.bf16.mxu0 %v7196_v33  ;;  %v7316_v33 = vcombine.high %v447_v27, %v455_v28  ;;  %v6902_v20 = vcombine.high %v32_v12, %v40_v13 }
  0xd9   :  { %4303 = vmatmul.mubr.bf16.gmra.mrb[76].mxu1 %v7187_v38  ;;  %v475_v38 = vld [vmem:[%s11124_s0 + $0xe60] sm:$0xff] }
  0xda   :  { %5459 = vmatmul.mubr.bf16.gmra.mrb[76].mxu0 %v7195_v39  ;;  %4310 = vmatprep.mubr.bf16.mxu1 %v7204_v40  ;;  %v7315_v39 = vcombine.low %v447_v27, %v455_v28  ;;  %v7323_v40 = vcombine.low %v451_v29, %v459_v30  ;;  %v7340_v42 = vcombine.high %v467_v37, %v475_v38  ;;  %v60_v27 = vld [vmem:[%s11124_s0 + $0x168] sm:$0xff] }
  0xdb   :  { %5466 = vmatprep.mubr.bf16.mxu0 %v7212_v41  ;;  %v7332_v41 = vcombine.high %v463_v35, %v471_v36  ;;  %v6901_v28 = vcombine.low %v32_v12, %v40_v13  ;;  %v8822_v12 = vld [vmem:[%s11123_s1 + $0x348] sm:$0xff]  }
  0xe1   :  { %4311 = vmatmul.mubr.bf16.gmra.mrb[80].mxu1 %v7203_v46  ;;  %v491_v46 = vld [vmem:[%s11124_s0 + $0xee0] sm:$0xff] }
  0xe2   :  { %5467 = vmatmul.mubr.bf16.gmra.mrb[80].mxu0 %v7211_v47  ;;  %4318 = vmatprep.mubr.bf16.mxu1 %v7220_v48  ;;  %v7331_v47 = vcombine.low %v463_v35, %v471_v36  ;;  %v7339_v48 = vcombine.low %v467_v37, %v475_v38  ;;  %v7356_v50 = vcombine.high %v483_v45, %v491_v46  ;;  %v72_v35 = vld [vmem:[%s11124_s0 + $0x1c8] sm:$0xff]  ;;  %v8809_v36 = vld [vmem:[%s11123_s1 + $0x118] sm:$0xff]  }
  0xe3   :  { %5474 = vmatprep.mubr.bf16.mxu0 %v7228_v49  ;;  %v7348_v49 = vcombine.high %v479_v43, %v487_v44  ;;  %v68_v37 = vld [vmem:[%s11124_s0 + $0x1a8] sm:$0xff] }
  0xe4   :  { %v76_v38 = vld [vmem:[%s11124_s0 + $0x1e8] sm:$0xff] }
  0xe9   :  { %4319 = vmatmul.mubr.bf16.gmra.mrb[84].mxu1 %v7219_v54  ;;  %v507_v54 = vld [vmem:[%s11124_s0 + $0xf60] sm:$0xff] }
  0xea   :  { %5475 = vmatmul.mubr.bf16.gmra.mrb[84].mxu0 %v7227_v55  ;;  %4326 = vmatprep.mubr.bf16.mxu1 %v7236_v56  ;;  %v7347_v55 = vcombine.low %v479_v43, %v487_v44  ;;  %v7355_v56 = vcombine.low %v483_v45, %v491_v46  ;;  %v7372_v58 = vcombine.high %v499_v53, %v507_v54  ;;  %v8811_v44 = vld [vmem:[%s11123_s1 + $0x120] sm:$0xff]   ;;  %v80_v46 = vld [vmem:[%s11124_s0 + $0x208] sm:$0xff] }
  0xeb   :  { %5482 = vmatprep.mubr.bf16.mxu0 %v7244_v57  ;;  %v7364_v57 = vcombine.high %v495_v51, %v503_v52  ;;  %v6942_v43 = vcombine.high %v68_v37, %v76_v38  ;;  %v8812_v45 = vld [vmem:[%s11123_s1 + $0x320] sm:$0xff]  }
  0xf1   :  { %4327 = vmatmul.mubr.bf16.gmra.mrb[88].mxu1 %v7235_v62  ;;  %v523_v62 = vld [vmem:[%s11124_s0 + $0xfe0] sm:$0xff] }
  0xf2   :  { %5483 = vmatmul.mubr.bf16.gmra.mrb[88].mxu0 %v7243_v63  ;;  %4334 = vmatprep.mubr.bf16.mxu1 %v7252_v1  ;;  %v7363_v63 = vcombine.low %v495_v51, %v503_v52  ;;  %v7371_v1 = vcombine.low %v499_v53, %v507_v54  ;;  %v7388_v3 = vcombine.high %v515_v61, %v523_v62  ;;  %v8814_v51 = vld [vmem:[%s11123_s1 + $0x328] sm:$0xff]  }
  0xf3   :  { %5490 = vmatprep.mubr.bf16.mxu0 %v7260_v2  ;;  %v7380_v2 = vcombine.high %v511_v59, %v519_v60  ;;  %v6941_v53 = vcombine.low %v68_v37, %v76_v38  ;;  %v160_v37 = vld [vmem:[%s11124_s0 + $0x488] sm:$0xff] }
  0xf4   :  { %v168_v38 = vld [vmem:[%s11124_s0 + $0x4c8] sm:$0xff] }
  0xf9   :  { %4335 = vmatmul.mubr.bf16.gmra.mrb[92].mxu1 %v7251_v7  ;;  %v28_v7 = vld [vmem:[%s11124_s0 + $0x68] sm:$0xff] }
  0xfa   :  { %5491 = vmatmul.mubr.bf16.gmra.mrb[92].mxu0 %v7259_v8  ;;  %4342 = vmatprep.mubr.bf16.mxu1 %v7268_v9  ;;  %v7379_v8 = vcombine.low %v511_v59, %v519_v60  ;;  %v7387_v9 = vcombine.low %v515_v61, %v523_v62  ;;  %v6894_v11 = vcombine.high %v20_v6, %v28_v7  ;;  %v104_v59 = vld [vmem:[%s11124_s0 + $0x2c8] sm:$0xff]  ;;  %v8817_v60 = vld [vmem:[%s11123_s1 + $0x138] sm:$0xff]  }
  0xfb   :  { %5498 = vmatprep.mubr.bf16.mxu0 %v7276_v10  ;;  %v6886_v10 = vcombine.high %v16_v4, %v24_v5  ;;  %v100_v61 = vld [vmem:[%s11124_s0 + $0x2a8] sm:$0xff]  ;;  %v8819_v5 = vld [vmem:[%s11123_s1 + $0x140] sm:$0xff]  }
  0xfc   :  { %v108_v62 = vld [vmem:[%s11124_s0 + $0x2e8] sm:$0xff] }
  0xfd   :  { %v6974_v4 = vcombine.high %v100_v61, %v108_v62 }
 0x101   :  { %4343 = vmatmul.mubr.bf16.gmra.mrb[96].mxu1 %v7267_v15  ;;  %v36_v15 = vld [vmem:[%s11124_s0 + $0xa8] sm:$0xff] }
 0x102   :  { %5499 = vmatmul.mubr.bf16.gmra.mrb[96].mxu0 %v7275_v16  ;;  %4350 = vmatprep.mubr.bf16.mxu1 %v7284_v17  ;;  %v44_v16 = vld [vmem:[%s11124_s0 + $0xe8] sm:$0xff]  ;;  %v6893_v17 = vcombine.low %v20_v6, %v28_v7  ;;  %v8820_v6 = vld [vmem:[%s11123_s1 + $0x340] sm:$0xff]  }
 0x103   :  { %5506 = vmatprep.mubr.bf16.mxu0 %v7292_v18  ;;  %v8803_v18 = vld [vmem:[%s11123_s1 + $0x100] sm:$0xff]   ;;  %v6910_v21 = vcombine.high %v36_v15, %v44_v16  ;;  %v6909_v29 = vcombine.low %v36_v15, %v44_v16  ;;  %v112_v7 = vld [vmem:[%s11124_s0 + $0x308] sm:$0xff] }
 0x109   :  { %4351 = vmatmul.mubr.bf16.gmra.mrb[100].mxu1 %v7283_v23  ;;  %v48_v23 = vld [vmem:[%s11124_s0 + $0x108] sm:$0xff] }
 0x10a   :  { %5507 = vmatmul.mubr.bf16.gmra.mrb[100].mxu0 %v7291_v24  ;;  %4358 = vmatprep.mubr.bf16.mxu1 %v7300_v25  ;;  %v56_v24 = vld [vmem:[%s11124_s0 + $0x148] sm:$0xff] }
 0x10b   :  { %5514 = vmatprep.mubr.bf16.mxu0 %v7308_v26  ;;  %v8806_v25 = vld [vmem:[%s11123_s1 + $0x308] sm:$0xff]   ;;  %v6918_v30 = vcombine.high %v48_v23, %v56_v24 }
 0x10c   :  { %v52_v26 = vld [vmem:[%s11124_s0 + $0x128] sm:$0xff] }
 0x111   :  { %4359 = vmatmul.mubr.bf16.gmra.mrb[104].mxu1 %v7299_v31  ;;  %v6926_v31 = vcombine.high %v52_v26, %v60_v27 }
 0x112   :  { %5515 = vmatmul.mubr.bf16.gmra.mrb[104].mxu0 %v7307_v32  ;;  %4366 = vmatprep.mubr.bf16.mxu1 %v7316_v33  ;;  %v8807_v32 = vld [vmem:[%s11123_s1 + $0x110] sm:$0xff]  }
 0x113   :  { %5522 = vmatprep.mubr.bf16.mxu0 %v7324_v34  ;;  %v8808_v33 = vld [vmem:[%s11123_s1 + $0x310] sm:$0xff]   ;;  %v64_v34 = vld [vmem:[%s11124_s0 + $0x188] sm:$0xff] }
 0x114   :  { %v6933_v52 = vcombine.low %v64_v34, %v72_v35 }
 0x119   :  { %4367 = vmatmul.mubr.bf16.gmra.mrb[108].mxu1 %v7315_v39  ;;  %v8810_v39 = vld [vmem:[%s11123_s1 + $0x318] sm:$0xff]  }
 0x11a   :  { %5523 = vmatmul.mubr.bf16.gmra.mrb[108].mxu0 %v7323_v40  ;;  %4374 = vmatprep.mubr.bf16.mxu1 %v7332_v41  ;;  %v6917_v40 = vcombine.low %v48_v23, %v56_v24  ;;  %v6925_v41 = vcombine.low %v52_v26, %v60_v27  ;;  %v8825_v27 = vld [vmem:[%s11123_s1 + $0x158] sm:$0xff]  }
 0x11b   :  { %5530 = vmatprep.mubr.bf16.mxu0 %v7340_v42  ;;  %v6934_v42 = vcombine.high %v64_v34, %v72_v35 }
 0x121   :  { %4375 = vmatmul.mubr.bf16.gmra.mrb[112].mxu1 %v7331_v47  ;;  %v88_v47 = vld [vmem:[%s11124_s0 + $0x248] sm:$0xff] }
 0x122   :  { %5531 = vmatmul.mubr.bf16.gmra.mrb[112].mxu0 %v7339_v48  ;;  %4382 = vmatprep.mubr.bf16.mxu1 %v7348_v49  ;;  %v8813_v48 = vld [vmem:[%s11123_s1 + $0x128] sm:$0xff]   ;;  %v6950_v54 = vcombine.high %v80_v46, %v88_v47 }
 0x123   :  { %5538 = vmatprep.mubr.bf16.mxu0 %v7356_v50  ;;  %v84_v49 = vld [vmem:[%s11124_s0 + $0x228] sm:$0xff] }
 0x124   :  { %v92_v50 = vld [vmem:[%s11124_s0 + $0x268] sm:$0xff] }
 0x129   :  { %4383 = vmatmul.mubr.bf16.gmra.mrb[116].mxu1 %v7347_v55  ;;  %v6958_v55 = vcombine.high %v84_v49, %v92_v50 }
 0x12a   :  { %5539 = vmatmul.mubr.bf16.gmra.mrb[116].mxu0 %v7355_v56  ;;  %4390 = vmatprep.mubr.bf16.mxu1 %v7364_v57  ;;  %v8815_v56 = vld [vmem:[%s11123_s1 + $0x130] sm:$0xff]  }
 0x12b   :  { %5546 = vmatprep.mubr.bf16.mxu0 %v7372_v58  ;;  %v8816_v57 = vld [vmem:[%s11123_s1 + $0x330] sm:$0xff]   ;;  %v96_v58 = vld [vmem:[%s11124_s0 + $0x288] sm:$0xff] }
 0x12c   :  { %v6965_v13 = vcombine.low %v96_v58, %v104_v59 }
 0x131   :  { %4391 = vmatmul.mubr.bf16.gmra.mrb[120].mxu1 %v7363_v63  ;;  %v8818_v63 = vld [vmem:[%s11123_s1 + $0x338] sm:$0xff]  }
 0x132   :  { %5547 = vmatmul.mubr.bf16.gmra.mrb[120].mxu0 %v7371_v1  ;;  %4398 = vmatprep.mubr.bf16.mxu1 %v7380_v2  ;;  %v6949_v1 = vcombine.low %v80_v46, %v88_v47  ;;  %v6957_v2 = vcombine.low %v84_v49, %v92_v50  ;;  %v8828_v46 = vld [vmem:[%s11123_s1 + $0x360] sm:$0xff]   ;;  %v176_v47 = vld [vmem:[%s11124_s0 + $0x508] sm:$0xff] }
 0x133   :  { %5554 = vmatprep.mubr.bf16.mxu0 %v7388_v3  ;;  %v6966_v3 = vcombine.high %v96_v58, %v104_v59  ;;  %v180_v49 = vld [vmem:[%s11124_s0 + $0x528] sm:$0xff] }
 0x134   :  { %v188_v50 = vld [vmem:[%s11124_s0 + $0x568] sm:$0xff] }
 0x135   :  { %v204_v58 = vld [vmem:[%s11124_s0 + $0x5e8] sm:$0xff] }
 0x139   :  { %4399 = vmatmul.mubr.bf16.gmra.mrb[124].mxu1 %v7379_v8  ;;  %v120_v8 = vld [vmem:[%s11124_s0 + $0x348] sm:$0xff] }
 0x13a   :  { %5555 = vmatmul.mubr.bf16.gmra.mrb[124].mxu0 %v7387_v9  ;;  %4439 = vmatprep.mubr.bf16.mxu1 %v6886_v10  ;;  %v8821_v9 = vld [vmem:[%s11123_s1 + $0x148] sm:$0xff]   ;;  %v6982_v15 = vcombine.high %v112_v7, %v120_v8  ;;  %v6981_v23 = vcombine.low %v112_v7, %v120_v8 }
 0x13b   :  { %5595 = vmatprep.mubr.bf16.mxu0 %v6894_v11  ;;  %v116_v10 = vld [vmem:[%s11124_s0 + $0x328] sm:$0xff] }
 0x13c   :  { %v124_v11 = vld [vmem:[%s11124_s0 + $0x368] sm:$0xff] }
 0x13d   :  { %v6990_v16 = vcombine.high %v116_v10, %v124_v11  ;;  %v6989_v24 = vcombine.low %v116_v10, %v124_v11  ;;  %v224_v10 = vld [vmem:[%s11124_s0 + $0x688] sm:$0xff] }
 0x13e   :  { %v232_v11 = vld [vmem:[%s11124_s0 + $0x6c8] sm:$0xff] }
 0x141   :  { %4440 = vmatmul.mubr.bf16.vlgmr.msra.gmra.mrb[0].mxu1 %v6885_v14  ;;  %v6973_v14 = vcombine.low %v100_v61, %v108_v62 }
 0x142   :  { %5596 = vmatmul.mubr.bf16.vlgmr.msra.gmra.mrb[0].mxu0 %v6893_v17  ;;  %4697 = vmatpush1.bf16.msra.mxu1 %v8803_v18  ;;  %v8823_v17 = vld [vmem:[%s11123_s1 + $0x150] sm:$0xff]  }
 0x143   :  { %5853 = vmatpush1.bf16.msra.mxu0 %v8804_v19  ;;  %4447 = vmatprep.mubr.bf16.mxu1 %v6902_v20  ;;  %v8824_v18 = vld [vmem:[%s11123_s1 + $0x350] sm:$0xff]   ;;  %v128_v19 = vld [vmem:[%s11124_s0 + $0x388] sm:$0xff] }
 0x144   :  { %5603 = vmatprep.mubr.bf16.mxu0 %v6910_v21  ;;  %4698 = vmatprep.subr.bf16.mxu1 %v8868_v0  ;;  %v136_v20 = vld [vmem:[%s11124_s0 + $0x3c8] sm:$0xff] }
 0x145   :  { %5854 = vmatprep.subr.bf16.mxu0 %v8868_v0  ;;  %v132_v21 = vld [vmem:[%s11124_s0 + $0x3a8] sm:$0xff] }
 0x146   :  { %4699 = vmatpush1.bf16.msra.mxu1 %v8805_v22  ;;  %v140_v22 = vld [vmem:[%s11124_s0 + $0x3e8] sm:$0xff] }
 0x147   :  { %5855 = vmatpush1.bf16.msra.mxu0 %v8806_v25  ;;  %4700 = vmatprep.subr.bf16.mxu1 %v8868_v0  ;;  %v6998_v25 = vcombine.high %v128_v19, %v136_v20  ;;  %v7006_v26 = vcombine.high %v132_v21, %v140_v22  ;;  %v7005_v34 = vcombine.low %v132_v21, %v140_v22  ;;  %v248_v21 = vld [vmem:[%s11124_s0 + $0x748] sm:$0xff] }
 0x148   :  { %5856 = vmatprep.subr.bf16.mxu0 %v8868_v0  ;;  %v244_v22 = vld [vmem:[%s11124_s0 + $0x728] sm:$0xff] }
 0x149   :  { %4448 = vmatmul.mubr.bf16.gmra.mrb[4].mxu1 %v6901_v28  ;;  %v8826_v28 = vld [vmem:[%s11123_s1 + $0x358] sm:$0xff]  }
 0x14a   :  { %5604 = vmatmul.mubr.bf16.gmra.mrb[4].mxu0 %v6909_v29  ;;  %4455 = vmatprep.mubr.bf16.mxu1 %v6918_v30  ;;  %v144_v29 = vld [vmem:[%s11124_s0 + $0x408] sm:$0xff] }
 0x14b   :  { %5611 = vmatprep.mubr.bf16.mxu0 %v6926_v31  ;;  %4701 = vmatpush1.bf16.msra.mxu1 %v8807_v32  ;;  %v152_v30 = vld [vmem:[%s11124_s0 + $0x448] sm:$0xff] }
 0x14c   :  { %5857 = vmatpush1.bf16.msra.mxu0 %v8808_v33  ;;  %4702 = vmatprep.subr.bf16.mxu1 %v8868_v0  ;;  %v148_v31 = vld [vmem:[%s11124_s0 + $0x428] sm:$0xff]  ;;  %v6997_v33 = vcombine.low %v128_v19, %v136_v20  ;;  %v7014_v35 = vcombine.high %v144_v29, %v152_v30  ;;  %v8832_v19 = vld [vmem:[%s11123_s1 + $0x370] sm:$0xff]  }
 0x14d   :  { %5858 = vmatprep.subr.bf16.mxu0 %v8868_v0  ;;  %v156_v32 = vld [vmem:[%s11124_s0 + $0x468] sm:$0xff] }
 0x14e   :  { %v240_v20 = vld [vmem:[%s11124_s0 + $0x708] sm:$0xff] }
 0x14f   :  { %4703 = vmatpush1.bf16.msra.mxu1 %v8809_v36  ;;  %v7022_v36 = vcombine.high %v148_v31, %v156_v32 }
 0x150   :  { %5859 = vmatpush1.bf16.msra.mxu0 %v8810_v39  ;;  %4704 = vmatprep.subr.bf16.mxu1 %v8868_v0  ;;  %v164_v39 = vld [vmem:[%s11124_s0 + $0x4a8] sm:$0xff] }
 0x151   :  { %4456 = vmatmul.mubr.bf16.gmra.mrb[8].mxu1 %v6917_v40  ;;  %5860 = vmatprep.subr.bf16.mxu0 %v8868_v0  ;;  %v172_v40 = vld [vmem:[%s11124_s0 + $0x4e8] sm:$0xff] }
 0x152   :  { %5612 = vmatmul.mubr.bf16.gmra.mrb[8].mxu0 %v6925_v41  ;;  %4463 = vmatprep.mubr.bf16.mxu1 %v6934_v42  ;;  %v7013_v41 = vcombine.low %v144_v29, %v152_v30  ;;  %v7021_v42 = vcombine.low %v148_v31, %v156_v32  ;;  %v264_v29 = vld [vmem:[%s11124_s0 + $0x7c8] sm:$0xff]  ;;  %v7109_v32 = vcombine.low %v240_v20, %v248_v21 }
 0x153   :  { %5619 = vmatprep.mubr.bf16.mxu0 %v6942_v43  ;;  %4705 = vmatpush1.bf16.msra.mxu1 %v8811_v44  ;;  %v7030_v43 = vcombine.high %v160_v37, %v168_v38  ;;  %v7038_v44 = vcombine.high %v164_v39, %v172_v40  ;;  %v260_v30 = vld [vmem:[%s11124_s0 + $0x7a8] sm:$0xff] }
 0x154   :  { %5861 = vmatpush1.bf16.msra.mxu0 %v8812_v45  ;;  %4706 = vmatprep.subr.bf16.mxu1 %v8868_v0  ;;  %v8827_v45 = vld [vmem:[%s11123_s1 + $0x160] sm:$0xff]   ;;  %v268_v31 = vld [vmem:[%s11124_s0 + $0x7e8] sm:$0xff] }
 0x155   :  { %5862 = vmatprep.subr.bf16.mxu0 %v8868_v0 }
 0x157   :  { %4707 = vmatpush1.bf16.msra.mxu1 %v8813_v48  ;;  %v184_v48 = vld [vmem:[%s11124_s0 + $0x548] sm:$0xff] }
 0x158   :  { %5863 = vmatpush1.bf16.msra.mxu0 %v8814_v51  ;;  %4708 = vmatprep.subr.bf16.mxu1 %v8868_v0  ;;  %v7029_v51 = vcombine.low %v160_v37, %v168_v38  ;;  %v7045_v59 = vcombine.low %v176_v47, %v184_v48  ;;  %v8834_v37 = vld [vmem:[%s11123_s1 + $0x378] sm:$0xff]   ;;  %v272_v38 = vld [vmem:[%s11124_s0 + $0x808] sm:$0xff] }
 0x159   :  { %4464 = vmatmul.mubr.bf16.gmra.mrb[12].mxu1 %v6933_v52  ;;  %5864 = vmatprep.subr.bf16.mxu0 %v8868_v0  ;;  %v7037_v52 = vcombine.low %v164_v39, %v172_v40  ;;  %v280_v39 = vld [vmem:[%s11124_s0 + $0x848] sm:$0xff] }
 0x15a   :  { %5620 = vmatmul.mubr.bf16.gmra.mrb[12].mxu0 %v6941_v53  ;;  %4471 = vmatprep.mubr.bf16.mxu1 %v6950_v54  ;;  %v7046_v53 = vcombine.high %v176_v47, %v184_v48  ;;  %v7054_v54 = vcombine.high %v180_v49, %v188_v50  ;;  %v276_v40 = vld [vmem:[%s11124_s0 + $0x828] sm:$0xff] }
 0x15b   :  { %5627 = vmatprep.mubr.bf16.mxu0 %v6958_v55  ;;  %4709 = vmatpush1.bf16.msra.mxu1 %v8815_v56  ;;  %v192_v55 = vld [vmem:[%s11124_s0 + $0x588] sm:$0xff] }
 0x15c   :  { %5865 = vmatpush1.bf16.msra.mxu0 %v8816_v57  ;;  %4710 = vmatprep.subr.bf16.mxu1 %v8868_v0  ;;  %v200_v56 = vld [vmem:[%s11124_s0 + $0x5c8] sm:$0xff] }
 0x15d   :  { %5866 = vmatprep.subr.bf16.mxu0 %v8868_v0  ;;  %v196_v57 = vld [vmem:[%s11124_s0 + $0x5a8] sm:$0xff]  ;;  %v7062_v61 = vcombine.high %v192_v55, %v200_v56 }
 0x15e   :  { %v7070_v62 = vcombine.high %v196_v57, %v204_v58  ;;  %v7069_v7 = vcombine.low %v196_v57, %v204_v58  ;;  %v296_v47 = vld [vmem:[%s11124_s0 + $0x8c8] sm:$0xff] }
 0x15f   :  { %4711 = vmatpush1.bf16.msra.mxu1 %v8817_v60  ;;  %v7053_v60 = vcombine.low %v180_v49, %v188_v50  ;;  %v292_v48 = vld [vmem:[%s11124_s0 + $0x8a8] sm:$0xff]  ;;  %v7141_v50 = vcombine.low %v272_v38, %v280_v39 }
 0x160   :  { %5867 = vmatpush1.bf16.msra.mxu0 %v8818_v63  ;;  %4712 = vmatprep.subr.bf16.mxu1 %v8868_v0  ;;  %v8829_v63 = vld [vmem:[%s11123_s1 + $0x168] sm:$0xff]  }
 0x161   :  { %4472 = vmatmul.mubr.bf16.gmra.mrb[16].mxu1 %v6949_v1  ;;  %5868 = vmatprep.subr.bf16.mxu0 %v8868_v0  ;;  %v8830_v1 = vld [vmem:[%s11123_s1 + $0x368] sm:$0xff]  }
 0x162   :  { %5628 = vmatmul.mubr.bf16.gmra.mrb[16].mxu0 %v6957_v2  ;;  %4479 = vmatprep.mubr.bf16.mxu1 %v6966_v3  ;;  %v208_v2 = vld [vmem:[%s11124_s0 + $0x608] sm:$0xff] }
 0x163   :  { %5635 = vmatprep.mubr.bf16.mxu0 %v6974_v4  ;;  %4713 = vmatpush1.bf16.msra.mxu1 %v8819_v5  ;;  %v216_v3 = vld [vmem:[%s11124_s0 + $0x648] sm:$0xff] }
 0x164   :  { %5869 = vmatpush1.bf16.msra.mxu0 %v8820_v6  ;;  %4714 = vmatprep.subr.bf16.mxu1 %v8868_v0  ;;  %v212_v4 = vld [vmem:[%s11124_s0 + $0x628] sm:$0xff]  ;;  %v7061_v6 = vcombine.low %v192_v55, %v200_v56  ;;  %v7078_v8 = vcombine.high %v208_v2, %v216_v3 }
 0x165   :  { %5870 = vmatprep.subr.bf16.mxu0 %v8868_v0  ;;  %v220_v5 = vld [vmem:[%s11124_s0 + $0x668] sm:$0xff] }
 0x166   :  { %v300_v49 = vld [vmem:[%s11124_s0 + $0x8e8] sm:$0xff] }
 0x167   :  { %4715 = vmatpush1.bf16.msra.mxu1 %v8821_v9  ;;  %v7086_v9 = vcombine.high %v212_v4, %v220_v5  ;;  %v312_v55 = vld [vmem:[%s11124_s0 + $0x948] sm:$0xff] }
 0x168   :  { %5871 = vmatpush1.bf16.msra.mxu0 %v8822_v12  ;;  %4716 = vmatprep.subr.bf16.mxu1 %v8868_v0  ;;  %v228_v12 = vld [vmem:[%s11124_s0 + $0x6a8] sm:$0xff] }
 0x169   :  { %4480 = vmatmul.mubr.bf16.gmra.mrb[20].mxu1 %v6965_v13  ;;  %5872 = vmatprep.subr.bf16.mxu0 %v8868_v0  ;;  %v236_v13 = vld [vmem:[%s11124_s0 + $0x6e8] sm:$0xff] }
 0x16a   :  { %5636 = vmatmul.mubr.bf16.gmra.mrb[20].mxu0 %v6973_v14  ;;  %4487 = vmatprep.mubr.bf16.mxu1 %v6982_v15  ;;  %v7077_v14 = vcombine.low %v208_v2, %v216_v3  ;;  %v7085_v15 = vcombine.low %v212_v4, %v220_v5  ;;  %v308_v56 = vld [vmem:[%s11124_s0 + $0x928] sm:$0xff] }
 0x16b   :  { %5643 = vmatprep.mubr.bf16.mxu0 %v6990_v16  ;;  %4717 = vmatpush1.bf16.msra.mxu1 %v8823_v17  ;;  %v7094_v16 = vcombine.high %v224_v10, %v232_v11  ;;  %v7102_v17 = vcombine.high %v228_v12, %v236_v13  ;;  %v316_v57 = vld [vmem:[%s11124_s0 + $0x968] sm:$0xff] }
 0x16c   :  { %5873 = vmatpush1.bf16.msra.mxu0 %v8824_v18  ;;  %4718 = vmatprep.subr.bf16.mxu1 %v8868_v0  ;;  %v8831_v18 = vld [vmem:[%s11123_s1 + $0x170] sm:$0xff]   ;;  %v332_v2 = vld [vmem:[%s11124_s0 + $0x9e8] sm:$0xff]  ;;  %v7181_v4 = vcombine.low %v308_v56, %v316_v57 }
 0x16d   :  { %5874 = vmatprep.subr.bf16.mxu0 %v8868_v0 }
 0x16f   :  { %4719 = vmatpush1.bf16.msra.mxu1 %v8825_v27 }
 0x170   :  { %5875 = vmatpush1.bf16.msra.mxu0 %v8826_v28  ;;  %4720 = vmatprep.subr.bf16.mxu1 %v8868_v0  ;;  %v256_v28 = vld [vmem:[%s11124_s0 + $0x788] sm:$0xff] }
 0x171   :  { %4488 = vmatmul.mubr.bf16.gmra.mrb[24].mxu1 %v6981_v23  ;;  %5876 = vmatprep.subr.bf16.mxu0 %v8868_v0  ;;  %v252_v23 = vld [vmem:[%s11124_s0 + $0x768] sm:$0xff] }
 0x172   :  { %5644 = vmatmul.mubr.bf16.gmra.mrb[24].mxu0 %v6989_v24  ;;  %4495 = vmatprep.mubr.bf16.mxu1 %v6998_v25  ;;  %v7093_v24 = vcombine.low %v224_v10, %v232_v11  ;;  %v7101_v25 = vcombine.low %v228_v12, %v236_v13  ;;  %v7118_v27 = vcombine.high %v244_v22, %v252_v23  ;;  %v348_v10 = vld [vmem:[%s11124_s0 + $0xa68] sm:$0xff] }
 0x173   :  { %5651 = vmatprep.mubr.bf16.mxu0 %v7006_v26  ;;  %4721 = vmatpush1.bf16.msra.mxu1 %v8827_v45  ;;  %v7110_v26 = vcombine.high %v240_v20, %v248_v21 }
 0x174   :  { %5877 = vmatpush1.bf16.msra.mxu0 %v8828_v46  ;;  %4722 = vmatprep.subr.bf16.mxu1 %v8868_v0  ;;  %v288_v46 = vld [vmem:[%s11124_s0 + $0x888] sm:$0xff] }
 0x175   :  { %5878 = vmatprep.subr.bf16.mxu0 %v8868_v0  ;;  %v7157_v58 = vcombine.low %v288_v46, %v296_v47 }
 0x177   :  { %4723 = vmatpush1.bf16.msra.mxu1 %v8829_v63  ;;  %v328_v63 = vld [vmem:[%s11124_s0 + $0x9c8] sm:$0xff] }
 0x178   :  { %5879 = vmatpush1.bf16.msra.mxu0 %v8830_v1  ;;  %4724 = vmatprep.subr.bf16.mxu1 %v8868_v0  ;;  %v324_v1 = vld [vmem:[%s11124_s0 + $0x9a8] sm:$0xff] }
 0x179   :  { %4496 = vmatmul.mubr.bf16.gmra.mrb[28].mxu1 %v6997_v33  ;;  %5880 = vmatprep.subr.bf16.mxu0 %v8868_v0  ;;  %v7117_v33 = vcombine.low %v244_v22, %v252_v23  ;;  %v7197_v12 = vcombine.low %v324_v1, %v332_v2  ;;  %v368_v23 = vld [vmem:[%s11124_s0 + $0xb08] sm:$0xff] }
 0x17a   :  { %5652 = vmatmul.mubr.bf16.gmra.mrb[28].mxu0 %v7005_v34  ;;  %4503 = vmatprep.mubr.bf16.mxu1 %v7014_v35  ;;  %v7126_v34 = vcombine.high %v256_v28, %v264_v29  ;;  %v7134_v35 = vcombine.high %v260_v30, %v268_v31 }
 0x17b   :  { %5659 = vmatprep.mubr.bf16.mxu0 %v7022_v36  ;;  %4725 = vmatpush1.bf16.msra.mxu1 %v8831_v18  ;;  %v8833_v36 = vld [vmem:[%s11123_s1 + $0x178] sm:$0xff]   ;;  %v364_v18 = vld [vmem:[%s11124_s0 + $0xae8] sm:$0xff] }
 0x17c   :  { %5881 = vmatpush1.bf16.msra.mxu0 %v8832_v19  ;;  %4726 = vmatprep.subr.bf16.mxu1 %v8868_v0 }
 0x17d   :  { %5882 = vmatprep.subr.bf16.mxu0 %v8868_v0 }
 0x17f   :  { %4727 = vmatpush1.bf16.msra.mxu1 %v8833_v36 }
 0x180   :  { %5883 = vmatpush1.bf16.msra.mxu0 %v8834_v37  ;;  %4985 = vmatprep.subr.bf16.mxu1 %v8868_v0 }
 0x181   :  { %4504 = vmatmul.mubr.bf16.gmra.mrb[32].mxu1 %v7013_v41  ;;  %v284_v41 = vld [vmem:[%s11124_s0 + $0x868] sm:$0xff]  ;;  %6141 = vmatprep.subr.bf16.mxu0 %v8868_v0 }
 0x182   :  { %5660 = vmatmul.mubr.bf16.gmra.mrb[32].mxu0 %v7021_v42  ;;  %4511 = vmatprep.mubr.bf16.mxu1 %v7030_v43  ;;  %v7125_v42 = vcombine.low %v256_v28, %v264_v29  ;;  %v7133_v43 = vcombine.low %v260_v30, %v268_v31  ;;  %v7150_v45 = vcombine.high %v276_v40, %v284_v41  ;;  %v384_v31 = vld [vmem:[%s11124_s0 + $0xb88] sm:$0xff] }
 0x183   :  { %5667 = vmatprep.mubr.bf16.mxu0 %v7038_v44  ;;  %v7142_v44 = vcombine.high %v272_v38, %v280_v39  ;;  %v400_v39 = vld [vmem:[%s11124_s0 + $0xc08] sm:$0xff] }
 0x189   :  { %4512 = vmatmul.mubr.bf16.gmra.mrb[36].mxu1 %v7029_v51  ;;  %v7149_v51 = vcombine.low %v276_v40, %v284_v41  ;;  %v408_v40 = vld [vmem:[%s11124_s0 + $0xc48] sm:$0xff] }
 0x18a   :  { %5668 = vmatmul.mubr.bf16.gmra.mrb[36].mxu0 %v7037_v52  ;;  %4519 = vmatprep.mubr.bf16.mxu1 %v7046_v53  ;;  %v7158_v52 = vcombine.high %v288_v46, %v296_v47  ;;  %v7166_v53 = vcombine.high %v292_v48, %v300_v49  ;;  %v404_v41 = vld [vmem:[%s11124_s0 + $0xc28] sm:$0xff] }
 0x18b   :  { %5675 = vmatprep.mubr.bf16.mxu0 %v7054_v54  ;;  %v304_v54 = vld [vmem:[%s11124_s0 + $0x908] sm:$0xff] }
 0x18c   :  { %v7173_v3 = vcombine.low %v304_v54, %v312_v55  ;;  %v416_v47 = vld [vmem:[%s11124_s0 + $0xc88] sm:$0xff] }
 0x191   :  { %4520 = vmatmul.mubr.bf16.gmra.mrb[40].mxu1 %v7045_v59  ;;  %v7165_v59 = vcombine.low %v292_v48, %v300_v49  ;;  %v424_v48 = vld [vmem:[%s11124_s0 + $0xcc8] sm:$0xff] }
 0x192   :  { %5676 = vmatmul.mubr.bf16.gmra.mrb[40].mxu0 %v7053_v60  ;;  %4527 = vmatprep.mubr.bf16.mxu1 %v7062_v61  ;;  %v7174_v60 = vcombine.high %v304_v54, %v312_v55  ;;  %v7182_v61 = vcombine.high %v308_v56, %v316_v57  ;;  %v420_v49 = vld [vmem:[%s11124_s0 + $0xca8] sm:$0xff] }
 0x193   :  { %5683 = vmatprep.mubr.bf16.mxu0 %v7070_v62  ;;  %v320_v62 = vld [vmem:[%s11124_s0 + $0x988] sm:$0xff] }
 0x194   :  { %v7190_v5 = vcombine.high %v320_v62, %v328_v63  ;;  %v7189_v11 = vcombine.low %v320_v62, %v328_v63  ;;  %v432_v55 = vld [vmem:[%s11124_s0 + $0xd08] sm:$0xff] }
 0x195   :  { %v440_v56 = vld [vmem:[%s11124_s0 + $0xd48] sm:$0xff] }
 0x196   :  { %v436_v57 = vld [vmem:[%s11124_s0 + $0xd28] sm:$0xff] }
 0x197   :  { %v448_v63 = vld [vmem:[%s11124_s0 + $0xd88] sm:$0xff] }
 0x199   :  { %4528 = vmatmul.mubr.bf16.gmra.mrb[44].mxu1 %v7061_v6  ;;  %v7198_v6 = vcombine.high %v324_v1, %v332_v2  ;;  %v456_v1 = vld [vmem:[%s11124_s0 + $0xdc8] sm:$0xff] }
 0x19a   :  { %5684 = vmatmul.mubr.bf16.gmra.mrb[44].mxu0 %v7069_v7  ;;  %4535 = vmatprep.mubr.bf16.mxu1 %v7078_v8  ;;  %v336_v7 = vld [vmem:[%s11124_s0 + $0xa08] sm:$0xff] }
 0x19b   :  { %5691 = vmatprep.mubr.bf16.mxu0 %v7086_v9  ;;  %v344_v8 = vld [vmem:[%s11124_s0 + $0xa48] sm:$0xff] }
 0x19c   :  { %v340_v9 = vld [vmem:[%s11124_s0 + $0xa28] sm:$0xff]  ;;  %v7206_v13 = vcombine.high %v336_v7, %v344_v8  ;;  %v7205_v19 = vcombine.low %v336_v7, %v344_v8 }
 0x19d   :  { %v7213_v20 = vcombine.low %v340_v9, %v348_v10  ;;  %v452_v2 = vld [vmem:[%s11124_s0 + $0xda8] sm:$0xff] }
 0x19e   :  { %v464_v8 = vld [vmem:[%s11124_s0 + $0xe08] sm:$0xff] }
 0x1a1   :  { %4536 = vmatmul.mubr.bf16.gmra.mrb[48].mxu1 %v7077_v14  ;;  %v7214_v14 = vcombine.high %v340_v9, %v348_v10  ;;  %v472_v9 = vld [vmem:[%s11124_s0 + $0xe48] sm:$0xff] }
 0x1a2   :  { %5692 = vmatmul.mubr.bf16.gmra.mrb[48].mxu0 %v7085_v15  ;;  %4543 = vmatprep.mubr.bf16.mxu1 %v7094_v16  ;;  %v352_v15 = vld [vmem:[%s11124_s0 + $0xa88] sm:$0xff] }
 0x1a3   :  { %5699 = vmatprep.mubr.bf16.mxu0 %v7102_v17  ;;  %v360_v16 = vld [vmem:[%s11124_s0 + $0xac8] sm:$0xff] }
 0x1a4   :  { %v356_v17 = vld [vmem:[%s11124_s0 + $0xaa8] sm:$0xff]  ;;  %v7222_v21 = vcombine.high %v352_v15, %v360_v16 }
 0x1a5   :  { %v7230_v22 = vcombine.high %v356_v17, %v364_v18  ;;  %v7229_v28 = vcombine.low %v356_v17, %v364_v18  ;;  %v468_v10 = vld [vmem:[%s11124_s0 + $0xe28] sm:$0xff] }
 0x1a6   :  { %v488_v17 = vld [vmem:[%s11124_s0 + $0xec8] sm:$0xff] }
 0x1a7   :  { %v484_v18 = vld [vmem:[%s11124_s0 + $0xea8] sm:$0xff] }
 0x1a9   :  { %4544 = vmatmul.mubr.bf16.gmra.mrb[52].mxu1 %v7093_v24  ;;  %v376_v24 = vld [vmem:[%s11124_s0 + $0xb48] sm:$0xff] }
 0x1aa   :  { %5700 = vmatmul.mubr.bf16.gmra.mrb[52].mxu0 %v7101_v25  ;;  %4551 = vmatprep.mubr.bf16.mxu1 %v7110_v26  ;;  %v372_v25 = vld [vmem:[%s11124_s0 + $0xb28] sm:$0xff]  ;;  %v7238_v29 = vcombine.high %v368_v23, %v376_v24 }
 0x1ab   :  { %5707 = vmatprep.mubr.bf16.mxu0 %v7118_v27  ;;  %v380_v26 = vld [vmem:[%s11124_s0 + $0xb68] sm:$0xff]  ;;  %v7221_v27 = vcombine.low %v352_v15, %v360_v16 }
 0x1ac   :  { %v7246_v30 = vcombine.high %v372_v25, %v380_v26  ;;  %v7245_v36 = vcombine.low %v372_v25, %v380_v26  ;;  %v480_v16 = vld [vmem:[%s11124_s0 + $0xe88] sm:$0xff] }
 0x1ad   :  { %v504_v25 = vld [vmem:[%s11124_s0 + $0xf48] sm:$0xff] }
 0x1ae   :  { %v500_v26 = vld [vmem:[%s11124_s0 + $0xf28] sm:$0xff] }
 0x1b1   :  { %4552 = vmatmul.mubr.bf16.gmra.mrb[56].mxu1 %v7109_v32  ;;  %v392_v32 = vld [vmem:[%s11124_s0 + $0xbc8] sm:$0xff] }
 0x1b2   :  { %5708 = vmatmul.mubr.bf16.gmra.mrb[56].mxu0 %v7117_v33  ;;  %4559 = vmatprep.mubr.bf16.mxu1 %v7126_v34  ;;  %v388_v33 = vld [vmem:[%s11124_s0 + $0xba8] sm:$0xff]  ;;  %v7254_v37 = vcombine.high %v384_v31, %v392_v32 }
 0x1b3   :  { %5715 = vmatprep.mubr.bf16.mxu0 %v7134_v35  ;;  %v396_v34 = vld [vmem:[%s11124_s0 + $0xbe8] sm:$0xff]  ;;  %v7237_v35 = vcombine.low %v368_v23, %v376_v24 }
 0x1b4   :  { %v7262_v38 = vcombine.high %v388_v33, %v396_v34  ;;  %v496_v24 = vld [vmem:[%s11124_s0 + $0xf08] sm:$0xff] }
 0x1b9   :  { %4560 = vmatmul.mubr.bf16.gmra.mrb[60].mxu1 %v7125_v42  ;;  %v412_v42 = vld [vmem:[%s11124_s0 + $0xc68] sm:$0xff] }
 0x1ba   :  { %5716 = vmatmul.mubr.bf16.gmra.mrb[60].mxu0 %v7133_v43  ;;  %4567 = vmatprep.mubr.bf16.mxu1 %v7142_v44  ;;  %v7253_v43 = vcombine.low %v384_v31, %v392_v32  ;;  %v7261_v44 = vcombine.low %v388_v33, %v396_v34  ;;  %v7278_v46 = vcombine.high %v404_v41, %v412_v42  ;;  %v512_v32 = vld [vmem:[%s11124_s0 + $0xf88] sm:$0xff] }
 0x1bb   :  { %5723 = vmatprep.mubr.bf16.mxu0 %v7150_v45  ;;  %v7270_v45 = vcombine.high %v400_v39, %v408_v40  ;;  %v520_v33 = vld [vmem:[%s11124_s0 + $0xfc8] sm:$0xff] }
 0x1bc   :  { %v516_v34 = vld [vmem:[%s11124_s0 + $0xfa8] sm:$0xff] }
 0x1c1   :  { %4568 = vmatmul.mubr.bf16.gmra.mrb[64].mxu1 %v7141_v50  ;;  %v428_v50 = vld [vmem:[%s11124_s0 + $0xce8] sm:$0xff] }
 0x1c2   :  { %5724 = vmatmul.mubr.bf16.gmra.mrb[64].mxu0 %v7149_v51  ;;  %4575 = vmatprep.mubr.bf16.mxu1 %v7158_v52  ;;  %v7269_v51 = vcombine.low %v400_v39, %v408_v40  ;;  %v7277_v52 = vcombine.low %v404_v41, %v412_v42  ;;  %v7294_v54 = vcombine.high %v420_v49, %v428_v50  ;;  %v17_v40 = vld [vmem:[%s11124_s0 + $0x10] sm:$0xff] }
 0x1c3   :  { %5731 = vmatprep.mubr.bf16.mxu0 %v7166_v53  ;;  %v7286_v53 = vcombine.high %v416_v47, %v424_v48  ;;  %v25_v41 = vld [vmem:[%s11124_s0 + $0x50] sm:$0xff] }
 0x1c4   :  { %v21_v42 = vld [vmem:[%s11124_s0 + $0x30] sm:$0xff] }
 0x1c9   :  { %4576 = vmatmul.mubr.bf16.gmra.mrb[68].mxu1 %v7157_v58  ;;  %v444_v58 = vld [vmem:[%s11124_s0 + $0xd68] sm:$0xff] }
 0x1ca   :  { %5732 = vmatmul.mubr.bf16.gmra.mrb[68].mxu0 %v7165_v59  ;;  %4583 = vmatprep.mubr.bf16.mxu1 %v7174_v60  ;;  %v7285_v59 = vcombine.low %v416_v47, %v424_v48  ;;  %v7293_v60 = vcombine.low %v420_v49, %v428_v50  ;;  %v7310_v62 = vcombine.high %v436_v57, %v444_v58  ;;  %v33_v48 = vld [vmem:[%s11124_s0 + $0x90] sm:$0xff] }
 0x1cb   :  { %5739 = vmatprep.mubr.bf16.mxu0 %v7182_v61  ;;  %v7302_v61 = vcombine.high %v432_v55, %v440_v56  ;;  %v41_v49 = vld [vmem:[%s11124_s0 + $0xd0] sm:$0xff]  ;;  %v6887_v50 = vcombine.low %v17_v40, %v25_v41 }
 0x1d1   :  { %4584 = vmatmul.mubr.bf16.gmra.mrb[72].mxu1 %v7173_v3  ;;  %v460_v3 = vld [vmem:[%s11124_s0 + $0xde8] sm:$0xff] }
 0x1d2   :  { %5740 = vmatmul.mubr.bf16.gmra.mrb[72].mxu0 %v7181_v4  ;;  %4591 = vmatprep.mubr.bf16.mxu1 %v7190_v5  ;;  %v7301_v4 = vcombine.low %v432_v55, %v440_v56  ;;  %v7309_v5 = vcombine.low %v436_v57, %v444_v58  ;;  %v7326_v7 = vcombine.high %v452_v2, %v460_v3  ;;  %v8836_v55 = vld [vmem:[%s11123_s1 + $0x380] sm:$0xff]   ;;  %v8837_v58 = vld [vmem:[%s11123_s1 + $0x188] sm:$0xff]  }
 0x1d3   :  { %5747 = vmatprep.mubr.bf16.mxu0 %v7198_v6  ;;  %v7318_v6 = vcombine.high %v448_v63, %v456_v1  ;;  %v6904_v56 = vcombine.high %v33_v48, %v41_v49 }
 0x1d9   :  { %4592 = vmatmul.mubr.bf16.gmra.mrb[76].mxu1 %v7189_v11  ;;  %v476_v11 = vld [vmem:[%s11124_s0 + $0xe68] sm:$0xff] }
 0x1da   :  { %5748 = vmatmul.mubr.bf16.gmra.mrb[76].mxu0 %v7197_v12  ;;  %4599 = vmatprep.mubr.bf16.mxu1 %v7206_v13  ;;  %v7317_v12 = vcombine.low %v448_v63, %v456_v1  ;;  %v7325_v13 = vcombine.low %v452_v2, %v460_v3  ;;  %v7342_v15 = vcombine.high %v468_v10, %v476_v11  ;;  %v61_v63 = vld [vmem:[%s11124_s0 + $0x170] sm:$0xff] }
 0x1db   :  { %5755 = vmatprep.mubr.bf16.mxu0 %v7214_v14  ;;  %v7334_v14 = vcombine.high %v464_v8, %v472_v9  ;;  %v6903_v1 = vcombine.low %v33_v48, %v41_v49  ;;  %v8854_v48 = vld [vmem:[%s11123_s1 + $0x3c8] sm:$0xff]  }
 0x1e1   :  { %4600 = vmatmul.mubr.bf16.gmra.mrb[80].mxu1 %v7205_v19  ;;  %v492_v19 = vld [vmem:[%s11124_s0 + $0xee8] sm:$0xff] }
 0x1e2   :  { %5756 = vmatmul.mubr.bf16.gmra.mrb[80].mxu0 %v7213_v20  ;;  %4607 = vmatprep.mubr.bf16.mxu1 %v7222_v21  ;;  %v7333_v20 = vcombine.low %v464_v8, %v472_v9  ;;  %v7341_v21 = vcombine.low %v468_v10, %v476_v11  ;;  %v7358_v23 = vcombine.high %v484_v18, %v492_v19  ;;  %v73_v8 = vld [vmem:[%s11124_s0 + $0x1d0] sm:$0xff]  ;;  %v8841_v9 = vld [vmem:[%s11123_s1 + $0x198] sm:$0xff]  }
 0x1e3   :  { %5763 = vmatprep.mubr.bf16.mxu0 %v7230_v22  ;;  %v7350_v22 = vcombine.high %v480_v16, %v488_v17  ;;  %v69_v10 = vld [vmem:[%s11124_s0 + $0x1b0] sm:$0xff] }
 0x1e4   :  { %v77_v11 = vld [vmem:[%s11124_s0 + $0x1f0] sm:$0xff] }
 0x1e9   :  { %4608 = vmatmul.mubr.bf16.gmra.mrb[84].mxu1 %v7221_v27  ;;  %v508_v27 = vld [vmem:[%s11124_s0 + $0xf68] sm:$0xff] }
 0x1ea   :  { %5764 = vmatmul.mubr.bf16.gmra.mrb[84].mxu0 %v7229_v28  ;;  %4615 = vmatprep.mubr.bf16.mxu1 %v7238_v29  ;;  %v7349_v28 = vcombine.low %v480_v16, %v488_v17  ;;  %v7357_v29 = vcombine.low %v484_v18, %v492_v19  ;;  %v7374_v31 = vcombine.high %v500_v26, %v508_v27  ;;  %v8843_v17 = vld [vmem:[%s11123_s1 + $0x1a0] sm:$0xff]   ;;  %v81_v19 = vld [vmem:[%s11124_s0 + $0x210] sm:$0xff] }
 0x1eb   :  { %5771 = vmatprep.mubr.bf16.mxu0 %v7246_v30  ;;  %v7366_v30 = vcombine.high %v496_v24, %v504_v25  ;;  %v6944_v16 = vcombine.high %v69_v10, %v77_v11  ;;  %v8844_v18 = vld [vmem:[%s11123_s1 + $0x3a0] sm:$0xff]  }
 0x1f1   :  { %4616 = vmatmul.mubr.bf16.gmra.mrb[88].mxu1 %v7237_v35  ;;  %v524_v35 = vld [vmem:[%s11124_s0 + $0xfe8] sm:$0xff] }
 0x1f2   :  { %5772 = vmatmul.mubr.bf16.gmra.mrb[88].mxu0 %v7245_v36  ;;  %4623 = vmatprep.mubr.bf16.mxu1 %v7254_v37  ;;  %v7365_v36 = vcombine.low %v496_v24, %v504_v25  ;;  %v7373_v37 = vcombine.low %v500_v26, %v508_v27  ;;  %v7390_v39 = vcombine.high %v516_v34, %v524_v35  ;;  %v8846_v24 = vld [vmem:[%s11123_s1 + $0x3a8] sm:$0xff]  }
 0x1f3   :  { %5779 = vmatprep.mubr.bf16.mxu0 %v7262_v38  ;;  %v7382_v38 = vcombine.high %v512_v32, %v520_v33  ;;  %v6943_v26 = vcombine.low %v69_v10, %v77_v11  ;;  %v161_v10 = vld [vmem:[%s11124_s0 + $0x490] sm:$0xff] }
 0x1f4   :  { %v169_v11 = vld [vmem:[%s11124_s0 + $0x4d0] sm:$0xff] }
 0x1f9   :  { %4624 = vmatmul.mubr.bf16.gmra.mrb[92].mxu1 %v7253_v43  ;;  %v29_v43 = vld [vmem:[%s11124_s0 + $0x70] sm:$0xff] }
 0x1fa   :  { %5780 = vmatmul.mubr.bf16.gmra.mrb[92].mxu0 %v7261_v44  ;;  %4631 = vmatprep.mubr.bf16.mxu1 %v7270_v45  ;;  %v7381_v44 = vcombine.low %v512_v32, %v520_v33  ;;  %v7389_v45 = vcombine.low %v516_v34, %v524_v35  ;;  %v6896_v47 = vcombine.high %v21_v42, %v29_v43  ;;  %v105_v32 = vld [vmem:[%s11124_s0 + $0x2d0] sm:$0xff]  ;;  %v8849_v33 = vld [vmem:[%s11123_s1 + $0x1b8] sm:$0xff]  }
 0x1fb   :  { %5787 = vmatprep.mubr.bf16.mxu0 %v7278_v46  ;;  %v6888_v46 = vcombine.high %v17_v40, %v25_v41  ;;  %v101_v34 = vld [vmem:[%s11124_s0 + $0x2b0] sm:$0xff]  ;;  %v8851_v41 = vld [vmem:[%s11123_s1 + $0x1c0] sm:$0xff]  }
 0x1fc   :  { %v109_v35 = vld [vmem:[%s11124_s0 + $0x2f0] sm:$0xff] }
 0x1fd   :  { %v6976_v40 = vcombine.high %v101_v34, %v109_v35 }
 0x201   :  { %4632 = vmatmul.mubr.bf16.gmra.mrb[96].mxu1 %v7269_v51  ;;  %v37_v51 = vld [vmem:[%s11124_s0 + $0xb0] sm:$0xff] }
 0x202   :  { %5788 = vmatmul.mubr.bf16.gmra.mrb[96].mxu0 %v7277_v52  ;;  %4639 = vmatprep.mubr.bf16.mxu1 %v7286_v53  ;;  %v45_v52 = vld [vmem:[%s11124_s0 + $0xf0] sm:$0xff]  ;;  %v6895_v53 = vcombine.low %v21_v42, %v29_v43  ;;  %v8852_v42 = vld [vmem:[%s11123_s1 + $0x3c0] sm:$0xff]  }
 0x203   :  { %5795 = vmatprep.mubr.bf16.mxu0 %v7294_v54  ;;  %v8835_v54 = vld [vmem:[%s11123_s1 + $0x180] sm:$0xff]   ;;  %v6912_v57 = vcombine.high %v37_v51, %v45_v52  ;;  %v6911_v2 = vcombine.low %v37_v51, %v45_v52  ;;  %v113_v43 = vld [vmem:[%s11124_s0 + $0x310] sm:$0xff] }
 0x209   :  { %4640 = vmatmul.mubr.bf16.gmra.mrb[100].mxu1 %v7285_v59  ;;  %v49_v59 = vld [vmem:[%s11124_s0 + $0x110] sm:$0xff] }
 0x20a   :  { %5796 = vmatmul.mubr.bf16.gmra.mrb[100].mxu0 %v7293_v60  ;;  %4647 = vmatprep.mubr.bf16.mxu1 %v7302_v61  ;;  %v57_v60 = vld [vmem:[%s11124_s0 + $0x150] sm:$0xff]  ;;  %v8838_v61 = vld [vmem:[%s11123_s1 + $0x388] sm:$0xff]  }
 0x20b   :  { %5803 = vmatprep.mubr.bf16.mxu0 %v7310_v62  ;;  %v53_v62 = vld [vmem:[%s11124_s0 + $0x130] sm:$0xff]  ;;  %v6920_v3 = vcombine.high %v49_v59, %v57_v60 }
 0x211   :  { %4648 = vmatmul.mubr.bf16.gmra.mrb[104].mxu1 %v7301_v4  ;;  %v6928_v4 = vcombine.high %v53_v62, %v61_v63 }
 0x212   :  { %5804 = vmatmul.mubr.bf16.gmra.mrb[104].mxu0 %v7309_v5  ;;  %4655 = vmatprep.mubr.bf16.mxu1 %v7318_v6  ;;  %v8839_v5 = vld [vmem:[%s11123_s1 + $0x190] sm:$0xff]  }
 0x213   :  { %5811 = vmatprep.mubr.bf16.mxu0 %v7326_v7  ;;  %v8840_v6 = vld [vmem:[%s11123_s1 + $0x390] sm:$0xff]  }
 0x214   :  { %v65_v7 = vld [vmem:[%s11124_s0 + $0x190] sm:$0xff] }
 0x215   :  { %v6935_v25 = vcombine.low %v65_v7, %v73_v8 }
 0x219   :  { %4656 = vmatmul.mubr.bf16.gmra.mrb[108].mxu1 %v7317_v12  ;;  %v8842_v12 = vld [vmem:[%s11123_s1 + $0x398] sm:$0xff]  }
 0x21a   :  { %5812 = vmatmul.mubr.bf16.gmra.mrb[108].mxu0 %v7325_v13  ;;  %4663 = vmatprep.mubr.bf16.mxu1 %v7334_v14  ;;  %v6919_v13 = vcombine.low %v49_v59, %v57_v60  ;;  %v6927_v14 = vcombine.low %v53_v62, %v61_v63  ;;  %v8857_v63 = vld [vmem:[%s11123_s1 + $0x1d8] sm:$0xff]  }
 0x21b   :  { %5819 = vmatprep.mubr.bf16.mxu0 %v7342_v15  ;;  %v6936_v15 = vcombine.high %v65_v7, %v73_v8 }
 0x221   :  { %4664 = vmatmul.mubr.bf16.gmra.mrb[112].mxu1 %v7333_v20  ;;  %v89_v20 = vld [vmem:[%s11124_s0 + $0x250] sm:$0xff] }
 0x222   :  { %5820 = vmatmul.mubr.bf16.gmra.mrb[112].mxu0 %v7341_v21  ;;  %4671 = vmatprep.mubr.bf16.mxu1 %v7350_v22  ;;  %v8845_v21 = vld [vmem:[%s11123_s1 + $0x1a8] sm:$0xff]   ;;  %v85_v22 = vld [vmem:[%s11124_s0 + $0x230] sm:$0xff]  ;;  %v6952_v27 = vcombine.high %v81_v19, %v89_v20 }
 0x223   :  { %5827 = vmatprep.mubr.bf16.mxu0 %v7358_v23  ;;  %v93_v23 = vld [vmem:[%s11124_s0 + $0x270] sm:$0xff] }
 0x229   :  { %4672 = vmatmul.mubr.bf16.gmra.mrb[116].mxu1 %v7349_v28  ;;  %v6960_v28 = vcombine.high %v85_v22, %v93_v23 }
 0x22a   :  { %5828 = vmatmul.mubr.bf16.gmra.mrb[116].mxu0 %v7357_v29  ;;  %4679 = vmatprep.mubr.bf16.mxu1 %v7366_v30  ;;  %v8847_v29 = vld [vmem:[%s11123_s1 + $0x1b0] sm:$0xff]  }
 0x22b   :  { %5835 = vmatprep.mubr.bf16.mxu0 %v7374_v31  ;;  %v8848_v30 = vld [vmem:[%s11123_s1 + $0x3b0] sm:$0xff]  }
 0x22c   :  { %v97_v31 = vld [vmem:[%s11124_s0 + $0x290] sm:$0xff] }
 0x22d   :  { %v6967_v49 = vcombine.low %v97_v31, %v105_v32 }
 0x231   :  { %4680 = vmatmul.mubr.bf16.gmra.mrb[120].mxu1 %v7365_v36  ;;  %v8850_v36 = vld [vmem:[%s11123_s1 + $0x3b8] sm:$0xff]  }
 0x232   :  { %5836 = vmatmul.mubr.bf16.gmra.mrb[120].mxu0 %v7373_v37  ;;  %4687 = vmatprep.mubr.bf16.mxu1 %v7382_v38  ;;  %v6951_v37 = vcombine.low %v81_v19, %v89_v20  ;;  %v6959_v38 = vcombine.low %v85_v22, %v93_v23  ;;  %v8860_v19 = vld [vmem:[%s11123_s1 + $0x3e0] sm:$0xff]   ;;  %v177_v20 = vld [vmem:[%s11124_s0 + $0x510] sm:$0xff] }
 0x233   :  { %5843 = vmatprep.mubr.bf16.mxu0 %v7390_v39  ;;  %v6968_v39 = vcombine.high %v97_v31, %v105_v32  ;;  %v181_v22 = vld [vmem:[%s11124_s0 + $0x530] sm:$0xff] }
 0x234   :  { %v189_v23 = vld [vmem:[%s11124_s0 + $0x570] sm:$0xff] }
 0x235   :  { %v205_v31 = vld [vmem:[%s11124_s0 + $0x5f0] sm:$0xff] }
 0x239   :  { %4688 = vmatmul.mubr.bf16.gmra.mrb[124].mxu1 %v7381_v44  ;;  %v121_v44 = vld [vmem:[%s11124_s0 + $0x350] sm:$0xff] }
 0x23a   :  { %5844 = vmatmul.mubr.bf16.gmra.mrb[124].mxu0 %v7389_v45  ;;  %4728 = vmatprep.mubr.bf16.mxu1 %v6888_v46  ;;  %v8853_v45 = vld [vmem:[%s11123_s1 + $0x1c8] sm:$0xff]   ;;  %v117_v46 = vld [vmem:[%s11124_s0 + $0x330] sm:$0xff]  ;;  %v6984_v51 = vcombine.high %v113_v43, %v121_v44  ;;  %v6983_v59 = vcombine.low %v113_v43, %v121_v44 }
 0x23b   :  { %5884 = vmatprep.mubr.bf16.mxu0 %v6896_v47  ;;  %v125_v47 = vld [vmem:[%s11124_s0 + $0x370] sm:$0xff] }
 0x23c   :  { %v6992_v52 = vcombine.high %v117_v46, %v125_v47  ;;  %v6991_v60 = vcombine.low %v117_v46, %v125_v47  ;;  %v225_v46 = vld [vmem:[%s11124_s0 + $0x690] sm:$0xff] }
 0x23d   :  { %v233_v47 = vld [vmem:[%s11124_s0 + $0x6d0] sm:$0xff] }
 0x241   :  { %4729 = vmatmul.mubr.bf16.vlgmr.msra.gmra.mrb[0].mxu1 %v6887_v50  ;;  %v6975_v50 = vcombine.low %v101_v34, %v109_v35 }
 0x242   :  { %5885 = vmatmul.mubr.bf16.vlgmr.msra.gmra.mrb[0].mxu0 %v6895_v53  ;;  %4986 = vmatpush1.bf16.msra.mxu1 %v8835_v54  ;;  %v8855_v53 = vld [vmem:[%s11123_s1 + $0x1d0] sm:$0xff]  }
 0x243   :  { %6142 = vmatpush1.bf16.msra.mxu0 %v8836_v55  ;;  %4736 = vmatprep.mubr.bf16.mxu1 %v6904_v56  ;;  %v8856_v54 = vld [vmem:[%s11123_s1 + $0x3d0] sm:$0xff]  }
 0x244   :  { %5892 = vmatprep.mubr.bf16.mxu0 %v6912_v57  ;;  %4987 = vmatprep.subr.bf16.mxu1 %v8868_v0  ;;  %v129_v55 = vld [vmem:[%s11124_s0 + $0x390] sm:$0xff] }
 0x245   :  { %6143 = vmatprep.subr.bf16.mxu0 %v8868_v0  ;;  %v137_v56 = vld [vmem:[%s11124_s0 + $0x3d0] sm:$0xff] }
 0x246   :  { %4988 = vmatpush1.bf16.msra.mxu1 %v8837_v58  ;;  %v133_v57 = vld [vmem:[%s11124_s0 + $0x3b0] sm:$0xff] }
 0x247   :  { %6144 = vmatpush1.bf16.msra.mxu0 %v8838_v61  ;;  %4989 = vmatprep.subr.bf16.mxu1 %v8868_v0  ;;  %v141_v58 = vld [vmem:[%s11124_s0 + $0x3f0] sm:$0xff]  ;;  %v7000_v61 = vcombine.high %v129_v55, %v137_v56 }
 0x248   :  { %6145 = vmatprep.subr.bf16.mxu0 %v8868_v0  ;;  %v7008_v62 = vcombine.high %v133_v57, %v141_v58  ;;  %v7007_v7 = vcombine.low %v133_v57, %v141_v58  ;;  %v249_v57 = vld [vmem:[%s11124_s0 + $0x750] sm:$0xff] }
 0x249   :  { %4737 = vmatmul.mubr.bf16.gmra.mrb[4].mxu1 %v6903_v1  ;;  %v8858_v1 = vld [vmem:[%s11123_s1 + $0x3d8] sm:$0xff]   ;;  %v245_v58 = vld [vmem:[%s11124_s0 + $0x730] sm:$0xff] }
 0x24a   :  { %5893 = vmatmul.mubr.bf16.gmra.mrb[4].mxu0 %v6911_v2  ;;  %4744 = vmatprep.mubr.bf16.mxu1 %v6920_v3  ;;  %v145_v2 = vld [vmem:[%s11124_s0 + $0x410] sm:$0xff] }
 0x24b   :  { %5900 = vmatprep.mubr.bf16.mxu0 %v6928_v4  ;;  %4990 = vmatpush1.bf16.msra.mxu1 %v8839_v5  ;;  %v153_v3 = vld [vmem:[%s11124_s0 + $0x450] sm:$0xff] }
 0x24c   :  { %6146 = vmatpush1.bf16.msra.mxu0 %v8840_v6  ;;  %4991 = vmatprep.subr.bf16.mxu1 %v8868_v0  ;;  %v149_v4 = vld [vmem:[%s11124_s0 + $0x430] sm:$0xff]  ;;  %v6999_v6 = vcombine.low %v129_v55, %v137_v56  ;;  %v7016_v8 = vcombine.high %v145_v2, %v153_v3 }
 0x24d   :  { %6147 = vmatprep.subr.bf16.mxu0 %v8868_v0  ;;  %v157_v5 = vld [vmem:[%s11124_s0 + $0x470] sm:$0xff] }
 0x24e   :  { %v8864_v55 = vld [vmem:[%s11123_s1 + $0x3f0] sm:$0xff]  }
 0x24f   :  { %4992 = vmatpush1.bf16.msra.mxu1 %v8841_v9  ;;  %v7024_v9 = vcombine.high %v149_v4, %v157_v5  ;;  %v241_v56 = vld [vmem:[%s11124_s0 + $0x710] sm:$0xff] }
 0x250   :  { %6148 = vmatpush1.bf16.msra.mxu0 %v8842_v12  ;;  %4993 = vmatprep.subr.bf16.mxu1 %v8868_v0  ;;  %v165_v12 = vld [vmem:[%s11124_s0 + $0x4b0] sm:$0xff] }
 0x251   :  { %4745 = vmatmul.mubr.bf16.gmra.mrb[8].mxu1 %v6919_v13  ;;  %6149 = vmatprep.subr.bf16.mxu0 %v8868_v0  ;;  %v173_v13 = vld [vmem:[%s11124_s0 + $0x4f0] sm:$0xff] }
 0x252   :  { %5901 = vmatmul.mubr.bf16.gmra.mrb[8].mxu0 %v6927_v14  ;;  %4752 = vmatprep.mubr.bf16.mxu1 %v6936_v15  ;;  %v7015_v14 = vcombine.low %v145_v2, %v153_v3  ;;  %v7023_v15 = vcombine.low %v149_v4, %v157_v5  ;;  %v265_v2 = vld [vmem:[%s11124_s0 + $0x7d0] sm:$0xff]  ;;  %v7111_v4 = vcombine.low %v241_v56, %v249_v57 }
 0x253   :  { %5908 = vmatprep.mubr.bf16.mxu0 %v6944_v16  ;;  %4994 = vmatpush1.bf16.msra.mxu1 %v8843_v17  ;;  %v7032_v16 = vcombine.high %v161_v10, %v169_v11  ;;  %v7040_v17 = vcombine.high %v165_v12, %v173_v13  ;;  %v261_v3 = vld [vmem:[%s11124_s0 + $0x7b0] sm:$0xff] }
 0x254   :  { %6150 = vmatpush1.bf16.msra.mxu0 %v8844_v18  ;;  %4995 = vmatprep.subr.bf16.mxu1 %v8868_v0  ;;  %v8859_v18 = vld [vmem:[%s11123_s1 + $0x1e0] sm:$0xff]  }
 0x255   :  { %6151 = vmatprep.subr.bf16.mxu0 %v8868_v0 }
 0x257   :  { %4996 = vmatpush1.bf16.msra.mxu1 %v8845_v21  ;;  %v185_v21 = vld [vmem:[%s11124_s0 + $0x550] sm:$0xff] }
 0x258   :  { %6152 = vmatpush1.bf16.msra.mxu0 %v8846_v24  ;;  %4997 = vmatprep.subr.bf16.mxu1 %v8868_v0  ;;  %v7031_v24 = vcombine.low %v161_v10, %v169_v11  ;;  %v7047_v32 = vcombine.low %v177_v20, %v185_v21  ;;  %v273_v10 = vld [vmem:[%s11124_s0 + $0x810] sm:$0xff] }
 0x259   :  { %4753 = vmatmul.mubr.bf16.gmra.mrb[12].mxu1 %v6935_v25  ;;  %6153 = vmatprep.subr.bf16.mxu0 %v8868_v0  ;;  %v7039_v25 = vcombine.low %v165_v12, %v173_v13  ;;  %v281_v11 = vld [vmem:[%s11124_s0 + $0x850] sm:$0xff] }
 0x25a   :  { %5909 = vmatmul.mubr.bf16.gmra.mrb[12].mxu0 %v6943_v26  ;;  %4760 = vmatprep.mubr.bf16.mxu1 %v6952_v27  ;;  %v7048_v26 = vcombine.high %v177_v20, %v185_v21  ;;  %v7056_v27 = vcombine.high %v181_v22, %v189_v23  ;;  %v277_v12 = vld [vmem:[%s11124_s0 + $0x830] sm:$0xff] }
 0x25b   :  { %5916 = vmatprep.mubr.bf16.mxu0 %v6960_v28  ;;  %4998 = vmatpush1.bf16.msra.mxu1 %v8847_v29  ;;  %v193_v28 = vld [vmem:[%s11124_s0 + $0x590] sm:$0xff] }
 0x25c   :  { %6154 = vmatpush1.bf16.msra.mxu0 %v8848_v30  ;;  %4999 = vmatprep.subr.bf16.mxu1 %v8868_v0  ;;  %v201_v29 = vld [vmem:[%s11124_s0 + $0x5d0] sm:$0xff] }
 0x25d   :  { %6155 = vmatprep.subr.bf16.mxu0 %v8868_v0  ;;  %v197_v30 = vld [vmem:[%s11124_s0 + $0x5b0] sm:$0xff]  ;;  %v7064_v34 = vcombine.high %v193_v28, %v201_v29 }
 0x25e   :  { %v7072_v35 = vcombine.high %v197_v30, %v205_v31  ;;  %v7071_v43 = vcombine.low %v197_v30, %v205_v31  ;;  %v285_v13 = vld [vmem:[%s11124_s0 + $0x870] sm:$0xff] }
 0x25f   :  { %5000 = vmatpush1.bf16.msra.mxu1 %v8849_v33  ;;  %v7055_v33 = vcombine.low %v181_v22, %v189_v23  ;;  %v293_v20 = vld [vmem:[%s11124_s0 + $0x8b0] sm:$0xff]  ;;  %v7143_v22 = vcombine.low %v273_v10, %v281_v11  ;;  %v7151_v23 = vcombine.low %v277_v12, %v285_v13 }
 0x260   :  { %6156 = vmatpush1.bf16.msra.mxu0 %v8850_v36  ;;  %5001 = vmatprep.subr.bf16.mxu1 %v8868_v0  ;;  %v8861_v36 = vld [vmem:[%s11123_s1 + $0x1e8] sm:$0xff]   ;;  %v301_v21 = vld [vmem:[%s11124_s0 + $0x8f0] sm:$0xff] }
 0x261   :  { %4761 = vmatmul.mubr.bf16.gmra.mrb[16].mxu1 %v6951_v37  ;;  %6157 = vmatprep.subr.bf16.mxu0 %v8868_v0  ;;  %v8862_v37 = vld [vmem:[%s11123_s1 + $0x3e8] sm:$0xff]   ;;  %v7167_v31 = vcombine.low %v293_v20, %v301_v21 }
 0x262   :  { %5917 = vmatmul.mubr.bf16.gmra.mrb[16].mxu0 %v6959_v38  ;;  %4768 = vmatprep.mubr.bf16.mxu1 %v6968_v39  ;;  %v209_v38 = vld [vmem:[%s11124_s0 + $0x610] sm:$0xff] }
 0x263   :  { %5924 = vmatprep.mubr.bf16.mxu0 %v6976_v40  ;;  %5002 = vmatpush1.bf16.msra.mxu1 %v8851_v41  ;;  %v217_v39 = vld [vmem:[%s11124_s0 + $0x650] sm:$0xff] }
 0x264   :  { %6158 = vmatpush1.bf16.msra.mxu0 %v8852_v42  ;;  %5003 = vmatprep.subr.bf16.mxu1 %v8868_v0  ;;  %v213_v40 = vld [vmem:[%s11124_s0 + $0x630] sm:$0xff]  ;;  %v7063_v42 = vcombine.low %v193_v28, %v201_v29  ;;  %v7080_v44 = vcombine.high %v209_v38, %v217_v39 }
 0x265   :  { %6159 = vmatprep.subr.bf16.mxu0 %v8868_v0  ;;  %v221_v41 = vld [vmem:[%s11124_s0 + $0x670] sm:$0xff] }
 0x266   :  { %v309_v28 = vld [vmem:[%s11124_s0 + $0x930] sm:$0xff] }
 0x267   :  { %5004 = vmatpush1.bf16.msra.mxu1 %v8853_v45  ;;  %v7088_v45 = vcombine.high %v213_v40, %v221_v41  ;;  %v317_v29 = vld [vmem:[%s11124_s0 + $0x970] sm:$0xff] }
 0x268   :  { %6160 = vmatpush1.bf16.msra.mxu0 %v8854_v48  ;;  %5005 = vmatprep.subr.bf16.mxu1 %v8868_v0  ;;  %v229_v48 = vld [vmem:[%s11124_s0 + $0x6b0] sm:$0xff] }
 0x269   :  { %4769 = vmatmul.mubr.bf16.gmra.mrb[20].mxu1 %v6967_v49  ;;  %6161 = vmatprep.subr.bf16.mxu0 %v8868_v0  ;;  %v237_v49 = vld [vmem:[%s11124_s0 + $0x6f0] sm:$0xff] }
 0x26a   :  { %5925 = vmatmul.mubr.bf16.gmra.mrb[20].mxu0 %v6975_v50  ;;  %4776 = vmatprep.mubr.bf16.mxu1 %v6984_v51  ;;  %v7079_v50 = vcombine.low %v209_v38, %v217_v39  ;;  %v7087_v51 = vcombine.low %v213_v40, %v221_v41  ;;  %v7183_v39 = vcombine.low %v309_v28, %v317_v29 }
 0x26b   :  { %5932 = vmatprep.mubr.bf16.mxu0 %v6992_v52  ;;  %5006 = vmatpush1.bf16.msra.mxu1 %v8855_v53  ;;  %v7096_v52 = vcombine.high %v225_v46, %v233_v47  ;;  %v7104_v53 = vcombine.high %v229_v48, %v237_v49 }
 0x26c   :  { %6162 = vmatpush1.bf16.msra.mxu0 %v8856_v54  ;;  %5007 = vmatprep.subr.bf16.mxu1 %v8868_v0  ;;  %v8863_v54 = vld [vmem:[%s11123_s1 + $0x1f0] sm:$0xff]  }
 0x26d   :  { %6163 = vmatprep.subr.bf16.mxu0 %v8868_v0 }
 0x26f   :  { %5008 = vmatpush1.bf16.msra.mxu1 %v8857_v63 }
 0x270   :  { %6164 = vmatpush1.bf16.msra.mxu0 %v8858_v1  ;;  %5009 = vmatprep.subr.bf16.mxu1 %v8868_v0  ;;  %v257_v1 = vld [vmem:[%s11124_s0 + $0x790] sm:$0xff] }
 0x271   :  { %4777 = vmatmul.mubr.bf16.gmra.mrb[24].mxu1 %v6983_v59  ;;  %6165 = vmatprep.subr.bf16.mxu0 %v8868_v0  ;;  %v253_v59 = vld [vmem:[%s11124_s0 + $0x770] sm:$0xff] }
 0x272   :  { %5933 = vmatmul.mubr.bf16.gmra.mrb[24].mxu0 %v6991_v60  ;;  %4784 = vmatprep.mubr.bf16.mxu1 %v7000_v61  ;;  %v7095_v60 = vcombine.low %v225_v46, %v233_v47  ;;  %v7103_v61 = vcombine.low %v229_v48, %v237_v49  ;;  %v7120_v63 = vcombine.high %v245_v58, %v253_v59 }
 0x273   :  { %5940 = vmatprep.mubr.bf16.mxu0 %v7008_v62  ;;  %5010 = vmatpush1.bf16.msra.mxu1 %v8859_v18  ;;  %v7112_v62 = vcombine.high %v241_v56, %v249_v57  ;;  %v7119_v5 = vcombine.low %v245_v58, %v253_v59  ;;  %v289_v18 = vld [vmem:[%s11124_s0 + $0x890] sm:$0xff] }
 0x274   :  { %6166 = vmatpush1.bf16.msra.mxu0 %v8860_v19  ;;  %5011 = vmatprep.subr.bf16.mxu1 %v8868_v0  ;;  %v297_v19 = vld [vmem:[%s11124_s0 + $0x8d0] sm:$0xff] }
 0x275   :  { %6167 = vmatprep.subr.bf16.mxu0 %v8868_v0  ;;  %v7159_v30 = vcombine.low %v289_v18, %v297_v19  ;;  %v369_v58 = vld [vmem:[%s11124_s0 + $0xb10] sm:$0xff] }
 0x276   :  { %v377_v59 = vld [vmem:[%s11124_s0 + $0xb50] sm:$0xff] }
 0x277   :  { %5012 = vmatpush1.bf16.msra.mxu1 %v8861_v36  ;;  %v325_v36 = vld [vmem:[%s11124_s0 + $0x9b0] sm:$0xff] }
 0x278   :  { %6168 = vmatpush1.bf16.msra.mxu0 %v8862_v37  ;;  %5013 = vmatprep.subr.bf16.mxu1 %v8868_v0  ;;  %v333_v37 = vld [vmem:[%s11124_s0 + $0x9f0] sm:$0xff] }
 0x279   :  { %4785 = vmatmul.mubr.bf16.gmra.mrb[28].mxu1 %v6999_v6  ;;  %6169 = vmatprep.subr.bf16.mxu0 %v8868_v0  ;;  %v7128_v6 = vcombine.high %v257_v1, %v265_v2  ;;  %v7200_v41 = vcombine.high %v325_v36, %v333_v37  ;;  %v7199_v47 = vcombine.low %v325_v36, %v333_v37  ;;  %v453_v36 = vld [vmem:[%s11124_s0 + $0xdb0] sm:$0xff] }
 0x27a   :  { %5941 = vmatmul.mubr.bf16.gmra.mrb[28].mxu0 %v7007_v7  ;;  %4792 = vmatprep.mubr.bf16.mxu1 %v7016_v8  ;;  %v8865_v8 = vld [vmem:[%s11123_s1 + $0x1f8] sm:$0xff]   ;;  %v461_v37 = vld [vmem:[%s11124_s0 + $0xdf0] sm:$0xff] }
 0x27b   :  { %5948 = vmatprep.mubr.bf16.mxu0 %v7024_v9  ;;  %5014 = vmatpush1.bf16.msra.mxu1 %v8863_v54  ;;  %v8866_v9 = vld [vmem:[%s11123_s1 + $0x3f8] sm:$0xff]  }
 0x27c   :  { %6170 = vmatpush1.bf16.msra.mxu0 %v8864_v55  ;;  %5015 = vmatprep.subr.bf16.mxu1 %v8868_v0 }
 0x27d   :  { %6171 = vmatprep.subr.bf16.mxu0 %v8868_v0  ;;  %v269_v0 = vld [vmem:[%s11124_s0 + $0x7f0] sm:$0xff] }
 0x27e   :  { %v7136_v7 = vcombine.high %v261_v3, %v269_v0 }
 0x27f   :  { %5016 = vmatpush1.bf16.msra.mxu1 %v8865_v8 }
 0x280   :  { %6172 = vmatpush1.bf16.msra.mxu0 %v8866_v9 }
 0x281   :  { %4793 = vmatmul.mubr.bf16.gmra.mrb[32].mxu1 %v7015_v14  ;;  %v7127_v14 = vcombine.low %v257_v1, %v265_v2  ;;  %v7240_v1 = vcombine.high %v369_v58, %v377_v59 }
 0x282   :  { %5949 = vmatmul.mubr.bf16.gmra.mrb[32].mxu0 %v7023_v15  ;;  %4800 = vmatprep.mubr.bf16.mxu1 %v7032_v16  ;;  %v7135_v15 = vcombine.low %v261_v3, %v269_v0  ;;  %v7144_v16 = vcombine.high %v273_v10, %v281_v11  ;;  %v385_v3 = vld [vmem:[%s11124_s0 + $0xb90] sm:$0xff] }
 0x283   :  { %5956 = vmatprep.mubr.bf16.mxu0 %v7040_v17  ;;  %v7152_v17 = vcombine.high %v277_v12, %v285_v13  ;;  %v393_v0 = vld [vmem:[%s11124_s0 + $0xbd0] sm:$0xff] }
 0x284   :  { %v7256_v8 = vcombine.high %v385_v3, %v393_v0  ;;  %v401_v10 = vld [vmem:[%s11124_s0 + $0xc10] sm:$0xff] }
 0x285   :  { %v409_v11 = vld [vmem:[%s11124_s0 + $0xc50] sm:$0xff] }
 0x286   :  { %v405_v12 = vld [vmem:[%s11124_s0 + $0xc30] sm:$0xff] }
 0x287   :  { %v413_v13 = vld [vmem:[%s11124_s0 + $0xc70] sm:$0xff] }
 0x289   :  { %4801 = vmatmul.mubr.bf16.gmra.mrb[36].mxu1 %v7031_v24  ;;  %v7160_v24 = vcombine.high %v289_v18, %v297_v19  ;;  %v417_v18 = vld [vmem:[%s11124_s0 + $0xc90] sm:$0xff] }
 0x28a   :  { %5957 = vmatmul.mubr.bf16.gmra.mrb[36].mxu0 %v7039_v25  ;;  %4808 = vmatprep.mubr.bf16.mxu1 %v7048_v26  ;;  %v7168_v25 = vcombine.high %v293_v20, %v301_v21  ;;  %v305_v26 = vld [vmem:[%s11124_s0 + $0x910] sm:$0xff] }
 0x28b   :  { %5964 = vmatprep.mubr.bf16.mxu0 %v7056_v27  ;;  %v313_v27 = vld [vmem:[%s11124_s0 + $0x950] sm:$0xff] }
 0x28c   :  { %v7175_v38 = vcombine.low %v305_v26, %v313_v27  ;;  %v425_v19 = vld [vmem:[%s11124_s0 + $0xcd0] sm:$0xff] }
 0x28d   :  { %v421_v20 = vld [vmem:[%s11124_s0 + $0xcb0] sm:$0xff] }
 0x28e   :  { %v429_v21 = vld [vmem:[%s11124_s0 + $0xcf0] sm:$0xff] }
 0x291   :  { %4809 = vmatmul.mubr.bf16.gmra.mrb[40].mxu1 %v7047_v32  ;;  %v7176_v32 = vcombine.high %v305_v26, %v313_v27  ;;  %v433_v26 = vld [vmem:[%s11124_s0 + $0xd10] sm:$0xff] }
 0x292   :  { %5965 = vmatmul.mubr.bf16.gmra.mrb[40].mxu0 %v7055_v33  ;;  %4816 = vmatprep.mubr.bf16.mxu1 %v7064_v34  ;;  %v7184_v33 = vcombine.high %v309_v28, %v317_v29  ;;  %v321_v34 = vld [vmem:[%s11124_s0 + $0x990] sm:$0xff] }
 0x293   :  { %5972 = vmatprep.mubr.bf16.mxu0 %v7072_v35  ;;  %v329_v35 = vld [vmem:[%s11124_s0 + $0x9d0] sm:$0xff] }
 0x294   :  { %v7192_v40 = vcombine.high %v321_v34, %v329_v35  ;;  %v7191_v46 = vcombine.low %v321_v34, %v329_v35  ;;  %v441_v27 = vld [vmem:[%s11124_s0 + $0xd50] sm:$0xff] }
 0x295   :  { %v437_v28 = vld [vmem:[%s11124_s0 + $0xd30] sm:$0xff] }
 0x296   :  { %v445_v29 = vld [vmem:[%s11124_s0 + $0xd70] sm:$0xff] }
 0x297   :  { %v449_v34 = vld [vmem:[%s11124_s0 + $0xd90] sm:$0xff] }
 0x298   :  { %v457_v35 = vld [vmem:[%s11124_s0 + $0xdd0] sm:$0xff] }
 0x299   :  { %4817 = vmatmul.mubr.bf16.gmra.mrb[44].mxu1 %v7063_v42  ;;  %v337_v42 = vld [vmem:[%s11124_s0 + $0xa10] sm:$0xff] }
 0x29a   :  { %5973 = vmatmul.mubr.bf16.gmra.mrb[44].mxu0 %v7071_v43  ;;  %4824 = vmatprep.mubr.bf16.mxu1 %v7080_v44  ;;  %v345_v43 = vld [vmem:[%s11124_s0 + $0xa50] sm:$0xff] }
 0x29b   :  { %5980 = vmatprep.mubr.bf16.mxu0 %v7088_v45  ;;  %v341_v44 = vld [vmem:[%s11124_s0 + $0xa30] sm:$0xff]  ;;  %v7208_v48 = vcombine.high %v337_v42, %v345_v43  ;;  %v7207_v54 = vcombine.low %v337_v42, %v345_v43 }
 0x29c   :  { %v349_v45 = vld [vmem:[%s11124_s0 + $0xa70] sm:$0xff] }
 0x29d   :  { %v7216_v49 = vcombine.high %v341_v44, %v349_v45  ;;  %v7215_v55 = vcombine.low %v341_v44, %v349_v45  ;;  %v465_v42 = vld [vmem:[%s11124_s0 + $0xe10] sm:$0xff] }
 0x29e   :  { %v473_v43 = vld [vmem:[%s11124_s0 + $0xe50] sm:$0xff] }
 0x29f   :  { %v469_v44 = vld [vmem:[%s11124_s0 + $0xe30] sm:$0xff] }
 0x2a0   :  { %v477_v45 = vld [vmem:[%s11124_s0 + $0xe70] sm:$0xff] }
 0x2a1   :  { %4825 = vmatmul.mubr.bf16.gmra.mrb[48].mxu1 %v7079_v50  ;;  %v353_v50 = vld [vmem:[%s11124_s0 + $0xa90] sm:$0xff] }
 0x2a2   :  { %5981 = vmatmul.mubr.bf16.gmra.mrb[48].mxu0 %v7087_v51  ;;  %4832 = vmatprep.mubr.bf16.mxu1 %v7096_v52  ;;  %v361_v51 = vld [vmem:[%s11124_s0 + $0xad0] sm:$0xff] }
 0x2a3   :  { %5988 = vmatprep.mubr.bf16.mxu0 %v7104_v53  ;;  %v357_v52 = vld [vmem:[%s11124_s0 + $0xab0] sm:$0xff]  ;;  %v7224_v56 = vcombine.high %v353_v50, %v361_v51 }
 0x2a4   :  { %v365_v53 = vld [vmem:[%s11124_s0 + $0xaf0] sm:$0xff] }
 0x2a5   :  { %v7232_v57 = vcombine.high %v357_v52, %v365_v53 }
 0x2a9   :  { %4833 = vmatmul.mubr.bf16.gmra.mrb[52].mxu1 %v7095_v60  ;;  %v373_v60 = vld [vmem:[%s11124_s0 + $0xb30] sm:$0xff] }
 0x2aa   :  { %5989 = vmatmul.mubr.bf16.gmra.mrb[52].mxu0 %v7103_v61  ;;  %4840 = vmatprep.mubr.bf16.mxu1 %v7112_v62  ;;  %v381_v61 = vld [vmem:[%s11124_s0 + $0xb70] sm:$0xff]  ;;  %v7223_v62 = vcombine.low %v353_v50, %v361_v51 }
 0x2ab   :  { %5996 = vmatprep.mubr.bf16.mxu0 %v7120_v63  ;;  %v7231_v63 = vcombine.low %v357_v52, %v365_v53  ;;  %v7248_v2 = vcombine.high %v373_v60, %v381_v61  ;;  %v481_v50 = vld [vmem:[%s11124_s0 + $0xe90] sm:$0xff] }
 0x2ac   :  { %v489_v51 = vld [vmem:[%s11124_s0 + $0xed0] sm:$0xff] }
 0x2ad   :  { %v485_v52 = vld [vmem:[%s11124_s0 + $0xeb0] sm:$0xff] }
 0x2ae   :  { %v493_v53 = vld [vmem:[%s11124_s0 + $0xef0] sm:$0xff] }
 0x2b1   :  { %4841 = vmatmul.mubr.bf16.gmra.mrb[56].mxu1 %v7111_v4  ;;  %v389_v4 = vld [vmem:[%s11124_s0 + $0xbb0] sm:$0xff] }
 0x2b2   :  { %5997 = vmatmul.mubr.bf16.gmra.mrb[56].mxu0 %v7119_v5  ;;  %4848 = vmatprep.mubr.bf16.mxu1 %v7128_v6  ;;  %v397_v5 = vld [vmem:[%s11124_s0 + $0xbf0] sm:$0xff]  ;;  %v7239_v6 = vcombine.low %v369_v58, %v377_v59 }
 0x2b3   :  { %6004 = vmatprep.mubr.bf16.mxu0 %v7136_v7  ;;  %v7247_v7 = vcombine.low %v373_v60, %v381_v61  ;;  %v7264_v9 = vcombine.high %v389_v4, %v397_v5  ;;  %v497_v58 = vld [vmem:[%s11124_s0 + $0xf10] sm:$0xff] }
 0x2b4   :  { %v505_v59 = vld [vmem:[%s11124_s0 + $0xf50] sm:$0xff] }
 0x2b5   :  { %v501_v60 = vld [vmem:[%s11124_s0 + $0xf30] sm:$0xff] }
 0x2b6   :  { %v509_v61 = vld [vmem:[%s11124_s0 + $0xf70] sm:$0xff] }
 0x2b9   :  { %4849 = vmatmul.mubr.bf16.gmra.mrb[60].mxu1 %v7127_v14  ;;  %v7255_v14 = vcombine.low %v385_v3, %v393_v0  ;;  %v513_v3 = vld [vmem:[%s11124_s0 + $0xf90] sm:$0xff] }
 0x2ba   :  { %6005 = vmatmul.mubr.bf16.gmra.mrb[60].mxu0 %v7135_v15  ;;  %4856 = vmatprep.mubr.bf16.mxu1 %v7144_v16  ;;  %v7263_v15 = vcombine.low %v389_v4, %v397_v5  ;;  %v7272_v16 = vcombine.high %v401_v10, %v409_v11  ;;  %v521_v0 = vld [vmem:[%s11124_s0 + $0xfd0] sm:$0xff] }
 0x2bb   :  { %6012 = vmatprep.mubr.bf16.mxu0 %v7152_v17  ;;  %v7280_v17 = vcombine.high %v405_v12, %v413_v13  ;;  %v517_v4 = vld [vmem:[%s11124_s0 + $0xfb0] sm:$0xff] }
 0x2bc   :  { %v525_v5 = vld [vmem:[%s11124_s0 + $0xff0] sm:$0xff] }
 0x2c1   :  { %4857 = vmatmul.mubr.bf16.gmra.mrb[64].mxu1 %v7143_v22  ;;  %v7271_v22 = vcombine.low %v401_v10, %v409_v11  ;;  %v18_v10 = vld [vmem:[%s11124_s0 + $0x18] sm:$0xff] }
 0x2c2   :  { %6013 = vmatmul.mubr.bf16.gmra.mrb[64].mxu0 %v7151_v23  ;;  %4864 = vmatprep.mubr.bf16.mxu1 %v7160_v24  ;;  %v7279_v23 = vcombine.low %v405_v12, %v413_v13  ;;  %v7288_v24 = vcombine.high %v417_v18, %v425_v19  ;;  %v26_v11 = vld [vmem:[%s11124_s0 + $0x58] sm:$0xff] }
 0x2c3   :  { %6020 = vmatprep.mubr.bf16.mxu0 %v7168_v25  ;;  %v7296_v25 = vcombine.high %v421_v20, %v429_v21  ;;  %v22_v12 = vld [vmem:[%s11124_s0 + $0x38] sm:$0xff] }
 0x2c4   :  { %v30_v13 = vld [vmem:[%s11124_s0 + $0x78] sm:$0xff] }
 0x2c9   :  { %4865 = vmatmul.mubr.bf16.gmra.mrb[68].mxu1 %v7159_v30  ;;  %v7287_v30 = vcombine.low %v417_v18, %v425_v19  ;;  %v34_v18 = vld [vmem:[%s11124_s0 + $0x98] sm:$0xff] }
 0x2ca   :  { %6021 = vmatmul.mubr.bf16.gmra.mrb[68].mxu0 %v7167_v31  ;;  %4872 = vmatprep.mubr.bf16.mxu1 %v7176_v32  ;;  %v7295_v31 = vcombine.low %v421_v20, %v429_v21  ;;  %v7304_v32 = vcombine.high %v433_v26, %v441_v27  ;;  %v42_v19 = vld [vmem:[%s11124_s0 + $0xd8] sm:$0xff] }
 0x2cb   :  { %6028 = vmatprep.mubr.bf16.mxu0 %v7184_v33  ;;  %v7312_v33 = vcombine.high %v437_v28, %v445_v29  ;;  %v38_v20 = vld [vmem:[%s11124_s0 + $0xb8] sm:$0xff] }
 0x2cc   :  { %v46_v21 = vld [vmem:[%s11124_s0 + $0xf8] sm:$0xff] }
 0x2d1   :  { %4873 = vmatmul.mubr.bf16.gmra.mrb[72].mxu1 %v7175_v38  ;;  %v7303_v38 = vcombine.low %v433_v26, %v441_v27  ;;  %v50_v26 = vld [vmem:[%s11124_s0 + $0x118] sm:$0xff] }
 0x2d2   :  { %6029 = vmatmul.mubr.bf16.gmra.mrb[72].mxu0 %v7183_v39  ;;  %4880 = vmatprep.mubr.bf16.mxu1 %v7192_v40  ;;  %v7311_v39 = vcombine.low %v437_v28, %v445_v29  ;;  %v7320_v40 = vcombine.high %v449_v34, %v457_v35  ;;  %v58_v27 = vld [vmem:[%s11124_s0 + $0x158] sm:$0xff] }
 0x2d3   :  { %6036 = vmatprep.mubr.bf16.mxu0 %v7200_v41  ;;  %v7328_v41 = vcombine.high %v453_v36, %v461_v37  ;;  %v54_v28 = vld [vmem:[%s11124_s0 + $0x138] sm:$0xff] }
 0x2d4   :  { %v62_v29 = vld [vmem:[%s11124_s0 + $0x178] sm:$0xff] }
 0x2d9   :  { %4881 = vmatmul.mubr.bf16.gmra.mrb[76].mxu1 %v7191_v46  ;;  %v7319_v46 = vcombine.low %v449_v34, %v457_v35  ;;  %v66_v34 = vld [vmem:[%s11124_s0 + $0x198] sm:$0xff] }
 0x2da   :  { %6037 = vmatmul.mubr.bf16.gmra.mrb[76].mxu0 %v7199_v47  ;;  %4888 = vmatprep.mubr.bf16.mxu1 %v7208_v48  ;;  %v7327_v47 = vcombine.low %v453_v36, %v461_v37  ;;  %v7336_v48 = vcombine.high %v465_v42, %v473_v43  ;;  %v74_v35 = vld [vmem:[%s11124_s0 + $0x1d8] sm:$0xff] }
 0x2db   :  { %6044 = vmatprep.mubr.bf16.mxu0 %v7216_v49  ;;  %v7344_v49 = vcombine.high %v469_v44, %v477_v45  ;;  %v70_v36 = vld [vmem:[%s11124_s0 + $0x1b8] sm:$0xff] }
 0x2dc   :  { %v78_v37 = vld [vmem:[%s11124_s0 + $0x1f8] sm:$0xff] }
 0x2e1   :  { %4889 = vmatmul.mubr.bf16.gmra.mrb[80].mxu1 %v7207_v54  ;;  %v7335_v54 = vcombine.low %v465_v42, %v473_v43  ;;  %v82_v42 = vld [vmem:[%s11124_s0 + $0x218] sm:$0xff] }
 0x2e2   :  { %6045 = vmatmul.mubr.bf16.gmra.mrb[80].mxu0 %v7215_v55  ;;  %4896 = vmatprep.mubr.bf16.mxu1 %v7224_v56  ;;  %v7343_v55 = vcombine.low %v469_v44, %v477_v45  ;;  %v7352_v56 = vcombine.high %v481_v50, %v489_v51  ;;  %v90_v43 = vld [vmem:[%s11124_s0 + $0x258] sm:$0xff] }
 0x2e3   :  { %6052 = vmatprep.mubr.bf16.mxu0 %v7232_v57  ;;  %v7360_v57 = vcombine.high %v485_v52, %v493_v53  ;;  %v86_v44 = vld [vmem:[%s11124_s0 + $0x238] sm:$0xff] }
 0x2e4   :  { %v94_v45 = vld [vmem:[%s11124_s0 + $0x278] sm:$0xff] }
 0x2e9   :  { %4897 = vmatmul.mubr.bf16.gmra.mrb[84].mxu1 %v7223_v62  ;;  %v7351_v62 = vcombine.low %v481_v50, %v489_v51  ;;  %v98_v50 = vld [vmem:[%s11124_s0 + $0x298] sm:$0xff] }
 0x2ea   :  { %6053 = vmatmul.mubr.bf16.gmra.mrb[84].mxu0 %v7231_v63  ;;  %4904 = vmatprep.mubr.bf16.mxu1 %v7240_v1  ;;  %v7359_v63 = vcombine.low %v485_v52, %v493_v53  ;;  %v7368_v1 = vcombine.high %v497_v58, %v505_v59  ;;  %v106_v51 = vld [vmem:[%s11124_s0 + $0x2d8] sm:$0xff] }
 0x2eb   :  { %6060 = vmatprep.mubr.bf16.mxu0 %v7248_v2  ;;  %v7376_v2 = vcombine.high %v501_v60, %v509_v61  ;;  %v102_v52 = vld [vmem:[%s11124_s0 + $0x2b8] sm:$0xff] }
 0x2ec   :  { %v110_v53 = vld [vmem:[%s11124_s0 + $0x2f8] sm:$0xff] }
 0x2f1   :  { %4905 = vmatmul.mubr.bf16.gmra.mrb[88].mxu1 %v7239_v6  ;;  %v7367_v6 = vcombine.low %v497_v58, %v505_v59  ;;  %v114_v58 = vld [vmem:[%s11124_s0 + $0x318] sm:$0xff] }
 0x2f2   :  { %6061 = vmatmul.mubr.bf16.gmra.mrb[88].mxu0 %v7247_v7  ;;  %4912 = vmatprep.mubr.bf16.mxu1 %v7256_v8  ;;  %v7375_v7 = vcombine.low %v501_v60, %v509_v61  ;;  %v7384_v8 = vcombine.high %v513_v3, %v521_v0  ;;  %v122_v59 = vld [vmem:[%s11124_s0 + $0x358] sm:$0xff] }
 0x2f3   :  { %6068 = vmatprep.mubr.bf16.mxu0 %v7264_v9  ;;  %v7392_v9 = vcombine.high %v517_v4, %v525_v5  ;;  %v118_v60 = vld [vmem:[%s11124_s0 + $0x338] sm:$0xff] }
 0x2f4   :  { %v126_v61 = vld [vmem:[%s11124_s0 + $0x378] sm:$0xff] }
 0x2f9   :  { %4913 = vmatmul.mubr.bf16.gmra.mrb[92].mxu1 %v7255_v14  ;;  %v7383_v14 = vcombine.low %v513_v3, %v521_v0  ;;  %v130_v3 = vld [vmem:[%s11124_s0 + $0x398] sm:$0xff] }
 0x2fa   :  { %6069 = vmatmul.mubr.bf16.gmra.mrb[92].mxu0 %v7263_v15  ;;  %4920 = vmatprep.mubr.bf16.mxu1 %v7272_v16  ;;  %v7391_v15 = vcombine.low %v517_v4, %v525_v5  ;;  %v6890_v16 = vcombine.high %v18_v10, %v26_v11  ;;  %v138_v0 = vld [vmem:[%s11124_s0 + $0x3d8] sm:$0xff] }
 0x2fb   :  { %6076 = vmatprep.mubr.bf16.mxu0 %v7280_v17  ;;  %v6898_v17 = vcombine.high %v22_v12, %v30_v13  ;;  %v134_v4 = vld [vmem:[%s11124_s0 + $0x3b8] sm:$0xff] }
 0x2fc   :  { %v142_v5 = vld [vmem:[%s11124_s0 + $0x3f8] sm:$0xff] }
 0x301   :  { %4921 = vmatmul.mubr.bf16.gmra.mrb[96].mxu1 %v7271_v22  ;;  %v6889_v22 = vcombine.low %v18_v10, %v26_v11  ;;  %v146_v10 = vld [vmem:[%s11124_s0 + $0x418] sm:$0xff] }
 0x302   :  { %6077 = vmatmul.mubr.bf16.gmra.mrb[96].mxu0 %v7279_v23  ;;  %4928 = vmatprep.mubr.bf16.mxu1 %v7288_v24  ;;  %v6897_v23 = vcombine.low %v22_v12, %v30_v13  ;;  %v6906_v24 = vcombine.high %v34_v18, %v42_v19  ;;  %v154_v11 = vld [vmem:[%s11124_s0 + $0x458] sm:$0xff] }
 0x303   :  { %6084 = vmatprep.mubr.bf16.mxu0 %v7296_v25  ;;  %v6914_v25 = vcombine.high %v38_v20, %v46_v21  ;;  %v150_v12 = vld [vmem:[%s11124_s0 + $0x438] sm:$0xff] }
 0x304   :  { %v158_v13 = vld [vmem:[%s11124_s0 + $0x478] sm:$0xff] }
 0x309   :  { %4929 = vmatmul.mubr.bf16.gmra.mrb[100].mxu1 %v7287_v30  ;;  %v6905_v30 = vcombine.low %v34_v18, %v42_v19  ;;  %v162_v18 = vld [vmem:[%s11124_s0 + $0x498] sm:$0xff] }
 0x30a   :  { %6085 = vmatmul.mubr.bf16.gmra.mrb[100].mxu0 %v7295_v31  ;;  %4936 = vmatprep.mubr.bf16.mxu1 %v7304_v32  ;;  %v6913_v31 = vcombine.low %v38_v20, %v46_v21  ;;  %v6922_v32 = vcombine.high %v50_v26, %v58_v27  ;;  %v170_v19 = vld [vmem:[%s11124_s0 + $0x4d8] sm:$0xff] }
 0x30b   :  { %6092 = vmatprep.mubr.bf16.mxu0 %v7312_v33  ;;  %v6930_v33 = vcombine.high %v54_v28, %v62_v29  ;;  %v166_v20 = vld [vmem:[%s11124_s0 + $0x4b8] sm:$0xff] }
 0x30c   :  { %v174_v21 = vld [vmem:[%s11124_s0 + $0x4f8] sm:$0xff] }
 0x311   :  { %4937 = vmatmul.mubr.bf16.gmra.mrb[104].mxu1 %v7303_v38  ;;  %v6921_v38 = vcombine.low %v50_v26, %v58_v27  ;;  %v178_v26 = vld [vmem:[%s11124_s0 + $0x518] sm:$0xff] }
 0x312   :  { %6093 = vmatmul.mubr.bf16.gmra.mrb[104].mxu0 %v7311_v39  ;;  %4944 = vmatprep.mubr.bf16.mxu1 %v7320_v40  ;;  %v6929_v39 = vcombine.low %v54_v28, %v62_v29  ;;  %v6938_v40 = vcombine.high %v66_v34, %v74_v35  ;;  %v186_v27 = vld [vmem:[%s11124_s0 + $0x558] sm:$0xff] }
 0x313   :  { %6100 = vmatprep.mubr.bf16.mxu0 %v7328_v41  ;;  %v6946_v41 = vcombine.high %v70_v36, %v78_v37  ;;  %v182_v28 = vld [vmem:[%s11124_s0 + $0x538] sm:$0xff] }
 0x314   :  { %v190_v29 = vld [vmem:[%s11124_s0 + $0x578] sm:$0xff] }
 0x319   :  { %4945 = vmatmul.mubr.bf16.gmra.mrb[108].mxu1 %v7319_v46  ;;  %v6937_v46 = vcombine.low %v66_v34, %v74_v35  ;;  %v194_v34 = vld [vmem:[%s11124_s0 + $0x598] sm:$0xff] }
 0x31a   :  { %6101 = vmatmul.mubr.bf16.gmra.mrb[108].mxu0 %v7327_v47  ;;  %4952 = vmatprep.mubr.bf16.mxu1 %v7336_v48  ;;  %v6945_v47 = vcombine.low %v70_v36, %v78_v37  ;;  %v6954_v48 = vcombine.high %v82_v42, %v90_v43  ;;  %v202_v35 = vld [vmem:[%s11124_s0 + $0x5d8] sm:$0xff] }
 0x31b   :  { %6108 = vmatprep.mubr.bf16.mxu0 %v7344_v49  ;;  %v6962_v49 = vcombine.high %v86_v44, %v94_v45  ;;  %v198_v36 = vld [vmem:[%s11124_s0 + $0x5b8] sm:$0xff] }
 0x31c   :  { %v206_v37 = vld [vmem:[%s11124_s0 + $0x5f8] sm:$0xff] }
 0x321   :  { %4953 = vmatmul.mubr.bf16.gmra.mrb[112].mxu1 %v7335_v54  ;;  %v6953_v54 = vcombine.low %v82_v42, %v90_v43  ;;  %v210_v42 = vld [vmem:[%s11124_s0 + $0x618] sm:$0xff] }
 0x322   :  { %6109 = vmatmul.mubr.bf16.gmra.mrb[112].mxu0 %v7343_v55  ;;  %4960 = vmatprep.mubr.bf16.mxu1 %v7352_v56  ;;  %v6961_v55 = vcombine.low %v86_v44, %v94_v45  ;;  %v6970_v56 = vcombine.high %v98_v50, %v106_v51  ;;  %v218_v43 = vld [vmem:[%s11124_s0 + $0x658] sm:$0xff] }
 0x323   :  { %6116 = vmatprep.mubr.bf16.mxu0 %v7360_v57  ;;  %v6978_v57 = vcombine.high %v102_v52, %v110_v53  ;;  %v214_v44 = vld [vmem:[%s11124_s0 + $0x638] sm:$0xff] }
 0x324   :  { %v222_v45 = vld [vmem:[%s11124_s0 + $0x678] sm:$0xff] }
 0x329   :  { %4961 = vmatmul.mubr.bf16.gmra.mrb[116].mxu1 %v7351_v62  ;;  %v6969_v62 = vcombine.low %v98_v50, %v106_v51  ;;  %v226_v50 = vld [vmem:[%s11124_s0 + $0x698] sm:$0xff] }
 0x32a   :  { %6117 = vmatmul.mubr.bf16.gmra.mrb[116].mxu0 %v7359_v63  ;;  %4968 = vmatprep.mubr.bf16.mxu1 %v7368_v1  ;;  %v6977_v63 = vcombine.low %v102_v52, %v110_v53  ;;  %v6986_v1 = vcombine.high %v114_v58, %v122_v59  ;;  %v234_v51 = vld [vmem:[%s11124_s0 + $0x6d8] sm:$0xff] }
 0x32b   :  { %6124 = vmatprep.mubr.bf16.mxu0 %v7376_v2  ;;  %v6994_v2 = vcombine.high %v118_v60, %v126_v61  ;;  %v230_v52 = vld [vmem:[%s11124_s0 + $0x6b8] sm:$0xff] }
 0x32c   :  { %v238_v53 = vld [vmem:[%s11124_s0 + $0x6f8] sm:$0xff] }
 0x331   :  { %4969 = vmatmul.mubr.bf16.gmra.mrb[120].mxu1 %v7367_v6  ;;  %v6985_v6 = vcombine.low %v114_v58, %v122_v59  ;;  %v242_v58 = vld [vmem:[%s11124_s0 + $0x718] sm:$0xff] }
 0x332   :  { %6125 = vmatmul.mubr.bf16.gmra.mrb[120].mxu0 %v7375_v7  ;;  %4976 = vmatprep.mubr.bf16.mxu1 %v7384_v8  ;;  %v6993_v7 = vcombine.low %v118_v60, %v126_v61  ;;  %v7002_v8 = vcombine.high %v130_v3, %v138_v0  ;;  %v250_v59 = vld [vmem:[%s11124_s0 + $0x758] sm:$0xff] }
 0x333   :  { %6132 = vmatprep.mubr.bf16.mxu0 %v7392_v9  ;;  %v7010_v9 = vcombine.high %v134_v4, %v142_v5  ;;  %v246_v60 = vld [vmem:[%s11124_s0 + $0x738] sm:$0xff] }
 0x334   :  { %v254_v61 = vld [vmem:[%s11124_s0 + $0x778] sm:$0xff] }
 0x339   :  { %4977 = vmatmul.mubr.bf16.gmra.mrb[124].mxu1 %v7383_v14  ;;  %v7001_v14 = vcombine.low %v130_v3, %v138_v0  ;;  %v258_v3 = vld [vmem:[%s11124_s0 + $0x798] sm:$0xff] }
 0x33a   :  { %6133 = vmatmul.mubr.bf16.gmra.mrb[124].mxu0 %v7391_v15  ;;  %5017 = vmatprep.mubr.bf16.mxu1 %v6890_v16  ;;  %v7009_v15 = vcombine.low %v134_v4, %v142_v5  ;;  %v7018_v16 = vcombine.high %v146_v10, %v154_v11  ;;  %v266_v0 = vld [vmem:[%s11124_s0 + $0x7d8] sm:$0xff] }
 0x33b   :  { %6173 = vmatprep.mubr.bf16.mxu0 %v6898_v17  ;;  %v7026_v17 = vcombine.high %v150_v12, %v158_v13  ;;  %v262_v4 = vld [vmem:[%s11124_s0 + $0x7b8] sm:$0xff] }
 0x33c   :  { %v270_v5 = vld [vmem:[%s11124_s0 + $0x7f8] sm:$0xff] }
 0x341   :  { %5018 = vmatmul.mubr.bf16.vlgmr.msra.gmra.mrb[0].mxu1 %v6889_v22  ;;  %v7017_v22 = vcombine.low %v146_v10, %v154_v11  ;;  %v274_v10 = vld [vmem:[%s11124_s0 + $0x818] sm:$0xff] }
 0x342   :  { %6174 = vmatmul.mubr.bf16.vlgmr.msra.gmra.mrb[0].mxu0 %v6897_v23  ;;  %5025 = vmatprep.mubr.bf16.mxu1 %v6906_v24  ;;  %v7025_v23 = vcombine.low %v150_v12, %v158_v13  ;;  %v7034_v24 = vcombine.high %v162_v18, %v170_v19  ;;  %v282_v11 = vld [vmem:[%s11124_s0 + $0x858] sm:$0xff] }
 0x343   :  { %6181 = vmatprep.mubr.bf16.mxu0 %v6914_v25  ;;  %v7042_v25 = vcombine.high %v166_v20, %v174_v21  ;;  %v278_v12 = vld [vmem:[%s11124_s0 + $0x838] sm:$0xff] }
 0x344   :  { %v286_v13 = vld [vmem:[%s11124_s0 + $0x878] sm:$0xff] }
 0x349   :  { %5026 = vmatmul.mubr.bf16.gmra.mrb[4].mxu1 %v6905_v30  ;;  %v7033_v30 = vcombine.low %v162_v18, %v170_v19  ;;  %v290_v18 = vld [vmem:[%s11124_s0 + $0x898] sm:$0xff] }
 0x34a   :  { %6182 = vmatmul.mubr.bf16.gmra.mrb[4].mxu0 %v6913_v31  ;;  %5033 = vmatprep.mubr.bf16.mxu1 %v6922_v32  ;;  %v7041_v31 = vcombine.low %v166_v20, %v174_v21  ;;  %v7050_v32 = vcombine.high %v178_v26, %v186_v27  ;;  %v298_v19 = vld [vmem:[%s11124_s0 + $0x8d8] sm:$0xff] }
 0x34b   :  { %6189 = vmatprep.mubr.bf16.mxu0 %v6930_v33  ;;  %v7058_v33 = vcombine.high %v182_v28, %v190_v29  ;;  %v294_v20 = vld [vmem:[%s11124_s0 + $0x8b8] sm:$0xff] }
 0x34c   :  { %v302_v21 = vld [vmem:[%s11124_s0 + $0x8f8] sm:$0xff] }
 0x351   :  { %5034 = vmatmul.mubr.bf16.gmra.mrb[8].mxu1 %v6921_v38  ;;  %v7049_v38 = vcombine.low %v178_v26, %v186_v27  ;;  %v306_v26 = vld [vmem:[%s11124_s0 + $0x918] sm:$0xff] }
 0x352   :  { %6190 = vmatmul.mubr.bf16.gmra.mrb[8].mxu0 %v6929_v39  ;;  %5041 = vmatprep.mubr.bf16.mxu1 %v6938_v40  ;;  %v7057_v39 = vcombine.low %v182_v28, %v190_v29  ;;  %v7066_v40 = vcombine.high %v194_v34, %v202_v35  ;;  %v314_v27 = vld [vmem:[%s11124_s0 + $0x958] sm:$0xff] }
 0x353   :  { %6197 = vmatprep.mubr.bf16.mxu0 %v6946_v41  ;;  %v7074_v41 = vcombine.high %v198_v36, %v206_v37  ;;  %v310_v28 = vld [vmem:[%s11124_s0 + $0x938] sm:$0xff] }
 0x354   :  { %v318_v29 = vld [vmem:[%s11124_s0 + $0x978] sm:$0xff] }
 0x359   :  { %5042 = vmatmul.mubr.bf16.gmra.mrb[12].mxu1 %v6937_v46  ;;  %v7065_v46 = vcombine.low %v194_v34, %v202_v35  ;;  %v322_v34 = vld [vmem:[%s11124_s0 + $0x998] sm:$0xff] }
 0x35a   :  { %6198 = vmatmul.mubr.bf16.gmra.mrb[12].mxu0 %v6945_v47  ;;  %5049 = vmatprep.mubr.bf16.mxu1 %v6954_v48  ;;  %v7073_v47 = vcombine.low %v198_v36, %v206_v37  ;;  %v7082_v48 = vcombine.high %v210_v42, %v218_v43  ;;  %v330_v35 = vld [vmem:[%s11124_s0 + $0x9d8] sm:$0xff] }
 0x35b   :  { %6205 = vmatprep.mubr.bf16.mxu0 %v6962_v49  ;;  %v7090_v49 = vcombine.high %v214_v44, %v222_v45  ;;  %v326_v36 = vld [vmem:[%s11124_s0 + $0x9b8] sm:$0xff] }
 0x35c   :  { %v334_v37 = vld [vmem:[%s11124_s0 + $0x9f8] sm:$0xff] }
 0x361   :  { %5050 = vmatmul.mubr.bf16.gmra.mrb[16].mxu1 %v6953_v54  ;;  %v7081_v54 = vcombine.low %v210_v42, %v218_v43  ;;  %v338_v42 = vld [vmem:[%s11124_s0 + $0xa18] sm:$0xff] }
 0x362   :  { %6206 = vmatmul.mubr.bf16.gmra.mrb[16].mxu0 %v6961_v55  ;;  %5057 = vmatprep.mubr.bf16.mxu1 %v6970_v56  ;;  %v7089_v55 = vcombine.low %v214_v44, %v222_v45  ;;  %v7098_v56 = vcombine.high %v226_v50, %v234_v51  ;;  %v346_v43 = vld [vmem:[%s11124_s0 + $0xa58] sm:$0xff] }
 0x363   :  { %6213 = vmatprep.mubr.bf16.mxu0 %v6978_v57  ;;  %v7106_v57 = vcombine.high %v230_v52, %v238_v53  ;;  %v342_v44 = vld [vmem:[%s11124_s0 + $0xa38] sm:$0xff] }
 0x364   :  { %v350_v45 = vld [vmem:[%s11124_s0 + $0xa78] sm:$0xff] }
 0x369   :  { %5058 = vmatmul.mubr.bf16.gmra.mrb[20].mxu1 %v6969_v62  ;;  %v7097_v62 = vcombine.low %v226_v50, %v234_v51  ;;  %v354_v50 = vld [vmem:[%s11124_s0 + $0xa98] sm:$0xff] }
 0x36a   :  { %6214 = vmatmul.mubr.bf16.gmra.mrb[20].mxu0 %v6977_v63  ;;  %5065 = vmatprep.mubr.bf16.mxu1 %v6986_v1  ;;  %v7105_v63 = vcombine.low %v230_v52, %v238_v53  ;;  %v7114_v1 = vcombine.high %v242_v58, %v250_v59  ;;  %v362_v51 = vld [vmem:[%s11124_s0 + $0xad8] sm:$0xff] }
 0x36b   :  { %6221 = vmatprep.mubr.bf16.mxu0 %v6994_v2  ;;  %v7122_v2 = vcombine.high %v246_v60, %v254_v61  ;;  %v358_v52 = vld [vmem:[%s11124_s0 + $0xab8] sm:$0xff] }
 0x36c   :  { %v366_v53 = vld [vmem:[%s11124_s0 + $0xaf8] sm:$0xff] }
 0x371   :  { %5066 = vmatmul.mubr.bf16.gmra.mrb[24].mxu1 %v6985_v6  ;;  %v7113_v6 = vcombine.low %v242_v58, %v250_v59  ;;  %v370_v58 = vld [vmem:[%s11124_s0 + $0xb18] sm:$0xff] }
 0x372   :  { %6222 = vmatmul.mubr.bf16.gmra.mrb[24].mxu0 %v6993_v7  ;;  %5073 = vmatprep.mubr.bf16.mxu1 %v7002_v8  ;;  %v7121_v7 = vcombine.low %v246_v60, %v254_v61  ;;  %v7130_v8 = vcombine.high %v258_v3, %v266_v0  ;;  %v378_v59 = vld [vmem:[%s11124_s0 + $0xb58] sm:$0xff] }
 0x373   :  { %6229 = vmatprep.mubr.bf16.mxu0 %v7010_v9  ;;  %v7138_v9 = vcombine.high %v262_v4, %v270_v5  ;;  %v374_v60 = vld [vmem:[%s11124_s0 + $0xb38] sm:$0xff] }
 0x374   :  { %v382_v61 = vld [vmem:[%s11124_s0 + $0xb78] sm:$0xff] }
 0x379   :  { %5074 = vmatmul.mubr.bf16.gmra.mrb[28].mxu1 %v7001_v14  ;;  %v7129_v14 = vcombine.low %v258_v3, %v266_v0  ;;  %v386_v3 = vld [vmem:[%s11124_s0 + $0xb98] sm:$0xff] }
 0x37a   :  { %6230 = vmatmul.mubr.bf16.gmra.mrb[28].mxu0 %v7009_v15  ;;  %5081 = vmatprep.mubr.bf16.mxu1 %v7018_v16  ;;  %v7137_v15 = vcombine.low %v262_v4, %v270_v5  ;;  %v7146_v16 = vcombine.high %v274_v10, %v282_v11  ;;  %v394_v0 = vld [vmem:[%s11124_s0 + $0xbd8] sm:$0xff] }
 0x37b   :  { %6237 = vmatprep.mubr.bf16.mxu0 %v7026_v17  ;;  %v7154_v17 = vcombine.high %v278_v12, %v286_v13  ;;  %v390_v4 = vld [vmem:[%s11124_s0 + $0xbb8] sm:$0xff] }
 0x37c   :  { %v398_v5 = vld [vmem:[%s11124_s0 + $0xbf8] sm:$0xff] }
 0x381   :  { %5082 = vmatmul.mubr.bf16.gmra.mrb[32].mxu1 %v7017_v22  ;;  %v7145_v22 = vcombine.low %v274_v10, %v282_v11  ;;  %v402_v10 = vld [vmem:[%s11124_s0 + $0xc18] sm:$0xff] }
 0x382   :  { %6238 = vmatmul.mubr.bf16.gmra.mrb[32].mxu0 %v7025_v23  ;;  %5089 = vmatprep.mubr.bf16.mxu1 %v7034_v24  ;;  %v7153_v23 = vcombine.low %v278_v12, %v286_v13  ;;  %v7162_v24 = vcombine.high %v290_v18, %v298_v19  ;;  %v410_v11 = vld [vmem:[%s11124_s0 + $0xc58] sm:$0xff] }
 0x383   :  { %6245 = vmatprep.mubr.bf16.mxu0 %v7042_v25  ;;  %v7170_v25 = vcombine.high %v294_v20, %v302_v21  ;;  %v406_v12 = vld [vmem:[%s11124_s0 + $0xc38] sm:$0xff] }
 0x384   :  { %v414_v13 = vld [vmem:[%s11124_s0 + $0xc78] sm:$0xff] }
 0x389   :  { %5090 = vmatmul.mubr.bf16.gmra.mrb[36].mxu1 %v7033_v30  ;;  %v7161_v30 = vcombine.low %v290_v18, %v298_v19  ;;  %v418_v18 = vld [vmem:[%s11124_s0 + $0xc98] sm:$0xff] }
 0x38a   :  { %6246 = vmatmul.mubr.bf16.gmra.mrb[36].mxu0 %v7041_v31  ;;  %5097 = vmatprep.mubr.bf16.mxu1 %v7050_v32  ;;  %v7169_v31 = vcombine.low %v294_v20, %v302_v21  ;;  %v7178_v32 = vcombine.high %v306_v26, %v314_v27  ;;  %v426_v19 = vld [vmem:[%s11124_s0 + $0xcd8] sm:$0xff] }
 0x38b   :  { %6253 = vmatprep.mubr.bf16.mxu0 %v7058_v33  ;;  %v7186_v33 = vcombine.high %v310_v28, %v318_v29  ;;  %v422_v20 = vld [vmem:[%s11124_s0 + $0xcb8] sm:$0xff] }
 0x38c   :  { %v430_v21 = vld [vmem:[%s11124_s0 + $0xcf8] sm:$0xff] }
 0x391   :  { %5098 = vmatmul.mubr.bf16.gmra.mrb[40].mxu1 %v7049_v38  ;;  %v7177_v38 = vcombine.low %v306_v26, %v314_v27  ;;  %v434_v26 = vld [vmem:[%s11124_s0 + $0xd18] sm:$0xff] }
 0x392   :  { %6254 = vmatmul.mubr.bf16.gmra.mrb[40].mxu0 %v7057_v39  ;;  %5105 = vmatprep.mubr.bf16.mxu1 %v7066_v40  ;;  %v7185_v39 = vcombine.low %v310_v28, %v318_v29  ;;  %v7194_v40 = vcombine.high %v322_v34, %v330_v35  ;;  %v442_v27 = vld [vmem:[%s11124_s0 + $0xd58] sm:$0xff] }
 0x393   :  { %6261 = vmatprep.mubr.bf16.mxu0 %v7074_v41  ;;  %v7202_v41 = vcombine.high %v326_v36, %v334_v37  ;;  %v438_v28 = vld [vmem:[%s11124_s0 + $0xd38] sm:$0xff] }
 0x394   :  { %v446_v29 = vld [vmem:[%s11124_s0 + $0xd78] sm:$0xff] }
 0x399   :  { %5106 = vmatmul.mubr.bf16.gmra.mrb[44].mxu1 %v7065_v46  ;;  %v7193_v46 = vcombine.low %v322_v34, %v330_v35  ;;  %v450_v34 = vld [vmem:[%s11124_s0 + $0xd98] sm:$0xff] }
 0x39a   :  { %6262 = vmatmul.mubr.bf16.gmra.mrb[44].mxu0 %v7073_v47  ;;  %5113 = vmatprep.mubr.bf16.mxu1 %v7082_v48  ;;  %v7201_v47 = vcombine.low %v326_v36, %v334_v37  ;;  %v7210_v48 = vcombine.high %v338_v42, %v346_v43  ;;  %v458_v35 = vld [vmem:[%s11124_s0 + $0xdd8] sm:$0xff] }
 0x39b   :  { %6269 = vmatprep.mubr.bf16.mxu0 %v7090_v49  ;;  %v7218_v49 = vcombine.high %v342_v44, %v350_v45  ;;  %v454_v36 = vld [vmem:[%s11124_s0 + $0xdb8] sm:$0xff] }
 0x39c   :  { %v462_v37 = vld [vmem:[%s11124_s0 + $0xdf8] sm:$0xff] }
 0x3a1   :  { %5114 = vmatmul.mubr.bf16.gmra.mrb[48].mxu1 %v7081_v54  ;;  %v7209_v54 = vcombine.low %v338_v42, %v346_v43  ;;  %v10908_v42 = vld [vmem:[%s11125_s2] ss:$0 sm:$0xff]  ;;  %v466_v43 = vld [vmem:[%s11124_s0 + $0xe18] sm:$0xff] }
 0x3a2   :  { %6270 = vmatmul.mubr.bf16.gmra.mrb[48].mxu0 %v7089_v55  ;;  %5121 = vmatprep.mubr.bf16.mxu1 %v7098_v56  ;;  %v7217_v55 = vcombine.low %v342_v44, %v350_v45  ;;  %v7226_v56 = vcombine.high %v354_v50, %v362_v51  ;;  %v474_v44 = vld [vmem:[%s11124_s0 + $0xe58] sm:$0xff] }
 0x3a3   :  { %6277 = vmatprep.mubr.bf16.mxu0 %v7106_v57  ;;  %v7234_v57 = vcombine.high %v358_v52, %v366_v53 }
 0x3a9   :  { %5122 = vmatmul.mubr.bf16.gmra.mrb[52].mxu1 %v7097_v62  ;;  %v7225_v62 = vcombine.low %v354_v50, %v362_v51  ;;  %v7321_v51 = vcombine.low %v450_v34, %v458_v35 }
 0x3aa   :  { %6278 = vmatmul.mubr.bf16.gmra.mrb[52].mxu0 %v7105_v63  ;;  %5129 = vmatprep.mubr.bf16.mxu1 %v7114_v1  ;;  %v7233_v63 = vcombine.low %v358_v52, %v366_v53  ;;  %v7242_v1 = vcombine.high %v370_v58, %v378_v59 }
 0x3ab   :  { %6285 = vmatprep.mubr.bf16.mxu0 %v7122_v2  ;;  %v7250_v2 = vcombine.high %v374_v60, %v382_v61 }
 0x3b1   :  { %5130 = vmatmul.mubr.bf16.gmra.mrb[56].mxu1 %v7113_v6  ;;  %v7241_v6 = vcombine.low %v370_v58, %v378_v59 }
 0x3b2   :  { %6286 = vmatmul.mubr.bf16.gmra.mrb[56].mxu0 %v7121_v7  ;;  %5137 = vmatprep.mubr.bf16.mxu1 %v7130_v8  ;;  %v7249_v7 = vcombine.low %v374_v60, %v382_v61  ;;  %v7258_v8 = vcombine.high %v386_v3, %v394_v0 }
 0x3b3   :  { %6293 = vmatprep.mubr.bf16.mxu0 %v7138_v9  ;;  %v7266_v9 = vcombine.high %v390_v4, %v398_v5 }
 0x3b9   :  { %5138 = vmatmul.mubr.bf16.gmra.mrb[60].mxu1 %v7129_v14  ;;  %v7257_v14 = vcombine.low %v386_v3, %v394_v0  ;;  %v490_v3 = vld [vmem:[%s11124_s0 + $0xed8] sm:$0xff] }
 0x3ba   :  { %6294 = vmatmul.mubr.bf16.gmra.mrb[60].mxu0 %v7137_v15  ;;  %5145 = vmatprep.mubr.bf16.mxu1 %v7146_v16  ;;  %v7265_v15 = vcombine.low %v390_v4, %v398_v5  ;;  %v7274_v16 = vcombine.high %v402_v10, %v410_v11  ;;  %v486_v4 = vld [vmem:[%s11124_s0 + $0xeb8] sm:$0xff] }
 0x3bb   :  { %6301 = vmatprep.mubr.bf16.mxu0 %v7154_v17  ;;  %v7282_v17 = vcombine.high %v406_v12, %v414_v13  ;;  %v494_v5 = vld [vmem:[%s11124_s0 + $0xef8] sm:$0xff] }
 0x3c1   :  { %5146 = vmatmul.mubr.bf16.gmra.mrb[64].mxu1 %v7145_v22  ;;  %v7273_v22 = vcombine.low %v402_v10, %v410_v11  ;;  %v7337_v11 = vcombine.low %v466_v43, %v474_v44 }
 0x3c2   :  { %6302 = vmatmul.mubr.bf16.gmra.mrb[64].mxu0 %v7153_v23  ;;  %5153 = vmatprep.mubr.bf16.mxu1 %v7162_v24  ;;  %v7281_v23 = vcombine.low %v406_v12, %v414_v13  ;;  %v7290_v24 = vcombine.high %v418_v18, %v426_v19 }
 0x3c3   :  { %6309 = vmatprep.mubr.bf16.mxu0 %v7170_v25  ;;  %v7298_v25 = vcombine.high %v422_v20, %v430_v21 }
 0x3c9   :  { %5154 = vmatmul.mubr.bf16.gmra.mrb[68].mxu1 %v7161_v30  ;;  %v7289_v30 = vcombine.low %v418_v18, %v426_v19 }
 0x3ca   :  { %6310 = vmatmul.mubr.bf16.gmra.mrb[68].mxu0 %v7169_v31  ;;  %5161 = vmatprep.mubr.bf16.mxu1 %v7178_v32  ;;  %v7297_v31 = vcombine.low %v422_v20, %v430_v21  ;;  %v7306_v32 = vcombine.high %v434_v26, %v442_v27  ;;  %v7362_v21 = vcombine.high %v486_v4, %v494_v5 }
 0x3cb   :  { %6317 = vmatprep.mubr.bf16.mxu0 %v7186_v33  ;;  %v7314_v33 = vcombine.high %v438_v28, %v446_v29 }
 0x3d1   :  { %5162 = vmatmul.mubr.bf16.gmra.mrb[72].mxu1 %v7177_v38  ;;  %v7305_v38 = vcombine.low %v434_v26, %v442_v27  ;;  %v498_v26 = vld [vmem:[%s11124_s0 + $0xf18] sm:$0xff] }
 0x3d2   :  { %6318 = vmatmul.mubr.bf16.gmra.mrb[72].mxu0 %v7185_v39  ;;  %5169 = vmatprep.mubr.bf16.mxu1 %v7194_v40  ;;  %v7313_v39 = vcombine.low %v438_v28, %v446_v29  ;;  %v7322_v40 = vcombine.high %v450_v34, %v458_v35  ;;  %v506_v27 = vld [vmem:[%s11124_s0 + $0xf58] sm:$0xff] }
 0x3d3   :  { %6325 = vmatprep.mubr.bf16.mxu0 %v7202_v41  ;;  %v7330_v41 = vcombine.high %v454_v36, %v462_v37  ;;  %v502_v29 = vld [vmem:[%s11124_s0 + $0xf38] sm:$0xff] }
 0x3d9   :  { %5170 = vmatmul.mubr.bf16.gmra.mrb[76].mxu1 %v7193_v46  ;;  %v470_v46 = vld [vmem:[%s11124_s0 + $0xe38] sm:$0xff] }
 0x3da   :  { %6326 = vmatmul.mubr.bf16.gmra.mrb[76].mxu0 %v7201_v47  ;;  %5177 = vmatprep.mubr.bf16.mxu1 %v7210_v48  ;;  %v478_v47 = vld [vmem:[%s11124_s0 + $0xe78] sm:$0xff] }
 0x3db   :  { %6333 = vmatprep.mubr.bf16.mxu0 %v7218_v49  ;;  %v7346_v60 = vcombine.high %v470_v46, %v478_v47 }
 0x3e1   :  { %5178 = vmatmul.mubr.bf16.gmra.mrb[80].mxu1 %v7209_v54  ;;  %v7329_v54 = vcombine.low %v454_v36, %v462_v37 }
 0x3e2   :  { %6334 = vmatmul.mubr.bf16.gmra.mrb[80].mxu0 %v7217_v55  ;;  %5185 = vmatprep.mubr.bf16.mxu1 %v7226_v56  ;;  %v7338_v55 = vcombine.high %v466_v43, %v474_v44 }
 0x3e3   :  { %6341 = vmatprep.mubr.bf16.mxu0 %v7234_v57 }
 0x3e9   :  { %5186 = vmatmul.mubr.bf16.gmra.mrb[84].mxu1 %v7225_v62 }
 0x3ea   :  { %6342 = vmatmul.mubr.bf16.gmra.mrb[84].mxu0 %v7233_v63  ;;  %5193 = vmatprep.mubr.bf16.mxu1 %v7242_v1 }
 0x3eb   :  { %6349 = vmatprep.mubr.bf16.mxu0 %v7250_v2  ;;  %v482_v2 = vld [vmem:[%s11124_s0 + $0xe98] sm:$0xff] }
 0x3ec   :  { %v7353_v36 = vcombine.low %v482_v2, %v490_v3 }
 0x3f1   :  { %5194 = vmatmul.mubr.bf16.gmra.mrb[88].mxu1 %v7241_v6 }
 0x3f2   :  { %6350 = vmatmul.mubr.bf16.gmra.mrb[88].mxu0 %v7249_v7  ;;  %5201 = vmatprep.mubr.bf16.mxu1 %v7258_v8 }
 0x3f3   :  { %6357 = vmatprep.mubr.bf16.mxu0 %v7266_v9 }
 0x3f9   :  { %5202 = vmatmul.mubr.bf16.gmra.mrb[92].mxu1 %v7257_v14  ;;  %v7345_v14 = vcombine.low %v470_v46, %v478_v47 }
 0x3fa   :  { %6358 = vmatmul.mubr.bf16.gmra.mrb[92].mxu0 %v7265_v15  ;;  %5209 = vmatprep.mubr.bf16.mxu1 %v7274_v16  ;;  %v7354_v15 = vcombine.high %v482_v2, %v490_v3 }
 0x3fb   :  { %6365 = vmatprep.mubr.bf16.mxu0 %v7282_v17 }
 0x401   :  { %5210 = vmatmul.mubr.bf16.gmra.mrb[96].mxu1 %v7273_v22 }
 0x402   :  { %6366 = vmatmul.mubr.bf16.gmra.mrb[96].mxu0 %v7281_v23  ;;  %5217 = vmatprep.mubr.bf16.mxu1 %v7290_v24 }
 0x403   :  { %6373 = vmatprep.mubr.bf16.mxu0 %v7298_v25 }
 0x409   :  { %5218 = vmatmul.mubr.bf16.gmra.mrb[100].mxu1 %v7289_v30  ;;  %v510_v30 = vld [vmem:[%s11124_s0 + $0xf78] sm:$0xff] }
 0x40a   :  { %6374 = vmatmul.mubr.bf16.gmra.mrb[100].mxu0 %v7297_v31  ;;  %5225 = vmatprep.mubr.bf16.mxu1 %v7306_v32  ;;  %v7378_v47 = vcombine.high %v502_v29, %v510_v30  ;;  %v7377_v2 = vcombine.low %v502_v29, %v510_v30 }
 0x40b   :  { %6381 = vmatprep.mubr.bf16.mxu0 %v7314_v33 }
 0x411   :  { %5226 = vmatmul.mubr.bf16.gmra.mrb[104].mxu1 %v7305_v38 }
 0x412   :  { %6382 = vmatmul.mubr.bf16.gmra.mrb[104].mxu0 %v7313_v39  ;;  %5233 = vmatprep.mubr.bf16.mxu1 %v7322_v40  ;;  %v7361_v39 = vcombine.low %v486_v4, %v494_v5  ;;  %v7370_v40 = vcombine.high %v498_v26, %v506_v27 }
 0x413   :  { %6389 = vmatprep.mubr.bf16.mxu0 %v7330_v41 }
 0x414   :  { %v5019_v45 = vpop.f32.mrb[0].mxu1 }
 0x415   :  { %v7842_v48 = vadd.f32 %v10908_v42, %v5019_v45  ;;  %v6175_v49 = vpop.f32.mrb[0].mxu0  ;;  %v5021_v50 = vpop.f32.mrb[1].mxu1 }
 0x416   :  { %v6177_v52 = vpop.f32.mrb[1].mxu0  ;;  %v5022_v53 = vpop.f32.mrb[2].mxu1 }
 0x417   :  { %v7843_v56 = vadd.f32 %v7842_v48, %v6175_v49  ;;  %v7844_v57 = vadd.f32 %v10908_v42, %v5022_v53  ;;  %v6178_v58 = vpop.f32.mrb[2].mxu0  ;;  %v5024_v59 = vpop.f32.mrb[3].mxu1  ;;  %v514_v52 = vld [vmem:[%s11124_s0 + $0xf98] sm:$0xff] }
 0x418   :  { %v6180_v61 = vpop.f32.mrb[3].mxu0  ;;  %v522_v53 = vld [vmem:[%s11124_s0 + $0xfd8] sm:$0xff] }
 0x419   :  { %v6430_v62 = vmul.f32 0.2, %v7843_v56  ;;  %v7845_v63 = vadd.f32 %v7844_v57, %v6178_v58  ;;  %5234 = vmatmul.mubr.bf16.gmra.mrb[108].mxu1 %v7321_v51  ;;  %v7386_v3 = vcombine.high %v514_v52, %v522_v53 }
 0x41a   :  { %6390 = vmatmul.mubr.bf16.gmra.mrb[108].mxu0 %v7329_v54  ;;  %5241 = vmatprep.mubr.bf16.mxu1 %v7338_v55  ;;  %v518_v55 = vld [vmem:[%s11124_s0 + $0xfb8] sm:$0xff] }
 0x41b   :  { %v6431_v1 = vmul.f32 0.2, %v7845_v63  ;;  %6397 = vmatprep.mubr.bf16.mxu0 %v7346_v60  ;;  %v6494_v6 = vmax.f32 %v7843_v56, %v6430_v62  ;;  %v526_v56 = vld [vmem:[%s11124_s0 + $0xff8] sm:$0xff]  ;;  %v7369_v62 = vcombine.low %v498_v26, %v506_v27 }
 0x41c   :  { %v5027_v0 = vpop.f32.mrb[4].mxu1 }
 0x41d   :  { %v6495_v7 = vmax.f32 %v7845_v63, %v6431_v1  ;;  %v7846_v8 = vadd.f32 %v10908_v42, %v5027_v0  ;;  %v6183_v9 = vpop.f32.mrb[4].mxu0  ;;  %v5029_v10 = vpop.f32.mrb[5].mxu1 }
 0x41e   :  { %v6185_v12 = vpop.f32.mrb[5].mxu0  ;;  %v5030_v13 = vpop.f32.mrb[6].mxu1 }
 0x41f   :  { %v7654_v16 = vpack.c.bf16 %v6495_v7, %v6494_v6  ;;  %v7847_v17 = vadd.f32 %v7846_v8, %v6183_v9  ;;  %v7848_v18 = vadd.f32 %v10908_v42, %v5030_v13  ;;  %v6186_v19 = vpop.f32.mrb[6].mxu0  ;;  %v5032_v20 = vpop.f32.mrb[7].mxu1  ;;  %v7394_v8 = vcombine.high %v518_v55, %v526_v56 }
 0x420   :  { %v6188_v22 = vpop.f32.mrb[7].mxu0 }
 0x421   :  { %7655 = vst [vmem:[%s11126_s3] sm:$0xff] %v7654_v16   ;;  %v6432_v23 = vmul.f32 0.2, %v7847_v17  ;;  %v7849_v24 = vadd.f32 %v7848_v18, %v6186_v19  ;;  %5242 = vmatmul.mubr.bf16.gmra.mrb[112].mxu1 %v7337_v11  ;;  %v7385_v19 = vcombine.low %v514_v52, %v522_v53  ;;  %v7393_v22 = vcombine.low %v518_v55, %v526_v56 }
 0x422   :  { %6398 = vmatmul.mubr.bf16.gmra.mrb[112].mxu0 %v7345_v14  ;;  %5249 = vmatprep.mubr.bf16.mxu1 %v7354_v15 }
 0x423   :  { %v6433_v25 = vmul.f32 0.2, %v7849_v24  ;;  %6405 = vmatprep.mubr.bf16.mxu0 %v7362_v21  ;;  %v6496_v31 = vmax.f32 %v7847_v17, %v6432_v23 }
 0x424   :  { %v5035_v28 = vpop.f32.mrb[8].mxu1 }
 0x425   :  { %v6497_v32 = vmax.f32 %v7849_v24, %v6433_v25  ;;  %v7850_v33 = vadd.f32 %v10908_v42, %v5035_v28  ;;  %v6191_v34 = vpop.f32.mrb[8].mxu0  ;;  %v5037_v35 = vpop.f32.mrb[9].mxu1 }
 0x426   :  { %v6193_v37 = vpop.f32.mrb[9].mxu0  ;;  %v5038_v38 = vpop.f32.mrb[10].mxu1 }
 0x427   :  { %v7659_v41 = vpack.c.bf16 %v6497_v32, %v6496_v31  ;;  %v7851_v43 = vadd.f32 %v7850_v33, %v6191_v34  ;;  %v7852_v44 = vadd.f32 %v10908_v42, %v5038_v38  ;;  %v6194_v45 = vpop.f32.mrb[10].mxu0  ;;  %v5040_v46 = vpop.f32.mrb[11].mxu1 }
 0x428   :  { %v6196_v48 = vpop.f32.mrb[11].mxu0 }
 0x429   :  { %7811 = vst [vmem:[%s11126_s3 + $0x8] sm:$0xff] %v7659_v41   ;;  %v6434_v49 = vmul.f32 0.2, %v7851_v43  ;;  %v7853_v50 = vadd.f32 %v7852_v44, %v6194_v45  ;;  %5250 = vmatmul.mubr.bf16.gmra.mrb[116].mxu1 %v7353_v36 }
 0x42a   :  { %6406 = vmatmul.mubr.bf16.gmra.mrb[116].mxu0 %v7361_v39  ;;  %5257 = vmatprep.mubr.bf16.mxu1 %v7370_v40 }
 0x42b   :  { %v6435_v51 = vmul.f32 0.2, %v7853_v50  ;;  %6413 = vmatprep.mubr.bf16.mxu0 %v7378_v47  ;;  %v6498_v57 = vmax.f32 %v7851_v43, %v6434_v49 }
 0x42c   :  { %v5043_v54 = vpop.f32.mrb[12].mxu1 }
 0x42d   :  { %v6499_v58 = vmax.f32 %v7853_v50, %v6435_v51  ;;  %v7854_v59 = vadd.f32 %v10908_v42, %v5043_v54  ;;  %v6199_v60 = vpop.f32.mrb[12].mxu0  ;;  %v5045_v61 = vpop.f32.mrb[13].mxu1 }
 0x42e   :  { %v6201_v63 = vpop.f32.mrb[13].mxu0  ;;  %v5046_v1 = vpop.f32.mrb[14].mxu1 }
 0x42f   :  { %v7664_v0 = vpack.c.bf16 %v6499_v58, %v6498_v57  ;;  %v7855_v4 = vadd.f32 %v7854_v59, %v6199_v60  ;;  %v7856_v5 = vadd.f32 %v10908_v42, %v5046_v1  ;;  %v6202_v6 = vpop.f32.mrb[14].mxu0  ;;  %v5048_v7 = vpop.f32.mrb[15].mxu1 }
 0x430   :  { %v6204_v9 = vpop.f32.mrb[15].mxu0 }
 0x431   :  { %7812 = vst [vmem:[%s11126_s3 + $0x10] sm:$0xff] %v7664_v0   ;;  %v6436_v10 = vmul.f32 0.2, %v7855_v4  ;;  %v7857_v11 = vadd.f32 %v7856_v5, %v6202_v6  ;;  %5258 = vmatmul.mubr.bf16.gmra.mrb[120].mxu1 %v7369_v62 }
 0x432   :  { %6414 = vmatmul.mubr.bf16.gmra.mrb[120].mxu0 %v7377_v2  ;;  %5265 = vmatprep.mubr.bf16.mxu1 %v7386_v3 }
 0x433   :  { %v6437_v12 = vmul.f32 0.2, %v7857_v11  ;;  %6421 = vmatprep.mubr.bf16.mxu0 %v7394_v8  ;;  %v6500_v14 = vmax.f32 %v7855_v4, %v6436_v10 }
 0x434   :  { %v5051_v13 = vpop.f32.mrb[16].mxu1 }
 0x435   :  { %v6501_v15 = vmax.f32 %v7857_v11, %v6437_v12  ;;  %v7858_v16 = vadd.f32 %v10908_v42, %v5051_v13  ;;  %v6207_v17 = vpop.f32.mrb[16].mxu0  ;;  %v5053_v18 = vpop.f32.mrb[17].mxu1 }
 0x436   :  { %v6209_v20 = vpop.f32.mrb[17].mxu0  ;;  %v5054_v21 = vpop.f32.mrb[18].mxu1 }
 0x437   :  { %v7669_v23 = vpack.c.bf16 %v6501_v15, %v6500_v14  ;;  %v7859_v24 = vadd.f32 %v7858_v16, %v6207_v17  ;;  %v7860_v25 = vadd.f32 %v10908_v42, %v5054_v21  ;;  %v6210_v26 = vpop.f32.mrb[18].mxu0  ;;  %v5056_v27 = vpop.f32.mrb[19].mxu1 }
 0x438   :  { %v6212_v28 = vpop.f32.mrb[19].mxu0 }
 0x439   :  { %7813 = vst [vmem:[%s11126_s3 + $0x18] sm:$0xff] %v7669_v23   ;;  %v6438_v29 = vmul.f32 0.2, %v7859_v24  ;;  %v7861_v30 = vadd.f32 %v7860_v25, %v6210_v26  ;;  %5266 = vmatmul.mubr.bf16.gmra.mrb[124].mxu1 %v7385_v19 }
 0x43a   :  { %6422 = vmatmul.mubr.bf16.gmra.mrb[124].mxu0 %v7393_v22 }
 0x43b   :  { %v6439_v31 = vmul.f32 0.2, %v7861_v30  ;;  %v6502_v33 = vmax.f32 %v7859_v24, %v6438_v29 }
 0x43c   :  { %v5059_v32 = vpop.f32.mrb[20].mxu1 }
 0x43d   :  { %v6503_v34 = vmax.f32 %v7861_v30, %v6439_v31  ;;  %v7862_v35 = vadd.f32 %v10908_v42, %v5059_v32  ;;  %v6215_v36 = vpop.f32.mrb[20].mxu0  ;;  %v5061_v37 = vpop.f32.mrb[21].mxu1 }
 0x43e   :  { %v6217_v38 = vpop.f32.mrb[21].mxu0  ;;  %v5062_v39 = vpop.f32.mrb[22].mxu1 }
 0x43f   :  { %v7674_v40 = vpack.c.bf16 %v6503_v34, %v6502_v33  ;;  %v7863_v41 = vadd.f32 %v7862_v35, %v6215_v36  ;;  %v7864_v43 = vadd.f32 %v10908_v42, %v5062_v39  ;;  %v6218_v44 = vpop.f32.mrb[22].mxu0  ;;  %v5064_v45 = vpop.f32.mrb[23].mxu1 }
 0x440   :  { %v6220_v46 = vpop.f32.mrb[23].mxu0 }
 0x441   :  { %7814 = vst [vmem:[%s11126_s3 + $0x20] sm:$0xff] %v7674_v40   ;;  %v6440_v47 = vmul.f32 0.2, %v7863_v41  ;;  %v7865_v48 = vadd.f32 %v7864_v43, %v6218_v44 }
 0x443   :  { %v6441_v49 = vmul.f32 0.2, %v7865_v48  ;;  %v6504_v51 = vmax.f32 %v7863_v41, %v6440_v47 }
 0x444   :  { %v5067_v50 = vpop.f32.mrb[24].mxu1 }
 0x445   :  { %v6505_v52 = vmax.f32 %v7865_v48, %v6441_v49  ;;  %v7866_v53 = vadd.f32 %v10908_v42, %v5067_v50  ;;  %v6223_v54 = vpop.f32.mrb[24].mxu0  ;;  %v5069_v55 = vpop.f32.mrb[25].mxu1 }
 0x446   :  { %v6225_v56 = vpop.f32.mrb[25].mxu0  ;;  %v5070_v57 = vpop.f32.mrb[26].mxu1 }
 0x447   :  { %v7679_v58 = vpack.c.bf16 %v6505_v52, %v6504_v51  ;;  %v7867_v59 = vadd.f32 %v7866_v53, %v6223_v54  ;;  %v7868_v60 = vadd.f32 %v10908_v42, %v5070_v57  ;;  %v6226_v61 = vpop.f32.mrb[26].mxu0  ;;  %v5072_v62 = vpop.f32.mrb[27].mxu1 }
 0x448   :  { %v6228_v63 = vpop.f32.mrb[27].mxu0 }
 0x449   :  { %7815 = vst [vmem:[%s11126_s3 + $0x28] sm:$0xff] %v7679_v58   ;;  %v6442_v1 = vmul.f32 0.2, %v7867_v59  ;;  %v7869_v2 = vadd.f32 %v7868_v60, %v6226_v61 }
 0x44b   :  { %v6443_v3 = vmul.f32 0.2, %v7869_v2  ;;  %v6506_v4 = vmax.f32 %v7867_v59, %v6442_v1 }
 0x44c   :  { %v5075_v0 = vpop.f32.mrb[28].mxu1 }
 0x44d   :  { %v6507_v5 = vmax.f32 %v7869_v2, %v6443_v3  ;;  %v7870_v6 = vadd.f32 %v10908_v42, %v5075_v0  ;;  %v6231_v7 = vpop.f32.mrb[28].mxu0  ;;  %v5077_v8 = vpop.f32.mrb[29].mxu1 }
 0x44e   :  { %v6233_v9 = vpop.f32.mrb[29].mxu0  ;;  %v5078_v10 = vpop.f32.mrb[30].mxu1 }
 0x44f   :  { %v7684_v11 = vpack.c.bf16 %v6507_v5, %v6506_v4  ;;  %v7871_v12 = vadd.f32 %v7870_v6, %v6231_v7  ;;  %v7872_v13 = vadd.f32 %v10908_v42, %v5078_v10  ;;  %v6234_v14 = vpop.f32.mrb[30].mxu0  ;;  %v5080_v15 = vpop.f32.mrb[31].mxu1 }
 0x450   :  { %v6236_v16 = vpop.f32.mrb[31].mxu0 }
 0x451   :  { %7816 = vst [vmem:[%s11126_s3 + $0x30] sm:$0xff] %v7684_v11   ;;  %v6444_v17 = vmul.f32 0.2, %v7871_v12  ;;  %v7873_v18 = vadd.f32 %v7872_v13, %v6234_v14 }
 0x453   :  { %v6445_v19 = vmul.f32 0.2, %v7873_v18  ;;  %v6508_v21 = vmax.f32 %v7871_v12, %v6444_v17 }
 0x454   :  { %v5083_v20 = vpop.f32.mrb[32].mxu1 }
 0x455   :  { %v6509_v22 = vmax.f32 %v7873_v18, %v6445_v19  ;;  %v7874_v23 = vadd.f32 %v10908_v42, %v5083_v20  ;;  %v6239_v24 = vpop.f32.mrb[32].mxu0  ;;  %v5085_v25 = vpop.f32.mrb[33].mxu1 }
 0x456   :  { %v6241_v26 = vpop.f32.mrb[33].mxu0  ;;  %v5086_v27 = vpop.f32.mrb[34].mxu1 }
 0x457   :  { %v7689_v28 = vpack.c.bf16 %v6509_v22, %v6508_v21  ;;  %v7875_v29 = vadd.f32 %v7874_v23, %v6239_v24  ;;  %v7876_v30 = vadd.f32 %v10908_v42, %v5086_v27  ;;  %v6242_v31 = vpop.f32.mrb[34].mxu0  ;;  %v5088_v32 = vpop.f32.mrb[35].mxu1 }
 0x458   :  { %v6244_v33 = vpop.f32.mrb[35].mxu0 }
 0x459   :  { %7817 = vst [vmem:[%s11126_s3 + $0x38] sm:$0xff] %v7689_v28   ;;  %v6446_v34 = vmul.f32 0.2, %v7875_v29  ;;  %v7877_v35 = vadd.f32 %v7876_v30, %v6242_v31 }
 0x45b   :  { %v6447_v36 = vmul.f32 0.2, %v7877_v35  ;;  %v6510_v38 = vmax.f32 %v7875_v29, %v6446_v34 }
 0x45c   :  { %v5091_v37 = vpop.f32.mrb[36].mxu1 }
 0x45d   :  { %v6511_v39 = vmax.f32 %v7877_v35, %v6447_v36  ;;  %v7878_v40 = vadd.f32 %v10908_v42, %v5091_v37  ;;  %v6247_v41 = vpop.f32.mrb[36].mxu0  ;;  %v5093_v43 = vpop.f32.mrb[37].mxu1 }
 0x45e   :  { %v6249_v44 = vpop.f32.mrb[37].mxu0  ;;  %v5094_v45 = vpop.f32.mrb[38].mxu1 }
 0x45f   :  { %v7694_v46 = vpack.c.bf16 %v6511_v39, %v6510_v38  ;;  %v7879_v47 = vadd.f32 %v7878_v40, %v6247_v41  ;;  %v7880_v48 = vadd.f32 %v10908_v42, %v5094_v45  ;;  %v6250_v49 = vpop.f32.mrb[38].mxu0  ;;  %v5096_v50 = vpop.f32.mrb[39].mxu1 }
 0x460   :  { %v6252_v51 = vpop.f32.mrb[39].mxu0 }
 0x461   :  { %7818 = vst [vmem:[%s11126_s3 + $0x40] sm:$0xff] %v7694_v46   ;;  %v6448_v52 = vmul.f32 0.2, %v7879_v47  ;;  %v7881_v53 = vadd.f32 %v7880_v48, %v6250_v49 }
 0x463   :  { %v6449_v54 = vmul.f32 0.2, %v7881_v53  ;;  %v6512_v56 = vmax.f32 %v7879_v47, %v6448_v52 }
 0x464   :  { %v5099_v55 = vpop.f32.mrb[40].mxu1 }
 0x465   :  { %v6513_v57 = vmax.f32 %v7881_v53, %v6449_v54  ;;  %v7882_v58 = vadd.f32 %v10908_v42, %v5099_v55  ;;  %v6255_v59 = vpop.f32.mrb[40].mxu0  ;;  %v5101_v60 = vpop.f32.mrb[41].mxu1 }
 0x466   :  { %v6257_v61 = vpop.f32.mrb[41].mxu0  ;;  %v5102_v62 = vpop.f32.mrb[42].mxu1 }
 0x467   :  { %v7699_v63 = vpack.c.bf16 %v6513_v57, %v6512_v56  ;;  %v7883_v1 = vadd.f32 %v7882_v58, %v6255_v59  ;;  %v7884_v2 = vadd.f32 %v10908_v42, %v5102_v62  ;;  %v6258_v3 = vpop.f32.mrb[42].mxu0  ;;  %v5104_v0 = vpop.f32.mrb[43].mxu1 }
 0x468   :  { %v6260_v4 = vpop.f32.mrb[43].mxu0 }
 0x469   :  { %7819 = vst [vmem:[%s11126_s3 + $0x48] sm:$0xff] %v7699_v63   ;;  %v6450_v5 = vmul.f32 0.2, %v7883_v1  ;;  %v7885_v6 = vadd.f32 %v7884_v2, %v6258_v3 }
 0x46b   :  { %v6451_v7 = vmul.f32 0.2, %v7885_v6  ;;  %v6514_v9 = vmax.f32 %v7883_v1, %v6450_v5 }
 0x46c   :  { %v5107_v8 = vpop.f32.mrb[44].mxu1 }
 0x46d   :  { %v6515_v10 = vmax.f32 %v7885_v6, %v6451_v7  ;;  %v7886_v11 = vadd.f32 %v10908_v42, %v5107_v8  ;;  %v6263_v12 = vpop.f32.mrb[44].mxu0  ;;  %v5109_v13 = vpop.f32.mrb[45].mxu1 }
 0x46e   :  { %v6265_v14 = vpop.f32.mrb[45].mxu0  ;;  %v5110_v15 = vpop.f32.mrb[46].mxu1 }
 0x46f   :  { %v7704_v16 = vpack.c.bf16 %v6515_v10, %v6514_v9  ;;  %v7887_v17 = vadd.f32 %v7886_v11, %v6263_v12  ;;  %v7888_v18 = vadd.f32 %v10908_v42, %v5110_v15  ;;  %v6266_v19 = vpop.f32.mrb[46].mxu0  ;;  %v5112_v20 = vpop.f32.mrb[47].mxu1 }
 0x470   :  { %v6268_v21 = vpop.f32.mrb[47].mxu0 }
 0x471   :  { %7820 = vst [vmem:[%s11126_s3 + $0x50] sm:$0xff] %v7704_v16   ;;  %v6452_v22 = vmul.f32 0.2, %v7887_v17  ;;  %v7889_v23 = vadd.f32 %v7888_v18, %v6266_v19 }
 0x473   :  { %v6453_v24 = vmul.f32 0.2, %v7889_v23  ;;  %v6516_v26 = vmax.f32 %v7887_v17, %v6452_v22 }
 0x474   :  { %v5115_v25 = vpop.f32.mrb[48].mxu1 }
 0x475   :  { %v6517_v27 = vmax.f32 %v7889_v23, %v6453_v24  ;;  %v7890_v28 = vadd.f32 %v10908_v42, %v5115_v25  ;;  %v6271_v29 = vpop.f32.mrb[48].mxu0  ;;  %v5117_v30 = vpop.f32.mrb[49].mxu1 }
 0x476   :  { %v6273_v31 = vpop.f32.mrb[49].mxu0  ;;  %v5118_v32 = vpop.f32.mrb[50].mxu1 }
 0x477   :  { %v7709_v33 = vpack.c.bf16 %v6517_v27, %v6516_v26  ;;  %v7891_v34 = vadd.f32 %v7890_v28, %v6271_v29  ;;  %v7892_v35 = vadd.f32 %v10908_v42, %v5118_v32  ;;  %v6274_v36 = vpop.f32.mrb[50].mxu0  ;;  %v5120_v37 = vpop.f32.mrb[51].mxu1 }
 0x478   :  { %v6276_v38 = vpop.f32.mrb[51].mxu0 }
 0x479   :  { %7821 = vst [vmem:[%s11126_s3 + $0x58] sm:$0xff] %v7709_v33   ;;  %v6454_v39 = vmul.f32 0.2, %v7891_v34  ;;  %v7893_v40 = vadd.f32 %v7892_v35, %v6274_v36 }
 0x47b   :  { %v6455_v41 = vmul.f32 0.2, %v7893_v40  ;;  %v6518_v44 = vmax.f32 %v7891_v34, %v6454_v39 }
 0x47c   :  { %v5123_v43 = vpop.f32.mrb[52].mxu1 }
 0x47d   :  { %v6519_v45 = vmax.f32 %v7893_v40, %v6455_v41  ;;  %v7894_v46 = vadd.f32 %v10908_v42, %v5123_v43  ;;  %v6279_v47 = vpop.f32.mrb[52].mxu0  ;;  %v5125_v48 = vpop.f32.mrb[53].mxu1 }
 0x47e   :  { %v6281_v49 = vpop.f32.mrb[53].mxu0  ;;  %v5126_v50 = vpop.f32.mrb[54].mxu1 }
 0x47f   :  { %v7714_v51 = vpack.c.bf16 %v6519_v45, %v6518_v44  ;;  %v7895_v52 = vadd.f32 %v7894_v46, %v6279_v47  ;;  %v7896_v53 = vadd.f32 %v10908_v42, %v5126_v50  ;;  %v6282_v54 = vpop.f32.mrb[54].mxu0  ;;  %v5128_v55 = vpop.f32.mrb[55].mxu1 }
 0x480   :  { %v6284_v56 = vpop.f32.mrb[55].mxu0 }
 0x481   :  { %7822 = vst [vmem:[%s11126_s3 + $0x60] sm:$0xff] %v7714_v51   ;;  %v6456_v57 = vmul.f32 0.2, %v7895_v52  ;;  %v7897_v58 = vadd.f32 %v7896_v53, %v6282_v54 }
 0x483   :  { %v6457_v59 = vmul.f32 0.2, %v7897_v58  ;;  %v6520_v61 = vmax.f32 %v7895_v52, %v6456_v57 }
 0x484   :  { %v5131_v60 = vpop.f32.mrb[56].mxu1 }
 0x485   :  { %v6521_v62 = vmax.f32 %v7897_v58, %v6457_v59  ;;  %v7898_v63 = vadd.f32 %v10908_v42, %v5131_v60  ;;  %v6287_v1 = vpop.f32.mrb[56].mxu0  ;;  %v5133_v2 = vpop.f32.mrb[57].mxu1 }
 0x486   :  { %v6289_v3 = vpop.f32.mrb[57].mxu0  ;;  %v5134_v0 = vpop.f32.mrb[58].mxu1 }
 0x487   :  { %v7719_v4 = vpack.c.bf16 %v6521_v62, %v6520_v61  ;;  %v7899_v5 = vadd.f32 %v7898_v63, %v6287_v1  ;;  %v7900_v6 = vadd.f32 %v10908_v42, %v5134_v0  ;;  %v6290_v7 = vpop.f32.mrb[58].mxu0  ;;  %v5136_v8 = vpop.f32.mrb[59].mxu1 }
 0x488   :  { %v6292_v9 = vpop.f32.mrb[59].mxu0 }
 0x489   :  { %7823 = vst [vmem:[%s11126_s3 + $0x68] sm:$0xff] %v7719_v4   ;;  %v6458_v10 = vmul.f32 0.2, %v7899_v5  ;;  %v7901_v11 = vadd.f32 %v7900_v6, %v6290_v7 }
 0x48b   :  { %v6459_v12 = vmul.f32 0.2, %v7901_v11  ;;  %v6522_v14 = vmax.f32 %v7899_v5, %v6458_v10 }
 0x48c   :  { %v5139_v13 = vpop.f32.mrb[60].mxu1 }
 0x48d   :  { %v6523_v15 = vmax.f32 %v7901_v11, %v6459_v12  ;;  %v7902_v16 = vadd.f32 %v10908_v42, %v5139_v13  ;;  %v6295_v17 = vpop.f32.mrb[60].mxu0  ;;  %v5141_v18 = vpop.f32.mrb[61].mxu1 }
 0x48e   :  { %v6297_v19 = vpop.f32.mrb[61].mxu0  ;;  %v5142_v20 = vpop.f32.mrb[62].mxu1 }
 0x48f   :  { %v7724_v21 = vpack.c.bf16 %v6523_v15, %v6522_v14  ;;  %v7903_v22 = vadd.f32 %v7902_v16, %v6295_v17  ;;  %v7904_v23 = vadd.f32 %v10908_v42, %v5142_v20  ;;  %v6298_v24 = vpop.f32.mrb[62].mxu0  ;;  %v5144_v25 = vpop.f32.mrb[63].mxu1 }
 0x490   :  { %v6300_v26 = vpop.f32.mrb[63].mxu0 }
 0x491   :  { %7824 = vst [vmem:[%s11126_s3 + $0x70] sm:$0xff] %v7724_v21   ;;  %v6460_v27 = vmul.f32 0.2, %v7903_v22  ;;  %v7905_v28 = vadd.f32 %v7904_v23, %v6298_v24 }
 0x493   :  { %v6461_v29 = vmul.f32 0.2, %v7905_v28  ;;  %v6524_v31 = vmax.f32 %v7903_v22, %v6460_v27 }
 0x494   :  { %v5147_v30 = vpop.f32.mrb[64].mxu1 }
 0x495   :  { %v6525_v32 = vmax.f32 %v7905_v28, %v6461_v29  ;;  %v7906_v33 = vadd.f32 %v10908_v42, %v5147_v30  ;;  %v6303_v34 = vpop.f32.mrb[64].mxu0  ;;  %v5149_v35 = vpop.f32.mrb[65].mxu1 }
 0x496   :  { %v6305_v36 = vpop.f32.mrb[65].mxu0  ;;  %v5150_v37 = vpop.f32.mrb[66].mxu1 }
 0x497   :  { %v7729_v38 = vpack.c.bf16 %v6525_v32, %v6524_v31  ;;  %v7907_v39 = vadd.f32 %v7906_v33, %v6303_v34  ;;  %v7908_v40 = vadd.f32 %v10908_v42, %v5150_v37  ;;  %v6306_v41 = vpop.f32.mrb[66].mxu0  ;;  %v5152_v43 = vpop.f32.mrb[67].mxu1 }
 0x498   :  { %v6308_v44 = vpop.f32.mrb[67].mxu0 }
 0x499   :  { %7825 = vst [vmem:[%s11126_s3 + $0x78] sm:$0xff] %v7729_v38   ;;  %v6462_v45 = vmul.f32 0.2, %v7907_v39  ;;  %v7909_v46 = vadd.f32 %v7908_v40, %v6306_v41 }
 0x49b   :  { %v6463_v47 = vmul.f32 0.2, %v7909_v46  ;;  %v6526_v49 = vmax.f32 %v7907_v39, %v6462_v45 }
 0x49c   :  { %v5155_v48 = vpop.f32.mrb[68].mxu1 }
 0x49d   :  { %v6527_v50 = vmax.f32 %v7909_v46, %v6463_v47  ;;  %v7910_v51 = vadd.f32 %v10908_v42, %v5155_v48  ;;  %v6311_v52 = vpop.f32.mrb[68].mxu0  ;;  %v5157_v53 = vpop.f32.mrb[69].mxu1 }
 0x49e   :  { %v6313_v54 = vpop.f32.mrb[69].mxu0  ;;  %v5158_v55 = vpop.f32.mrb[70].mxu1 }
 0x49f   :  { %v7734_v56 = vpack.c.bf16 %v6527_v50, %v6526_v49  ;;  %v7911_v57 = vadd.f32 %v7910_v51, %v6311_v52  ;;  %v7912_v58 = vadd.f32 %v10908_v42, %v5158_v55  ;;  %v6314_v59 = vpop.f32.mrb[70].mxu0  ;;  %v5160_v60 = vpop.f32.mrb[71].mxu1 }
 0x4a0   :  { %v6316_v61 = vpop.f32.mrb[71].mxu0 }
 0x4a1   :  { %7826 = vst [vmem:[%s11126_s3 + $0x80] sm:$0xff] %v7734_v56   ;;  %v6464_v62 = vmul.f32 0.2, %v7911_v57  ;;  %v7913_v63 = vadd.f32 %v7912_v58, %v6314_v59 }
 0x4a3   :  { %v6465_v1 = vmul.f32 0.2, %v7913_v63  ;;  %v6528_v3 = vmax.f32 %v7911_v57, %v6464_v62 }
 0x4a4   :  { %v5163_v2 = vpop.f32.mrb[72].mxu1 }
 0x4a5   :  { %v6529_v0 = vmax.f32 %v7913_v63, %v6465_v1  ;;  %v7914_v4 = vadd.f32 %v10908_v42, %v5163_v2  ;;  %v6319_v5 = vpop.f32.mrb[72].mxu0  ;;  %v5165_v6 = vpop.f32.mrb[73].mxu1 }
 0x4a6   :  { %v6321_v7 = vpop.f32.mrb[73].mxu0  ;;  %v5166_v8 = vpop.f32.mrb[74].mxu1 }
 0x4a7   :  { %v7739_v9 = vpack.c.bf16 %v6529_v0, %v6528_v3  ;;  %v7915_v10 = vadd.f32 %v7914_v4, %v6319_v5  ;;  %v7916_v11 = vadd.f32 %v10908_v42, %v5166_v8  ;;  %v6322_v12 = vpop.f32.mrb[74].mxu0  ;;  %v5168_v13 = vpop.f32.mrb[75].mxu1 }
 0x4a8   :  { %v6324_v14 = vpop.f32.mrb[75].mxu0 }
 0x4a9   :  { %7827 = vst [vmem:[%s11126_s3 + $0x88] sm:$0xff] %v7739_v9   ;;  %v6466_v15 = vmul.f32 0.2, %v7915_v10  ;;  %v7917_v16 = vadd.f32 %v7916_v11, %v6322_v12 }
 0x4ab   :  { %v6467_v17 = vmul.f32 0.2, %v7917_v16  ;;  %v6530_v19 = vmax.f32 %v7915_v10, %v6466_v15 }
 0x4ac   :  { %v5171_v18 = vpop.f32.mrb[76].mxu1 }
 0x4ad   :  { %v6531_v20 = vmax.f32 %v7917_v16, %v6467_v17  ;;  %v7918_v21 = vadd.f32 %v10908_v42, %v5171_v18  ;;  %v6327_v22 = vpop.f32.mrb[76].mxu0  ;;  %v5173_v23 = vpop.f32.mrb[77].mxu1 }
 0x4ae   :  { %v6329_v24 = vpop.f32.mrb[77].mxu0  ;;  %v5174_v25 = vpop.f32.mrb[78].mxu1 }
 0x4af   :  { %v7744_v26 = vpack.c.bf16 %v6531_v20, %v6530_v19  ;;  %v7919_v27 = vadd.f32 %v7918_v21, %v6327_v22  ;;  %v7920_v28 = vadd.f32 %v10908_v42, %v5174_v25  ;;  %v6330_v29 = vpop.f32.mrb[78].mxu0  ;;  %v5176_v30 = vpop.f32.mrb[79].mxu1 }
 0x4b0   :  { %v6332_v31 = vpop.f32.mrb[79].mxu0 }
 0x4b1   :  { %7828 = vst [vmem:[%s11126_s3 + $0x90] sm:$0xff] %v7744_v26   ;;  %v6468_v32 = vmul.f32 0.2, %v7919_v27  ;;  %v7921_v33 = vadd.f32 %v7920_v28, %v6330_v29 }
 0x4b3   :  { %v6469_v34 = vmul.f32 0.2, %v7921_v33  ;;  %v6532_v36 = vmax.f32 %v7919_v27, %v6468_v32 }
 0x4b4   :  { %v5179_v35 = vpop.f32.mrb[80].mxu1 }
 0x4b5   :  { %v6533_v37 = vmax.f32 %v7921_v33, %v6469_v34  ;;  %v7922_v38 = vadd.f32 %v10908_v42, %v5179_v35  ;;  %v6335_v39 = vpop.f32.mrb[80].mxu0  ;;  %v5181_v40 = vpop.f32.mrb[81].mxu1 }
 0x4b6   :  { %v6337_v41 = vpop.f32.mrb[81].mxu0  ;;  %v5182_v43 = vpop.f32.mrb[82].mxu1 }
 0x4b7   :  { %v7749_v44 = vpack.c.bf16 %v6533_v37, %v6532_v36  ;;  %v7923_v45 = vadd.f32 %v7922_v38, %v6335_v39  ;;  %v7924_v46 = vadd.f32 %v10908_v42, %v5182_v43  ;;  %v6338_v47 = vpop.f32.mrb[82].mxu0  ;;  %v5184_v48 = vpop.f32.mrb[83].mxu1 }
 0x4b8   :  { %v6340_v49 = vpop.f32.mrb[83].mxu0 }
 0x4b9   :  { %7829 = vst [vmem:[%s11126_s3 + $0x98] sm:$0xff] %v7749_v44   ;;  %v6470_v50 = vmul.f32 0.2, %v7923_v45  ;;  %v7925_v51 = vadd.f32 %v7924_v46, %v6338_v47 }
 0x4bb   :  { %v6471_v52 = vmul.f32 0.2, %v7925_v51  ;;  %v6534_v54 = vmax.f32 %v7923_v45, %v6470_v50 }
 0x4bc   :  { %v5187_v53 = vpop.f32.mrb[84].mxu1 }
 0x4bd   :  { %v6535_v55 = vmax.f32 %v7925_v51, %v6471_v52  ;;  %v7926_v56 = vadd.f32 %v10908_v42, %v5187_v53  ;;  %v6343_v57 = vpop.f32.mrb[84].mxu0  ;;  %v5189_v58 = vpop.f32.mrb[85].mxu1 }
 0x4be   :  { %v6345_v59 = vpop.f32.mrb[85].mxu0  ;;  %v5190_v60 = vpop.f32.mrb[86].mxu1 }
 0x4bf   :  { %v7754_v61 = vpack.c.bf16 %v6535_v55, %v6534_v54  ;;  %v7927_v62 = vadd.f32 %v7926_v56, %v6343_v57  ;;  %v7928_v63 = vadd.f32 %v10908_v42, %v5190_v60  ;;  %v6346_v1 = vpop.f32.mrb[86].mxu0  ;;  %v5192_v2 = vpop.f32.mrb[87].mxu1 }
 0x4c0   :  { %v6348_v3 = vpop.f32.mrb[87].mxu0 }
 0x4c1   :  { %7830 = vst [vmem:[%s11126_s3 + $0xa0] sm:$0xff] %v7754_v61   ;;  %v6472_v0 = vmul.f32 0.2, %v7927_v62  ;;  %v7929_v4 = vadd.f32 %v7928_v63, %v6346_v1 }
 0x4c3   :  { %v6473_v5 = vmul.f32 0.2, %v7929_v4  ;;  %v6536_v7 = vmax.f32 %v7927_v62, %v6472_v0 }
 0x4c4   :  { %v5195_v6 = vpop.f32.mrb[88].mxu1 }
 0x4c5   :  { %v6537_v8 = vmax.f32 %v7929_v4, %v6473_v5  ;;  %v7930_v9 = vadd.f32 %v10908_v42, %v5195_v6  ;;  %v6351_v10 = vpop.f32.mrb[88].mxu0  ;;  %v5197_v11 = vpop.f32.mrb[89].mxu1  ;;  %v11084_v4 = vld [vmem:[%s11125_s2] ss:$0 sm:$0xff] }
 0x4c6   :  { %v6353_v12 = vpop.f32.mrb[89].mxu0  ;;  %v5198_v13 = vpop.f32.mrb[90].mxu1 }
 0x4c7   :  { %v7759_v14 = vpack.c.bf16 %v6537_v8, %v6536_v7  ;;  %v7931_v15 = vadd.f32 %v7930_v9, %v6351_v10  ;;  %v7932_v16 = vadd.f32 %v10908_v42, %v5198_v13  ;;  %v6354_v17 = vpop.f32.mrb[90].mxu0  ;;  %v5200_v18 = vpop.f32.mrb[91].mxu1 }
 0x4c8   :  { %v6356_v19 = vpop.f32.mrb[91].mxu0 }
 0x4c9   :  { %7831 = vst [vmem:[%s11126_s3 + $0xa8] sm:$0xff] %v7759_v14   ;;  %v6474_v20 = vmul.f32 0.2, %v7931_v15  ;;  %v7933_v21 = vadd.f32 %v7932_v16, %v6354_v17 }
 0x4cb   :  { %v6475_v22 = vmul.f32 0.2, %v7933_v21  ;;  %v6538_v24 = vmax.f32 %v7931_v15, %v6474_v20 }
 0x4cc   :  { %v5203_v23 = vpop.f32.mrb[92].mxu1 }
 0x4cd   :  { %v6539_v25 = vmax.f32 %v7933_v21, %v6475_v22  ;;  %v7934_v26 = vadd.f32 %v10908_v42, %v5203_v23  ;;  %v6359_v27 = vpop.f32.mrb[92].mxu0  ;;  %v5205_v28 = vpop.f32.mrb[93].mxu1 }
 0x4ce   :  { %v6361_v29 = vpop.f32.mrb[93].mxu0  ;;  %v5206_v30 = vpop.f32.mrb[94].mxu1 }
 0x4cf   :  { %v7764_v31 = vpack.c.bf16 %v6539_v25, %v6538_v24  ;;  %v7935_v32 = vadd.f32 %v7934_v26, %v6359_v27  ;;  %v7936_v33 = vadd.f32 %v10908_v42, %v5206_v30  ;;  %v6362_v34 = vpop.f32.mrb[94].mxu0  ;;  %v5208_v35 = vpop.f32.mrb[95].mxu1 }
 0x4d0   :  { %v6364_v36 = vpop.f32.mrb[95].mxu0 }
 0x4d1   :  { %7832 = vst [vmem:[%s11126_s3 + $0xb0] sm:$0xff] %v7764_v31   ;;  %v6476_v37 = vmul.f32 0.2, %v7935_v32  ;;  %v7937_v38 = vadd.f32 %v7936_v33, %v6362_v34 }
 0x4d3   :  { %v6477_v39 = vmul.f32 0.2, %v7937_v38  ;;  %v6540_v41 = vmax.f32 %v7935_v32, %v6476_v37 }
 0x4d4   :  { %v5211_v40 = vpop.f32.mrb[96].mxu1 }
 0x4d5   :  { %v6541_v43 = vmax.f32 %v7937_v38, %v6477_v39  ;;  %v7938_v44 = vadd.f32 %v10908_v42, %v5211_v40  ;;  %v6367_v45 = vpop.f32.mrb[96].mxu0  ;;  %v5213_v46 = vpop.f32.mrb[97].mxu1 }
 0x4d6   :  { %v6369_v47 = vpop.f32.mrb[97].mxu0  ;;  %v5214_v48 = vpop.f32.mrb[98].mxu1 }
 0x4d7   :  { %v7769_v49 = vpack.c.bf16 %v6541_v43, %v6540_v41  ;;  %v7939_v50 = vadd.f32 %v7938_v44, %v6367_v45  ;;  %v7940_v51 = vadd.f32 %v10908_v42, %v5214_v48  ;;  %v6370_v52 = vpop.f32.mrb[98].mxu0  ;;  %v5216_v53 = vpop.f32.mrb[99].mxu1 }
 0x4d8   :  { %v6372_v54 = vpop.f32.mrb[99].mxu0 }
 0x4d9   :  { %7833 = vst [vmem:[%s11126_s3 + $0xb8] sm:$0xff] %v7769_v49   ;;  %v6478_v55 = vmul.f32 0.2, %v7939_v50  ;;  %v7941_v56 = vadd.f32 %v7940_v51, %v6370_v52 }
 0x4db   :  { %v6479_v57 = vmul.f32 0.2, %v7941_v56  ;;  %v6542_v59 = vmax.f32 %v7939_v50, %v6478_v55 }
 0x4dc   :  { %v5219_v58 = vpop.f32.mrb[100].mxu1 }
 0x4dd   :  { %v6543_v60 = vmax.f32 %v7941_v56, %v6479_v57  ;;  %v7942_v61 = vadd.f32 %v10908_v42, %v5219_v58  ;;  %v6375_v62 = vpop.f32.mrb[100].mxu0  ;;  %v5221_v63 = vpop.f32.mrb[101].mxu1 }
 0x4de   :  { %v6377_v1 = vpop.f32.mrb[101].mxu0  ;;  %v5222_v2 = vpop.f32.mrb[102].mxu1 }
 0x4df   :  { %v7774_v3 = vpack.c.bf16 %v6543_v60, %v6542_v59  ;;  %v7943_v0 = vadd.f32 %v7942_v61, %v6375_v62  ;;  %v7944_v5 = vadd.f32 %v11084_v4, %v5222_v2  ;;  %v6378_v6 = vpop.f32.mrb[102].mxu0  ;;  %v5224_v7 = vpop.f32.mrb[103].mxu1 }
 0x4e0   :  { %v6380_v8 = vpop.f32.mrb[103].mxu0 }
 0x4e1   :  { %7834 = vst [vmem:[%s11126_s3 + $0xc0] sm:$0xff] %v7774_v3   ;;  %v6480_v42 = vmul.f32 0.2, %v7943_v0  ;;  %v7945_v9 = vadd.f32 %v7944_v5, %v6378_v6 }
 0x4e3   :  { %v6481_v10 = vmul.f32 0.2, %v7945_v9  ;;  %v6544_v12 = vmax.f32 %v7943_v0, %v6480_v42 }
 0x4e4   :  { %v5227_v11 = vpop.f32.mrb[104].mxu1 }
 0x4e5   :  { %v6545_v13 = vmax.f32 %v7945_v9, %v6481_v10  ;;  %v7946_v14 = vadd.f32 %v11084_v4, %v5227_v11  ;;  %v6383_v15 = vpop.f32.mrb[104].mxu0  ;;  %v5229_v16 = vpop.f32.mrb[105].mxu1 }
 0x4e6   :  { %v6385_v17 = vpop.f32.mrb[105].mxu0  ;;  %v5230_v18 = vpop.f32.mrb[106].mxu1 }
 0x4e7   :  { %v7779_v19 = vpack.c.bf16 %v6545_v13, %v6544_v12  ;;  %v7947_v20 = vadd.f32 %v7946_v14, %v6383_v15  ;;  %v7948_v21 = vadd.f32 %v11084_v4, %v5230_v18  ;;  %v6386_v22 = vpop.f32.mrb[106].mxu0  ;;  %v5232_v23 = vpop.f32.mrb[107].mxu1 }
 0x4e8   :  { %v6388_v24 = vpop.f32.mrb[107].mxu0 }
 0x4e9   :  { %7835 = vst [vmem:[%s11126_s3 + $0xc8] sm:$0xff] %v7779_v19   ;;  %v6482_v25 = vmul.f32 0.2, %v7947_v20  ;;  %v7949_v26 = vadd.f32 %v7948_v21, %v6386_v22 }
 0x4eb   :  { %v6483_v27 = vmul.f32 0.2, %v7949_v26  ;;  %v6546_v29 = vmax.f32 %v7947_v20, %v6482_v25 }
 0x4ec   :  { %v5235_v28 = vpop.f32.mrb[108].mxu1 }
 0x4ed   :  { %v6547_v30 = vmax.f32 %v7949_v26, %v6483_v27  ;;  %v7950_v31 = vadd.f32 %v11084_v4, %v5235_v28  ;;  %v6391_v32 = vpop.f32.mrb[108].mxu0  ;;  %v5237_v33 = vpop.f32.mrb[109].mxu1 }
 0x4ee   :  { %v6393_v34 = vpop.f32.mrb[109].mxu0  ;;  %v5238_v35 = vpop.f32.mrb[110].mxu1 }
 0x4ef   :  { %v7784_v36 = vpack.c.bf16 %v6547_v30, %v6546_v29  ;;  %v7951_v37 = vadd.f32 %v7950_v31, %v6391_v32  ;;  %v7952_v38 = vadd.f32 %v11084_v4, %v5238_v35  ;;  %v6394_v39 = vpop.f32.mrb[110].mxu0  ;;  %v5240_v40 = vpop.f32.mrb[111].mxu1 }
 0x4f0   :  { %v6396_v41 = vpop.f32.mrb[111].mxu0 }
 0x4f1   :  { %7836 = vst [vmem:[%s11126_s3 + $0xd0] sm:$0xff] %v7784_v36   ;;  %v6484_v43 = vmul.f32 0.2, %v7951_v37  ;;  %v7953_v44 = vadd.f32 %v7952_v38, %v6394_v39 }
 0x4f3   :  { %v6485_v45 = vmul.f32 0.2, %v7953_v44  ;;  %v6548_v47 = vmax.f32 %v7951_v37, %v6484_v43 }
 0x4f4   :  { %v5243_v46 = vpop.f32.mrb[112].mxu1 }
 0x4f5   :  { %v6549_v48 = vmax.f32 %v7953_v44, %v6485_v45  ;;  %v7954_v49 = vadd.f32 %v11084_v4, %v5243_v46  ;;  %v6399_v50 = vpop.f32.mrb[112].mxu0  ;;  %v5245_v51 = vpop.f32.mrb[113].mxu1 }
 0x4f6   :  { %v6401_v52 = vpop.f32.mrb[113].mxu0  ;;  %v5246_v53 = vpop.f32.mrb[114].mxu1 }
 0x4f7   :  { %v7789_v54 = vpack.c.bf16 %v6549_v48, %v6548_v47  ;;  %v7955_v55 = vadd.f32 %v7954_v49, %v6399_v50  ;;  %v7956_v56 = vadd.f32 %v11084_v4, %v5246_v53  ;;  %v6402_v57 = vpop.f32.mrb[114].mxu0  ;;  %v5248_v58 = vpop.f32.mrb[115].mxu1 }
 0x4f8   :  { %v6404_v59 = vpop.f32.mrb[115].mxu0 }
 0x4f9   :  { %7837 = vst [vmem:[%s11126_s3 + $0xd8] sm:$0xff] %v7789_v54   ;;  %v6486_v60 = vmul.f32 0.2, %v7955_v55  ;;  %v7957_v61 = vadd.f32 %v7956_v56, %v6402_v57 }
 0x4fb   :  { %v6487_v62 = vmul.f32 0.2, %v7957_v61  ;;  %v6550_v1 = vmax.f32 %v7955_v55, %v6486_v60 }
 0x4fc   :  { %v5251_v63 = vpop.f32.mrb[116].mxu1 }
 0x4fd   :  { %v6551_v2 = vmax.f32 %v7957_v61, %v6487_v62  ;;  %v7958_v3 = vadd.f32 %v11084_v4, %v5251_v63  ;;  %v6407_v0 = vpop.f32.mrb[116].mxu0  ;;  %v5253_v5 = vpop.f32.mrb[117].mxu1 }
 0x4fe   :  { %v6409_v6 = vpop.f32.mrb[117].mxu0  ;;  %v5254_v7 = vpop.f32.mrb[118].mxu1 }
 0x4ff   :  { %v7794_v8 = vpack.c.bf16 %v6551_v2, %v6550_v1  ;;  %v7959_v42 = vadd.f32 %v7958_v3, %v6407_v0  ;;  %v7960_v9 = vadd.f32 %v11084_v4, %v5254_v7  ;;  %v6410_v10 = vpop.f32.mrb[118].mxu0  ;;  %v5256_v11 = vpop.f32.mrb[119].mxu1 }
 0x500   :  { %v6412_v12 = vpop.f32.mrb[119].mxu0 }
 0x501   :  { %7838 = vst [vmem:[%s11126_s3 + $0xe0] sm:$0xff] %v7794_v8   ;;  %v6488_v13 = vmul.f32 0.2, %v7959_v42  ;;  %v7961_v14 = vadd.f32 %v7960_v9, %v6410_v10 }
 0x503   :  { %v6489_v15 = vmul.f32 0.2, %v7961_v14  ;;  %v6552_v17 = vmax.f32 %v7959_v42, %v6488_v13 }
 0x504   :  { %v5259_v16 = vpop.f32.mrb[120].mxu1 }
 0x505   :  { %v6553_v18 = vmax.f32 %v7961_v14, %v6489_v15  ;;  %v7962_v19 = vadd.f32 %v11084_v4, %v5259_v16  ;;  %v6415_v20 = vpop.f32.mrb[120].mxu0  ;;  %v5261_v21 = vpop.f32.mrb[121].mxu1 }
 0x506   :  { %v6417_v22 = vpop.f32.mrb[121].mxu0  ;;  %v5262_v23 = vpop.f32.mrb[122].mxu1 }
 0x507   :  { %v7799_v24 = vpack.c.bf16 %v6553_v18, %v6552_v17  ;;  %v7963_v25 = vadd.f32 %v7962_v19, %v6415_v20  ;;  %v7964_v26 = vadd.f32 %v11084_v4, %v5262_v23  ;;  %v6418_v27 = vpop.f32.mrb[122].mxu0  ;;  %v5264_v28 = vpop.f32.mrb[123].mxu1 }
 0x508   :  { %v6420_v29 = vpop.f32.mrb[123].mxu0 }
 0x509   :  { %7839 = vst [vmem:[%s11126_s3 + $0xe8] sm:$0xff] %v7799_v24   ;;  %v6490_v30 = vmul.f32 0.2, %v7963_v25  ;;  %v7965_v31 = vadd.f32 %v7964_v26, %v6418_v27 }
 0x50b   :  { %v6491_v32 = vmul.f32 0.2, %v7965_v31  ;;  %v6554_v34 = vmax.f32 %v7963_v25, %v6490_v30 }
 0x50c   :  { %v5267_v33 = vpop.f32.mrb[124].mxu1 }
 0x50d   :  { %v6555_v35 = vmax.f32 %v7965_v31, %v6491_v32  ;;  %v7966_v36 = vadd.f32 %v11084_v4, %v5267_v33  ;;  %v6423_v37 = vpop.f32.mrb[124].mxu0  ;;  %v5269_v38 = vpop.f32.mrb[125].mxu1 }
 0x50e   :  { %v6425_v39 = vpop.f32.mrb[125].mxu0  ;;  %v5270_v40 = vpop.f32.mrb[126].mxu1 }
 0x50f   :  { %v7804_v41 = vpack.c.bf16 %v6555_v35, %v6554_v34  ;;  %v7967_v43 = vadd.f32 %v7966_v36, %v6423_v37  ;;  %v7968_v44 = vadd.f32 %v11084_v4, %v5270_v40  ;;  %v6426_v45 = vpop.f32.mrb[126].mxu0  ;;  %v5272_v46 = vpop.f32.mrb[127].mxu1 }
 0x510   :  { %v6428_v47 = vpop.f32.mrb[127].mxu0 }
 0x511   :  { %7840 = vst [vmem:[%s11126_s3 + $0xf0] sm:$0xff] %v7804_v41   ;;  %v6492_v48 = vmul.f32 0.2, %v7967_v43  ;;  %v7969_v49 = vadd.f32 %v7968_v44, %v6426_v45 }
 0x513   :  { %v6493_v50 = vmul.f32 0.2, %v7969_v49  ;;  %v6556_v51 = vmax.f32 %v7967_v43, %v6492_v48 }
 0x515   :  { %v6557_v52 = vmax.f32 %v7969_v49, %v6493_v50 }
 0x517   :  { %v7809_v53 = vpack.c.bf16 %v6557_v52, %v6556_v51 }
 0x519   :  { %7841 = vst [vmem:[%s11126_s3 + $0xf8] sm:$0xff] %v7809_v53  }

// kernel: critic_forward.7
= control target key start
LH: loop header
LB: loop body
LE: loop exit
PB: predicated region body
PF: predicated region fallthrough
CT: control target
= control target key end

     0   :  { %s4659_s1 = inlined_call_operand.vmem [shape: bf16[2048,128], index: 1, kind: input, shape index: {}]   ;;  %s4660_s0 = inlined_call_operand.vmem [shape: bf16[128,2048], index: 0, kind: input, shape index: {}]   ;;  %s4661_s2 = inlined_call_operand.vmem [shape: f32[1,128], index: 2, kind: input, shape index: {}]   ;;  %s4662_s3 = inlined_call_operand.vmem [shape: bf16[128,128], index: 3, kind: output, shape index: {}]  }
   0x1   :  { %v3554_v0 = vld [vmem:[%s4659_s1 + $0x40] sm:$0xff]   ;;  %v3558_v4 = vld [vmem:[%s4659_s1 + $0x48] sm:$0xff]   ;;  %v3562_v8 = vld [vmem:[%s4659_s1 + $0x50] sm:$0xff]  }
   0x2   :  { %v3555_v1 = vld [vmem:[%s4659_s1 + $0xc0] sm:$0xff]   ;;  %3042 = vmatprep.subr.bf16.mxu0 %v3554_v0  ;;  %v3559_v5 = vld [vmem:[%s4659_s1 + $0xc8] sm:$0xff]   ;;  %v3563_v9 = vld [vmem:[%s4659_s1 + $0xd0] sm:$0xff]  }
   0x3   :  { %v3556_v2 = vld [vmem:[%s4659_s1] sm:$0xff]   ;;  %3106 = vmatprep.subr.bf16.mxu1 %v3555_v1  ;;  %v3560_v6 = vld [vmem:[%s4659_s1 + $0x8] sm:$0xff]   ;;  %v3564_v10 = vld [vmem:[%s4659_s1 + $0x10] sm:$0xff]  }
   0x4   :  { %v3557_v3 = vld [vmem:[%s4659_s1 + $0x80] sm:$0xff]   ;;  %3043 = vmatpush3.bf16.msra.mxu0 %v3556_v2  ;;  %v3561_v7 = vld [vmem:[%s4659_s1 + $0x88] sm:$0xff]   ;;  %v3565_v11 = vld [vmem:[%s4659_s1 + $0x90] sm:$0xff]  }
   0x5   :  { %3107 = vmatpush3.bf16.msra.mxu1 %v3557_v3  ;;  %3044 = vmatprep.subr.bf16.mxu0 %v3558_v4  ;;  %v3566_v12 = vld [vmem:[%s4659_s1 + $0x58] sm:$0xff]   ;;  %v3570_v16 = vld [vmem:[%s4659_s1 + $0x60] sm:$0xff]   ;;  %v3574_v20 = vld [vmem:[%s4659_s1 + $0x68] sm:$0xff]  }
   0x6   :  { %3108 = vmatprep.subr.bf16.mxu1 %v3559_v5  ;;  %v3567_v13 = vld [vmem:[%s4659_s1 + $0xd8] sm:$0xff]   ;;  %v3571_v17 = vld [vmem:[%s4659_s1 + $0xe0] sm:$0xff]   ;;  %v3575_v21 = vld [vmem:[%s4659_s1 + $0xe8] sm:$0xff]  }
   0x7   :  { %v3568_v14 = vld [vmem:[%s4659_s1 + $0x18] sm:$0xff]   ;;  %v3572_v18 = vld [vmem:[%s4659_s1 + $0x20] sm:$0xff]   ;;  %v3576_v22 = vld [vmem:[%s4659_s1 + $0x28] sm:$0xff]  }
   0x8   :  { %3045 = vmatpush3.bf16.msra.mxu0 %v3560_v6  ;;  %v3569_v15 = vld [vmem:[%s4659_s1 + $0x98] sm:$0xff]   ;;  %v3573_v19 = vld [vmem:[%s4659_s1 + $0xa0] sm:$0xff]   ;;  %v3577_v23 = vld [vmem:[%s4659_s1 + $0xa8] sm:$0xff]  }
   0x9   :  { %3109 = vmatpush3.bf16.msra.mxu1 %v3561_v7  ;;  %3046 = vmatprep.subr.bf16.mxu0 %v3562_v8  ;;  %v3578_v24 = vld [vmem:[%s4659_s1 + $0x70] sm:$0xff]   ;;  %v3582_v28 = vld [vmem:[%s4659_s1 + $0x78] sm:$0xff]   ;;  %v15_v32 = vld [vmem:[%s4660_s0] sm:$0xff] }
   0xa   :  { %3110 = vmatprep.subr.bf16.mxu1 %v3563_v9  ;;  %v3579_v25 = vld [vmem:[%s4659_s1 + $0xf0] sm:$0xff]   ;;  %v3583_v29 = vld [vmem:[%s4659_s1 + $0xf8] sm:$0xff]   ;;  %v23_v33 = vld [vmem:[%s4660_s0 + $0x40] sm:$0xff] }
   0xb   :  { %v3580_v26 = vld [vmem:[%s4659_s1 + $0x30] sm:$0xff]   ;;  %v3584_v30 = vld [vmem:[%s4659_s1 + $0x38] sm:$0xff]   ;;  %v16_v34 = vld [vmem:[%s4660_s0 + $0x8] sm:$0xff]  ;;  %v2707_v35 = vcombine.low %v15_v32, %v23_v33  ;;  %v2708_v36 = vcombine.high %v15_v32, %v23_v33 }
   0xc   :  { %3047 = vmatpush3.bf16.msra.mxu0 %v3564_v10  ;;  %v3581_v27 = vld [vmem:[%s4659_s1 + $0xb0] sm:$0xff]   ;;  %v3585_v31 = vld [vmem:[%s4659_s1 + $0xb8] sm:$0xff]   ;;  %v24_v37 = vld [vmem:[%s4660_s0 + $0x48] sm:$0xff] }
   0xd   :  { %3111 = vmatpush3.bf16.msra.mxu1 %v3565_v11  ;;  %3048 = vmatprep.subr.bf16.mxu0 %v3566_v12  ;;  %v2709_v38 = vcombine.low %v16_v34, %v24_v37  ;;  %v2710_v39 = vcombine.high %v16_v34, %v24_v37  ;;  %v3586_v40 = vld [vmem:[%s4659_s1 + $0x140] sm:$0xff]   ;;  %v32_v47 = vld [vmem:[%s4660_s0 + $0x88] sm:$0xff]  ;;  %v3594_v62 = vld [vmem:[%s4659_s1 + $0x150] sm:$0xff]  }
   0xe   :  { %3112 = vmatprep.subr.bf16.mxu1 %v3567_v13  ;;  %1846 = vmatprep.mubr.bf16.mxu0 %v2708_v36  ;;  %v3587_v41 = vld [vmem:[%s4659_s1 + $0x100] sm:$0xff]   ;;  %v40_v48 = vld [vmem:[%s4660_s0 + $0xc8] sm:$0xff]  ;;  %v3595_v63 = vld [vmem:[%s4659_s1 + $0x110] sm:$0xff]  }
   0xf   :  { %1943 = vmatprep.mubr.bf16.mxu1 %v2710_v39  ;;  %v3588_v42 = vld [vmem:[%s4659_s1 + $0x1c0] sm:$0xff]   ;;  %v2726_v49 = vcombine.high %v32_v47, %v40_v48  ;;  %v3590_v50 = vld [vmem:[%s4659_s1 + $0x148] sm:$0xff]   ;;  %v2725_v53 = vcombine.low %v32_v47, %v40_v48  ;;  %v3596_v0 = vld [vmem:[%s4659_s1 + $0x1d0] sm:$0xff]  }
  0x10   :  { %3049 = vmatpush3.bf16.msra.mxu0 %v3568_v14  ;;  %v3589_v43 = vld [vmem:[%s4659_s1 + $0x180] sm:$0xff]   ;;  %v3591_v52 = vld [vmem:[%s4659_s1 + $0x108] sm:$0xff]   ;;  %v3597_v1 = vld [vmem:[%s4659_s1 + $0x190] sm:$0xff]  }
  0x11   :  { %3113 = vmatpush3.bf16.msra.mxu1 %v3569_v15  ;;  %3050 = vmatprep.subr.bf16.mxu0 %v3570_v16  ;;  %v31_v44 = vld [vmem:[%s4660_s0 + $0x80] sm:$0xff]  ;;  %v3592_v54 = vld [vmem:[%s4659_s1 + $0x1c8] sm:$0xff]   ;;  %v3598_v10 = vld [vmem:[%s4659_s1 + $0x158] sm:$0xff]  }
  0x12   :  { %3114 = vmatprep.subr.bf16.mxu1 %v3571_v17  ;;  %v39_v45 = vld [vmem:[%s4660_s0 + $0xc0] sm:$0xff]  ;;  %v3593_v55 = vld [vmem:[%s4659_s1 + $0x188] sm:$0xff]   ;;  %v3599_v11 = vld [vmem:[%s4659_s1 + $0x118] sm:$0xff]  }
  0x13   :  { %v2724_v46 = vcombine.high %v31_v44, %v39_v45  ;;  %v2723_v51 = vcombine.low %v31_v44, %v39_v45  ;;  %v47_v56 = vld [vmem:[%s4660_s0 + $0x100] sm:$0xff]  ;;  %v48_v58 = vld [vmem:[%s4660_s0 + $0x108] sm:$0xff]  ;;  %v3600_v12 = vld [vmem:[%s4659_s1 + $0x1d8] sm:$0xff]  }
  0x14   :  { %3051 = vmatpush3.bf16.msra.mxu0 %v3572_v18  ;;  %v55_v57 = vld [vmem:[%s4660_s0 + $0x140] sm:$0xff]  ;;  %v56_v59 = vld [vmem:[%s4660_s0 + $0x148] sm:$0xff]  ;;  %v3601_v13 = vld [vmem:[%s4659_s1 + $0x198] sm:$0xff]  }
  0x15   :  { %3115 = vmatpush3.bf16.msra.mxu1 %v3573_v19  ;;  %3052 = vmatprep.subr.bf16.mxu0 %v3574_v20  ;;  %v2740_v60 = vcombine.high %v47_v56, %v55_v57  ;;  %v2742_v61 = vcombine.high %v48_v58, %v56_v59  ;;  %v2739_v2 = vcombine.low %v47_v56, %v55_v57  ;;  %v63_v3 = vld [vmem:[%s4660_s0 + $0x180] sm:$0xff]  ;;  %v64_v5 = vld [vmem:[%s4660_s0 + $0x188] sm:$0xff]  ;;  %v3611_v39 = vld [vmem:[%s4659_s1 + $0x130] sm:$0xff]  }
  0x16   :  { %3116 = vmatprep.subr.bf16.mxu1 %v3575_v21  ;;  %v71_v4 = vld [vmem:[%s4660_s0 + $0x1c0] sm:$0xff]  ;;  %v2741_v6 = vcombine.low %v48_v58, %v56_v59  ;;  %v72_v8 = vld [vmem:[%s4660_s0 + $0x1c8] sm:$0xff]  ;;  %v3615_v48 = vld [vmem:[%s4659_s1 + $0x138] sm:$0xff]  }
  0x17   :  { %v2756_v7 = vcombine.high %v63_v3, %v71_v4  ;;  %v2758_v9 = vcombine.high %v64_v5, %v72_v8  ;;  %v79_v14 = vld [vmem:[%s4660_s0 + $0x200] sm:$0xff]  ;;  %v80_v16 = vld [vmem:[%s4660_s0 + $0x208] sm:$0xff]  ;;  %v2755_v19 = vcombine.low %v63_v3, %v71_v4  ;;  %v2757_v21 = vcombine.low %v64_v5, %v72_v8  ;;  %v26_v3 = vld [vmem:[%s4660_s0 + $0x58] sm:$0xff] }
  0x18   :  { %3053 = vmatpush3.bf16.msra.mxu0 %v3576_v22  ;;  %v87_v15 = vld [vmem:[%s4660_s0 + $0x240] sm:$0xff]  ;;  %v88_v17 = vld [vmem:[%s4660_s0 + $0x248] sm:$0xff]  ;;  %v33_v8 = vld [vmem:[%s4660_s0 + $0x90] sm:$0xff] }
  0x19   :  { %3117 = vmatpush3.bf16.msra.mxu1 %v3577_v23  ;;  %3054 = vmatprep.subr.bf16.mxu0 %v3578_v24  ;;  %v3602_v18 = vld [vmem:[%s4659_s1 + $0x160] sm:$0xff]   ;;  %v2772_v22 = vcombine.high %v79_v14, %v87_v15  ;;  %v2774_v24 = vcombine.high %v80_v16, %v88_v17  ;;  %v3608_v32 = vld [vmem:[%s4659_s1 + $0x1e8] sm:$0xff]   ;;  %v2771_v34 = vcombine.low %v79_v14, %v87_v15 }
  0x1a   :  { %3118 = vmatprep.subr.bf16.mxu1 %v3579_v25  ;;  %v3603_v20 = vld [vmem:[%s4659_s1 + $0x120] sm:$0xff]   ;;  %v3609_v33 = vld [vmem:[%s4659_s1 + $0x1a8] sm:$0xff]  }
  0x1b   :  { %v3604_v23 = vld [vmem:[%s4659_s1 + $0x1e0] sm:$0xff]   ;;  %v112_v44 = vld [vmem:[%s4660_s0 + $0x308] sm:$0xff] }
  0x1c   :  { %3055 = vmatpush3.bf16.msra.mxu0 %v3580_v26  ;;  %v3605_v25 = vld [vmem:[%s4659_s1 + $0x1a0] sm:$0xff]   ;;  %v120_v45 = vld [vmem:[%s4660_s0 + $0x348] sm:$0xff] }
  0x1d   :  { %3119 = vmatpush3.bf16.msra.mxu1 %v3581_v27  ;;  %3056 = vmatprep.subr.bf16.mxu0 %v3582_v28  ;;  %v95_v26 = vld [vmem:[%s4660_s0 + $0x280] sm:$0xff]  ;;  %v3606_v28 = vld [vmem:[%s4659_s1 + $0x168] sm:$0xff]  }
  0x1e   :  { %3120 = vmatprep.subr.bf16.mxu1 %v3583_v29  ;;  %v103_v27 = vld [vmem:[%s4660_s0 + $0x2c0] sm:$0xff]  ;;  %v96_v29 = vld [vmem:[%s4660_s0 + $0x288] sm:$0xff] }
  0x1f   :  { %v2788_v36 = vcombine.high %v95_v26, %v103_v27  ;;  %v2787_v47 = vcombine.low %v95_v26, %v103_v27  ;;  %v3618_v56 = vld [vmem:[%s4659_s1 + $0x240] sm:$0xff]   ;;  %v128_v57 = vld [vmem:[%s4660_s0 + $0x388] sm:$0xff]  ;;  %v3626_v26 = vld [vmem:[%s4659_s1 + $0x250] sm:$0xff]  }
  0x20   :  { %3057 = vmatpush3.bf16.msra.mxu0 %v3584_v30  ;;  %v104_v30 = vld [vmem:[%s4660_s0 + $0x2c8] sm:$0xff]  ;;  %v3620_v58 = vld [vmem:[%s4659_s1 + $0x2c0] sm:$0xff]   ;;  %v3628_v27 = vld [vmem:[%s4659_s1 + $0x2d0] sm:$0xff]  }
  0x21   :  { %3121 = vmatpush3.bf16.msra.mxu1 %v3585_v31  ;;  %3170 = vmatprep.subr.bf16.mxu0 %v3586_v40  ;;  %v3607_v31 = vld [vmem:[%s4659_s1 + $0x128] sm:$0xff]   ;;  %v2790_v37 = vcombine.high %v96_v29, %v104_v30  ;;  %v3612_v40 = vld [vmem:[%s4659_s1 + $0x1f0] sm:$0xff]   ;;  %v3621_v15 = vld [vmem:[%s4659_s1 + $0x280] sm:$0xff]  }
  0x22   :  { %3234 = vmatprep.subr.bf16.mxu1 %v3588_v42  ;;  %v119_v42 = vld [vmem:[%s4660_s0 + $0x340] sm:$0xff]  ;;  %v136_v59 = vld [vmem:[%s4660_s0 + $0x3c8] sm:$0xff] }
  0x23   :  { %1847 = vmatmul.mubr.bf16.vlgmr.msra.gmra.mrb[0].mxu0 %v2707_v35  ;;  %v2773_v35 = vcombine.low %v80_v16, %v88_v17  ;;  %v2821_v5 = vcombine.low %v128_v57, %v136_v59  ;;  %v3622_v17 = vld [vmem:[%s4659_s1 + $0x248] sm:$0xff]  }
  0x24   :  { %1944 = vmatmul.mubr.bf16.vlgmr.msra.gmra.mrb[0].mxu1 %v2709_v38  ;;  %3171 = vmatpush3.bf16.msra.mxu0 %v3587_v41  ;;  %v3610_v38 = vld [vmem:[%s4659_s1 + $0x170] sm:$0xff]   ;;  %v111_v41 = vld [vmem:[%s4660_s0 + $0x300] sm:$0xff] }
  0x25   :  { %3235 = vmatpush3.bf16.msra.mxu1 %v3589_v43  ;;  %1854 = vmatprep.mubr.bf16.mxu0 %v2724_v46  ;;  %v3613_v43 = vld [vmem:[%s4659_s1 + $0x1b0] sm:$0xff]   ;;  %v3614_v46 = vld [vmem:[%s4659_s1 + $0x178] sm:$0xff]  }
  0x26   :  { %1951 = vmatprep.mubr.bf16.mxu1 %v2726_v49  ;;  %3172 = vmatprep.subr.bf16.mxu0 %v3590_v50  ;;  %v2789_v49 = vcombine.low %v96_v29, %v104_v30  ;;  %v2804_v50 = vcombine.high %v111_v41, %v119_v42 }
  0x27   :  { %3236 = vmatprep.subr.bf16.mxu1 %v3592_v54  ;;  %v127_v54 = vld [vmem:[%s4660_s0 + $0x380] sm:$0xff] }
  0x28   :  { %3173 = vmatpush3.bf16.msra.mxu0 %v3591_v52  ;;  %v2806_v52 = vcombine.high %v112_v44, %v120_v45 }
  0x29   :  { %3237 = vmatpush3.bf16.msra.mxu1 %v3593_v55  ;;  %3174 = vmatprep.subr.bf16.mxu0 %v3594_v62  ;;  %v135_v55 = vld [vmem:[%s4660_s0 + $0x3c0] sm:$0xff] }
  0x2a   :  { %3238 = vmatprep.subr.bf16.mxu1 %v3596_v0  ;;  %v2820_v62 = vcombine.high %v127_v54, %v135_v55  ;;  %v17_v0 = vld [vmem:[%s4660_s0 + $0x10] sm:$0xff]  ;;  %v2819_v4 = vcombine.low %v127_v54, %v135_v55  ;;  %v82_v54 = vld [vmem:[%s4660_s0 + $0x218] sm:$0xff] }
  0x2b   :  { %1855 = vmatmul.mubr.bf16.gmra.mrb[4].mxu0 %v2723_v51  ;;  %v3616_v51 = vld [vmem:[%s4659_s1 + $0x1f8] sm:$0xff]  }
  0x2c   :  { %1952 = vmatmul.mubr.bf16.gmra.mrb[4].mxu1 %v2725_v53  ;;  %1862 = vmatprep.mubr.bf16.mxu0 %v2740_v60  ;;  %v3617_v53 = vld [vmem:[%s4659_s1 + $0x1b8] sm:$0xff]   ;;  %v2803_v60 = vcombine.low %v111_v41, %v119_v42  ;;  %v3634_v42 = vld [vmem:[%s4659_s1 + $0x260] sm:$0xff]  }
  0x2d   :  { %1959 = vmatprep.mubr.bf16.mxu1 %v2742_v61  ;;  %3175 = vmatpush3.bf16.msra.mxu0 %v3595_v63  ;;  %v2805_v61 = vcombine.low %v112_v44, %v120_v45  ;;  %v2822_v63 = vcombine.high %v128_v57, %v136_v59  ;;  %v3633_v41 = vld [vmem:[%s4659_s1 + $0x298] sm:$0xff]   ;;  %v3636_v44 = vld [vmem:[%s4659_s1 + $0x2e0] sm:$0xff]   ;;  %v3641_v57 = vld [vmem:[%s4659_s1 + $0x2a8] sm:$0xff]  }
  0x2e   :  { %3239 = vmatpush3.bf16.msra.mxu1 %v3597_v1  ;;  %3176 = vmatprep.subr.bf16.mxu0 %v3598_v10  ;;  %v25_v1 = vld [vmem:[%s4660_s0 + $0x50] sm:$0xff]  ;;  %v90_v55 = vld [vmem:[%s4660_s0 + $0x258] sm:$0xff] }
  0x2f   :  { %3240 = vmatprep.subr.bf16.mxu1 %v3600_v12  ;;  %v2711_v10 = vcombine.low %v17_v0, %v25_v1  ;;  %v34_v12 = vld [vmem:[%s4660_s0 + $0x98] sm:$0xff] }
  0x31   :  { %3177 = vmatpush3.bf16.msra.mxu0 %v3599_v11  ;;  %v3619_v11 = vld [vmem:[%s4659_s1 + $0x200] sm:$0xff]  }
  0x32   :  { %3241 = vmatpush3.bf16.msra.mxu1 %v3601_v13  ;;  %3178 = vmatprep.subr.bf16.mxu0 %v3602_v18  ;;  %v42_v13 = vld [vmem:[%s4660_s0 + $0xd8] sm:$0xff] }
  0x33   :  { %1863 = vmatmul.mubr.bf16.gmra.mrb[8].mxu0 %v2739_v2  ;;  %3242 = vmatprep.subr.bf16.mxu1 %v3604_v23  ;;  %v18_v2 = vld [vmem:[%s4660_s0 + $0x18] sm:$0xff]  ;;  %v2730_v18 = vcombine.high %v34_v12, %v42_v13  ;;  %v57_v23 = vld [vmem:[%s4660_s0 + $0x150] sm:$0xff]  ;;  %v2729_v29 = vcombine.low %v34_v12, %v42_v13  ;;  %v3652_v12 = vld [vmem:[%s4659_s1 + $0x3c0] sm:$0xff]   ;;  %v2777_v13 = vcombine.low %v82_v54, %v90_v55 }
  0x34   :  { %1960 = vmatmul.mubr.bf16.gmra.mrb[8].mxu1 %v2741_v6  ;;  %1870 = vmatprep.mubr.bf16.mxu0 %v2756_v7  ;;  %v2712_v6 = vcombine.high %v17_v0, %v25_v1  ;;  %v2714_v7 = vcombine.high %v18_v2, %v26_v3  ;;  %v2713_v14 = vcombine.low %v18_v2, %v26_v3  ;;  %v3643_v0 = vld [vmem:[%s4659_s1 + $0x230] sm:$0xff]   ;;  %v3646_v2 = vld [vmem:[%s4659_s1 + $0x278] sm:$0xff]  }
  0x35   :  { %1967 = vmatprep.mubr.bf16.mxu1 %v2758_v9  ;;  %3179 = vmatpush3.bf16.msra.mxu0 %v3603_v20  ;;  %v41_v9 = vld [vmem:[%s4660_s0 + $0xd0] sm:$0xff]  ;;  %v3624_v20 = vld [vmem:[%s4659_s1 + $0x2c8] sm:$0xff]  }
  0x36   :  { %3243 = vmatpush3.bf16.msra.mxu1 %v3605_v25  ;;  %3180 = vmatprep.subr.bf16.mxu0 %v3606_v28  ;;  %v2728_v16 = vcombine.high %v33_v8, %v41_v9  ;;  %v58_v25 = vld [vmem:[%s4660_s0 + $0x158] sm:$0xff]  ;;  %v2727_v28 = vcombine.low %v33_v8, %v41_v9  ;;  %v3645_v1 = vld [vmem:[%s4659_s1 + $0x2b0] sm:$0xff]  }
  0x37   :  { %3244 = vmatprep.subr.bf16.mxu1 %v3608_v32  ;;  %v3627_v32 = vld [vmem:[%s4659_s1 + $0x210] sm:$0xff]   ;;  %v3647_v8 = vld [vmem:[%s4659_s1 + $0x238] sm:$0xff]  }
  0x38   :  { %v97_v3 = vld [vmem:[%s4660_s0 + $0x290] sm:$0xff]  ;;  %v3649_v9 = vld [vmem:[%s4659_s1 + $0x2b8] sm:$0xff]  }
  0x39   :  { %3181 = vmatpush3.bf16.msra.mxu0 %v3607_v31 }
  0x3a   :  { %3245 = vmatpush3.bf16.msra.mxu1 %v3609_v33  ;;  %3182 = vmatprep.subr.bf16.mxu0 %v3610_v38  ;;  %v3629_v33 = vld [vmem:[%s4659_s1 + $0x290] sm:$0xff]   ;;  %v66_v38 = vld [vmem:[%s4660_s0 + $0x198] sm:$0xff] }
  0x3b   :  { %1871 = vmatmul.mubr.bf16.gmra.mrb[12].mxu0 %v2755_v19  ;;  %3246 = vmatprep.subr.bf16.mxu1 %v3612_v40  ;;  %v3623_v19 = vld [vmem:[%s4659_s1 + $0x208] sm:$0xff]   ;;  %v3631_v40 = vld [vmem:[%s4659_s1 + $0x218] sm:$0xff]  }
  0x3c   :  { %1968 = vmatmul.mubr.bf16.gmra.mrb[12].mxu1 %v2757_v21  ;;  %1878 = vmatprep.mubr.bf16.mxu0 %v2772_v22  ;;  %v3625_v21 = vld [vmem:[%s4659_s1 + $0x288] sm:$0xff]   ;;  %v49_v22 = vld [vmem:[%s4660_s0 + $0x110] sm:$0xff] }
  0x3d   :  { %1975 = vmatprep.mubr.bf16.mxu1 %v2774_v24  ;;  %3183 = vmatpush3.bf16.msra.mxu0 %v3611_v39  ;;  %v50_v24 = vld [vmem:[%s4660_s0 + $0x118] sm:$0xff]  ;;  %v2744_v30 = vcombine.high %v49_v22, %v57_v23 }
  0x3e   :  { %3247 = vmatpush3.bf16.msra.mxu1 %v3613_v43  ;;  %3184 = vmatprep.subr.bf16.mxu0 %v3614_v46  ;;  %v2746_v31 = vcombine.high %v50_v24, %v58_v25  ;;  %v74_v39 = vld [vmem:[%s4660_s0 + $0x1d8] sm:$0xff]  ;;  %v2743_v43 = vcombine.low %v49_v22, %v57_v23  ;;  %v2745_v45 = vcombine.low %v50_v24, %v58_v25  ;;  %v129_v24 = vld [vmem:[%s4660_s0 + $0x390] sm:$0xff] }
  0x3f   :  { %3248 = vmatprep.subr.bf16.mxu1 %v3616_v51  ;;  %v81_v51 = vld [vmem:[%s4660_s0 + $0x210] sm:$0xff] }
  0x40   :  { %v137_v25 = vld [vmem:[%s4660_s0 + $0x3d0] sm:$0xff] }
  0x41   :  { %3185 = vmatpush3.bf16.msra.mxu0 %v3615_v48  ;;  %v2762_v48 = vcombine.high %v66_v38, %v74_v39 }
  0x42   :  { %3249 = vmatpush3.bf16.msra.mxu1 %v3617_v53  ;;  %3298 = vmatprep.subr.bf16.mxu0 %v3618_v56  ;;  %v89_v53 = vld [vmem:[%s4660_s0 + $0x250] sm:$0xff]  ;;  %v3639_v56 = vld [vmem:[%s4659_s1 + $0x228] sm:$0xff]  }
  0x43   :  { %1879 = vmatmul.mubr.bf16.gmra.mrb[16].mxu0 %v2771_v34  ;;  %3362 = vmatprep.subr.bf16.mxu1 %v3620_v58  ;;  %v3630_v34 = vld [vmem:[%s4659_s1 + $0x258] sm:$0xff]   ;;  %v3642_v58 = vld [vmem:[%s4659_s1 + $0x270] sm:$0xff]  }
  0x44   :  { %1976 = vmatmul.mubr.bf16.gmra.mrb[16].mxu1 %v2773_v35  ;;  %1886 = vmatprep.mubr.bf16.mxu0 %v2788_v36  ;;  %v65_v35 = vld [vmem:[%s4660_s0 + $0x190] sm:$0xff] }
  0x45   :  { %1983 = vmatprep.mubr.bf16.mxu1 %v2790_v37  ;;  %v73_v36 = vld [vmem:[%s4660_s0 + $0x1d0] sm:$0xff]  ;;  %v3632_v37 = vld [vmem:[%s4659_s1 + $0x2d8] sm:$0xff]  }
  0x46   :  { %v2760_v46 = vcombine.high %v65_v35, %v73_v36  ;;  %v2759_v59 = vcombine.low %v65_v35, %v73_v36  ;;  %v28_v35 = vld [vmem:[%s4660_s0 + $0x68] sm:$0xff]  ;;  %v2823_v36 = vcombine.low %v129_v24, %v137_v25 }
  0x4b   :  { %1887 = vmatmul.mubr.bf16.gmra.mrb[20].mxu0 %v2787_v47  ;;  %v3635_v47 = vld [vmem:[%s4659_s1 + $0x220] sm:$0xff]  }
  0x4c   :  { %1984 = vmatmul.mubr.bf16.gmra.mrb[20].mxu1 %v2789_v49  ;;  %1894 = vmatprep.mubr.bf16.mxu0 %v2804_v50  ;;  %v3637_v49 = vld [vmem:[%s4659_s1 + $0x2a0] sm:$0xff]   ;;  %v3638_v50 = vld [vmem:[%s4659_s1 + $0x268] sm:$0xff]  }
  0x4d   :  { %1991 = vmatprep.mubr.bf16.mxu1 %v2806_v52  ;;  %v3640_v52 = vld [vmem:[%s4659_s1 + $0x2e8] sm:$0xff]  }
  0x53   :  { %1895 = vmatmul.mubr.bf16.gmra.mrb[24].mxu0 %v2803_v60  ;;  %v3644_v60 = vld [vmem:[%s4659_s1 + $0x2f0] sm:$0xff]  }
  0x54   :  { %1992 = vmatmul.mubr.bf16.gmra.mrb[24].mxu1 %v2805_v61  ;;  %1902 = vmatprep.mubr.bf16.mxu0 %v2820_v62  ;;  %v2761_v61 = vcombine.low %v66_v38, %v74_v39  ;;  %v2776_v62 = vcombine.high %v81_v51, %v89_v53 }
  0x55   :  { %1999 = vmatprep.mubr.bf16.mxu1 %v2822_v63  ;;  %v2778_v63 = vcombine.high %v82_v54, %v90_v55  ;;  %v51_v54 = vld [vmem:[%s4660_s0 + $0x120] sm:$0xff] }
  0x56   :  { %v59_v55 = vld [vmem:[%s4660_s0 + $0x160] sm:$0xff] }
  0x5b   :  { %1903 = vmatmul.mubr.bf16.gmra.mrb[28].mxu0 %v2819_v4  ;;  %v105_v4 = vld [vmem:[%s4660_s0 + $0x2d0] sm:$0xff] }
  0x5c   :  { %2000 = vmatmul.mubr.bf16.gmra.mrb[28].mxu1 %v2821_v5  ;;  %2040 = vmatprep.mubr.bf16.mxu0 %v2712_v6  ;;  %v3648_v5 = vld [vmem:[%s4659_s1 + $0x2f8] sm:$0xff]  }
  0x5d   :  { %2137 = vmatprep.mubr.bf16.mxu1 %v2714_v7  ;;  %v98_v6 = vld [vmem:[%s4660_s0 + $0x298] sm:$0xff] }
  0x5e   :  { %v106_v7 = vld [vmem:[%s4660_s0 + $0x2d8] sm:$0xff] }
  0x63   :  { %2041 = vmatmul.mubr.bf16.vlgmr.msra.gmra.mrb[32].mxu0 %v2711_v10  ;;  %v3650_v10 = vld [vmem:[%s4659_s1 + $0x340] sm:$0xff]  }
  0x64   :  { %2138 = vmatmul.mubr.bf16.vlgmr.msra.gmra.mrb[32].mxu1 %v2713_v14  ;;  %3299 = vmatpush3.bf16.msra.mxu0 %v3619_v11  ;;  %v2775_v11 = vcombine.low %v81_v51, %v89_v53  ;;  %v2792_v14 = vcombine.high %v97_v3, %v105_v4  ;;  %v3656_v51 = vld [vmem:[%s4659_s1 + $0x3c8] sm:$0xff]  }
  0x65   :  { %3363 = vmatpush3.bf16.msra.mxu1 %v3621_v15  ;;  %2048 = vmatprep.mubr.bf16.mxu0 %v2728_v16  ;;  %v2794_v15 = vcombine.high %v98_v6, %v106_v7  ;;  %v113_v16 = vld [vmem:[%s4660_s0 + $0x310] sm:$0xff]  ;;  %v3657_v53 = vld [vmem:[%s4659_s1 + $0x388] sm:$0xff]  }
  0x66   :  { %2145 = vmatprep.mubr.bf16.mxu1 %v2730_v18  ;;  %3300 = vmatprep.subr.bf16.mxu0 %v3622_v17  ;;  %v121_v17 = vld [vmem:[%s4660_s0 + $0x350] sm:$0xff]  ;;  %v114_v18 = vld [vmem:[%s4660_s0 + $0x318] sm:$0xff] }
  0x67   :  { %3364 = vmatprep.subr.bf16.mxu1 %v3624_v20  ;;  %v2791_v20 = vcombine.low %v97_v3, %v105_v4  ;;  %v2808_v22 = vcombine.high %v113_v16, %v121_v17  ;;  %v3664_v3 = vld [vmem:[%s4659_s1 + $0x3d8] sm:$0xff]   ;;  %v67_v4 = vld [vmem:[%s4660_s0 + $0x1a0] sm:$0xff] }
  0x68   :  { %3301 = vmatpush3.bf16.msra.mxu0 %v3623_v19  ;;  %v122_v19 = vld [vmem:[%s4660_s0 + $0x358] sm:$0xff] }
  0x69   :  { %3365 = vmatpush3.bf16.msra.mxu1 %v3625_v21  ;;  %3302 = vmatprep.subr.bf16.mxu0 %v3626_v26  ;;  %v2793_v21 = vcombine.low %v98_v6, %v106_v7  ;;  %v2810_v23 = vcombine.high %v114_v18, %v122_v19  ;;  %v130_v26 = vld [vmem:[%s4660_s0 + $0x398] sm:$0xff]  ;;  %v68_v6 = vld [vmem:[%s4660_s0 + $0x1a8] sm:$0xff] }
  0x6a   :  { %3366 = vmatprep.subr.bf16.mxu1 %v3628_v27  ;;  %v138_v27 = vld [vmem:[%s4660_s0 + $0x3d8] sm:$0xff] }
  0x6b   :  { %2049 = vmatmul.mubr.bf16.gmra.mrb[36].mxu0 %v2727_v28  ;;  %v2807_v28 = vcombine.low %v113_v16, %v121_v17  ;;  %v3663_v7 = vld [vmem:[%s4659_s1 + $0x318] sm:$0xff]   ;;  %v3667_v16 = vld [vmem:[%s4659_s1 + $0x320] sm:$0xff]  }
  0x6c   :  { %2146 = vmatmul.mubr.bf16.gmra.mrb[36].mxu1 %v2729_v29  ;;  %2056 = vmatprep.mubr.bf16.mxu0 %v2744_v30  ;;  %v2809_v29 = vcombine.low %v114_v18, %v122_v19  ;;  %v2824_v30 = vcombine.high %v129_v24, %v137_v25  ;;  %v3669_v17 = vld [vmem:[%s4659_s1 + $0x3a0] sm:$0xff]   ;;  %v3670_v18 = vld [vmem:[%s4659_s1 + $0x368] sm:$0xff]  }
  0x6d   :  { %2153 = vmatprep.mubr.bf16.mxu1 %v2746_v31  ;;  %3303 = vmatpush3.bf16.msra.mxu0 %v3627_v32  ;;  %v2826_v31 = vcombine.high %v130_v26, %v138_v27  ;;  %v19_v32 = vld [vmem:[%s4660_s0 + $0x20] sm:$0xff]  ;;  %v3672_v19 = vld [vmem:[%s4659_s1 + $0x3e8] sm:$0xff]  }
  0x6e   :  { %3367 = vmatpush3.bf16.msra.mxu1 %v3629_v33  ;;  %3304 = vmatprep.subr.bf16.mxu0 %v3630_v34  ;;  %v27_v33 = vld [vmem:[%s4660_s0 + $0x60] sm:$0xff]  ;;  %v20_v34 = vld [vmem:[%s4660_s0 + $0x28] sm:$0xff] }
  0x6f   :  { %3368 = vmatprep.subr.bf16.mxu1 %v3632_v37  ;;  %v2825_v37 = vcombine.low %v130_v26, %v138_v27  ;;  %v2716_v38 = vcombine.high %v19_v32, %v27_v33  ;;  %v2718_v39 = vcombine.high %v20_v34, %v28_v35  ;;  %v92_v24 = vld [vmem:[%s4660_s0 + $0x268] sm:$0xff]  ;;  %v3674_v26 = vld [vmem:[%s4659_s1 + $0x370] sm:$0xff]  }
  0x70   :  { %v3673_v25 = vld [vmem:[%s4659_s1 + $0x3a8] sm:$0xff]  }
  0x71   :  { %3305 = vmatpush3.bf16.msra.mxu0 %v3631_v40  ;;  %v35_v40 = vld [vmem:[%s4660_s0 + $0xa0] sm:$0xff] }
  0x72   :  { %3369 = vmatpush3.bf16.msra.mxu1 %v3633_v41  ;;  %3306 = vmatprep.subr.bf16.mxu0 %v3634_v42  ;;  %v43_v41 = vld [vmem:[%s4660_s0 + $0xe0] sm:$0xff]  ;;  %v2715_v42 = vcombine.low %v19_v32, %v27_v33  ;;  %v3675_v32 = vld [vmem:[%s4659_s1 + $0x330] sm:$0xff]  }
  0x73   :  { %2057 = vmatmul.mubr.bf16.gmra.mrb[40].mxu0 %v2743_v43  ;;  %3370 = vmatprep.subr.bf16.mxu1 %v3636_v44  ;;  %v36_v43 = vld [vmem:[%s4660_s0 + $0xa8] sm:$0xff]  ;;  %v3677_v33 = vld [vmem:[%s4659_s1 + $0x3b0] sm:$0xff]  }
  0x74   :  { %2154 = vmatmul.mubr.bf16.gmra.mrb[40].mxu1 %v2745_v45  ;;  %2064 = vmatprep.mubr.bf16.mxu0 %v2760_v46  ;;  %v44_v44 = vld [vmem:[%s4660_s0 + $0xe8] sm:$0xff]  ;;  %v2717_v45 = vcombine.low %v20_v34, %v28_v35  ;;  %v3651_v46 = vld [vmem:[%s4659_s1 + $0x300] sm:$0xff]   ;;  %v3678_v34 = vld [vmem:[%s4659_s1 + $0x378] sm:$0xff]  }
  0x75   :  { %2161 = vmatprep.mubr.bf16.mxu1 %v2762_v48  ;;  %3307 = vmatpush3.bf16.msra.mxu0 %v3635_v47  ;;  %v3653_v47 = vld [vmem:[%s4659_s1 + $0x380] sm:$0xff]   ;;  %v2732_v48 = vcombine.high %v35_v40, %v43_v41  ;;  %v3680_v35 = vld [vmem:[%s4659_s1 + $0x3f8] sm:$0xff]  }
  0x76   :  { %3371 = vmatpush3.bf16.msra.mxu1 %v3637_v49  ;;  %3308 = vmatprep.subr.bf16.mxu0 %v3638_v50  ;;  %v2734_v49 = vcombine.high %v36_v43, %v44_v44  ;;  %v3654_v50 = vld [vmem:[%s4659_s1 + $0x348] sm:$0xff]  }
  0x77   :  { %3372 = vmatprep.subr.bf16.mxu1 %v3640_v52  ;;  %v3655_v52 = vld [vmem:[%s4659_s1 + $0x308] sm:$0xff]  }
  0x79   :  { %3309 = vmatpush3.bf16.msra.mxu0 %v3639_v56  ;;  %v3658_v56 = vld [vmem:[%s4659_s1 + $0x350] sm:$0xff]  }
  0x7a   :  { %3373 = vmatpush3.bf16.msra.mxu1 %v3641_v57  ;;  %3310 = vmatprep.subr.bf16.mxu0 %v3642_v58  ;;  %v52_v57 = vld [vmem:[%s4660_s0 + $0x128] sm:$0xff] }
  0x7b   :  { %2065 = vmatmul.mubr.bf16.gmra.mrb[44].mxu0 %v2759_v59  ;;  %3374 = vmatprep.subr.bf16.mxu1 %v3644_v60  ;;  %v60_v58 = vld [vmem:[%s4660_s0 + $0x168] sm:$0xff]  ;;  %v3660_v59 = vld [vmem:[%s4659_s1 + $0x3d0] sm:$0xff]   ;;  %v2731_v60 = vcombine.low %v35_v40, %v43_v41  ;;  %v3681_v41 = vld [vmem:[%s4659_s1 + $0x3b8] sm:$0xff]  }
  0x7c   :  { %2162 = vmatmul.mubr.bf16.gmra.mrb[44].mxu1 %v2761_v61  ;;  %2072 = vmatprep.mubr.bf16.mxu0 %v2776_v62  ;;  %v2733_v61 = vcombine.low %v36_v43, %v44_v44  ;;  %v2748_v62 = vcombine.high %v51_v54, %v59_v55  ;;  %v108_v40 = vld [vmem:[%s4660_s0 + $0x2e8] sm:$0xff] }
  0x7d   :  { %2169 = vmatprep.mubr.bf16.mxu1 %v2778_v63  ;;  %3311 = vmatpush3.bf16.msra.mxu0 %v3643_v0  ;;  %v2750_v63 = vcombine.high %v52_v57, %v60_v58  ;;  %v3659_v0 = vld [vmem:[%s4659_s1 + $0x310] sm:$0xff]  }
  0x7e   :  { %3375 = vmatpush3.bf16.msra.mxu1 %v3645_v1  ;;  %3312 = vmatprep.subr.bf16.mxu0 %v3646_v2  ;;  %v3661_v1 = vld [vmem:[%s4659_s1 + $0x390] sm:$0xff]   ;;  %v3662_v2 = vld [vmem:[%s4659_s1 + $0x358] sm:$0xff]  }
  0x7f   :  { %3376 = vmatprep.subr.bf16.mxu1 %v3648_v5  ;;  %v75_v5 = vld [vmem:[%s4660_s0 + $0x1e0] sm:$0xff] }
  0x80   :  { %v2763_v27 = vcombine.low %v67_v4, %v75_v5 }
  0x81   :  { %3313 = vmatpush3.bf16.msra.mxu0 %v3647_v8  ;;  %v76_v8 = vld [vmem:[%s4660_s0 + $0x1e8] sm:$0xff] }
  0x82   :  { %3377 = vmatpush3.bf16.msra.mxu1 %v3649_v9  ;;  %3426 = vmatprep.subr.bf16.mxu0 %v3650_v10  ;;  %v3665_v9 = vld [vmem:[%s4659_s1 + $0x398] sm:$0xff]   ;;  %v3666_v10 = vld [vmem:[%s4659_s1 + $0x360] sm:$0xff]  }
  0x83   :  { %2073 = vmatmul.mubr.bf16.gmra.mrb[48].mxu0 %v2775_v11  ;;  %3490 = vmatprep.subr.bf16.mxu1 %v3652_v12  ;;  %v2747_v11 = vcombine.low %v51_v54, %v59_v55  ;;  %v3668_v12 = vld [vmem:[%s4659_s1 + $0x3e0] sm:$0xff]  }
  0x84   :  { %2170 = vmatmul.mubr.bf16.gmra.mrb[48].mxu1 %v2777_v13  ;;  %2080 = vmatprep.mubr.bf16.mxu0 %v2792_v14  ;;  %v2749_v13 = vcombine.low %v52_v57, %v60_v58  ;;  %v2764_v14 = vcombine.high %v67_v4, %v75_v5  ;;  %v131_v54 = vld [vmem:[%s4660_s0 + $0x3a0] sm:$0xff]  ;;  %v140_v57 = vld [vmem:[%s4660_s0 + $0x3e8] sm:$0xff] }
  0x85   :  { %2177 = vmatprep.mubr.bf16.mxu1 %v2794_v15  ;;  %v2766_v15 = vcombine.high %v68_v6, %v76_v8  ;;  %v139_v55 = vld [vmem:[%s4660_s0 + $0x3e0] sm:$0xff] }
  0x8b   :  { %2081 = vmatmul.mubr.bf16.gmra.mrb[52].mxu0 %v2791_v20  ;;  %v83_v20 = vld [vmem:[%s4660_s0 + $0x220] sm:$0xff] }
  0x8c   :  { %2178 = vmatmul.mubr.bf16.gmra.mrb[52].mxu1 %v2793_v21  ;;  %2088 = vmatprep.mubr.bf16.mxu0 %v2808_v22  ;;  %v91_v21 = vld [vmem:[%s4660_s0 + $0x260] sm:$0xff]  ;;  %v84_v22 = vld [vmem:[%s4660_s0 + $0x228] sm:$0xff] }
  0x8d   :  { %2185 = vmatprep.mubr.bf16.mxu1 %v2810_v23  ;;  %v3671_v23 = vld [vmem:[%s4659_s1 + $0x328] sm:$0xff]   ;;  %v2781_v43 = vcombine.low %v84_v22, %v92_v24 }
  0x93   :  { %2089 = vmatmul.mubr.bf16.gmra.mrb[56].mxu0 %v2807_v28  ;;  %v3676_v28 = vld [vmem:[%s4659_s1 + $0x3f0] sm:$0xff]  }
  0x94   :  { %2186 = vmatmul.mubr.bf16.gmra.mrb[56].mxu1 %v2809_v29  ;;  %2096 = vmatprep.mubr.bf16.mxu0 %v2824_v30  ;;  %v2765_v29 = vcombine.low %v68_v6, %v76_v8  ;;  %v2780_v30 = vcombine.high %v83_v20, %v91_v21  ;;  %v37_v6 = vld [vmem:[%s4660_s0 + $0xb0] sm:$0xff]  ;;  %v38_v8 = vld [vmem:[%s4660_s0 + $0xb8] sm:$0xff] }
  0x95   :  { %2193 = vmatprep.mubr.bf16.mxu1 %v2826_v31  ;;  %v2782_v31 = vcombine.high %v84_v22, %v92_v24  ;;  %v69_v22 = vld [vmem:[%s4660_s0 + $0x1b0] sm:$0xff]  ;;  %v70_v24 = vld [vmem:[%s4660_s0 + $0x1b8] sm:$0xff] }
  0x9b   :  { %2097 = vmatmul.mubr.bf16.gmra.mrb[60].mxu0 %v2823_v36  ;;  %v99_v36 = vld [vmem:[%s4660_s0 + $0x2a0] sm:$0xff] }
  0x9c   :  { %2194 = vmatmul.mubr.bf16.gmra.mrb[60].mxu1 %v2825_v37  ;;  %2234 = vmatprep.mubr.bf16.mxu0 %v2716_v38  ;;  %v107_v37 = vld [vmem:[%s4660_s0 + $0x2e0] sm:$0xff]  ;;  %v3679_v38 = vld [vmem:[%s4659_s1 + $0x338] sm:$0xff]  }
  0x9d   :  { %2331 = vmatprep.mubr.bf16.mxu1 %v2718_v39  ;;  %v100_v39 = vld [vmem:[%s4660_s0 + $0x2a8] sm:$0xff]  ;;  %v2796_v44 = vcombine.high %v99_v36, %v107_v37 }
  0xa3   :  { %2235 = vmatmul.mubr.bf16.vlgmr.msra.gmra.mrb[64].mxu0 %v2715_v42  ;;  %v2779_v42 = vcombine.low %v83_v20, %v91_v21 }
  0xa4   :  { %2332 = vmatmul.mubr.bf16.vlgmr.msra.gmra.mrb[64].mxu1 %v2717_v45  ;;  %3427 = vmatpush3.bf16.msra.mxu0 %v3651_v46  ;;  %v2798_v45 = vcombine.high %v100_v39, %v108_v40  ;;  %v115_v46 = vld [vmem:[%s4660_s0 + $0x320] sm:$0xff] }
  0xa5   :  { %3491 = vmatpush3.bf16.msra.mxu1 %v3653_v47  ;;  %2242 = vmatprep.mubr.bf16.mxu0 %v2732_v48  ;;  %v123_v47 = vld [vmem:[%s4660_s0 + $0x360] sm:$0xff]  ;;  %v116_v48 = vld [vmem:[%s4660_s0 + $0x328] sm:$0xff] }
  0xa6   :  { %2339 = vmatprep.mubr.bf16.mxu1 %v2734_v49  ;;  %3428 = vmatprep.subr.bf16.mxu0 %v3654_v50  ;;  %v124_v49 = vld [vmem:[%s4660_s0 + $0x368] sm:$0xff]  ;;  %v2795_v50 = vcombine.low %v99_v36, %v107_v37  ;;  %v2811_v58 = vcombine.low %v115_v46, %v123_v47  ;;  %v4437_v36 = vld [vmem:[%s4661_s2] ss:$0 sm:$0xff] }
  0xa7   :  { %3492 = vmatprep.subr.bf16.mxu1 %v3656_v51  ;;  %v2797_v51 = vcombine.low %v100_v39, %v108_v40 }
  0xa8   :  { %3429 = vmatpush3.bf16.msra.mxu0 %v3655_v52  ;;  %v2812_v52 = vcombine.high %v115_v46, %v123_v47 }
  0xa9   :  { %3493 = vmatpush3.bf16.msra.mxu1 %v3657_v53  ;;  %3430 = vmatprep.subr.bf16.mxu0 %v3658_v56  ;;  %v2814_v53 = vcombine.high %v116_v48, %v124_v49  ;;  %v132_v56 = vld [vmem:[%s4660_s0 + $0x3a8] sm:$0xff] }
  0xaa   :  { %3494 = vmatprep.subr.bf16.mxu1 %v3660_v59  ;;  %v2813_v59 = vcombine.low %v116_v48, %v124_v49 }
  0xab   :  { %2243 = vmatmul.mubr.bf16.gmra.mrb[68].mxu0 %v2731_v60  ;;  %v2828_v60 = vcombine.high %v131_v54, %v139_v55 }
  0xac   :  { %2340 = vmatmul.mubr.bf16.gmra.mrb[68].mxu1 %v2733_v61  ;;  %2250 = vmatprep.mubr.bf16.mxu0 %v2748_v62  ;;  %v2830_v61 = vcombine.high %v132_v56, %v140_v57  ;;  %v21_v62 = vld [vmem:[%s4660_s0 + $0x30] sm:$0xff] }
  0xad   :  { %2347 = vmatprep.mubr.bf16.mxu1 %v2750_v63  ;;  %3431 = vmatpush3.bf16.msra.mxu0 %v3659_v0  ;;  %v29_v63 = vld [vmem:[%s4660_s0 + $0x70] sm:$0xff]  ;;  %v22_v0 = vld [vmem:[%s4660_s0 + $0x38] sm:$0xff] }
  0xae   :  { %3495 = vmatpush3.bf16.msra.mxu1 %v3661_v1  ;;  %3432 = vmatprep.subr.bf16.mxu0 %v3662_v2  ;;  %v30_v1 = vld [vmem:[%s4660_s0 + $0x78] sm:$0xff]  ;;  %v2827_v2 = vcombine.low %v131_v54, %v139_v55  ;;  %v2720_v4 = vcombine.high %v21_v62, %v29_v63  ;;  %v101_v54 = vld [vmem:[%s4660_s0 + $0x2b0] sm:$0xff] }
  0xaf   :  { %3496 = vmatprep.subr.bf16.mxu1 %v3664_v3  ;;  %v2829_v3 = vcombine.low %v132_v56, %v140_v57  ;;  %v2722_v5 = vcombine.high %v22_v0, %v30_v1  ;;  %v109_v55 = vld [vmem:[%s4660_s0 + $0x2f0] sm:$0xff] }
  0xb1   :  { %3433 = vmatpush3.bf16.msra.mxu0 %v3663_v7  ;;  %v45_v7 = vld [vmem:[%s4660_s0 + $0xf0] sm:$0xff] }
  0xb2   :  { %3497 = vmatpush3.bf16.msra.mxu1 %v3665_v9  ;;  %3434 = vmatprep.subr.bf16.mxu0 %v3666_v10  ;;  %v46_v9 = vld [vmem:[%s4660_s0 + $0xf8] sm:$0xff]  ;;  %v2719_v10 = vcombine.low %v21_v62, %v29_v63 }
  0xb3   :  { %2251 = vmatmul.mubr.bf16.gmra.mrb[72].mxu0 %v2747_v11  ;;  %3498 = vmatprep.subr.bf16.mxu1 %v3668_v12  ;;  %v2721_v11 = vcombine.low %v22_v0, %v30_v1  ;;  %v2736_v12 = vcombine.high %v37_v6, %v45_v7 }
  0xb4   :  { %2348 = vmatmul.mubr.bf16.gmra.mrb[72].mxu1 %v2749_v13  ;;  %2258 = vmatprep.mubr.bf16.mxu0 %v2764_v14  ;;  %v2738_v13 = vcombine.high %v38_v8, %v46_v9  ;;  %v53_v14 = vld [vmem:[%s4660_s0 + $0x130] sm:$0xff] }
  0xb5   :  { %2355 = vmatprep.mubr.bf16.mxu1 %v2766_v15  ;;  %3435 = vmatpush3.bf16.msra.mxu0 %v3667_v16  ;;  %v61_v15 = vld [vmem:[%s4660_s0 + $0x170] sm:$0xff]  ;;  %v54_v16 = vld [vmem:[%s4660_s0 + $0x138] sm:$0xff] }
  0xb6   :  { %3499 = vmatpush3.bf16.msra.mxu1 %v3669_v17  ;;  %3436 = vmatprep.subr.bf16.mxu0 %v3670_v18  ;;  %v62_v17 = vld [vmem:[%s4660_s0 + $0x178] sm:$0xff]  ;;  %v2735_v18 = vcombine.low %v37_v6, %v45_v7  ;;  %v2752_v20 = vcombine.high %v53_v14, %v61_v15 }
  0xb7   :  { %3500 = vmatprep.subr.bf16.mxu1 %v3672_v19  ;;  %v2737_v19 = vcombine.low %v38_v8, %v46_v9  ;;  %v2754_v21 = vcombine.high %v54_v16, %v62_v17 }
  0xb9   :  { %3437 = vmatpush3.bf16.msra.mxu0 %v3671_v23  ;;  %v77_v23 = vld [vmem:[%s4660_s0 + $0x1f0] sm:$0xff] }
  0xba   :  { %3501 = vmatpush3.bf16.msra.mxu1 %v3673_v25  ;;  %3438 = vmatprep.subr.bf16.mxu0 %v3674_v26  ;;  %v78_v25 = vld [vmem:[%s4660_s0 + $0x1f8] sm:$0xff]  ;;  %v2751_v26 = vcombine.low %v53_v14, %v61_v15  ;;  %v117_v14 = vld [vmem:[%s4660_s0 + $0x330] sm:$0xff] }
  0xbb   :  { %2259 = vmatmul.mubr.bf16.gmra.mrb[76].mxu0 %v2763_v27  ;;  %3502 = vmatprep.subr.bf16.mxu1 %v3676_v28  ;;  %v2753_v27 = vcombine.low %v54_v16, %v62_v17  ;;  %v2768_v28 = vcombine.high %v69_v22, %v77_v23  ;;  %v125_v15 = vld [vmem:[%s4660_s0 + $0x370] sm:$0xff] }
  0xbc   :  { %2356 = vmatmul.mubr.bf16.gmra.mrb[76].mxu1 %v2765_v29  ;;  %2266 = vmatprep.mubr.bf16.mxu0 %v2780_v30  ;;  %v2770_v29 = vcombine.high %v70_v24, %v78_v25  ;;  %v85_v30 = vld [vmem:[%s4660_s0 + $0x230] sm:$0xff] }
  0xbd   :  { %2363 = vmatprep.mubr.bf16.mxu1 %v2782_v31  ;;  %3439 = vmatpush3.bf16.msra.mxu0 %v3675_v32  ;;  %v93_v31 = vld [vmem:[%s4660_s0 + $0x270] sm:$0xff] }
  0xbe   :  { %3503 = vmatpush3.bf16.msra.mxu1 %v3677_v33  ;;  %3440 = vmatprep.subr.bf16.mxu0 %v3678_v34  ;;  %v86_v33 = vld [vmem:[%s4660_s0 + $0x238] sm:$0xff]  ;;  %v2783_v62 = vcombine.low %v85_v30, %v93_v31 }
  0xbf   :  { %3504 = vmatprep.subr.bf16.mxu1 %v3680_v35  ;;  %v94_v34 = vld [vmem:[%s4660_s0 + $0x278] sm:$0xff] }
  0xc0   :  { %v2786_v47 = vcombine.high %v86_v33, %v94_v34 }
  0xc1   :  { %3441 = vmatpush3.bf16.msra.mxu0 %v3679_v38  ;;  %v2767_v38 = vcombine.low %v69_v22, %v77_v23  ;;  %v2799_v22 = vcombine.low %v101_v54, %v109_v55 }
  0xc2   :  { %3505 = vmatpush3.bf16.msra.mxu1 %v3681_v41 }
  0xc3   :  { %2267 = vmatmul.mubr.bf16.gmra.mrb[80].mxu0 %v2779_v42  ;;  %v2769_v42 = vcombine.low %v70_v24, %v78_v25 }
  0xc4   :  { %2364 = vmatmul.mubr.bf16.gmra.mrb[80].mxu1 %v2781_v43  ;;  %2274 = vmatprep.mubr.bf16.mxu0 %v2796_v44  ;;  %v2784_v43 = vcombine.high %v85_v30, %v93_v31 }
  0xc5   :  { %2371 = vmatprep.mubr.bf16.mxu1 %v2798_v45 }
  0xcb   :  { %2275 = vmatmul.mubr.bf16.gmra.mrb[84].mxu0 %v2795_v50 }
  0xcc   :  { %2372 = vmatmul.mubr.bf16.gmra.mrb[84].mxu1 %v2797_v51  ;;  %2282 = vmatprep.mubr.bf16.mxu0 %v2812_v52 }
  0xcd   :  { %2379 = vmatprep.mubr.bf16.mxu1 %v2814_v53 }
  0xd3   :  { %2283 = vmatmul.mubr.bf16.gmra.mrb[88].mxu0 %v2811_v58  ;;  %v102_v58 = vld [vmem:[%s4660_s0 + $0x2b8] sm:$0xff] }
  0xd4   :  { %2380 = vmatmul.mubr.bf16.gmra.mrb[88].mxu1 %v2813_v59  ;;  %2290 = vmatprep.mubr.bf16.mxu0 %v2828_v60  ;;  %v110_v59 = vld [vmem:[%s4660_s0 + $0x2f8] sm:$0xff] }
  0xd5   :  { %2387 = vmatprep.mubr.bf16.mxu1 %v2830_v61  ;;  %v2802_v7 = vcombine.high %v102_v58, %v110_v59 }
  0xdb   :  { %2291 = vmatmul.mubr.bf16.gmra.mrb[92].mxu0 %v2827_v2  ;;  %v2785_v2 = vcombine.low %v86_v33, %v94_v34 }
  0xdc   :  { %2388 = vmatmul.mubr.bf16.gmra.mrb[92].mxu1 %v2829_v3  ;;  %2428 = vmatprep.mubr.bf16.mxu0 %v2720_v4  ;;  %v2800_v3 = vcombine.high %v101_v54, %v109_v55 }
  0xdd   :  { %2525 = vmatprep.mubr.bf16.mxu1 %v2722_v5 }
  0xe3   :  { %2429 = vmatmul.mubr.bf16.vlgmr.msra.gmra.mrb[96].mxu0 %v2719_v10 }
  0xe4   :  { %2526 = vmatmul.mubr.bf16.vlgmr.msra.gmra.mrb[96].mxu1 %v2721_v11  ;;  %2436 = vmatprep.mubr.bf16.mxu0 %v2736_v12 }
  0xe5   :  { %2533 = vmatprep.mubr.bf16.mxu1 %v2738_v13 }
  0xeb   :  { %2437 = vmatmul.mubr.bf16.gmra.mrb[100].mxu0 %v2735_v18  ;;  %v118_v18 = vld [vmem:[%s4660_s0 + $0x338] sm:$0xff] }
  0xec   :  { %2534 = vmatmul.mubr.bf16.gmra.mrb[100].mxu1 %v2737_v19  ;;  %2444 = vmatprep.mubr.bf16.mxu0 %v2752_v20  ;;  %v126_v19 = vld [vmem:[%s4660_s0 + $0x378] sm:$0xff] }
  0xed   :  { %2541 = vmatprep.mubr.bf16.mxu1 %v2754_v21  ;;  %v2818_v31 = vcombine.high %v118_v18, %v126_v19 }
  0xf3   :  { %2445 = vmatmul.mubr.bf16.gmra.mrb[104].mxu0 %v2751_v26  ;;  %v2801_v26 = vcombine.low %v102_v58, %v110_v59 }
  0xf4   :  { %2542 = vmatmul.mubr.bf16.gmra.mrb[104].mxu1 %v2753_v27  ;;  %2452 = vmatprep.mubr.bf16.mxu0 %v2768_v28  ;;  %v2816_v27 = vcombine.high %v117_v14, %v125_v15 }
  0xf5   :  { %2549 = vmatprep.mubr.bf16.mxu1 %v2770_v29 }
  0xf6   :  { %v3058_v32 = vpop.f32.mrb[0].mxu0 }
  0xf7   :  { %v3122_v35 = vpop.f32.mrb[0].mxu1  ;;  %v3059_v37 = vpop.f32.mrb[1].mxu0 }
  0xf8   :  { %v3060_v39 = vadd.f32 %v3059_v37, %v3058_v32  ;;  %v3123_v40 = vpop.f32.mrb[1].mxu1  ;;  %v3061_v41 = vpop.f32.mrb[2].mxu0 }
  0xf9   :  { %v3124_v44 = vadd.f32 %v3123_v40, %v3122_v35  ;;  %v3125_v45 = vpop.f32.mrb[2].mxu1  ;;  %v3062_v46 = vpop.f32.mrb[3].mxu0  ;;  %v141_v40 = vld [vmem:[%s4660_s0 + $0x3f0] sm:$0xff] }
  0xfa   :  { %v1849_v48 = vadd.f32 %v3060_v39, %v4437_v36  ;;  %v3063_v49 = vadd.f32 %v3062_v46, %v3061_v41  ;;  %v3126_v50 = vpop.f32.mrb[3].mxu1  ;;  %v133_v39 = vld [vmem:[%s4660_s0 + $0x3b0] sm:$0xff] }
  0xfb   :  { %v3127_v51 = vadd.f32 %v3126_v50, %v3125_v45  ;;  %2453 = vmatmul.mubr.bf16.gmra.mrb[108].mxu0 %v2767_v38 }
  0xfc   :  { %v4440_v52 = vadd.f32 %v3124_v44, %v1849_v48  ;;  %v1852_v53 = vadd.f32 %v3063_v49, %v4437_v36  ;;  %2550 = vmatmul.mubr.bf16.gmra.mrb[108].mxu1 %v2769_v42  ;;  %2460 = vmatprep.mubr.bf16.mxu0 %v2784_v43  ;;  %v134_v43 = vld [vmem:[%s4660_s0 + $0x3b8] sm:$0xff] }
  0xfd   :  { %2557 = vmatprep.mubr.bf16.mxu1 %v2786_v47  ;;  %v142_v44 = vld [vmem:[%s4660_s0 + $0x3f8] sm:$0xff]  ;;  %v2815_v47 = vcombine.low %v117_v14, %v125_v15 }
  0xfe   :  { %v4449_v56 = vadd.f32 %v3127_v51, %v1852_v53  ;;  %v3064_v57 = vpop.f32.mrb[4].mxu0  ;;  %v2817_v51 = vcombine.low %v118_v18, %v126_v19  ;;  %v2832_v53 = vcombine.high %v133_v39, %v141_v40  ;;  %v2834_v58 = vcombine.high %v134_v43, %v142_v44 }
  0xff   :  { %v3128_v60 = vpop.f32.mrb[4].mxu1  ;;  %v3065_v61 = vpop.f32.mrb[5].mxu0 }
 0x100   :  { %v3066_v63 = vadd.f32 %v3065_v61, %v3064_v57  ;;  %v3129_v0 = vpop.f32.mrb[5].mxu1  ;;  %v3067_v1 = vpop.f32.mrb[6].mxu0 }
 0x101   :  { %v3130_v4 = vadd.f32 %v3129_v0, %v3128_v60  ;;  %v3131_v5 = vpop.f32.mrb[6].mxu1  ;;  %v3068_v6 = vpop.f32.mrb[7].mxu0 }
 0x102   :  { %v1857_v8 = vadd.f32 %v3066_v63, %v4437_v36  ;;  %v3069_v9 = vadd.f32 %v3068_v6, %v3067_v1  ;;  %v3132_v10 = vpop.f32.mrb[7].mxu1 }
 0x103   :  { %v3133_v11 = vadd.f32 %v3132_v10, %v3131_v5  ;;  %2461 = vmatmul.mubr.bf16.gmra.mrb[112].mxu0 %v2783_v62  ;;  %v2831_v5 = vcombine.low %v133_v39, %v141_v40 }
 0x104   :  { %v4458_v12 = vadd.f32 %v3130_v4, %v1857_v8  ;;  %v1860_v13 = vadd.f32 %v3069_v9, %v4437_v36  ;;  %2558 = vmatmul.mubr.bf16.gmra.mrb[112].mxu1 %v2785_v2  ;;  %2468 = vmatprep.mubr.bf16.mxu0 %v2800_v3  ;;  %v2833_v9 = vcombine.low %v134_v43, %v142_v44 }
 0x105   :  { %2565 = vmatprep.mubr.bf16.mxu1 %v2802_v7 }
 0x106   :  { %v4467_v16 = vadd.f32 %v3133_v11, %v1860_v13  ;;  %v3070_v17 = vpop.f32.mrb[8].mxu0 }
 0x107   :  { %v3134_v20 = vpop.f32.mrb[8].mxu1  ;;  %v3071_v21 = vpop.f32.mrb[9].mxu0 }
 0x108   :  { %v3072_v23 = vadd.f32 %v3071_v21, %v3070_v17  ;;  %v3135_v24 = vpop.f32.mrb[9].mxu1  ;;  %v3073_v25 = vpop.f32.mrb[10].mxu0 }
 0x109   :  { %v3136_v28 = vadd.f32 %v3135_v24, %v3134_v20  ;;  %v3137_v29 = vpop.f32.mrb[10].mxu1  ;;  %v3074_v30 = vpop.f32.mrb[11].mxu0 }
 0x10a   :  { %v1865_v32 = vadd.f32 %v3072_v23, %v4437_v36  ;;  %v3075_v33 = vadd.f32 %v3074_v30, %v3073_v25  ;;  %v3138_v34 = vpop.f32.mrb[11].mxu1 }
 0x10b   :  { %v3139_v35 = vadd.f32 %v3138_v34, %v3137_v29  ;;  %2469 = vmatmul.mubr.bf16.gmra.mrb[116].mxu0 %v2799_v22 }
 0x10c   :  { %v4476_v37 = vadd.f32 %v3136_v28, %v1865_v32  ;;  %v1868_v38 = vadd.f32 %v3075_v33, %v4437_v36  ;;  %2566 = vmatmul.mubr.bf16.gmra.mrb[116].mxu1 %v2801_v26  ;;  %2476 = vmatprep.mubr.bf16.mxu0 %v2816_v27 }
 0x10d   :  { %2573 = vmatprep.mubr.bf16.mxu1 %v2818_v31 }
 0x10e   :  { %v4485_v41 = vadd.f32 %v3139_v35, %v1868_v38  ;;  %v3076_v42 = vpop.f32.mrb[12].mxu0 }
 0x10f   :  { %v3140_v45 = vpop.f32.mrb[12].mxu1  ;;  %v3077_v46 = vpop.f32.mrb[13].mxu0 }
 0x110   :  { %v3078_v48 = vadd.f32 %v3077_v46, %v3076_v42  ;;  %v3141_v49 = vpop.f32.mrb[13].mxu1  ;;  %v3079_v50 = vpop.f32.mrb[14].mxu0 }
 0x111   :  { %v3142_v54 = vadd.f32 %v3141_v49, %v3140_v45  ;;  %v3143_v55 = vpop.f32.mrb[14].mxu1  ;;  %v3080_v57 = vpop.f32.mrb[15].mxu0 }
 0x112   :  { %v1873_v59 = vadd.f32 %v3078_v48, %v4437_v36  ;;  %v3081_v60 = vadd.f32 %v3080_v57, %v3079_v50  ;;  %v3144_v61 = vpop.f32.mrb[15].mxu1 }
 0x113   :  { %v3145_v62 = vadd.f32 %v3144_v61, %v3143_v55  ;;  %2477 = vmatmul.mubr.bf16.gmra.mrb[120].mxu0 %v2815_v47 }
 0x114   :  { %v4494_v63 = vadd.f32 %v3142_v54, %v1873_v59  ;;  %v1876_v0 = vadd.f32 %v3081_v60, %v4437_v36  ;;  %2574 = vmatmul.mubr.bf16.gmra.mrb[120].mxu1 %v2817_v51  ;;  %2484 = vmatprep.mubr.bf16.mxu0 %v2832_v53 }
 0x115   :  { %2581 = vmatprep.mubr.bf16.mxu1 %v2834_v58 }
 0x116   :  { %v4497_v1 = vadd.f32 %v3145_v62, %v1876_v0  ;;  %v3082_v2 = vpop.f32.mrb[16].mxu0 }
 0x117   :  { %v3146_v3 = vpop.f32.mrb[16].mxu1  ;;  %v3083_v4 = vpop.f32.mrb[17].mxu0 }
 0x118   :  { %v3084_v6 = vadd.f32 %v3083_v4, %v3082_v2  ;;  %v3147_v7 = vpop.f32.mrb[17].mxu1  ;;  %v3085_v8 = vpop.f32.mrb[18].mxu0 }
 0x119   :  { %v3148_v10 = vadd.f32 %v3147_v7, %v3146_v3  ;;  %v3149_v11 = vpop.f32.mrb[18].mxu1  ;;  %v3086_v13 = vpop.f32.mrb[19].mxu0 }
 0x11a   :  { %v1881_v14 = vadd.f32 %v3084_v6, %v4437_v36  ;;  %v3087_v15 = vadd.f32 %v3086_v13, %v3085_v8  ;;  %v3150_v17 = vpop.f32.mrb[19].mxu1 }
 0x11b   :  { %v3151_v18 = vadd.f32 %v3150_v17, %v3149_v11  ;;  %2485 = vmatmul.mubr.bf16.gmra.mrb[124].mxu0 %v2831_v5 }
 0x11c   :  { %v4500_v19 = vadd.f32 %v3148_v10, %v1881_v14  ;;  %v1884_v20 = vadd.f32 %v3087_v15, %v4437_v36  ;;  %2582 = vmatmul.mubr.bf16.gmra.mrb[124].mxu1 %v2833_v9 }
 0x11e   :  { %v4503_v21 = vadd.f32 %v3151_v18, %v1884_v20  ;;  %v3088_v22 = vpop.f32.mrb[20].mxu0 }
 0x11f   :  { %v3152_v23 = vpop.f32.mrb[20].mxu1  ;;  %v3089_v24 = vpop.f32.mrb[21].mxu0 }
 0x120   :  { %v3090_v25 = vadd.f32 %v3089_v24, %v3088_v22  ;;  %v3153_v26 = vpop.f32.mrb[21].mxu1  ;;  %v3091_v27 = vpop.f32.mrb[22].mxu0 }
 0x121   :  { %v3154_v28 = vadd.f32 %v3153_v26, %v3152_v23  ;;  %v3155_v29 = vpop.f32.mrb[22].mxu1  ;;  %v3092_v30 = vpop.f32.mrb[23].mxu0 }
 0x122   :  { %v1889_v31 = vadd.f32 %v3090_v25, %v4437_v36  ;;  %v3093_v32 = vadd.f32 %v3092_v30, %v3091_v27  ;;  %v3156_v33 = vpop.f32.mrb[23].mxu1 }
 0x123   :  { %v3157_v34 = vadd.f32 %v3156_v33, %v3155_v29 }
 0x124   :  { %v4506_v35 = vadd.f32 %v3154_v28, %v1889_v31  ;;  %v1892_v38 = vadd.f32 %v3093_v32, %v4437_v36 }
 0x126   :  { %v4509_v39 = vadd.f32 %v3157_v34, %v1892_v38  ;;  %v3094_v40 = vpop.f32.mrb[24].mxu0 }
 0x127   :  { %v3158_v42 = vpop.f32.mrb[24].mxu1  ;;  %v3095_v43 = vpop.f32.mrb[25].mxu0 }
 0x128   :  { %v3096_v44 = vadd.f32 %v3095_v43, %v3094_v40  ;;  %v3159_v45 = vpop.f32.mrb[25].mxu1  ;;  %v3097_v46 = vpop.f32.mrb[26].mxu0 }
 0x129   :  { %v3160_v47 = vadd.f32 %v3159_v45, %v3158_v42  ;;  %v3161_v48 = vpop.f32.mrb[26].mxu1  ;;  %v3098_v49 = vpop.f32.mrb[27].mxu0 }
 0x12a   :  { %v1897_v50 = vadd.f32 %v3096_v44, %v4437_v36  ;;  %v3099_v51 = vadd.f32 %v3098_v49, %v3097_v46  ;;  %v3162_v53 = vpop.f32.mrb[27].mxu1 }
 0x12b   :  { %v3163_v54 = vadd.f32 %v3162_v53, %v3161_v48 }
 0x12c   :  { %v4512_v55 = vadd.f32 %v3160_v47, %v1897_v50  ;;  %v1900_v57 = vadd.f32 %v3099_v51, %v4437_v36 }
 0x12e   :  { %v4515_v58 = vadd.f32 %v3163_v54, %v1900_v57  ;;  %v3100_v59 = vpop.f32.mrb[28].mxu0 }
 0x12f   :  { %v3164_v60 = vpop.f32.mrb[28].mxu1  ;;  %v3101_v61 = vpop.f32.mrb[29].mxu0 }
 0x130   :  { %v3102_v62 = vadd.f32 %v3101_v61, %v3100_v59  ;;  %v3165_v0 = vpop.f32.mrb[29].mxu1  ;;  %v3103_v2 = vpop.f32.mrb[30].mxu0 }
 0x131   :  { %v3166_v3 = vadd.f32 %v3165_v0, %v3164_v60  ;;  %v3167_v4 = vpop.f32.mrb[30].mxu1  ;;  %v3104_v5 = vpop.f32.mrb[31].mxu0 }
 0x132   :  { %v1905_v6 = vadd.f32 %v3102_v62, %v4437_v36  ;;  %v3105_v7 = vadd.f32 %v3104_v5, %v3103_v2  ;;  %v3168_v8 = vpop.f32.mrb[31].mxu1 }
 0x133   :  { %v3169_v9 = vadd.f32 %v3168_v8, %v3167_v4 }
 0x134   :  { %v4518_v10 = vadd.f32 %v3166_v3, %v1905_v6  ;;  %v1908_v11 = vadd.f32 %v3105_v7, %v4437_v36 }
 0x136   :  { %v4521_v13 = vadd.f32 %v3169_v9, %v1908_v11  ;;  %v3186_v14 = vpop.f32.mrb[32].mxu0 }
 0x137   :  { %v3250_v15 = vpop.f32.mrb[32].mxu1  ;;  %v3187_v17 = vpop.f32.mrb[33].mxu0 }
 0x138   :  { %v3188_v18 = vadd.f32 %v3187_v17, %v3186_v14  ;;  %v3251_v20 = vpop.f32.mrb[33].mxu1  ;;  %v3189_v22 = vpop.f32.mrb[34].mxu0 }
 0x139   :  { %v3252_v23 = vadd.f32 %v3251_v20, %v3250_v15  ;;  %v3253_v24 = vpop.f32.mrb[34].mxu1  ;;  %v3190_v25 = vpop.f32.mrb[35].mxu0 }
 0x13a   :  { %v2043_v26 = vadd.f32 %v3188_v18, %v4440_v52  ;;  %v3191_v27 = vadd.f32 %v3190_v25, %v3189_v22  ;;  %v3254_v28 = vpop.f32.mrb[35].mxu1 }
 0x13b   :  { %v3255_v29 = vadd.f32 %v3254_v28, %v3253_v24 }
 0x13c   :  { %v4524_v30 = vadd.f32 %v3252_v23, %v2043_v26  ;;  %v2046_v36 = vadd.f32 %v3191_v27, %v4449_v56 }
 0x13e   :  { %v4527_v31 = vadd.f32 %v3255_v29, %v2046_v36  ;;  %v3192_v32 = vpop.f32.mrb[36].mxu0 }
 0x13f   :  { %v3256_v33 = vpop.f32.mrb[36].mxu1  ;;  %v3193_v34 = vpop.f32.mrb[37].mxu0 }
 0x140   :  { %v3194_v38 = vadd.f32 %v3193_v34, %v3192_v32  ;;  %v3257_v40 = vpop.f32.mrb[37].mxu1  ;;  %v3195_v42 = vpop.f32.mrb[38].mxu0 }
 0x141   :  { %v3258_v43 = vadd.f32 %v3257_v40, %v3256_v33  ;;  %v3259_v44 = vpop.f32.mrb[38].mxu1  ;;  %v3196_v45 = vpop.f32.mrb[39].mxu0 }
 0x142   :  { %v2051_v52 = vadd.f32 %v3194_v38, %v4458_v12  ;;  %v3197_v46 = vadd.f32 %v3196_v45, %v3195_v42  ;;  %v3260_v47 = vpop.f32.mrb[39].mxu1 }
 0x143   :  { %v3261_v48 = vadd.f32 %v3260_v47, %v3259_v44 }
 0x144   :  { %v4530_v49 = vadd.f32 %v3258_v43, %v2051_v52  ;;  %v2054_v56 = vadd.f32 %v3197_v46, %v4467_v16 }
 0x146   :  { %v4533_v50 = vadd.f32 %v3261_v48, %v2054_v56  ;;  %v3198_v51 = vpop.f32.mrb[40].mxu0 }
 0x147   :  { %v3262_v53 = vpop.f32.mrb[40].mxu1  ;;  %v3199_v54 = vpop.f32.mrb[41].mxu0 }
 0x148   :  { %v3200_v57 = vadd.f32 %v3199_v54, %v3198_v51  ;;  %v3263_v59 = vpop.f32.mrb[41].mxu1  ;;  %v3201_v60 = vpop.f32.mrb[42].mxu0 }
 0x149   :  { %v3264_v61 = vadd.f32 %v3263_v59, %v3262_v53  ;;  %v3265_v62 = vpop.f32.mrb[42].mxu1  ;;  %v3202_v0 = vpop.f32.mrb[43].mxu0 }
 0x14a   :  { %v2059_v12 = vadd.f32 %v3200_v57, %v4476_v37  ;;  %v3203_v2 = vadd.f32 %v3202_v0, %v3201_v60  ;;  %v3266_v3 = vpop.f32.mrb[43].mxu1 }
 0x14b   :  { %v3267_v4 = vadd.f32 %v3266_v3, %v3265_v62 }
 0x14c   :  { %v4536_v5 = vadd.f32 %v3264_v61, %v2059_v12  ;;  %v2062_v16 = vadd.f32 %v3203_v2, %v4485_v41 }
 0x14e   :  { %v4539_v6 = vadd.f32 %v3267_v4, %v2062_v16  ;;  %v3204_v7 = vpop.f32.mrb[44].mxu0 }
 0x14f   :  { %v3268_v8 = vpop.f32.mrb[44].mxu1  ;;  %v3205_v9 = vpop.f32.mrb[45].mxu0 }
 0x150   :  { %v3206_v11 = vadd.f32 %v3205_v9, %v3204_v7  ;;  %v3269_v14 = vpop.f32.mrb[45].mxu1  ;;  %v3207_v15 = vpop.f32.mrb[46].mxu0 }
 0x151   :  { %v3270_v17 = vadd.f32 %v3269_v14, %v3268_v8  ;;  %v3271_v18 = vpop.f32.mrb[46].mxu1  ;;  %v3208_v20 = vpop.f32.mrb[47].mxu0 }
 0x152   :  { %v2067_v37 = vadd.f32 %v3206_v11, %v4494_v63  ;;  %v3209_v22 = vadd.f32 %v3208_v20, %v3207_v15  ;;  %v3272_v23 = vpop.f32.mrb[47].mxu1 }
 0x153   :  { %v3273_v24 = vadd.f32 %v3272_v23, %v3271_v18 }
 0x154   :  { %v4542_v25 = vadd.f32 %v3270_v17, %v2067_v37  ;;  %v2070_v41 = vadd.f32 %v3209_v22, %v4497_v1 }
 0x156   :  { %v4545_v26 = vadd.f32 %v3273_v24, %v2070_v41  ;;  %v3210_v27 = vpop.f32.mrb[48].mxu0 }
 0x157   :  { %v3274_v28 = vpop.f32.mrb[48].mxu1  ;;  %v3211_v29 = vpop.f32.mrb[49].mxu0 }
 0x158   :  { %v3212_v36 = vadd.f32 %v3211_v29, %v3210_v27  ;;  %v3275_v32 = vpop.f32.mrb[49].mxu1  ;;  %v3213_v33 = vpop.f32.mrb[50].mxu0 }
 0x159   :  { %v3276_v34 = vadd.f32 %v3275_v32, %v3274_v28  ;;  %v3277_v38 = vpop.f32.mrb[50].mxu1  ;;  %v3214_v40 = vpop.f32.mrb[51].mxu0 }
 0x15a   :  { %v2075_v63 = vadd.f32 %v3212_v36, %v4500_v19  ;;  %v3215_v42 = vadd.f32 %v3214_v40, %v3213_v33  ;;  %v3278_v43 = vpop.f32.mrb[51].mxu1 }
 0x15b   :  { %v3279_v44 = vadd.f32 %v3278_v43, %v3277_v38 }
 0x15c   :  { %v4548_v45 = vadd.f32 %v3276_v34, %v2075_v63  ;;  %v2078_v1 = vadd.f32 %v3215_v42, %v4503_v21 }
 0x15e   :  { %v4551_v52 = vadd.f32 %v3279_v44, %v2078_v1  ;;  %v3216_v46 = vpop.f32.mrb[52].mxu0 }
 0x15f   :  { %v3280_v47 = vpop.f32.mrb[52].mxu1  ;;  %v3217_v48 = vpop.f32.mrb[53].mxu0 }
 0x160   :  { %v3218_v56 = vadd.f32 %v3217_v48, %v3216_v46  ;;  %v3281_v51 = vpop.f32.mrb[53].mxu1  ;;  %v3219_v53 = vpop.f32.mrb[54].mxu0 }
 0x161   :  { %v3282_v54 = vadd.f32 %v3281_v51, %v3280_v47  ;;  %v3283_v57 = vpop.f32.mrb[54].mxu1  ;;  %v3220_v59 = vpop.f32.mrb[55].mxu0 }
 0x162   :  { %v2083_v19 = vadd.f32 %v3218_v56, %v4506_v35  ;;  %v3221_v60 = vadd.f32 %v3220_v59, %v3219_v53  ;;  %v3284_v61 = vpop.f32.mrb[55].mxu1 }
 0x163   :  { %v3285_v62 = vadd.f32 %v3284_v61, %v3283_v57 }
 0x164   :  { %v4554_v0 = vadd.f32 %v3282_v54, %v2083_v19  ;;  %v2086_v21 = vadd.f32 %v3221_v60, %v4509_v39 }
 0x166   :  { %v4557_v12 = vadd.f32 %v3285_v62, %v2086_v21  ;;  %v3222_v2 = vpop.f32.mrb[56].mxu0 }
 0x167   :  { %v3286_v3 = vpop.f32.mrb[56].mxu1  ;;  %v3223_v4 = vpop.f32.mrb[57].mxu0 }
 0x168   :  { %v3224_v16 = vadd.f32 %v3223_v4, %v3222_v2  ;;  %v3287_v7 = vpop.f32.mrb[57].mxu1  ;;  %v3225_v8 = vpop.f32.mrb[58].mxu0 }
 0x169   :  { %v3288_v9 = vadd.f32 %v3287_v7, %v3286_v3  ;;  %v3289_v11 = vpop.f32.mrb[58].mxu1  ;;  %v3226_v14 = vpop.f32.mrb[59].mxu0 }
 0x16a   :  { %v2091_v35 = vadd.f32 %v3224_v16, %v4512_v55  ;;  %v3227_v15 = vadd.f32 %v3226_v14, %v3225_v8  ;;  %v3290_v17 = vpop.f32.mrb[59].mxu1 }
 0x16b   :  { %v3291_v18 = vadd.f32 %v3290_v17, %v3289_v11 }
 0x16c   :  { %v4560_v20 = vadd.f32 %v3288_v9, %v2091_v35  ;;  %v2094_v39 = vadd.f32 %v3227_v15, %v4515_v58 }
 0x16e   :  { %v4563_v37 = vadd.f32 %v3291_v18, %v2094_v39  ;;  %v3228_v22 = vpop.f32.mrb[60].mxu0 }
 0x16f   :  { %v3292_v23 = vpop.f32.mrb[60].mxu1  ;;  %v3229_v24 = vpop.f32.mrb[61].mxu0 }
 0x170   :  { %v3230_v41 = vadd.f32 %v3229_v24, %v3228_v22  ;;  %v3293_v27 = vpop.f32.mrb[61].mxu1  ;;  %v3231_v28 = vpop.f32.mrb[62].mxu0 }
 0x171   :  { %v3294_v29 = vadd.f32 %v3293_v27, %v3292_v23  ;;  %v3295_v36 = vpop.f32.mrb[62].mxu1  ;;  %v3232_v32 = vpop.f32.mrb[63].mxu0 }
 0x172   :  { %v2099_v55 = vadd.f32 %v3230_v41, %v4518_v10  ;;  %v3233_v33 = vadd.f32 %v3232_v32, %v3231_v28  ;;  %v3296_v34 = vpop.f32.mrb[63].mxu1 }
 0x173   :  { %v3297_v38 = vadd.f32 %v3296_v34, %v3295_v36 }
 0x174   :  { %v4566_v40 = vadd.f32 %v3294_v29, %v2099_v55  ;;  %v2102_v58 = vadd.f32 %v3233_v33, %v4521_v13 }
 0x176   :  { %v4569_v63 = vadd.f32 %v3297_v38, %v2102_v58  ;;  %v3314_v42 = vpop.f32.mrb[64].mxu0 }
 0x177   :  { %v3378_v43 = vpop.f32.mrb[64].mxu1  ;;  %v3315_v44 = vpop.f32.mrb[65].mxu0 }
 0x178   :  { %v3316_v1 = vadd.f32 %v3315_v44, %v3314_v42  ;;  %v3379_v46 = vpop.f32.mrb[65].mxu1  ;;  %v3317_v47 = vpop.f32.mrb[66].mxu0 }
 0x179   :  { %v3380_v48 = vadd.f32 %v3379_v46, %v3378_v43  ;;  %v3381_v56 = vpop.f32.mrb[66].mxu1  ;;  %v3318_v51 = vpop.f32.mrb[67].mxu0 }
 0x17a   :  { %v2237_v10 = vadd.f32 %v3316_v1, %v4524_v30  ;;  %v3319_v53 = vadd.f32 %v3318_v51, %v3317_v47  ;;  %v3382_v54 = vpop.f32.mrb[67].mxu1 }
 0x17b   :  { %v3383_v57 = vadd.f32 %v3382_v54, %v3381_v56 }
 0x17c   :  { %v4572_v59 = vadd.f32 %v3380_v48, %v2237_v10  ;;  %v2240_v13 = vadd.f32 %v3319_v53, %v4527_v31 }
 0x17e   :  { %v4575_v19 = vadd.f32 %v3383_v57, %v2240_v13  ;;  %v3320_v60 = vpop.f32.mrb[68].mxu0 }
 0x17f   :  { %v3384_v61 = vpop.f32.mrb[68].mxu1  ;;  %v3321_v62 = vpop.f32.mrb[69].mxu0 }
 0x180   :  { %v3322_v21 = vadd.f32 %v3321_v62, %v3320_v60  ;;  %v3385_v2 = vpop.f32.mrb[69].mxu1  ;;  %v3323_v3 = vpop.f32.mrb[70].mxu0 }
 0x181   :  { %v3386_v4 = vadd.f32 %v3385_v2, %v3384_v61  ;;  %v3387_v16 = vpop.f32.mrb[70].mxu1  ;;  %v3324_v7 = vpop.f32.mrb[71].mxu0 }
 0x182   :  { %v2245_v30 = vadd.f32 %v3322_v21, %v4530_v49  ;;  %v3325_v8 = vadd.f32 %v3324_v7, %v3323_v3  ;;  %v3388_v9 = vpop.f32.mrb[71].mxu1 }
 0x183   :  { %v3389_v11 = vadd.f32 %v3388_v9, %v3387_v16 }
 0x184   :  { %v4578_v14 = vadd.f32 %v3386_v4, %v2245_v30  ;;  %v2248_v31 = vadd.f32 %v3325_v8, %v4533_v50 }
 0x186   :  { %v4581_v35 = vadd.f32 %v3389_v11, %v2248_v31  ;;  %v3326_v15 = vpop.f32.mrb[72].mxu0 }
 0x187   :  { %v3390_v17 = vpop.f32.mrb[72].mxu1  ;;  %v3327_v18 = vpop.f32.mrb[73].mxu0 }
 0x188   :  { %v3328_v39 = vadd.f32 %v3327_v18, %v3326_v15  ;;  %v3391_v22 = vpop.f32.mrb[73].mxu1  ;;  %v3329_v23 = vpop.f32.mrb[74].mxu0 }
 0x189   :  { %v3392_v24 = vadd.f32 %v3391_v22, %v3390_v17  ;;  %v3393_v41 = vpop.f32.mrb[74].mxu1  ;;  %v3330_v27 = vpop.f32.mrb[75].mxu0 }
 0x18a   :  { %v2253_v49 = vadd.f32 %v3328_v39, %v4536_v5  ;;  %v3331_v28 = vadd.f32 %v3330_v27, %v3329_v23  ;;  %v3394_v29 = vpop.f32.mrb[75].mxu1 }
 0x18b   :  { %v3395_v36 = vadd.f32 %v3394_v29, %v3393_v41 }
 0x18c   :  { %v4584_v32 = vadd.f32 %v3392_v24, %v2253_v49  ;;  %v2256_v50 = vadd.f32 %v3331_v28, %v4539_v6 }
 0x18e   :  { %v4587_v55 = vadd.f32 %v3395_v36, %v2256_v50  ;;  %v3332_v33 = vpop.f32.mrb[76].mxu0 }
 0x18f   :  { %v3396_v34 = vpop.f32.mrb[76].mxu1  ;;  %v3333_v38 = vpop.f32.mrb[77].mxu0 }
 0x190   :  { %v3334_v58 = vadd.f32 %v3333_v38, %v3332_v33  ;;  %v3397_v42 = vpop.f32.mrb[77].mxu1  ;;  %v3335_v43 = vpop.f32.mrb[78].mxu0 }
 0x191   :  { %v3398_v44 = vadd.f32 %v3397_v42, %v3396_v34  ;;  %v3399_v1 = vpop.f32.mrb[78].mxu1  ;;  %v3336_v46 = vpop.f32.mrb[79].mxu0 }
 0x192   :  { %v2261_v5 = vadd.f32 %v3334_v58, %v4542_v25  ;;  %v3337_v47 = vadd.f32 %v3336_v46, %v3335_v43  ;;  %v3400_v48 = vpop.f32.mrb[79].mxu1 }
 0x193   :  { %v3401_v56 = vadd.f32 %v3400_v48, %v3399_v1 }
 0x194   :  { %v4590_v51 = vadd.f32 %v3398_v44, %v2261_v5  ;;  %v2264_v6 = vadd.f32 %v3337_v47, %v4545_v26 }
 0x196   :  { %v4593_v10 = vadd.f32 %v3401_v56, %v2264_v6  ;;  %v3338_v53 = vpop.f32.mrb[80].mxu0 }
 0x197   :  { %v3402_v54 = vpop.f32.mrb[80].mxu1  ;;  %v3339_v57 = vpop.f32.mrb[81].mxu0 }
 0x198   :  { %v3340_v13 = vadd.f32 %v3339_v57, %v3338_v53  ;;  %v3403_v60 = vpop.f32.mrb[81].mxu1  ;;  %v3341_v61 = vpop.f32.mrb[82].mxu0 }
 0x199   :  { %v3404_v62 = vadd.f32 %v3403_v60, %v3402_v54  ;;  %v3405_v21 = vpop.f32.mrb[82].mxu1  ;;  %v3342_v2 = vpop.f32.mrb[83].mxu0 }
 0x19a   :  { %v2269_v25 = vadd.f32 %v3340_v13, %v4548_v45  ;;  %v3343_v3 = vadd.f32 %v3342_v2, %v3341_v61  ;;  %v3406_v4 = vpop.f32.mrb[83].mxu1 }
 0x19b   :  { %v3407_v16 = vadd.f32 %v3406_v4, %v3405_v21 }
 0x19c   :  { %v4596_v7 = vadd.f32 %v3404_v62, %v2269_v25  ;;  %v2272_v26 = vadd.f32 %v3343_v3, %v4551_v52 }
 0x19e   :  { %v4599_v30 = vadd.f32 %v3407_v16, %v2272_v26  ;;  %v3344_v8 = vpop.f32.mrb[84].mxu0 }
 0x19f   :  { %v3408_v9 = vpop.f32.mrb[84].mxu1  ;;  %v3345_v11 = vpop.f32.mrb[85].mxu0 }
 0x1a0   :  { %v3346_v31 = vadd.f32 %v3345_v11, %v3344_v8  ;;  %v3409_v15 = vpop.f32.mrb[85].mxu1  ;;  %v3347_v17 = vpop.f32.mrb[86].mxu0 }
 0x1a1   :  { %v3410_v18 = vadd.f32 %v3409_v15, %v3408_v9  ;;  %v3411_v39 = vpop.f32.mrb[86].mxu1  ;;  %v3348_v22 = vpop.f32.mrb[87].mxu0 }
 0x1a2   :  { %v2277_v45 = vadd.f32 %v3346_v31, %v4554_v0  ;;  %v3349_v23 = vadd.f32 %v3348_v22, %v3347_v17  ;;  %v3412_v24 = vpop.f32.mrb[87].mxu1 }
 0x1a3   :  { %v3413_v41 = vadd.f32 %v3412_v24, %v3411_v39 }
 0x1a4   :  { %v4602_v27 = vadd.f32 %v3410_v18, %v2277_v45  ;;  %v2280_v52 = vadd.f32 %v3349_v23, %v4557_v12 }
 0x1a6   :  { %v4605_v49 = vadd.f32 %v3413_v41, %v2280_v52  ;;  %v3350_v28 = vpop.f32.mrb[88].mxu0 }
 0x1a7   :  { %v3414_v29 = vpop.f32.mrb[88].mxu1  ;;  %v3351_v36 = vpop.f32.mrb[89].mxu0 }
 0x1a8   :  { %v3352_v50 = vadd.f32 %v3351_v36, %v3350_v28  ;;  %v3415_v33 = vpop.f32.mrb[89].mxu1  ;;  %v3353_v34 = vpop.f32.mrb[90].mxu0 }
 0x1a9   :  { %v3416_v38 = vadd.f32 %v3415_v33, %v3414_v29  ;;  %v3417_v58 = vpop.f32.mrb[90].mxu1  ;;  %v3354_v42 = vpop.f32.mrb[91].mxu0 }
 0x1aa   :  { %v2285_v0 = vadd.f32 %v3352_v50, %v4560_v20  ;;  %v3355_v43 = vadd.f32 %v3354_v42, %v3353_v34  ;;  %v3418_v44 = vpop.f32.mrb[91].mxu1 }
 0x1ab   :  { %v3419_v1 = vadd.f32 %v3418_v44, %v3417_v58 }
 0x1ac   :  { %v4608_v46 = vadd.f32 %v3416_v38, %v2285_v0  ;;  %v2288_v12 = vadd.f32 %v3355_v43, %v4563_v37 }
 0x1ae   :  { %v4611_v5 = vadd.f32 %v3419_v1, %v2288_v12  ;;  %v3356_v47 = vpop.f32.mrb[92].mxu0 }
 0x1af   :  { %v3420_v48 = vpop.f32.mrb[92].mxu1  ;;  %v3357_v56 = vpop.f32.mrb[93].mxu0 }
 0x1b0   :  { %v3358_v6 = vadd.f32 %v3357_v56, %v3356_v47  ;;  %v3421_v53 = vpop.f32.mrb[93].mxu1  ;;  %v3359_v54 = vpop.f32.mrb[94].mxu0 }
 0x1b1   :  { %v3422_v57 = vadd.f32 %v3421_v53, %v3420_v48  ;;  %v3423_v13 = vpop.f32.mrb[94].mxu1  ;;  %v3360_v60 = vpop.f32.mrb[95].mxu0 }
 0x1b2   :  { %v2293_v20 = vadd.f32 %v3358_v6, %v4566_v40  ;;  %v3361_v61 = vadd.f32 %v3360_v60, %v3359_v54  ;;  %v3424_v62 = vpop.f32.mrb[95].mxu1 }
 0x1b3   :  { %v3425_v21 = vadd.f32 %v3424_v62, %v3423_v13 }
 0x1b4   :  { %v4614_v2 = vadd.f32 %v3422_v57, %v2293_v20  ;;  %v2296_v37 = vadd.f32 %v3361_v61, %v4569_v63 }
 0x1b6   :  { %v4617_v25 = vadd.f32 %v3425_v21, %v2296_v37  ;;  %v3442_v3 = vpop.f32.mrb[96].mxu0 }
 0x1b7   :  { %v3506_v4 = vpop.f32.mrb[96].mxu1  ;;  %v3443_v16 = vpop.f32.mrb[97].mxu0 }
 0x1b8   :  { %v3444_v26 = vadd.f32 %v3443_v16, %v3442_v3  ;;  %v3507_v8 = vpop.f32.mrb[97].mxu1  ;;  %v3445_v9 = vpop.f32.mrb[98].mxu0 }
 0x1b9   :  { %v3508_v11 = vadd.f32 %v3507_v8, %v3506_v4  ;;  %v3509_v31 = vpop.f32.mrb[98].mxu1  ;;  %v3446_v15 = vpop.f32.mrb[99].mxu0 }
 0x1ba   :  { %v2431_v40 = vadd.f32 %v3444_v26, %v4572_v59  ;;  %v3447_v17 = vadd.f32 %v3446_v15, %v3445_v9  ;;  %v3510_v18 = vpop.f32.mrb[99].mxu1 }
 0x1bb   :  { %v3511_v39 = vadd.f32 %v3510_v18, %v3509_v31 }
 0x1bc   :  { %v2528_v22 = vadd.f32 %v3508_v11, %v2431_v40  ;;  %v2434_v45 = vadd.f32 %v3447_v17, %v4575_v19 }
 0x1be   :  { %v2590_v63 = vmul.f32 0.2, %v2528_v22  ;;  %v2531_v23 = vadd.f32 %v3511_v39, %v2434_v45  ;;  %v3448_v24 = vpop.f32.mrb[100].mxu0 }
 0x1bf   :  { %v3512_v41 = vpop.f32.mrb[100].mxu1  ;;  %v3449_v52 = vpop.f32.mrb[101].mxu0 }
 0x1c0   :  { %v2591_v28 = vmul.f32 0.2, %v2531_v23  ;;  %v3450_v29 = vadd.f32 %v3449_v52, %v3448_v24  ;;  %v3513_v36 = vpop.f32.mrb[101].mxu1  ;;  %v3451_v50 = vpop.f32.mrb[102].mxu0  ;;  %v2606_v58 = vmax.f32 %v2528_v22, %v2590_v63 }
 0x1c1   :  { %v3514_v33 = vadd.f32 %v3513_v36, %v3512_v41  ;;  %v3515_v34 = vpop.f32.mrb[102].mxu1  ;;  %v3452_v38 = vpop.f32.mrb[103].mxu0 }
 0x1c2   :  { %v2607_v59 = vmax.f32 %v2531_v23, %v2591_v28  ;;  %v2439_v42 = vadd.f32 %v3450_v29, %v4578_v14  ;;  %v3453_v0 = vadd.f32 %v3452_v38, %v3451_v50  ;;  %v3516_v43 = vpop.f32.mrb[103].mxu1 }
 0x1c3   :  { %v3517_v44 = vadd.f32 %v3516_v43, %v3515_v34 }
 0x1c4   :  { %v2998_v19 = vpack.c.bf16 %v2607_v59, %v2606_v58  ;;  %v2536_v1 = vadd.f32 %v3514_v33, %v2439_v42  ;;  %v2442_v12 = vadd.f32 %v3453_v0, %v4581_v35 }
 0x1c6   :  { %2999 = vst [vmem:[%s4662_s3] sm:$0xff] %v2998_v19   ;;  %v2592_v47 = vmul.f32 0.2, %v2536_v1  ;;  %v2539_v48 = vadd.f32 %v3517_v44, %v2442_v12  ;;  %v3454_v56 = vpop.f32.mrb[104].mxu0 }
 0x1c7   :  { %v3518_v6 = vpop.f32.mrb[104].mxu1  ;;  %v3455_v53 = vpop.f32.mrb[105].mxu0 }
 0x1c8   :  { %v2593_v54 = vmul.f32 0.2, %v2539_v48  ;;  %v3456_v57 = vadd.f32 %v3455_v53, %v3454_v56  ;;  %v3519_v13 = vpop.f32.mrb[105].mxu1  ;;  %v3457_v14 = vpop.f32.mrb[106].mxu0  ;;  %v2608_v62 = vmax.f32 %v2536_v1, %v2592_v47 }
 0x1c9   :  { %v3520_v60 = vadd.f32 %v3519_v13, %v3518_v6  ;;  %v3521_v20 = vpop.f32.mrb[106].mxu1  ;;  %v3458_v61 = vpop.f32.mrb[107].mxu0 }
 0x1ca   :  { %v2609_v21 = vmax.f32 %v2539_v48, %v2593_v54  ;;  %v2447_v35 = vadd.f32 %v3456_v57, %v4584_v32  ;;  %v3459_v37 = vadd.f32 %v3458_v61, %v3457_v14  ;;  %v3522_v3 = vpop.f32.mrb[107].mxu1 }
 0x1cb   :  { %v3523_v4 = vadd.f32 %v3522_v3, %v3521_v20 }
 0x1cc   :  { %v3003_v16 = vpack.c.bf16 %v2609_v21, %v2608_v62  ;;  %v2544_v26 = vadd.f32 %v3520_v60, %v2447_v35  ;;  %v2450_v8 = vadd.f32 %v3459_v37, %v4587_v55 }
 0x1ce   :  { %3035 = vst [vmem:[%s4662_s3 + $0x8] sm:$0xff] %v3003_v16   ;;  %v2594_v9 = vmul.f32 0.2, %v2544_v26  ;;  %v2547_v11 = vadd.f32 %v3523_v4, %v2450_v8  ;;  %v3460_v31 = vpop.f32.mrb[108].mxu0 }
 0x1cf   :  { %v3524_v15 = vpop.f32.mrb[108].mxu1  ;;  %v3461_v40 = vpop.f32.mrb[109].mxu0 }
 0x1d0   :  { %v2595_v17 = vmul.f32 0.2, %v2547_v11  ;;  %v3462_v18 = vadd.f32 %v3461_v40, %v3460_v31  ;;  %v3525_v39 = vpop.f32.mrb[109].mxu1  ;;  %v3463_v32 = vpop.f32.mrb[110].mxu0  ;;  %v2610_v23 = vmax.f32 %v2544_v26, %v2594_v9 }
 0x1d1   :  { %v3526_v22 = vadd.f32 %v3525_v39, %v3524_v15  ;;  %v3527_v45 = vpop.f32.mrb[110].mxu1  ;;  %v3464_v63 = vpop.f32.mrb[111].mxu0 }
 0x1d2   :  { %v2611_v24 = vmax.f32 %v2547_v11, %v2595_v17  ;;  %v2455_v55 = vadd.f32 %v3462_v18, %v4590_v51  ;;  %v3465_v41 = vadd.f32 %v3464_v63, %v3463_v32  ;;  %v3528_v52 = vpop.f32.mrb[111].mxu1 }
 0x1d3   :  { %v3529_v28 = vadd.f32 %v3528_v52, %v3527_v45 }
 0x1d4   :  { %v3008_v29 = vpack.c.bf16 %v2611_v24, %v2610_v23  ;;  %v2552_v36 = vadd.f32 %v3526_v22, %v2455_v55  ;;  %v2458_v50 = vadd.f32 %v3465_v41, %v4593_v10 }
 0x1d6   :  { %3036 = vst [vmem:[%s4662_s3 + $0x10] sm:$0xff] %v3008_v29   ;;  %v2596_v33 = vmul.f32 0.2, %v2552_v36  ;;  %v2555_v34 = vadd.f32 %v3529_v28, %v2458_v50  ;;  %v3466_v38 = vpop.f32.mrb[112].mxu0 }
 0x1d7   :  { %v3530_v58 = vpop.f32.mrb[112].mxu1  ;;  %v3467_v59 = vpop.f32.mrb[113].mxu0 }
 0x1d8   :  { %v2597_v42 = vmul.f32 0.2, %v2555_v34  ;;  %v3468_v0 = vadd.f32 %v3467_v59, %v3466_v38  ;;  %v3531_v43 = vpop.f32.mrb[113].mxu1  ;;  %v3469_v51 = vpop.f32.mrb[114].mxu0  ;;  %v2612_v12 = vmax.f32 %v2552_v36, %v2596_v33 }
 0x1d9   :  { %v3532_v44 = vadd.f32 %v3531_v43, %v3530_v58  ;;  %v3533_v19 = vpop.f32.mrb[114].mxu1  ;;  %v3470_v1 = vpop.f32.mrb[115].mxu0 }
 0x1da   :  { %v2613_v47 = vmax.f32 %v2555_v34, %v2597_v42  ;;  %v2463_v10 = vadd.f32 %v3468_v0, %v4596_v7  ;;  %v3471_v48 = vadd.f32 %v3470_v1, %v3469_v51  ;;  %v3534_v56 = vpop.f32.mrb[115].mxu1 }
 0x1db   :  { %v3535_v6 = vadd.f32 %v3534_v56, %v3533_v19 }
 0x1dc   :  { %v3013_v53 = vpack.c.bf16 %v2613_v47, %v2612_v12  ;;  %v2560_v54 = vadd.f32 %v3532_v44, %v2463_v10  ;;  %v2466_v57 = vadd.f32 %v3471_v48, %v4599_v30 }
 0x1de   :  { %3037 = vst [vmem:[%s4662_s3 + $0x18] sm:$0xff] %v3013_v53   ;;  %v2598_v13 = vmul.f32 0.2, %v2560_v54  ;;  %v2563_v14 = vadd.f32 %v3535_v6, %v2466_v57  ;;  %v3472_v60 = vpop.f32.mrb[116].mxu0 }
 0x1df   :  { %v3536_v20 = vpop.f32.mrb[116].mxu1  ;;  %v3473_v61 = vpop.f32.mrb[117].mxu0 }
 0x1e0   :  { %v2599_v62 = vmul.f32 0.2, %v2563_v14  ;;  %v3474_v21 = vadd.f32 %v3473_v61, %v3472_v60  ;;  %v3537_v35 = vpop.f32.mrb[117].mxu1  ;;  %v3475_v7 = vpop.f32.mrb[118].mxu0  ;;  %v2614_v16 = vmax.f32 %v2560_v54, %v2598_v13 }
 0x1e1   :  { %v3538_v37 = vadd.f32 %v3537_v35, %v3536_v20  ;;  %v3539_v3 = vpop.f32.mrb[118].mxu1  ;;  %v3476_v4 = vpop.f32.mrb[119].mxu0 }
 0x1e2   :  { %v2615_v26 = vmax.f32 %v2563_v14, %v2599_v62  ;;  %v2471_v30 = vadd.f32 %v3474_v21, %v4602_v27  ;;  %v3477_v8 = vadd.f32 %v3476_v4, %v3475_v7  ;;  %v3540_v9 = vpop.f32.mrb[119].mxu1 }
 0x1e3   :  { %v3541_v11 = vadd.f32 %v3540_v9, %v3539_v3 }
 0x1e4   :  { %v3018_v31 = vpack.c.bf16 %v2615_v26, %v2614_v16  ;;  %v2568_v15 = vadd.f32 %v3538_v37, %v2471_v30  ;;  %v2474_v40 = vadd.f32 %v3477_v8, %v4605_v49 }
 0x1e6   :  { %3038 = vst [vmem:[%s4662_s3 + $0x20] sm:$0xff] %v3018_v31   ;;  %v2600_v17 = vmul.f32 0.2, %v2568_v15  ;;  %v2571_v18 = vadd.f32 %v3541_v11, %v2474_v40  ;;  %v3478_v39 = vpop.f32.mrb[120].mxu0 }
 0x1e7   :  { %v3542_v32 = vpop.f32.mrb[120].mxu1  ;;  %v3479_v22 = vpop.f32.mrb[121].mxu0 }
 0x1e8   :  { %v2601_v45 = vmul.f32 0.2, %v2571_v18  ;;  %v3480_v63 = vadd.f32 %v3479_v22, %v3478_v39  ;;  %v3543_v23 = vpop.f32.mrb[121].mxu1  ;;  %v3481_v27 = vpop.f32.mrb[122].mxu0  ;;  %v2616_v52 = vmax.f32 %v2568_v15, %v2600_v17 }
 0x1e9   :  { %v3544_v24 = vadd.f32 %v3543_v23, %v3542_v32  ;;  %v3545_v55 = vpop.f32.mrb[122].mxu1  ;;  %v3482_v41 = vpop.f32.mrb[123].mxu0 }
 0x1ea   :  { %v2617_v28 = vmax.f32 %v2571_v18, %v2601_v45  ;;  %v2479_v49 = vadd.f32 %v3480_v63, %v4608_v46  ;;  %v3483_v29 = vadd.f32 %v3482_v41, %v3481_v27  ;;  %v3546_v36 = vpop.f32.mrb[123].mxu1 }
 0x1eb   :  { %v3547_v50 = vadd.f32 %v3546_v36, %v3545_v55 }
 0x1ec   :  { %v3023_v33 = vpack.c.bf16 %v2617_v28, %v2616_v52  ;;  %v2576_v34 = vadd.f32 %v3544_v24, %v2479_v49  ;;  %v2482_v38 = vadd.f32 %v3483_v29, %v4611_v5 }
 0x1ee   :  { %3039 = vst [vmem:[%s4662_s3 + $0x28] sm:$0xff] %v3023_v33   ;;  %v2602_v58 = vmul.f32 0.2, %v2576_v34  ;;  %v2579_v59 = vadd.f32 %v3547_v50, %v2482_v38  ;;  %v3484_v42 = vpop.f32.mrb[124].mxu0 }
 0x1ef   :  { %v3548_v0 = vpop.f32.mrb[124].mxu1  ;;  %v3485_v43 = vpop.f32.mrb[125].mxu0 }
 0x1f0   :  { %v2603_v51 = vmul.f32 0.2, %v2579_v59  ;;  %v3486_v44 = vadd.f32 %v3485_v43, %v3484_v42  ;;  %v3549_v19 = vpop.f32.mrb[125].mxu1  ;;  %v3487_v46 = vpop.f32.mrb[126].mxu0  ;;  %v2618_v10 = vmax.f32 %v2576_v34, %v2602_v58 }
 0x1f1   :  { %v3550_v1 = vadd.f32 %v3549_v19, %v3548_v0  ;;  %v3551_v12 = vpop.f32.mrb[126].mxu1  ;;  %v3488_v47 = vpop.f32.mrb[127].mxu0 }
 0x1f2   :  { %v2619_v48 = vmax.f32 %v2579_v59, %v2603_v51  ;;  %v2487_v5 = vadd.f32 %v3486_v44, %v4614_v2  ;;  %v3489_v56 = vadd.f32 %v3488_v47, %v3487_v46  ;;  %v3552_v6 = vpop.f32.mrb[127].mxu1 }
 0x1f3   :  { %v3553_v53 = vadd.f32 %v3552_v6, %v3551_v12 }
 0x1f4   :  { %v3028_v54 = vpack.c.bf16 %v2619_v48, %v2618_v10  ;;  %v2584_v57 = vadd.f32 %v3550_v1, %v2487_v5  ;;  %v2490_v13 = vadd.f32 %v3489_v56, %v4617_v25 }
 0x1f6   :  { %3040 = vst [vmem:[%s4662_s3 + $0x30] sm:$0xff] %v3028_v54   ;;  %v2604_v14 = vmul.f32 0.2, %v2584_v57  ;;  %v2587_v60 = vadd.f32 %v3553_v53, %v2490_v13 }
 0x1f8   :  { %v2605_v20 = vmul.f32 0.2, %v2587_v60  ;;  %v2620_v61 = vmax.f32 %v2584_v57, %v2604_v14 }
 0x1fa   :  { %v2621_v62 = vmax.f32 %v2587_v60, %v2605_v20 }
 0x1fc   :  { %v3033_v21 = vpack.c.bf16 %v2621_v62, %v2620_v61 }
 0x1fe   :  { %3041 = vst [vmem:[%s4662_s3 + $0x38] sm:$0xff] %v3033_v21  }

// kernel: critic_forward.9
= control target key start
LH: loop header
LB: loop body
LE: loop exit
PB: predicated region body
PF: predicated region fallthrough
CT: control target
= control target key end

     0   :  { %s2483_s0 = inlined_call_operand.vmem [shape: bf16[2,2048], index: 0, kind: input, shape index: {}]   ;;  %s2484_s1 = inlined_call_operand.vmem [shape: bf16[2048,128], index: 1, kind: input, shape index: {}]   ;;  %s2485_s2 = inlined_call_operand.vmem [shape: f32[1,128], index: 2, kind: input, shape index: {}]   ;;  %s2486_s3 = inlined_call_operand.vmem [shape: f32[1,128], index: 3, kind: input, shape index: {}]   ;;  %s2487_s4 = inlined_call_operand.<no memory space> [shape: f32[1,1], index: 4, kind: input, shape index: {}]   ;;  %s2488_s5 = inlined_call_operand.hbm [shape: f32[2,128], index: 5, kind: output, shape index: {0}]   ;;  %s2489_s6 = inlined_call_operand.vmem [shape: f32[2,1], index: 6, kind: output, shape index: {1}]  }
   0x1   :  { %v12_v0 = vstv %s2487_s4 }
   0x2   :  { %13 = vst [vmem:[#allocation2] sm:$0x1] %v12_v0 }
   0x3   :  { %v1850_v1 = vld [vmem:[%s2484_s1 + $0x40] sm:$0xff]   ;;  %v1854_v5 = vld [vmem:[%s2484_s1 + $0x48] sm:$0xff]   ;;  %v1858_v9 = vld [vmem:[%s2484_s1 + $0x50] sm:$0xff]   ;;  %v297_v29 = vlaneseq  ;;  %v2008_v37 = vmov 1966171168  }
   0x4   :  { %v1851_v2 = vld [vmem:[%s2484_s1 + $0xc0] sm:$0xff]   ;;  %1672 = vmatprep.subr.bf16.mxu0 %v1850_v1  ;;  %v1855_v6 = vld [vmem:[%s2484_s1 + $0xc8] sm:$0xff]   ;;  %v1859_v10 = vld [vmem:[%s2484_s1 + $0xd0] sm:$0xff]   ;;  %v295_v38 = vunpack.c.l.s4 %v2008_v37 }
   0x5   :  { %v1852_v3 = vld [vmem:[%s2484_s1] sm:$0xff]   ;;  %1694 = vmatprep.subr.bf16.mxu1 %v1851_v2  ;;  %v1856_v7 = vld [vmem:[%s2484_s1 + $0x8] sm:$0xff]   ;;  %v1860_v11 = vld [vmem:[%s2484_s1 + $0x10] sm:$0xff]   ;;  %v298_v34 = vshrl.u32 %v297_v29, 7 }
   0x6   :  { %v1853_v4 = vld [vmem:[%s2484_s1 + $0x80] sm:$0xff]   ;;  %1673 = vmatpush3.bf16.msra.mxu0 %v1852_v3  ;;  %v1857_v8 = vld [vmem:[%s2484_s1 + $0x88] sm:$0xff]   ;;  %v1861_v12 = vld [vmem:[%s2484_s1 + $0x90] sm:$0xff]   ;;  %v296_v41 = vunpack.c.0.s8 %v295_v38 }
   0x7   :  { %1695 = vmatpush3.bf16.msra.mxu1 %v1853_v4  ;;  %1674 = vmatprep.subr.bf16.mxu0 %v1854_v5  ;;  %v1862_v13 = vld [vmem:[%s2484_s1 + $0x58] sm:$0xff]   ;;  %v1866_v17 = vld [vmem:[%s2484_s1 + $0x60] sm:$0xff]   ;;  %v1870_v21 = vld [vmem:[%s2484_s1 + $0x68] sm:$0xff]  }
   0x8   :  { %1696 = vmatprep.subr.bf16.mxu1 %v1855_v6  ;;  %v1863_v14 = vld [vmem:[%s2484_s1 + $0xd8] sm:$0xff]   ;;  %v1867_v18 = vld [vmem:[%s2484_s1 + $0xe0] sm:$0xff]   ;;  %v1871_v22 = vld [vmem:[%s2484_s1 + $0xe8] sm:$0xff]   ;;  %v2153_v42 = vsub.s32 %v296_v41, %v298_v34 }
   0x9   :  { %v1864_v15 = vld [vmem:[%s2484_s1 + $0x18] sm:$0xff]   ;;  %v1868_v19 = vld [vmem:[%s2484_s1 + $0x20] sm:$0xff]   ;;  %v1872_v23 = vld [vmem:[%s2484_s1 + $0x28] sm:$0xff]  }
   0xa   :  { %1675 = vmatpush3.bf16.msra.mxu0 %v1856_v7  ;;  %v1865_v16 = vld [vmem:[%s2484_s1 + $0x98] sm:$0xff]   ;;  %v1869_v20 = vld [vmem:[%s2484_s1 + $0xa0] sm:$0xff]   ;;  %v1873_v24 = vld [vmem:[%s2484_s1 + $0xa8] sm:$0xff]  }
   0xb   :  { %1697 = vmatpush3.bf16.msra.mxu1 %v1857_v8  ;;  %1676 = vmatprep.subr.bf16.mxu0 %v1858_v9  ;;  %v1874_v25 = vld [vmem:[%s2484_s1 + $0x70] sm:$0xff]   ;;  %v1878_v30 = vld [vmem:[%s2484_s1 + $0x78] sm:$0xff]   ;;  %v26_v35 = vld [vmem:[%s2483_s0] sm:$0xff] }
   0xc   :  { %1698 = vmatprep.subr.bf16.mxu1 %v1859_v10  ;;  %v1875_v26 = vld [vmem:[%s2484_s1 + $0xf0] sm:$0xff]   ;;  %v1879_v31 = vld [vmem:[%s2484_s1 + $0xf8] sm:$0xff]   ;;  %v1883_v36 = vld [vmem:[%s2484_s1 + $0x140] sm:$0xff]   ;;  %v293_v40 = vcombine.high %v26_v35, %v26_v35  ;;  %v300_v43 = vrot.slane %v26_v35, %v2153_v42 }
   0xd   :  { %v1876_v27 = vld [vmem:[%s2484_s1 + $0x30] sm:$0xff]   ;;  %v1880_v32 = vld [vmem:[%s2484_s1 + $0x38] sm:$0xff]   ;;  %v1884_v39 = vld [vmem:[%s2484_s1 + $0x1c0] sm:$0xff]  }
   0xe   :  { %1677 = vmatpush3.bf16.msra.mxu0 %v1860_v11  ;;  %v1877_v28 = vld [vmem:[%s2484_s1 + $0xb0] sm:$0xff]   ;;  %v1881_v33 = vld [vmem:[%s2484_s1 + $0xb8] sm:$0xff]   ;;  %v2157_v44 = vrot.slane %v293_v40, %v2153_v42  ;;  %v308_v45 = vcombine.high %v300_v43, %v300_v43  ;;  %v316_v46 = vrot.slane %v300_v43, %v2153_v42  ;;  %v1885_v49 = vld [vmem:[%s2484_s1 + $0x100] sm:$0xff]  }
   0xf   :  { %1699 = vmatpush3.bf16.msra.mxu1 %v1861_v12  ;;  %1678 = vmatprep.subr.bf16.mxu0 %v1862_v13  ;;  %v1887_v52 = vld [vmem:[%s2484_s1 + $0x148] sm:$0xff]   ;;  %v1886_v54 = vld [vmem:[%s2484_s1 + $0x180] sm:$0xff]   ;;  %v1891_v58 = vld [vmem:[%s2484_s1 + $0x150] sm:$0xff]  }
  0x10   :  { %1700 = vmatprep.subr.bf16.mxu1 %v1863_v14  ;;  %v309_v47 = vcombine.high %v2157_v44, %v2157_v44  ;;  %v330_v48 = vrot.slane %v308_v45, %v2153_v42  ;;  %v338_v51 = vcombine.high %v316_v46, %v316_v46  ;;  %v1888_v55 = vld [vmem:[%s2484_s1 + $0x1c8] sm:$0xff]   ;;  %v1892_v60 = vld [vmem:[%s2484_s1 + $0x1d0] sm:$0xff]   ;;  %v1895_v62 = vld [vmem:[%s2484_s1 + $0x158] sm:$0xff]  }
  0x11   :  { %v1889_v57 = vld [vmem:[%s2484_s1 + $0x108] sm:$0xff]   ;;  %v1893_v61 = vld [vmem:[%s2484_s1 + $0x110] sm:$0xff]   ;;  %v1896_v0 = vld [vmem:[%s2484_s1 + $0x1d8] sm:$0xff]  }
  0x12   :  { %1679 = vmatpush3.bf16.msra.mxu0 %v1864_v15  ;;  %v337_v50 = vrot.slane %v309_v47, %v2153_v42  ;;  %1207 = vmatprep.mubr.bf16.mxu0 %v330_v48  ;;  %v340_v53 = vcombine.high %v330_v48, %v330_v48  ;;  %v1890_v59 = vld [vmem:[%s2484_s1 + $0x188] sm:$0xff]   ;;  %v1894_v63 = vld [vmem:[%s2484_s1 + $0x190] sm:$0xff]   ;;  %v1897_v1 = vld [vmem:[%s2484_s1 + $0x118] sm:$0xff]  }
  0x13   :  { %1701 = vmatpush3.bf16.msra.mxu1 %v1865_v16  ;;  %1680 = vmatprep.subr.bf16.mxu0 %v1866_v17  ;;  %v1899_v2 = vld [vmem:[%s2484_s1 + $0x160] sm:$0xff]   ;;  %v1898_v3 = vld [vmem:[%s2484_s1 + $0x198] sm:$0xff]   ;;  %v1903_v6 = vld [vmem:[%s2484_s1 + $0x168] sm:$0xff]  }
  0x14   :  { %1702 = vmatprep.subr.bf16.mxu1 %v1867_v18  ;;  %v341_v56 = vcombine.high %v337_v50, %v337_v50  ;;  %1247 = vmatprep.mubr.bf16.mxu1 %v340_v53  ;;  %v1900_v4 = vld [vmem:[%s2484_s1 + $0x1e0] sm:$0xff]   ;;  %v1904_v8 = vld [vmem:[%s2484_s1 + $0x1e8] sm:$0xff]   ;;  %v1907_v10 = vld [vmem:[%s2484_s1 + $0x170] sm:$0xff]   ;;  %v323_v18 = vrot.slane %v2157_v44, %v2153_v42 }
  0x15   :  { %v1901_v5 = vld [vmem:[%s2484_s1 + $0x120] sm:$0xff]   ;;  %v1905_v9 = vld [vmem:[%s2484_s1 + $0x128] sm:$0xff]   ;;  %v1908_v12 = vld [vmem:[%s2484_s1 + $0x1f0] sm:$0xff]  }
  0x16   :  { %1681 = vmatpush3.bf16.msra.mxu0 %v1868_v19  ;;  %v1902_v7 = vld [vmem:[%s2484_s1 + $0x1a0] sm:$0xff]   ;;  %v1906_v11 = vld [vmem:[%s2484_s1 + $0x1a8] sm:$0xff]   ;;  %v1909_v13 = vld [vmem:[%s2484_s1 + $0x130] sm:$0xff]  }
  0x17   :  { %1703 = vmatpush3.bf16.msra.mxu1 %v1869_v20  ;;  %1682 = vmatprep.subr.bf16.mxu0 %v1870_v21  ;;  %v1911_v14 = vld [vmem:[%s2484_s1 + $0x178] sm:$0xff]   ;;  %v1910_v15 = vld [vmem:[%s2484_s1 + $0x1b0] sm:$0xff]   ;;  %v1915_v19 = vld [vmem:[%s2484_s1 + $0x240] sm:$0xff]  }
  0x18   :  { %1704 = vmatprep.subr.bf16.mxu1 %v1871_v22  ;;  %v1912_v16 = vld [vmem:[%s2484_s1 + $0x1f8] sm:$0xff]   ;;  %v1916_v21 = vld [vmem:[%s2484_s1 + $0x2c0] sm:$0xff]   ;;  %v1922_v29 = vld [vmem:[%s2484_s1 + $0x288] sm:$0xff]  }
  0x19   :  { %v1913_v17 = vld [vmem:[%s2484_s1 + $0x138] sm:$0xff]   ;;  %v1917_v22 = vld [vmem:[%s2484_s1 + $0x200] sm:$0xff]   ;;  %v1935_v40 = vld [vmem:[%s2484_s1 + $0x268] sm:$0xff]  }
  0x1a   :  { %1683 = vmatpush3.bf16.msra.mxu0 %v1872_v23  ;;  %v1914_v20 = vld [vmem:[%s2484_s1 + $0x1b8] sm:$0xff]   ;;  %v339_v23 = vcombine.high %v323_v18, %v323_v18  ;;  %v1932_v38 = vld [vmem:[%s2484_s1 + $0x2e0] sm:$0xff]   ;;  %v1936_v43 = vld [vmem:[%s2484_s1 + $0x2e8] sm:$0xff]  }
  0x1b   :  { %1705 = vmatpush3.bf16.msra.mxu1 %v1873_v24  ;;  %1684 = vmatprep.subr.bf16.mxu0 %v1874_v25  ;;  %v1919_v24 = vld [vmem:[%s2484_s1 + $0x248] sm:$0xff]   ;;  %v1918_v25 = vld [vmem:[%s2484_s1 + $0x280] sm:$0xff]   ;;  %v1928_v34 = vld [vmem:[%s2484_s1 + $0x2d8] sm:$0xff]  }
  0x1c   :  { %1706 = vmatprep.subr.bf16.mxu1 %v1875_v26  ;;  %v1920_v26 = vld [vmem:[%s2484_s1 + $0x2c8] sm:$0xff]   ;;  %v1929_v35 = vld [vmem:[%s2484_s1 + $0x218] sm:$0xff]   ;;  %v1934_v41 = vld [vmem:[%s2484_s1 + $0x2a0] sm:$0xff]  }
  0x1d   :  { %v1930_v37 = vld [vmem:[%s2484_s1 + $0x298] sm:$0xff]   ;;  %v1937_v44 = vld [vmem:[%s2484_s1 + $0x228] sm:$0xff]   ;;  %v1939_v45 = vld [vmem:[%s2484_s1 + $0x270] sm:$0xff]  }
  0x1e   :  { %1685 = vmatpush3.bf16.msra.mxu0 %v1876_v27  ;;  %v1921_v27 = vld [vmem:[%s2484_s1 + $0x208] sm:$0xff]  }
  0x1f   :  { %1707 = vmatpush3.bf16.msra.mxu1 %v1877_v28  ;;  %1686 = vmatprep.subr.bf16.mxu0 %v1878_v30  ;;  %v1923_v28 = vld [vmem:[%s2484_s1 + $0x250] sm:$0xff]   ;;  %v1938_v47 = vld [vmem:[%s2484_s1 + $0x2a8] sm:$0xff]  }
  0x20   :  { %1708 = vmatprep.subr.bf16.mxu1 %v1879_v31  ;;  %v1924_v30 = vld [vmem:[%s2484_s1 + $0x2d0] sm:$0xff]  }
  0x21   :  { %v1925_v31 = vld [vmem:[%s2484_s1 + $0x210] sm:$0xff]  }
  0x22   :  { %1687 = vmatpush3.bf16.msra.mxu0 %v1880_v32  ;;  %v1927_v32 = vld [vmem:[%s2484_s1 + $0x258] sm:$0xff]  }
  0x23   :  { %1709 = vmatpush3.bf16.msra.mxu1 %v1881_v33  ;;  %1716 = vmatprep.subr.bf16.mxu0 %v1883_v36  ;;  %v1926_v33 = vld [vmem:[%s2484_s1 + $0x290] sm:$0xff]   ;;  %v1931_v36 = vld [vmem:[%s2484_s1 + $0x260] sm:$0xff]  }
  0x24   :  { %1738 = vmatprep.subr.bf16.mxu1 %v1884_v39  ;;  %v1933_v39 = vld [vmem:[%s2484_s1 + $0x220] sm:$0xff]  }
  0x25   :  { %1208 = vmatmul.mubr.bf16.vlgmr.msra.gmra.mrb[0].mxu0 %v316_v46  ;;  %v27_v46 = vld [vmem:[%s2483_s0 + $0x8] sm:$0xff] }
  0x26   :  { %1717 = vmatpush3.bf16.msra.mxu0 %v1885_v49  ;;  %1248 = vmatmul.mubr.bf16.vlgmr.msra.gmra.mrb[0].mxu1 %v338_v51  ;;  %v349_v48 = vrot.slane %v27_v46, %v2153_v42  ;;  %v342_v49 = vcombine.high %v27_v46, %v27_v46  ;;  %v1941_v51 = vld [vmem:[%s2484_s1 + $0x230] sm:$0xff]  }
  0x27   :  { %1718 = vmatprep.subr.bf16.mxu0 %v1887_v52  ;;  %1739 = vmatpush3.bf16.msra.mxu1 %v1886_v54  ;;  %v1943_v54 = vld [vmem:[%s2484_s1 + $0x278] sm:$0xff]  }
  0x28   :  { %1287 = vmatprep.mubr.bf16.mxu0 %v337_v50  ;;  %1740 = vmatprep.subr.bf16.mxu1 %v1888_v55  ;;  %v1940_v50 = vld [vmem:[%s2484_s1 + $0x2f0] sm:$0xff]   ;;  %v357_v52 = vcombine.high %v349_v48, %v349_v48  ;;  %v2342_v53 = vrot.slane %v342_v49, %v2153_v42 }
  0x29   :  { %1327 = vmatprep.mubr.bf16.mxu1 %v341_v56  ;;  %v1942_v55 = vld [vmem:[%s2484_s1 + $0x2b0] sm:$0xff]  }
  0x2a   :  { %1719 = vmatpush3.bf16.msra.mxu0 %v1889_v57  ;;  %v379_v56 = vrot.slane %v357_v52, %v2153_v42  ;;  %v358_v57 = vcombine.high %v2342_v53, %v2342_v53 }
  0x2b   :  { %1720 = vmatprep.subr.bf16.mxu0 %v1891_v58  ;;  %1741 = vmatpush3.bf16.msra.mxu1 %v1890_v59  ;;  %v1944_v58 = vld [vmem:[%s2484_s1 + $0x2f8] sm:$0xff]  }
  0x2c   :  { %1742 = vmatprep.subr.bf16.mxu1 %v1892_v60  ;;  %v1945_v59 = vld [vmem:[%s2484_s1 + $0x238] sm:$0xff]   ;;  %v389_v60 = vcombine.high %v379_v56, %v379_v56 }
  0x2e   :  { %1721 = vmatpush3.bf16.msra.mxu0 %v1893_v61  ;;  %v365_v61 = vrot.slane %v349_v48, %v2153_v42 }
  0x2f   :  { %1722 = vmatprep.subr.bf16.mxu0 %v1895_v62  ;;  %1743 = vmatpush3.bf16.msra.mxu1 %v1894_v63  ;;  %v1947_v62 = vld [vmem:[%s2484_s1 + $0x340] sm:$0xff]   ;;  %v1946_v63 = vld [vmem:[%s2484_s1 + $0x2b8] sm:$0xff]  }
  0x30   :  { %1744 = vmatprep.subr.bf16.mxu1 %v1896_v0  ;;  %v386_v0 = vrot.slane %v358_v57, %v2153_v42 }
  0x32   :  { %1723 = vmatpush3.bf16.msra.mxu0 %v1897_v1  ;;  %v1948_v1 = vld [vmem:[%s2484_s1 + $0x3c0] sm:$0xff]  }
  0x33   :  { %1724 = vmatprep.subr.bf16.mxu0 %v1899_v2  ;;  %1745 = vmatpush3.bf16.msra.mxu1 %v1898_v3  ;;  %v1949_v2 = vld [vmem:[%s2484_s1 + $0x300] sm:$0xff]   ;;  %v387_v3 = vcombine.high %v365_v61, %v365_v61 }
  0x34   :  { %1746 = vmatprep.subr.bf16.mxu1 %v1900_v4  ;;  %v1951_v4 = vld [vmem:[%s2484_s1 + $0x348] sm:$0xff]  }
  0x36   :  { %1725 = vmatpush3.bf16.msra.mxu0 %v1901_v5  ;;  %v1950_v5 = vld [vmem:[%s2484_s1 + $0x380] sm:$0xff]  }
  0x37   :  { %1726 = vmatprep.subr.bf16.mxu0 %v1903_v6  ;;  %1747 = vmatpush3.bf16.msra.mxu1 %v1902_v7  ;;  %v390_v6 = vcombine.high %v386_v0, %v386_v0  ;;  %v1952_v7 = vld [vmem:[%s2484_s1 + $0x3c8] sm:$0xff]  }
  0x38   :  { %1748 = vmatprep.subr.bf16.mxu1 %v1904_v8  ;;  %v1953_v8 = vld [vmem:[%s2484_s1 + $0x308] sm:$0xff]  }
  0x3a   :  { %1727 = vmatpush3.bf16.msra.mxu0 %v1905_v9  ;;  %v1955_v9 = vld [vmem:[%s2484_s1 + $0x350] sm:$0xff]  }
  0x3b   :  { %1728 = vmatprep.subr.bf16.mxu0 %v1907_v10  ;;  %1749 = vmatpush3.bf16.msra.mxu1 %v1906_v11  ;;  %v1954_v10 = vld [vmem:[%s2484_s1 + $0x388] sm:$0xff]   ;;  %v1956_v11 = vld [vmem:[%s2484_s1 + $0x3d0] sm:$0xff]  }
  0x3c   :  { %1750 = vmatprep.subr.bf16.mxu1 %v1908_v12  ;;  %v1957_v12 = vld [vmem:[%s2484_s1 + $0x310] sm:$0xff]  }
  0x3e   :  { %1729 = vmatpush3.bf16.msra.mxu0 %v1909_v13  ;;  %v1959_v13 = vld [vmem:[%s2484_s1 + $0x358] sm:$0xff]  }
  0x3f   :  { %1730 = vmatprep.subr.bf16.mxu0 %v1911_v14  ;;  %1751 = vmatpush3.bf16.msra.mxu1 %v1910_v15  ;;  %v1958_v14 = vld [vmem:[%s2484_s1 + $0x390] sm:$0xff]   ;;  %v1960_v15 = vld [vmem:[%s2484_s1 + $0x3d8] sm:$0xff]  }
  0x40   :  { %1752 = vmatprep.subr.bf16.mxu1 %v1912_v16  ;;  %v1961_v16 = vld [vmem:[%s2484_s1 + $0x318] sm:$0xff]  }
  0x42   :  { %1731 = vmatpush3.bf16.msra.mxu0 %v1913_v17  ;;  %v1963_v17 = vld [vmem:[%s2484_s1 + $0x360] sm:$0xff]  }
  0x43   :  { %1760 = vmatprep.subr.bf16.mxu0 %v1915_v19  ;;  %1753 = vmatpush3.bf16.msra.mxu1 %v1914_v20  ;;  %v1964_v19 = vld [vmem:[%s2484_s1 + $0x3e0] sm:$0xff]  }
  0x44   :  { %1782 = vmatprep.subr.bf16.mxu1 %v1916_v21  ;;  %v1965_v20 = vld [vmem:[%s2484_s1 + $0x320] sm:$0xff]   ;;  %v1967_v21 = vld [vmem:[%s2484_s1 + $0x368] sm:$0xff]  }
  0x45   :  { %1288 = vmatmul.mubr.bf16.vlgmr.msra.gmra.mrb[4].mxu0 %v323_v18  ;;  %v1962_v18 = vld [vmem:[%s2484_s1 + $0x398] sm:$0xff]  }
  0x46   :  { %1761 = vmatpush3.bf16.msra.mxu0 %v1917_v22  ;;  %1328 = vmatmul.mubr.bf16.vlgmr.msra.gmra.mrb[4].mxu1 %v339_v23  ;;  %v1966_v22 = vld [vmem:[%s2484_s1 + $0x3a0] sm:$0xff]   ;;  %v1968_v23 = vld [vmem:[%s2484_s1 + $0x3e8] sm:$0xff]  }
  0x47   :  { %1762 = vmatprep.subr.bf16.mxu0 %v1919_v24  ;;  %1783 = vmatpush3.bf16.msra.mxu1 %v1918_v25  ;;  %v1969_v24 = vld [vmem:[%s2484_s1 + $0x328] sm:$0xff]   ;;  %v1971_v25 = vld [vmem:[%s2484_s1 + $0x370] sm:$0xff]  }
  0x48   :  { %1784 = vmatprep.subr.bf16.mxu1 %v1920_v26  ;;  %1367 = vmatprep.mubr.bf16.mxu0 %v379_v56 }
  0x49   :  { %1407 = vmatprep.mubr.bf16.mxu1 %v389_v60 }
  0x4a   :  { %1763 = vmatpush3.bf16.msra.mxu0 %v1921_v27 }
  0x4b   :  { %1764 = vmatprep.subr.bf16.mxu0 %v1923_v28  ;;  %1785 = vmatpush3.bf16.msra.mxu1 %v1922_v29 }
  0x4c   :  { %1786 = vmatprep.subr.bf16.mxu1 %v1924_v30 }
  0x4e   :  { %1765 = vmatpush3.bf16.msra.mxu0 %v1925_v31 }
  0x4f   :  { %1766 = vmatprep.subr.bf16.mxu0 %v1927_v32  ;;  %1787 = vmatpush3.bf16.msra.mxu1 %v1926_v33 }
  0x50   :  { %1788 = vmatprep.subr.bf16.mxu1 %v1928_v34 }
  0x52   :  { %1767 = vmatpush3.bf16.msra.mxu0 %v1929_v35 }
  0x53   :  { %1768 = vmatprep.subr.bf16.mxu0 %v1931_v36  ;;  %1789 = vmatpush3.bf16.msra.mxu1 %v1930_v37 }
  0x54   :  { %1790 = vmatprep.subr.bf16.mxu1 %v1932_v38 }
  0x56   :  { %1769 = vmatpush3.bf16.msra.mxu0 %v1933_v39 }
  0x57   :  { %1770 = vmatprep.subr.bf16.mxu0 %v1935_v40  ;;  %1791 = vmatpush3.bf16.msra.mxu1 %v1934_v41 }
  0x58   :  { %1792 = vmatprep.subr.bf16.mxu1 %v1936_v43 }
  0x5a   :  { %1771 = vmatpush3.bf16.msra.mxu0 %v1937_v44 }
  0x5b   :  { %1772 = vmatprep.subr.bf16.mxu0 %v1939_v45  ;;  %1793 = vmatpush3.bf16.msra.mxu1 %v1938_v47 }
  0x5c   :  { %1794 = vmatprep.subr.bf16.mxu1 %v1940_v50 }
  0x5e   :  { %1773 = vmatpush3.bf16.msra.mxu0 %v1941_v51 }
  0x5f   :  { %1774 = vmatprep.subr.bf16.mxu0 %v1943_v54  ;;  %1795 = vmatpush3.bf16.msra.mxu1 %v1942_v55 }
  0x60   :  { %1796 = vmatprep.subr.bf16.mxu1 %v1944_v58 }
  0x62   :  { %1775 = vmatpush3.bf16.msra.mxu0 %v1945_v59 }
  0x63   :  { %1804 = vmatprep.subr.bf16.mxu0 %v1947_v62  ;;  %1797 = vmatpush3.bf16.msra.mxu1 %v1946_v63 }
  0x64   :  { %1826 = vmatprep.subr.bf16.mxu1 %v1948_v1 }
  0x65   :  { %1368 = vmatmul.mubr.bf16.vlgmr.msra.gmra.mrb[8].mxu0 %v365_v61 }
  0x66   :  { %1805 = vmatpush3.bf16.msra.mxu0 %v1949_v2  ;;  %1447 = vmatprep.mubr.bf16.mxu0 %v386_v0 }
  0x67   :  { %1408 = vmatmul.mubr.bf16.vlgmr.msra.gmra.mrb[8].mxu1 %v387_v3  ;;  %1806 = vmatprep.subr.bf16.mxu0 %v1951_v4 }
  0x68   :  { %1827 = vmatpush3.bf16.msra.mxu1 %v1950_v5  ;;  %1487 = vmatprep.mubr.bf16.mxu1 %v390_v6 }
  0x69   :  { %1828 = vmatprep.subr.bf16.mxu1 %v1952_v7 }
  0x6a   :  { %1807 = vmatpush3.bf16.msra.mxu0 %v1953_v8 }
  0x6b   :  { %1808 = vmatprep.subr.bf16.mxu0 %v1955_v9 }
  0x6c   :  { %1829 = vmatpush3.bf16.msra.mxu1 %v1954_v10 }
  0x6d   :  { %1830 = vmatprep.subr.bf16.mxu1 %v1956_v11 }
  0x6e   :  { %1809 = vmatpush3.bf16.msra.mxu0 %v1957_v12 }
  0x6f   :  { %1810 = vmatprep.subr.bf16.mxu0 %v1959_v13 }
  0x70   :  { %1831 = vmatpush3.bf16.msra.mxu1 %v1958_v14 }
  0x71   :  { %1832 = vmatprep.subr.bf16.mxu1 %v1960_v15 }
  0x72   :  { %1811 = vmatpush3.bf16.msra.mxu0 %v1961_v16 }
  0x73   :  { %1812 = vmatprep.subr.bf16.mxu0 %v1963_v17 }
  0x74   :  { %1833 = vmatpush3.bf16.msra.mxu1 %v1962_v18 }
  0x75   :  { %1834 = vmatprep.subr.bf16.mxu1 %v1964_v19 }
  0x76   :  { %1813 = vmatpush3.bf16.msra.mxu0 %v1965_v20 }
  0x77   :  { %1814 = vmatprep.subr.bf16.mxu0 %v1967_v21 }
  0x78   :  { %14 = vsyncpa [#allocation4], 0  ;;  %1835 = vmatpush3.bf16.msra.mxu1 %v1966_v22  ;;  %v1970_v26 = vld [vmem:[%s2484_s1 + $0x3a8] sm:$0xff]   ;;  %v1972_v27 = vld [vmem:[%s2484_s1 + $0x3f0] sm:$0xff]   ;;  %v372_v33 = vrot.slane %v2342_v53, %v2153_v42  ;;  %vm1504_vm0 = vcmask 1041408   ;;  %s2009_s7 = smov [#allocation3]  }
  0x79   :  { %1836 = vmatprep.subr.bf16.mxu1 %v1968_v23  ;;  %v1973_v28 = vld [vmem:[%s2484_s1 + $0x330] sm:$0xff]   ;;  %v1975_v29 = vld [vmem:[%s2484_s1 + $0x378] sm:$0xff]   ;;  %v1541_v37 = vld [vmem:[%s2485_s2] ss:$0 sm:$0xff]  ;;  %s1529_s8 = sshll.u32 %s2009_s7, 4  ;;  %s1530_s8 = int_to_ptr.vmem [resolvable:$true] %s1529_s8 }
  0x7a   :  { %1815 = vmatpush3.bf16.msra.mxu0 %v1969_v24  ;;  %v1974_v30 = vld [vmem:[%s2484_s1 + $0x3b0] sm:$0xff]   ;;  %v1976_v31 = vld [vmem:[%s2484_s1 + $0x3f8] sm:$0xff]   ;;  %v388_v35 = vcombine.high %v372_v33, %v372_v33  ;;  %v1670_v20 = vld [vmem:[%s2486_s3] ss:$0 sm:$0xff]  ;;  %s1984_s0 = scalar_lea.vmem %s1530_s8, 32  ;;  %p1989_p1 = scmp.lt.s32.totalorder %s1530_s8, %s1530_s8 }
  0x7b   :  { %1816 = vmatprep.subr.bf16.mxu0 %v1971_v25  ;;  %v1977_v32 = vld [vmem:[%s2484_s1 + $0x338] sm:$0xff]   ;;  %p1985_p0 = scmp.ne.s32.totalorder %s1530_s8, %s1984_s0  ;;  %p1990_p2 = scmp.lt.s32.totalorder %s1984_s0, %s1984_s0 }
  0x7c   :  { %1837 = vmatpush3.bf16.msra.mxu1 %v1970_v26  ;;  %v1978_v34 = vld [vmem:[%s2484_s1 + $0x3b8] sm:$0xff]  }
  0x7d   :  { %1838 = vmatprep.subr.bf16.mxu1 %v1972_v27  ;;  %p1991_p3 = por %p1990_p2, %p1989_p1 }
  0x7e   :  { %1817 = vmatpush3.bf16.msra.mxu0 %v1973_v28 }
  0x7f   :  { %1818 = vmatprep.subr.bf16.mxu0 %v1975_v29  ;;  %p1992_p4 = pnand %p1991_p3, %p1985_p0 }
  0x80   :  { %1839 = vmatpush3.bf16.msra.mxu1 %v1974_v30 }
  0x81   :  { %1840 = vmatprep.subr.bf16.mxu1 %v1976_v31 }
  0x82   :  { %1819 = vmatpush3.bf16.msra.mxu0 %v1977_v32 }
  0x84   :  { %1841 = vmatpush3.bf16.msra.mxu1 %v1978_v34 }
  0x85   :  { %1448 = vmatmul.mubr.bf16.vlgmr.msra.gmra.mrb[12].mxu0 %v372_v33 }
  0x87   :  { %1488 = vmatmul.mubr.bf16.vlgmr.msra.gmra.mrb[12].mxu1 %v388_v35 }
  0xf8   :  { %v1688_v36 = vpop.f32.mrb[0].mxu0 }
  0xf9   :  { %v1689_v38 = vpop.f32.mrb[1].mxu0  ;;  %v1710_v39 = vpop.f32.mrb[0].mxu1 }
  0xfa   :  { %v1690_v40 = vadd.f32 %v1689_v38, %v1688_v36  ;;  %v1691_v42 = vpop.f32.mrb[2].mxu0  ;;  %v1711_v41 = vpop.f32.mrb[1].mxu1 }
  0xfb   :  { %v1692_v43 = vpop.f32.mrb[3].mxu0  ;;  %v1712_v45 = vadd.f32 %v1711_v41, %v1710_v39  ;;  %v1713_v46 = vpop.f32.mrb[2].mxu1 }
  0xfc   :  { %v1210_v44 = vadd.f32 %v1690_v40, %v1541_v37  ;;  %v1714_v47 = vpop.f32.mrb[3].mxu1 }
  0xfe   :  { %v1250_v48 = vadd.f32 %v1712_v45, %v1210_v44 }
 0x118   :  { %v1732_v49 = vpop.f32.mrb[4].mxu0 }
 0x119   :  { %v1733_v50 = vpop.f32.mrb[5].mxu0  ;;  %v1754_v51 = vpop.f32.mrb[4].mxu1 }
 0x11a   :  { %v1734_v52 = vadd.f32 %v1733_v50, %v1732_v49  ;;  %v1735_v53 = vpop.f32.mrb[6].mxu0  ;;  %v1755_v54 = vpop.f32.mrb[5].mxu1 }
 0x11b   :  { %v1736_v55 = vpop.f32.mrb[7].mxu0  ;;  %v1756_v57 = vadd.f32 %v1755_v54, %v1754_v51  ;;  %v1757_v58 = vpop.f32.mrb[6].mxu1 }
 0x11c   :  { %v1290_v56 = vadd.f32 %v1734_v52, %v1250_v48  ;;  %v1758_v59 = vpop.f32.mrb[7].mxu1 }
 0x11e   :  { %v1330_v60 = vadd.f32 %v1756_v57, %v1290_v56 }
 0x138   :  { %v1776_v61 = vpop.f32.mrb[8].mxu0 }
 0x139   :  { %v1777_v62 = vpop.f32.mrb[9].mxu0 }
 0x13a   :  { %v1798_v63 = vpop.f32.mrb[8].mxu1  ;;  %v1778_v0 = vadd.f32 %v1777_v62, %v1776_v61  ;;  %v1779_v1 = vpop.f32.mrb[10].mxu0 }
 0x13b   :  { %v1799_v2 = vpop.f32.mrb[9].mxu1  ;;  %v1780_v3 = vpop.f32.mrb[11].mxu0 }
 0x13c   :  { %v1370_v4 = vadd.f32 %v1778_v0, %v1330_v60  ;;  %v1800_v5 = vadd.f32 %v1799_v2, %v1798_v63  ;;  %v1801_v6 = vpop.f32.mrb[10].mxu1 }
 0x13d   :  { %v1802_v7 = vpop.f32.mrb[11].mxu1 }
 0x13e   :  { %v1410_v8 = vadd.f32 %v1800_v5, %v1370_v4 }
 0x158   :  { %v1820_v9 = vpop.f32.mrb[12].mxu0 }
 0x159   :  { %v1821_v10 = vpop.f32.mrb[13].mxu0 }
 0x15a   :  { %v1842_v11 = vpop.f32.mrb[12].mxu1  ;;  %v1822_v12 = vadd.f32 %v1821_v10, %v1820_v9  ;;  %v1823_v13 = vpop.f32.mrb[14].mxu0 }
 0x15b   :  { %v1843_v14 = vpop.f32.mrb[13].mxu1  ;;  %v1824_v15 = vpop.f32.mrb[15].mxu0 }
 0x15c   :  { %v1450_v16 = vadd.f32 %v1822_v12, %v1410_v8  ;;  %v1844_v17 = vadd.f32 %v1843_v14, %v1842_v11  ;;  %v1845_v18 = vpop.f32.mrb[14].mxu1 }
 0x15d   :  { %v1846_v19 = vpop.f32.mrb[15].mxu1 }
 0x15e   :  { %v1490_v21 = vadd.f32 %v1844_v17, %v1450_v16 }
 0x160   :  { %1495 = vst [vmem:[#allocation3] sm:$0x3] %v1490_v21  ;;  %v1503_v22 = vmul.f32 %v1670_v20, %v1490_v21 }
 0x162   :  { %v1505_v23 = vsel %vm1504_vm0, %v1503_v22, 0.0 }
 0x163   :  { %1506 = vadd.xlane.f32.xlu0 %v1505_v23 }
 0x164   :  { %1995 = shalt.err (!%p1992_p4)
}
 0x165   :  { %s1996_s3 = scalar_lea.hbm %s2488_s5, 32 }
 0x166   :  { %p1997_p5 = scmp.ne.s32.totalorder %s2488_s5, %s1996_s3  ;;  %p2000_p6 = scmp.lt.u32.totalorder %s1996_s3, %s2488_s5 }
 0x168   :  { %p2002_p7 = pnand %p2000_p6, %p1997_p5 }
 0x16a   :  { %2005 = shalt.err (!%p2002_p7)
}
 0x16b   :  { %1532 = dma.vmem_to_hbm [thread:$0]  %s1530_s8, 32, %s2488_s5, [#allocation4]   ;;  %v1671_v24 = vld [vmem:[#allocation2] ss:$0 sm:$0xff]  ;;  %vm1521_vm1 = vcmask 1024  }
 0x1f0   :  { %v1507_v25 = vpop.xlane.xlu0 %1506 }
 0x1f1   :  { %v1515_v26 = vadd.f32 %v1671_v24, %v1507_v25 }
 0x1f3   :  { %v1516_v27 = vsub.f32 0.0, %v1515_v26 }
 0x1f5   :  { %v1517_v28 = vmul.f32 1.442695, %v1516_v27 }
 0x1f7   :  { %1980 = vpow2.f32 %v1517_v28 }
 0x201   :  { %v1981_v29 = vpop.eup %1980 }
 0x202   :  { %v1519_v30 = vadd.f32 1.0, %v1981_v29 }
 0x204   :  { %1982 = vrcp.f32 %v1519_v30 }
 0x20e   :  { %v1983_v31 = vpop.eup %1982 }
 0x20f   :  { %1522 = vst.msk [vmem:[%s2489_s6] sm:$0x3] %vm1521_vm1, %v1983_v31 }
 0x210   :  { %2006 = dma.done.wait [#allocation4], 32  }
 0x211   :  { %2007 = vsyncadd [#allocation4], 4294967264 }
 0x212   :  { %1540 = vsyncpa [#allocation4], 1 }

// kernel: critic_forward.8
= control target key start
LH: loop header
LB: loop body
LE: loop exit
PB: predicated region body
PF: predicated region fallthrough
CT: control target
= control target key end

     0   :  { %s2703_s1 = inlined_call_operand.vmem [shape: bf16[2048,128], index: 1, kind: input, shape index: {}]   ;;  %s2704_s0 = inlined_call_operand.vmem [shape: bf16[32,2048], index: 0, kind: input, shape index: {}]   ;;  %s2705_s2 = inlined_call_operand.vmem [shape: f32[1,128], index: 2, kind: input, shape index: {}]   ;;  %s2706_s3 = inlined_call_operand.vmem [shape: bf16[32,128], index: 3, kind: output, shape index: {}]  }
   0x1   :  { %v2066_v0 = vld [vmem:[%s2703_s1 + $0x40] sm:$0xff]   ;;  %v2070_v4 = vld [vmem:[%s2703_s1 + $0x48] sm:$0xff]   ;;  %v2074_v8 = vld [vmem:[%s2703_s1 + $0x50] sm:$0xff]  }
   0x2   :  { %v2067_v1 = vld [vmem:[%s2703_s1 + $0xc0] sm:$0xff]   ;;  %1842 = vmatprep.subr.bf16.mxu0 %v2066_v0  ;;  %v2071_v5 = vld [vmem:[%s2703_s1 + $0xc8] sm:$0xff]   ;;  %v2075_v9 = vld [vmem:[%s2703_s1 + $0xd0] sm:$0xff]  }
   0x3   :  { %v2068_v2 = vld [vmem:[%s2703_s1] sm:$0xff]   ;;  %1870 = vmatprep.subr.bf16.mxu1 %v2067_v1  ;;  %v2072_v6 = vld [vmem:[%s2703_s1 + $0x8] sm:$0xff]   ;;  %v2076_v10 = vld [vmem:[%s2703_s1 + $0x10] sm:$0xff]  }
   0x4   :  { %v2069_v3 = vld [vmem:[%s2703_s1 + $0x80] sm:$0xff]   ;;  %1843 = vmatpush3.bf16.msra.mxu0 %v2068_v2  ;;  %v2073_v7 = vld [vmem:[%s2703_s1 + $0x88] sm:$0xff]   ;;  %v2077_v11 = vld [vmem:[%s2703_s1 + $0x90] sm:$0xff]  }
   0x5   :  { %1871 = vmatpush3.bf16.msra.mxu1 %v2069_v3  ;;  %1844 = vmatprep.subr.bf16.mxu0 %v2070_v4  ;;  %v2078_v12 = vld [vmem:[%s2703_s1 + $0x58] sm:$0xff]   ;;  %v2082_v16 = vld [vmem:[%s2703_s1 + $0x60] sm:$0xff]   ;;  %v2086_v20 = vld [vmem:[%s2703_s1 + $0x68] sm:$0xff]  }
   0x6   :  { %1872 = vmatprep.subr.bf16.mxu1 %v2071_v5  ;;  %v2079_v13 = vld [vmem:[%s2703_s1 + $0xd8] sm:$0xff]   ;;  %v2083_v17 = vld [vmem:[%s2703_s1 + $0xe0] sm:$0xff]   ;;  %v2087_v21 = vld [vmem:[%s2703_s1 + $0xe8] sm:$0xff]  }
   0x7   :  { %v2080_v14 = vld [vmem:[%s2703_s1 + $0x18] sm:$0xff]   ;;  %v2084_v18 = vld [vmem:[%s2703_s1 + $0x20] sm:$0xff]   ;;  %v2088_v22 = vld [vmem:[%s2703_s1 + $0x28] sm:$0xff]  }
   0x8   :  { %1845 = vmatpush3.bf16.msra.mxu0 %v2072_v6  ;;  %v2081_v15 = vld [vmem:[%s2703_s1 + $0x98] sm:$0xff]   ;;  %v2085_v19 = vld [vmem:[%s2703_s1 + $0xa0] sm:$0xff]   ;;  %v2089_v23 = vld [vmem:[%s2703_s1 + $0xa8] sm:$0xff]  }
   0x9   :  { %1873 = vmatpush3.bf16.msra.mxu1 %v2073_v7  ;;  %1846 = vmatprep.subr.bf16.mxu0 %v2074_v8  ;;  %v2090_v24 = vld [vmem:[%s2703_s1 + $0x70] sm:$0xff]   ;;  %v2094_v28 = vld [vmem:[%s2703_s1 + $0x78] sm:$0xff]   ;;  %v15_v32 = vld [vmem:[%s2704_s0] sm:$0xff] }
   0xa   :  { %1874 = vmatprep.subr.bf16.mxu1 %v2075_v9  ;;  %v2091_v25 = vld [vmem:[%s2703_s1 + $0xf0] sm:$0xff]   ;;  %v2095_v29 = vld [vmem:[%s2703_s1 + $0xf8] sm:$0xff]   ;;  %v23_v33 = vld [vmem:[%s2704_s0 + $0x40] sm:$0xff] }
   0xb   :  { %v2092_v26 = vld [vmem:[%s2703_s1 + $0x30] sm:$0xff]   ;;  %v2096_v30 = vld [vmem:[%s2703_s1 + $0x38] sm:$0xff]   ;;  %v16_v34 = vld [vmem:[%s2704_s0 + $0x8] sm:$0xff]  ;;  %v1663_v35 = vcombine.low %v15_v32, %v23_v33  ;;  %v1664_v36 = vcombine.high %v15_v32, %v23_v33 }
   0xc   :  { %1847 = vmatpush3.bf16.msra.mxu0 %v2076_v10  ;;  %v2093_v27 = vld [vmem:[%s2703_s1 + $0xb0] sm:$0xff]   ;;  %v2097_v31 = vld [vmem:[%s2703_s1 + $0xb8] sm:$0xff]   ;;  %v24_v37 = vld [vmem:[%s2704_s0 + $0x48] sm:$0xff] }
   0xd   :  { %1875 = vmatpush3.bf16.msra.mxu1 %v2077_v11  ;;  %1848 = vmatprep.subr.bf16.mxu0 %v2078_v12  ;;  %v1665_v38 = vcombine.low %v16_v34, %v24_v37  ;;  %v1666_v39 = vcombine.high %v16_v34, %v24_v37  ;;  %v2098_v40 = vld [vmem:[%s2703_s1 + $0x140] sm:$0xff]   ;;  %v2102_v44 = vld [vmem:[%s2703_s1 + $0x148] sm:$0xff]   ;;  %v2106_v48 = vld [vmem:[%s2703_s1 + $0x150] sm:$0xff]  }
   0xe   :  { %1876 = vmatprep.subr.bf16.mxu1 %v2079_v13  ;;  %1270 = vmatprep.mubr.bf16.mxu0 %v1664_v36  ;;  %v2099_v41 = vld [vmem:[%s2703_s1 + $0x1c0] sm:$0xff]   ;;  %v2103_v45 = vld [vmem:[%s2703_s1 + $0x1c8] sm:$0xff]   ;;  %v2107_v49 = vld [vmem:[%s2703_s1 + $0x1d0] sm:$0xff]  }
   0xf   :  { %1319 = vmatprep.mubr.bf16.mxu1 %v1666_v39  ;;  %v2100_v42 = vld [vmem:[%s2703_s1 + $0x100] sm:$0xff]   ;;  %v2104_v46 = vld [vmem:[%s2703_s1 + $0x108] sm:$0xff]   ;;  %v2108_v50 = vld [vmem:[%s2703_s1 + $0x110] sm:$0xff]  }
  0x10   :  { %1849 = vmatpush3.bf16.msra.mxu0 %v2080_v14  ;;  %v2101_v43 = vld [vmem:[%s2703_s1 + $0x180] sm:$0xff]   ;;  %v2105_v47 = vld [vmem:[%s2703_s1 + $0x188] sm:$0xff]   ;;  %v2109_v51 = vld [vmem:[%s2703_s1 + $0x190] sm:$0xff]  }
  0x11   :  { %1877 = vmatpush3.bf16.msra.mxu1 %v2081_v15  ;;  %1850 = vmatprep.subr.bf16.mxu0 %v2082_v16  ;;  %v2110_v52 = vld [vmem:[%s2703_s1 + $0x158] sm:$0xff]   ;;  %v2114_v56 = vld [vmem:[%s2703_s1 + $0x160] sm:$0xff]   ;;  %v2118_v60 = vld [vmem:[%s2703_s1 + $0x168] sm:$0xff]  }
  0x12   :  { %1878 = vmatprep.subr.bf16.mxu1 %v2083_v17  ;;  %v2111_v53 = vld [vmem:[%s2703_s1 + $0x1d8] sm:$0xff]   ;;  %v2115_v57 = vld [vmem:[%s2703_s1 + $0x1e0] sm:$0xff]   ;;  %v2119_v61 = vld [vmem:[%s2703_s1 + $0x1e8] sm:$0xff]  }
  0x13   :  { %v2112_v54 = vld [vmem:[%s2703_s1 + $0x118] sm:$0xff]   ;;  %v2116_v58 = vld [vmem:[%s2703_s1 + $0x120] sm:$0xff]   ;;  %v2120_v1 = vld [vmem:[%s2703_s1 + $0x128] sm:$0xff]  }
  0x14   :  { %1851 = vmatpush3.bf16.msra.mxu0 %v2084_v18  ;;  %v2113_v55 = vld [vmem:[%s2703_s1 + $0x198] sm:$0xff]   ;;  %v2117_v59 = vld [vmem:[%s2703_s1 + $0x1a0] sm:$0xff]   ;;  %v2121_v3 = vld [vmem:[%s2703_s1 + $0x1a8] sm:$0xff]  }
  0x15   :  { %1879 = vmatpush3.bf16.msra.mxu1 %v2085_v19  ;;  %1852 = vmatprep.subr.bf16.mxu0 %v2086_v20  ;;  %v31_v62 = vld [vmem:[%s2704_s0 + $0x80] sm:$0xff]  ;;  %v32_v4 = vld [vmem:[%s2704_s0 + $0x88] sm:$0xff]  ;;  %v2122_v8 = vld [vmem:[%s2703_s1 + $0x170] sm:$0xff]  }
  0x16   :  { %1880 = vmatprep.subr.bf16.mxu1 %v2087_v21  ;;  %v39_v63 = vld [vmem:[%s2704_s0 + $0xc0] sm:$0xff]  ;;  %v40_v5 = vld [vmem:[%s2704_s0 + $0xc8] sm:$0xff]  ;;  %v2123_v9 = vld [vmem:[%s2703_s1 + $0x1f0] sm:$0xff]  }
  0x17   :  { %v1680_v0 = vcombine.high %v31_v62, %v39_v63  ;;  %v1679_v2 = vcombine.low %v31_v62, %v39_v63  ;;  %v1682_v6 = vcombine.high %v32_v4, %v40_v5  ;;  %v1681_v7 = vcombine.low %v32_v4, %v40_v5  ;;  %v2124_v10 = vld [vmem:[%s2703_s1 + $0x130] sm:$0xff]   ;;  %v2126_v12 = vld [vmem:[%s2703_s1 + $0x178] sm:$0xff]   ;;  %v20_v4 = vld [vmem:[%s2704_s0 + $0x28] sm:$0xff] }
  0x18   :  { %1853 = vmatpush3.bf16.msra.mxu0 %v2088_v22  ;;  %v2125_v11 = vld [vmem:[%s2703_s1 + $0x1b0] sm:$0xff]   ;;  %v2127_v13 = vld [vmem:[%s2703_s1 + $0x1f8] sm:$0xff]   ;;  %v28_v5 = vld [vmem:[%s2704_s0 + $0x68] sm:$0xff] }
  0x19   :  { %1881 = vmatpush3.bf16.msra.mxu1 %v2089_v23  ;;  %1854 = vmatprep.subr.bf16.mxu0 %v2090_v24  ;;  %v2128_v14 = vld [vmem:[%s2703_s1 + $0x138] sm:$0xff]   ;;  %v17_v16 = vld [vmem:[%s2704_s0 + $0x10] sm:$0xff]  ;;  %v2130_v24 = vld [vmem:[%s2703_s1 + $0x240] sm:$0xff]  }
  0x1a   :  { %1882 = vmatprep.subr.bf16.mxu1 %v2091_v25  ;;  %v2129_v15 = vld [vmem:[%s2703_s1 + $0x1b8] sm:$0xff]   ;;  %v25_v17 = vld [vmem:[%s2704_s0 + $0x50] sm:$0xff]  ;;  %v2131_v25 = vld [vmem:[%s2703_s1 + $0x2c0] sm:$0xff]  }
  0x1b   :  { %v18_v18 = vld [vmem:[%s2704_s0 + $0x18] sm:$0xff]  ;;  %v1667_v20 = vcombine.low %v17_v16, %v25_v17  ;;  %v1668_v21 = vcombine.high %v17_v16, %v25_v17  ;;  %v33_v32 = vld [vmem:[%s2704_s0 + $0x90] sm:$0xff]  ;;  %v35_v16 = vld [vmem:[%s2704_s0 + $0xa0] sm:$0xff] }
  0x1c   :  { %1855 = vmatpush3.bf16.msra.mxu0 %v2092_v26  ;;  %v26_v19 = vld [vmem:[%s2704_s0 + $0x58] sm:$0xff]  ;;  %v2132_v26 = vld [vmem:[%s2703_s1 + $0x200] sm:$0xff]   ;;  %v41_v33 = vld [vmem:[%s2704_s0 + $0xd0] sm:$0xff] }
  0x1d   :  { %1883 = vmatpush3.bf16.msra.mxu1 %v2093_v27  ;;  %1856 = vmatprep.subr.bf16.mxu0 %v2094_v28  ;;  %v1669_v22 = vcombine.low %v18_v18, %v26_v19  ;;  %v1670_v23 = vcombine.high %v18_v18, %v26_v19  ;;  %v2133_v27 = vld [vmem:[%s2703_s1 + $0x280] sm:$0xff]   ;;  %v2134_v28 = vld [vmem:[%s2703_s1 + $0x248] sm:$0xff]   ;;  %v1684_v34 = vcombine.high %v33_v32, %v41_v33  ;;  %v2138_v36 = vld [vmem:[%s2703_s1 + $0x250] sm:$0xff]  }
  0x1e   :  { %1884 = vmatprep.subr.bf16.mxu1 %v2095_v29  ;;  %v2135_v29 = vld [vmem:[%s2703_s1 + $0x2c8] sm:$0xff]   ;;  %v2139_v37 = vld [vmem:[%s2703_s1 + $0x2d0] sm:$0xff]   ;;  %v42_v39 = vld [vmem:[%s2704_s0 + $0xd8] sm:$0xff] }
  0x1f   :  { %v2160_v62 = vld [vmem:[%s2703_s1 + $0x238] sm:$0xff]   ;;  %v43_v17 = vld [vmem:[%s2704_s0 + $0xe0] sm:$0xff] }
  0x20   :  { %1857 = vmatpush3.bf16.msra.mxu0 %v2096_v30  ;;  %v2136_v30 = vld [vmem:[%s2703_s1 + $0x208] sm:$0xff]   ;;  %v2161_v63 = vld [vmem:[%s2703_s1 + $0x2b8] sm:$0xff]   ;;  %v1688_v18 = vcombine.high %v35_v16, %v43_v17  ;;  %v1687_v19 = vcombine.low %v35_v16, %v43_v17 }
  0x21   :  { %1885 = vmatpush3.bf16.msra.mxu1 %v2097_v31  ;;  %1898 = vmatprep.subr.bf16.mxu0 %v2098_v40  ;;  %v2137_v31 = vld [vmem:[%s2703_s1 + $0x288] sm:$0xff]  }
  0x22   :  { %1926 = vmatprep.subr.bf16.mxu1 %v2099_v41  ;;  %v2140_v41 = vld [vmem:[%s2703_s1 + $0x210] sm:$0xff]  }
  0x23   :  { %1271 = vmatmul.mubr.bf16.vlgmr.msra.gmra.mrb[0].mxu0 %v1663_v35  ;;  %v1683_v35 = vcombine.low %v33_v32, %v41_v33  ;;  %v2178_v32 = vld [vmem:[%s2703_s1 + $0x360] sm:$0xff]  }
  0x24   :  { %1320 = vmatmul.mubr.bf16.vlgmr.msra.gmra.mrb[0].mxu1 %v1665_v38  ;;  %1899 = vmatpush3.bf16.msra.mxu0 %v2100_v42  ;;  %v34_v38 = vld [vmem:[%s2704_s0 + $0x98] sm:$0xff]  ;;  %v2179_v33 = vld [vmem:[%s2703_s1 + $0x3e0] sm:$0xff]  }
  0x25   :  { %1927 = vmatpush3.bf16.msra.mxu1 %v2101_v43  ;;  %1900 = vmatprep.subr.bf16.mxu0 %v2102_v44  ;;  %v1686_v40 = vcombine.high %v34_v38, %v42_v39  ;;  %v1685_v42 = vcombine.low %v34_v38, %v42_v39  ;;  %v2141_v43 = vld [vmem:[%s2703_s1 + $0x290] sm:$0xff]   ;;  %v2142_v44 = vld [vmem:[%s2703_s1 + $0x258] sm:$0xff]   ;;  %v2184_v38 = vld [vmem:[%s2703_s1 + $0x328] sm:$0xff]  }
  0x26   :  { %1928 = vmatprep.subr.bf16.mxu1 %v2103_v45  ;;  %1278 = vmatprep.mubr.bf16.mxu0 %v1680_v0  ;;  %v2143_v45 = vld [vmem:[%s2703_s1 + $0x2d8] sm:$0xff]   ;;  %v19_v0 = vld [vmem:[%s2704_s0 + $0x20] sm:$0xff]  ;;  %v2185_v39 = vld [vmem:[%s2703_s1 + $0x3a8] sm:$0xff]  }
  0x27   :  { %1327 = vmatprep.mubr.bf16.mxu1 %v1682_v6  ;;  %v1673_v6 = vcombine.low %v20_v4, %v28_v5 }
  0x28   :  { %1901 = vmatpush3.bf16.msra.mxu0 %v2104_v46  ;;  %v2144_v46 = vld [vmem:[%s2703_s1 + $0x218] sm:$0xff]  }
  0x29   :  { %1929 = vmatpush3.bf16.msra.mxu1 %v2105_v47  ;;  %1902 = vmatprep.subr.bf16.mxu0 %v2106_v48  ;;  %v2145_v47 = vld [vmem:[%s2703_s1 + $0x298] sm:$0xff]   ;;  %v2146_v48 = vld [vmem:[%s2703_s1 + $0x260] sm:$0xff]  }
  0x2a   :  { %1930 = vmatprep.subr.bf16.mxu1 %v2107_v49  ;;  %v2147_v49 = vld [vmem:[%s2703_s1 + $0x2e0] sm:$0xff]  }
  0x2b   :  { %1279 = vmatmul.mubr.bf16.gmra.mrb[4].mxu0 %v1679_v2 }
  0x2c   :  { %1903 = vmatpush3.bf16.msra.mxu0 %v2108_v50  ;;  %1328 = vmatmul.mubr.bf16.gmra.mrb[4].mxu1 %v1681_v7  ;;  %v2148_v50 = vld [vmem:[%s2703_s1 + $0x220] sm:$0xff]   ;;  %v1674_v7 = vcombine.high %v20_v4, %v28_v5 }
  0x2d   :  { %1931 = vmatpush3.bf16.msra.mxu1 %v2109_v51  ;;  %1904 = vmatprep.subr.bf16.mxu0 %v2110_v52  ;;  %v2149_v51 = vld [vmem:[%s2703_s1 + $0x2a0] sm:$0xff]   ;;  %v2150_v52 = vld [vmem:[%s2703_s1 + $0x268] sm:$0xff]  }
  0x2e   :  { %1932 = vmatprep.subr.bf16.mxu1 %v2111_v53  ;;  %1368 = vmatprep.mubr.bf16.mxu0 %v1668_v21  ;;  %v2151_v53 = vld [vmem:[%s2703_s1 + $0x2e8] sm:$0xff]   ;;  %v2171_v21 = vld [vmem:[%s2703_s1 + $0x3d0] sm:$0xff]  }
  0x2f   :  { %1417 = vmatprep.mubr.bf16.mxu1 %v1670_v23  ;;  %v44_v23 = vld [vmem:[%s2704_s0 + $0xe8] sm:$0xff] }
  0x30   :  { %1905 = vmatpush3.bf16.msra.mxu0 %v2112_v54  ;;  %v2152_v54 = vld [vmem:[%s2703_s1 + $0x228] sm:$0xff]  }
  0x31   :  { %1933 = vmatpush3.bf16.msra.mxu1 %v2113_v55  ;;  %1906 = vmatprep.subr.bf16.mxu0 %v2114_v56  ;;  %v2153_v55 = vld [vmem:[%s2703_s1 + $0x2a8] sm:$0xff]   ;;  %v2154_v56 = vld [vmem:[%s2703_s1 + $0x270] sm:$0xff]  }
  0x32   :  { %1934 = vmatprep.subr.bf16.mxu1 %v2115_v57  ;;  %v2155_v57 = vld [vmem:[%s2703_s1 + $0x2f0] sm:$0xff]  }
  0x34   :  { %1907 = vmatpush3.bf16.msra.mxu0 %v2116_v58  ;;  %v2156_v58 = vld [vmem:[%s2703_s1 + $0x230] sm:$0xff]  }
  0x35   :  { %1935 = vmatpush3.bf16.msra.mxu1 %v2117_v59  ;;  %1908 = vmatprep.subr.bf16.mxu0 %v2118_v60  ;;  %v2157_v59 = vld [vmem:[%s2703_s1 + $0x2b0] sm:$0xff]   ;;  %v2158_v60 = vld [vmem:[%s2703_s1 + $0x278] sm:$0xff]  }
  0x36   :  { %1936 = vmatprep.subr.bf16.mxu1 %v2119_v61  ;;  %v2159_v61 = vld [vmem:[%s2703_s1 + $0x2f8] sm:$0xff]  }
  0x38   :  { %1909 = vmatpush3.bf16.msra.mxu0 %v2120_v1  ;;  %v27_v1 = vld [vmem:[%s2704_s0 + $0x60] sm:$0xff] }
  0x39   :  { %1937 = vmatpush3.bf16.msra.mxu1 %v2121_v3  ;;  %1910 = vmatprep.subr.bf16.mxu0 %v2122_v8  ;;  %v1671_v2 = vcombine.low %v19_v0, %v27_v1  ;;  %v1672_v3 = vcombine.high %v19_v0, %v27_v1  ;;  %v2162_v8 = vld [vmem:[%s2703_s1 + $0x340] sm:$0xff]  }
  0x3a   :  { %1938 = vmatprep.subr.bf16.mxu1 %v2123_v9  ;;  %v2163_v9 = vld [vmem:[%s2703_s1 + $0x3c0] sm:$0xff]  }
  0x3c   :  { %1911 = vmatpush3.bf16.msra.mxu0 %v2124_v10  ;;  %v2164_v10 = vld [vmem:[%s2703_s1 + $0x300] sm:$0xff]  }
  0x3d   :  { %1939 = vmatpush3.bf16.msra.mxu1 %v2125_v11  ;;  %1912 = vmatprep.subr.bf16.mxu0 %v2126_v12  ;;  %v2165_v11 = vld [vmem:[%s2703_s1 + $0x380] sm:$0xff]   ;;  %v2166_v12 = vld [vmem:[%s2703_s1 + $0x348] sm:$0xff]  }
  0x3e   :  { %1940 = vmatprep.subr.bf16.mxu1 %v2127_v13  ;;  %v2167_v13 = vld [vmem:[%s2703_s1 + $0x3c8] sm:$0xff]  }
  0x40   :  { %1913 = vmatpush3.bf16.msra.mxu0 %v2128_v14  ;;  %v2168_v14 = vld [vmem:[%s2703_s1 + $0x308] sm:$0xff]  }
  0x41   :  { %1941 = vmatpush3.bf16.msra.mxu1 %v2129_v15  ;;  %1954 = vmatprep.subr.bf16.mxu0 %v2130_v24  ;;  %v2169_v15 = vld [vmem:[%s2703_s1 + $0x388] sm:$0xff]  }
  0x42   :  { %1982 = vmatprep.subr.bf16.mxu1 %v2131_v25  ;;  %v2172_v25 = vld [vmem:[%s2703_s1 + $0x310] sm:$0xff]  }
  0x43   :  { %1369 = vmatmul.mubr.bf16.vlgmr.msra.gmra.mrb[8].mxu0 %v1667_v20  ;;  %v2170_v20 = vld [vmem:[%s2703_s1 + $0x350] sm:$0xff]  }
  0x44   :  { %1418 = vmatmul.mubr.bf16.vlgmr.msra.gmra.mrb[8].mxu1 %v1669_v22  ;;  %1955 = vmatpush3.bf16.msra.mxu0 %v2132_v26  ;;  %v36_v22 = vld [vmem:[%s2704_s0 + $0xa8] sm:$0xff] }
  0x45   :  { %1983 = vmatpush3.bf16.msra.mxu1 %v2133_v27  ;;  %1956 = vmatprep.subr.bf16.mxu0 %v2134_v28  ;;  %v1690_v24 = vcombine.high %v36_v22, %v44_v23  ;;  %v1689_v26 = vcombine.low %v36_v22, %v44_v23  ;;  %v2173_v27 = vld [vmem:[%s2703_s1 + $0x390] sm:$0xff]   ;;  %v2174_v28 = vld [vmem:[%s2703_s1 + $0x358] sm:$0xff]  }
  0x46   :  { %1984 = vmatprep.subr.bf16.mxu1 %v2135_v29  ;;  %1376 = vmatprep.mubr.bf16.mxu0 %v1684_v34  ;;  %v2175_v29 = vld [vmem:[%s2703_s1 + $0x3d8] sm:$0xff]   ;;  %v2180_v34 = vld [vmem:[%s2703_s1 + $0x320] sm:$0xff]  }
  0x47   :  { %1425 = vmatprep.mubr.bf16.mxu1 %v1686_v40  ;;  %v2186_v40 = vld [vmem:[%s2703_s1 + $0x370] sm:$0xff]  }
  0x48   :  { %1957 = vmatpush3.bf16.msra.mxu0 %v2136_v30  ;;  %v2176_v30 = vld [vmem:[%s2703_s1 + $0x318] sm:$0xff]  }
  0x49   :  { %1985 = vmatpush3.bf16.msra.mxu1 %v2137_v31  ;;  %1958 = vmatprep.subr.bf16.mxu0 %v2138_v36  ;;  %v2177_v31 = vld [vmem:[%s2703_s1 + $0x398] sm:$0xff]   ;;  %v2182_v36 = vld [vmem:[%s2703_s1 + $0x368] sm:$0xff]  }
  0x4a   :  { %1986 = vmatprep.subr.bf16.mxu1 %v2139_v37  ;;  %v2183_v37 = vld [vmem:[%s2703_s1 + $0x3e8] sm:$0xff]  }
  0x4b   :  { %1377 = vmatmul.mubr.bf16.gmra.mrb[12].mxu0 %v1683_v35  ;;  %v2181_v35 = vld [vmem:[%s2703_s1 + $0x3a0] sm:$0xff]  }
  0x4c   :  { %1959 = vmatpush3.bf16.msra.mxu0 %v2140_v41  ;;  %1426 = vmatmul.mubr.bf16.gmra.mrb[12].mxu1 %v1685_v42  ;;  %v2187_v41 = vld [vmem:[%s2703_s1 + $0x3f0] sm:$0xff]  }
  0x4d   :  { %1987 = vmatpush3.bf16.msra.mxu1 %v2141_v43  ;;  %1960 = vmatprep.subr.bf16.mxu0 %v2142_v44  ;;  %v2188_v42 = vld [vmem:[%s2703_s1 + $0x330] sm:$0xff]   ;;  %v2190_v44 = vld [vmem:[%s2703_s1 + $0x378] sm:$0xff]  }
  0x4e   :  { %1988 = vmatprep.subr.bf16.mxu1 %v2143_v45  ;;  %1466 = vmatprep.mubr.bf16.mxu0 %v1672_v3  ;;  %v2189_v43 = vld [vmem:[%s2703_s1 + $0x3b0] sm:$0xff]   ;;  %v2191_v45 = vld [vmem:[%s2703_s1 + $0x3f8] sm:$0xff]  }
  0x4f   :  { %1515 = vmatprep.mubr.bf16.mxu1 %v1674_v7 }
  0x50   :  { %1961 = vmatpush3.bf16.msra.mxu0 %v2144_v46  ;;  %v2192_v46 = vld [vmem:[%s2703_s1 + $0x338] sm:$0xff]  }
  0x51   :  { %1989 = vmatpush3.bf16.msra.mxu1 %v2145_v47  ;;  %1962 = vmatprep.subr.bf16.mxu0 %v2146_v48  ;;  %v2193_v47 = vld [vmem:[%s2703_s1 + $0x3b8] sm:$0xff]   ;;  %v21_v48 = vld [vmem:[%s2704_s0 + $0x30] sm:$0xff] }
  0x52   :  { %1990 = vmatprep.subr.bf16.mxu1 %v2147_v49  ;;  %v29_v49 = vld [vmem:[%s2704_s0 + $0x70] sm:$0xff] }
  0x54   :  { %1963 = vmatpush3.bf16.msra.mxu0 %v2148_v50  ;;  %v22_v50 = vld [vmem:[%s2704_s0 + $0x38] sm:$0xff] }
  0x55   :  { %1991 = vmatpush3.bf16.msra.mxu1 %v2149_v51  ;;  %1964 = vmatprep.subr.bf16.mxu0 %v2150_v52  ;;  %v1675_v51 = vcombine.low %v21_v48, %v29_v49  ;;  %v1676_v52 = vcombine.high %v21_v48, %v29_v49 }
  0x56   :  { %1992 = vmatprep.subr.bf16.mxu1 %v2151_v53  ;;  %v30_v53 = vld [vmem:[%s2704_s0 + $0x78] sm:$0xff] }
  0x58   :  { %1965 = vmatpush3.bf16.msra.mxu0 %v2152_v54  ;;  %v37_v54 = vld [vmem:[%s2704_s0 + $0xb0] sm:$0xff] }
  0x59   :  { %1993 = vmatpush3.bf16.msra.mxu1 %v2153_v55  ;;  %1966 = vmatprep.subr.bf16.mxu0 %v2154_v56  ;;  %v45_v55 = vld [vmem:[%s2704_s0 + $0xf0] sm:$0xff]  ;;  %v1677_v56 = vcombine.low %v22_v50, %v30_v53 }
  0x5a   :  { %1994 = vmatprep.subr.bf16.mxu1 %v2155_v57  ;;  %v1678_v57 = vcombine.high %v22_v50, %v30_v53 }
  0x5c   :  { %1967 = vmatpush3.bf16.msra.mxu0 %v2156_v58  ;;  %v1692_v58 = vcombine.high %v37_v54, %v45_v55 }
  0x5d   :  { %1995 = vmatpush3.bf16.msra.mxu1 %v2157_v59  ;;  %1968 = vmatprep.subr.bf16.mxu0 %v2158_v60  ;;  %v38_v59 = vld [vmem:[%s2704_s0 + $0xb8] sm:$0xff] }
  0x5e   :  { %1996 = vmatprep.subr.bf16.mxu1 %v2159_v61  ;;  %v46_v60 = vld [vmem:[%s2704_s0 + $0xf8] sm:$0xff] }
  0x5f   :  { %v1694_v61 = vcombine.high %v38_v59, %v46_v60 }
  0x60   :  { %1969 = vmatpush3.bf16.msra.mxu0 %v2160_v62  ;;  %v1691_v62 = vcombine.low %v37_v54, %v45_v55 }
  0x61   :  { %1997 = vmatpush3.bf16.msra.mxu1 %v2161_v63  ;;  %2010 = vmatprep.subr.bf16.mxu0 %v2162_v8  ;;  %v1693_v63 = vcombine.low %v38_v59, %v46_v60 }
  0x62   :  { %2038 = vmatprep.subr.bf16.mxu1 %v2163_v9 }
  0x63   :  { %1467 = vmatmul.mubr.bf16.vlgmr.msra.gmra.mrb[16].mxu0 %v1671_v2  ;;  %v1662_v2 = vld [vmem:[%s2705_s2] ss:$0 sm:$0xff] }
  0x64   :  { %1516 = vmatmul.mubr.bf16.vlgmr.msra.gmra.mrb[16].mxu1 %v1673_v6  ;;  %2011 = vmatpush3.bf16.msra.mxu0 %v2164_v10 }
  0x65   :  { %2039 = vmatpush3.bf16.msra.mxu1 %v2165_v11  ;;  %2012 = vmatprep.subr.bf16.mxu0 %v2166_v12 }
  0x66   :  { %2040 = vmatprep.subr.bf16.mxu1 %v2167_v13  ;;  %1474 = vmatprep.mubr.bf16.mxu0 %v1688_v18 }
  0x67   :  { %1523 = vmatprep.mubr.bf16.mxu1 %v1690_v24 }
  0x68   :  { %2013 = vmatpush3.bf16.msra.mxu0 %v2168_v14 }
  0x69   :  { %2041 = vmatpush3.bf16.msra.mxu1 %v2169_v15  ;;  %2014 = vmatprep.subr.bf16.mxu0 %v2170_v20 }
  0x6a   :  { %2042 = vmatprep.subr.bf16.mxu1 %v2171_v21 }
  0x6b   :  { %1475 = vmatmul.mubr.bf16.gmra.mrb[20].mxu0 %v1687_v19 }
  0x6c   :  { %2015 = vmatpush3.bf16.msra.mxu0 %v2172_v25  ;;  %1524 = vmatmul.mubr.bf16.gmra.mrb[20].mxu1 %v1689_v26 }
  0x6d   :  { %2043 = vmatpush3.bf16.msra.mxu1 %v2173_v27  ;;  %2016 = vmatprep.subr.bf16.mxu0 %v2174_v28 }
  0x6e   :  { %2044 = vmatprep.subr.bf16.mxu1 %v2175_v29  ;;  %1564 = vmatprep.mubr.bf16.mxu0 %v1676_v52 }
  0x6f   :  { %1613 = vmatprep.mubr.bf16.mxu1 %v1678_v57 }
  0x70   :  { %2017 = vmatpush3.bf16.msra.mxu0 %v2176_v30 }
  0x71   :  { %2045 = vmatpush3.bf16.msra.mxu1 %v2177_v31  ;;  %2018 = vmatprep.subr.bf16.mxu0 %v2178_v32 }
  0x72   :  { %2046 = vmatprep.subr.bf16.mxu1 %v2179_v33 }
  0x74   :  { %2019 = vmatpush3.bf16.msra.mxu0 %v2180_v34 }
  0x75   :  { %2047 = vmatpush3.bf16.msra.mxu1 %v2181_v35  ;;  %2020 = vmatprep.subr.bf16.mxu0 %v2182_v36 }
  0x76   :  { %2048 = vmatprep.subr.bf16.mxu1 %v2183_v37 }
  0x78   :  { %2021 = vmatpush3.bf16.msra.mxu0 %v2184_v38 }
  0x79   :  { %2049 = vmatpush3.bf16.msra.mxu1 %v2185_v39  ;;  %2022 = vmatprep.subr.bf16.mxu0 %v2186_v40 }
  0x7a   :  { %2050 = vmatprep.subr.bf16.mxu1 %v2187_v41 }
  0x7c   :  { %2023 = vmatpush3.bf16.msra.mxu0 %v2188_v42 }
  0x7d   :  { %2051 = vmatpush3.bf16.msra.mxu1 %v2189_v43  ;;  %2024 = vmatprep.subr.bf16.mxu0 %v2190_v44 }
  0x7e   :  { %2052 = vmatprep.subr.bf16.mxu1 %v2191_v45 }
  0x80   :  { %2025 = vmatpush3.bf16.msra.mxu0 %v2192_v46 }
  0x81   :  { %2053 = vmatpush3.bf16.msra.mxu1 %v2193_v47 }
  0x83   :  { %1565 = vmatmul.mubr.bf16.vlgmr.msra.gmra.mrb[24].mxu0 %v1675_v51 }
  0x84   :  { %1614 = vmatmul.mubr.bf16.vlgmr.msra.gmra.mrb[24].mxu1 %v1677_v56  ;;  %1572 = vmatprep.mubr.bf16.mxu0 %v1692_v58 }
  0x85   :  { %1621 = vmatprep.mubr.bf16.mxu1 %v1694_v61 }
  0x8b   :  { %1573 = vmatmul.mubr.bf16.gmra.mrb[28].mxu0 %v1691_v62 }
  0x8c   :  { %1622 = vmatmul.mubr.bf16.gmra.mrb[28].mxu1 %v1693_v63 }
  0xf6   :  { %v1858_v0 = vpop.f32.mrb[0].mxu0 }
  0xf7   :  { %v1886_v1 = vpop.f32.mrb[0].mxu1  ;;  %v1859_v3 = vpop.f32.mrb[1].mxu0 }
  0xf8   :  { %v1860_v4 = vadd.f32 %v1859_v3, %v1858_v0  ;;  %v1887_v5 = vpop.f32.mrb[1].mxu1  ;;  %v1861_v6 = vpop.f32.mrb[2].mxu0 }
  0xf9   :  { %v1888_v7 = vadd.f32 %v1887_v5, %v1886_v1  ;;  %v1889_v8 = vpop.f32.mrb[2].mxu1  ;;  %v1862_v9 = vpop.f32.mrb[3].mxu0 }
  0xfa   :  { %v1273_v10 = vadd.f32 %v1860_v4, %v1662_v2  ;;  %v1863_v11 = vadd.f32 %v1862_v9, %v1861_v6  ;;  %v1890_v12 = vpop.f32.mrb[3].mxu1 }
  0xfb   :  { %v1891_v13 = vadd.f32 %v1890_v12, %v1889_v8 }
  0xfc   :  { %v1322_v14 = vadd.f32 %v1888_v7, %v1273_v10  ;;  %v1276_v15 = vadd.f32 %v1863_v11, %v1662_v2 }
  0xfe   :  { %v1325_v16 = vadd.f32 %v1891_v13, %v1276_v15  ;;  %v1864_v17 = vpop.f32.mrb[4].mxu0 }
  0xff   :  { %v1865_v18 = vpop.f32.mrb[5].mxu0  ;;  %v1892_v21 = vpop.f32.mrb[4].mxu1 }
 0x100   :  { %v1866_v19 = vadd.f32 %v1865_v18, %v1864_v17  ;;  %v1867_v20 = vpop.f32.mrb[6].mxu0  ;;  %v1893_v25 = vpop.f32.mrb[5].mxu1 }
 0x101   :  { %v1868_v22 = vpop.f32.mrb[7].mxu0  ;;  %v1894_v26 = vadd.f32 %v1893_v25, %v1892_v21  ;;  %v1895_v27 = vpop.f32.mrb[6].mxu1 }
 0x102   :  { %v1281_v23 = vadd.f32 %v1866_v19, %v1662_v2  ;;  %v1869_v24 = vadd.f32 %v1868_v22, %v1867_v20  ;;  %v1896_v29 = vpop.f32.mrb[7].mxu1 }
 0x103   :  { %v1897_v31 = vadd.f32 %v1896_v29, %v1895_v27 }
 0x104   :  { %v1284_v28 = vadd.f32 %v1869_v24, %v1662_v2  ;;  %v1330_v30 = vadd.f32 %v1894_v26, %v1281_v23 }
 0x106   :  { %v1333_v32 = vadd.f32 %v1897_v31, %v1284_v28 }
 0x116   :  { %v1914_v33 = vpop.f32.mrb[8].mxu0 }
 0x117   :  { %v1942_v34 = vpop.f32.mrb[8].mxu1  ;;  %v1915_v35 = vpop.f32.mrb[9].mxu0 }
 0x118   :  { %v1943_v36 = vpop.f32.mrb[9].mxu1  ;;  %v1916_v37 = vadd.f32 %v1915_v35, %v1914_v33  ;;  %v1917_v39 = vpop.f32.mrb[10].mxu0 }
 0x119   :  { %v1944_v38 = vadd.f32 %v1943_v36, %v1942_v34  ;;  %v1945_v40 = vpop.f32.mrb[10].mxu1  ;;  %v1918_v41 = vpop.f32.mrb[11].mxu0 }
 0x11a   :  { %v1946_v42 = vpop.f32.mrb[11].mxu1  ;;  %v1371_v43 = vadd.f32 %v1916_v37, %v1322_v14  ;;  %v1919_v44 = vadd.f32 %v1918_v41, %v1917_v39 }
 0x11b   :  { %v1947_v45 = vadd.f32 %v1946_v42, %v1945_v40 }
 0x11c   :  { %v1420_v46 = vadd.f32 %v1944_v38, %v1371_v43  ;;  %v1374_v47 = vadd.f32 %v1919_v44, %v1325_v16 }
 0x11e   :  { %v1423_v48 = vadd.f32 %v1947_v45, %v1374_v47  ;;  %v1920_v49 = vpop.f32.mrb[12].mxu0 }
 0x11f   :  { %v1921_v50 = vpop.f32.mrb[13].mxu0  ;;  %v1948_v55 = vpop.f32.mrb[12].mxu1 }
 0x120   :  { %v1922_v51 = vadd.f32 %v1921_v50, %v1920_v49  ;;  %v1923_v52 = vpop.f32.mrb[14].mxu0  ;;  %v1949_v57 = vpop.f32.mrb[13].mxu1 }
 0x121   :  { %v1924_v53 = vpop.f32.mrb[15].mxu0  ;;  %v1950_v59 = vadd.f32 %v1949_v57, %v1948_v55  ;;  %v1951_v60 = vpop.f32.mrb[14].mxu1 }
 0x122   :  { %v1379_v54 = vadd.f32 %v1922_v51, %v1330_v30  ;;  %v1925_v56 = vadd.f32 %v1924_v53, %v1923_v52  ;;  %v1952_v61 = vpop.f32.mrb[15].mxu1 }
 0x123   :  { %v1953_v63 = vadd.f32 %v1952_v61, %v1951_v60 }
 0x124   :  { %v1382_v58 = vadd.f32 %v1925_v56, %v1333_v32  ;;  %v1428_v62 = vadd.f32 %v1950_v59, %v1379_v54 }
 0x126   :  { %v1431_v0 = vadd.f32 %v1953_v63, %v1382_v58 }
 0x136   :  { %v1970_v1 = vpop.f32.mrb[16].mxu0 }
 0x137   :  { %v1998_v2 = vpop.f32.mrb[16].mxu1  ;;  %v1971_v3 = vpop.f32.mrb[17].mxu0 }
 0x138   :  { %v1972_v4 = vadd.f32 %v1971_v3, %v1970_v1  ;;  %v1999_v5 = vpop.f32.mrb[17].mxu1  ;;  %v1973_v6 = vpop.f32.mrb[18].mxu0 }
 0x139   :  { %v2000_v7 = vadd.f32 %v1999_v5, %v1998_v2  ;;  %v2001_v8 = vpop.f32.mrb[18].mxu1  ;;  %v1974_v9 = vpop.f32.mrb[19].mxu0 }
 0x13a   :  { %v1469_v10 = vadd.f32 %v1972_v4, %v1420_v46  ;;  %v1975_v11 = vadd.f32 %v1974_v9, %v1973_v6  ;;  %v2002_v12 = vpop.f32.mrb[19].mxu1 }
 0x13b   :  { %v2003_v13 = vadd.f32 %v2002_v12, %v2001_v8 }
 0x13c   :  { %v1518_v14 = vadd.f32 %v2000_v7, %v1469_v10  ;;  %v1472_v15 = vadd.f32 %v1975_v11, %v1423_v48 }
 0x13e   :  { %v1521_v16 = vadd.f32 %v2003_v13, %v1472_v15  ;;  %v1976_v17 = vpop.f32.mrb[20].mxu0 }
 0x13f   :  { %v1977_v18 = vpop.f32.mrb[21].mxu0  ;;  %v2004_v21 = vpop.f32.mrb[20].mxu1 }
 0x140   :  { %v1978_v19 = vadd.f32 %v1977_v18, %v1976_v17  ;;  %v1979_v20 = vpop.f32.mrb[22].mxu0  ;;  %v2005_v25 = vpop.f32.mrb[21].mxu1 }
 0x141   :  { %v1980_v22 = vpop.f32.mrb[23].mxu0  ;;  %v2006_v26 = vadd.f32 %v2005_v25, %v2004_v21  ;;  %v2007_v27 = vpop.f32.mrb[22].mxu1 }
 0x142   :  { %v1477_v23 = vadd.f32 %v1978_v19, %v1428_v62  ;;  %v1981_v24 = vadd.f32 %v1980_v22, %v1979_v20  ;;  %v2008_v29 = vpop.f32.mrb[23].mxu1 }
 0x143   :  { %v2009_v31 = vadd.f32 %v2008_v29, %v2007_v27 }
 0x144   :  { %v1480_v28 = vadd.f32 %v1981_v24, %v1431_v0  ;;  %v1526_v30 = vadd.f32 %v2006_v26, %v1477_v23 }
 0x146   :  { %v1529_v32 = vadd.f32 %v2009_v31, %v1480_v28 }
 0x156   :  { %v2026_v33 = vpop.f32.mrb[24].mxu0 }
 0x157   :  { %v2054_v34 = vpop.f32.mrb[24].mxu1  ;;  %v2027_v35 = vpop.f32.mrb[25].mxu0 }
 0x158   :  { %v2028_v36 = vadd.f32 %v2027_v35, %v2026_v33  ;;  %v2055_v37 = vpop.f32.mrb[25].mxu1  ;;  %v2029_v38 = vpop.f32.mrb[26].mxu0 }
 0x159   :  { %v2056_v39 = vadd.f32 %v2055_v37, %v2054_v34  ;;  %v2057_v40 = vpop.f32.mrb[26].mxu1  ;;  %v2030_v41 = vpop.f32.mrb[27].mxu0 }
 0x15a   :  { %v1567_v42 = vadd.f32 %v2028_v36, %v1518_v14  ;;  %v2031_v43 = vadd.f32 %v2030_v41, %v2029_v38  ;;  %v2058_v44 = vpop.f32.mrb[27].mxu1 }
 0x15b   :  { %v2059_v45 = vadd.f32 %v2058_v44, %v2057_v40 }
 0x15c   :  { %v1616_v46 = vadd.f32 %v2056_v39, %v1567_v42  ;;  %v1570_v47 = vadd.f32 %v2031_v43, %v1521_v16 }
 0x15e   :  { %v1630_v48 = vmul.f32 0.2, %v1616_v46  ;;  %v1619_v49 = vadd.f32 %v2059_v45, %v1570_v47  ;;  %v2032_v50 = vpop.f32.mrb[28].mxu0 }
 0x15f   :  { %v2060_v51 = vpop.f32.mrb[28].mxu1  ;;  %v2033_v52 = vpop.f32.mrb[29].mxu0 }
 0x160   :  { %v1631_v53 = vmul.f32 0.2, %v1619_v49  ;;  %v2034_v54 = vadd.f32 %v2033_v52, %v2032_v50  ;;  %v2061_v55 = vpop.f32.mrb[29].mxu1  ;;  %v2035_v56 = vpop.f32.mrb[30].mxu0  ;;  %v1634_v60 = vmax.f32 %v1616_v46, %v1630_v48 }
 0x161   :  { %v2062_v57 = vadd.f32 %v2061_v55, %v2060_v51  ;;  %v2063_v58 = vpop.f32.mrb[30].mxu1  ;;  %v2036_v59 = vpop.f32.mrb[31].mxu0 }
 0x162   :  { %v1635_v61 = vmax.f32 %v1619_v49, %v1631_v53  ;;  %v1575_v62 = vadd.f32 %v2034_v54, %v1526_v30  ;;  %v2037_v63 = vadd.f32 %v2036_v59, %v2035_v56  ;;  %v2064_v0 = vpop.f32.mrb[31].mxu1 }
 0x163   :  { %v2065_v1 = vadd.f32 %v2064_v0, %v2063_v58 }
 0x164   :  { %v1834_v2 = vpack.c.bf16 %v1635_v61, %v1634_v60  ;;  %v1624_v3 = vadd.f32 %v2062_v57, %v1575_v62  ;;  %v1578_v4 = vadd.f32 %v2037_v63, %v1529_v32 }
 0x166   :  { %1835 = vst [vmem:[%s2706_s3] sm:$0xff] %v1834_v2   ;;  %v1632_v5 = vmul.f32 0.2, %v1624_v3  ;;  %v1627_v6 = vadd.f32 %v2065_v1, %v1578_v4 }
 0x168   :  { %v1633_v7 = vmul.f32 0.2, %v1627_v6  ;;  %v1636_v8 = vmax.f32 %v1624_v3, %v1632_v5 }
 0x16a   :  { %v1637_v9 = vmax.f32 %v1627_v6, %v1633_v7 }
 0x16c   :  { %v1839_v10 = vpack.c.bf16 %v1637_v9, %v1636_v8 }
 0x16e   :  { %1841 = vst [vmem:[%s2706_s3 + $0x8] sm:$0xff] %v1839_v10  }

</bundles_post_ra>
